<compile_context>
chip_gen: v5e
topology: v5e:2x2
jax: 0.10.0
libtpu: 0.0.40
codegen_flags: <defaults>
</compile_context>

<pallas_src>
import jax
import jax.numpy as jnp
from jax.experimental import pallas as pl
from jax.experimental.pallas import tpu as pltpu


def _rope_cache_kernel(inv_freq_ref, cos_ref, sin_ref):
    # inv_freq_ref : (1, dim) f32   -- inv_freq duplicated: [inv_freq, inv_freq]
    # cos_ref/sin_ref : (ts, dim)   -- output tiles for this sequence tile
    ts = cos_ref.shape[0]
    row = jax.lax.broadcasted_iota(jnp.int32, cos_ref.shape, 0)          # (ts, dim)
    pos = (row + pl.program_id(0) * ts).astype(jnp.float32)              # absolute positions
    angles = pos * inv_freq_ref[...]                                     # broadcast (1,dim) over rows
    cos_ref[...] = jnp.cos(angles).astype(cos_ref.dtype)
    sin_ref[...] = jnp.sin(angles).astype(sin_ref.dtype)


def rope_cos_sin_cache(seq_len, dim, base=10000.0, *, dtype=jnp.float32, tile=256):
    """Build the (seq_len, dim) cos / sin caches with a Pallas TPU kernel."""
    assert dim % 2 == 0
    # inv_freq (buffer math, tiny: dim elements) duplicated once so that the
    # kernel's broadcast multiply directly realizes cat([freqs, freqs], -1).
    inv_freq = 1.0 / (base ** (jnp.arange(0, dim, 2, dtype=jnp.float32) / dim))
    inv_freq_full = jnp.concatenate([inv_freq, inv_freq]).reshape(1, dim)

    # Row tile: 256 rows when the sequence is long enough, otherwise the whole
    # (8-row padded) sequence in one step.
    if seq_len >= tile:
        ts = tile
    else:
        ts = ((seq_len + 7) // 8) * 8
    s_pad = ((seq_len + ts - 1) // ts) * ts
    grid = (s_pad // ts,)

    itemsize = jnp.dtype(dtype).itemsize
    cost = pl.CostEstimate(
        flops=s_pad * dim,                       # the pos * inv_freq multiply
        transcendentals=2 * s_pad * dim,         # cos + sin
        bytes_accessed=2 * s_pad * dim * itemsize + dim * 4,
    )

    cos, sin = pl.pallas_call(
        _rope_cache_kernel,
        out_shape=(jax.ShapeDtypeStruct((s_pad, dim), dtype),
                   jax.ShapeDtypeStruct((s_pad, dim), dtype)),
        grid_spec=pltpu.PrefetchScalarGridSpec(
            num_scalar_prefetch=0,
            grid=grid,
            in_specs=[pl.BlockSpec((1, dim), lambda i: (0, 0))],         # inv_freq row
            out_specs=[pl.BlockSpec((ts, dim), lambda i: (i, 0)),        # cos
                       pl.BlockSpec((ts, dim), lambda i: (i, 0))],       # sin
        ),
        compiler_params=pltpu.CompilerParams(
            dimension_semantics=("parallel",)),
        cost_estimate=cost,
    )(inv_freq_full)
    return cos[:seq_len], sin[:seq_len]


class DeepseekV3RotaryEmbedding:
    """JAX/Pallas port of the PyTorch module (forward semantics preserved)."""

    def __init__(self, dim, max_position_embeddings=2048, base=10000):
        self.dim = dim
        self.max_position_embeddings = max_position_embeddings
        self.base = float(base)
        self._set_cos_sin_cache(max_position_embeddings, jnp.float32)
        # Mirrors the original module: max_seq_len_cached is reset to None after
        # __init__, so the first forward rebuilds the cache at its seq_len.
        self.max_seq_len_cached = None

    def _set_cos_sin_cache(self, seq_len, dtype):
        self.max_seq_len_cached = seq_len
        cos, sin = rope_cos_sin_cache(seq_len, self.dim, self.base, dtype=dtype)
        self.cos_cached = cos
        self.sin_cached = sin

    def __call__(self, x, seq_len=None):
        if self.max_seq_len_cached is None or seq_len > self.max_seq_len_cached:
            self._set_cos_sin_cache(seq_len, x.dtype)
        return (self.cos_cached[:seq_len].astype(x.dtype),
                self.sin_cached[:seq_len].astype(x.dtype))


def _reference(seq_len, dim, base=10000.0):
    inv_freq = 1.0 / (base ** (jnp.arange(0, dim, 2, dtype=jnp.float32) / dim))
    t = jnp.arange(seq_len, dtype=jnp.float32)
    freqs = jnp.outer(t, inv_freq)
    emb = jnp.concatenate([freqs, freqs], axis=-1)
    return jnp.cos(emb), jnp.sin(emb)


if __name__ == "__main__":
    key = jax.random.PRNGKey(0)

    dim = 64                        # DeepSeek rope head dim
    max_position_embeddings = 256
    seq_len = 128
    batch, heads = 2, 4

    rope = DeepseekV3RotaryEmbedding(dim, max_position_embeddings=max_position_embeddings,
                                     base=10000)

    x = jax.random.normal(key, (batch, heads, seq_len, dim), dtype=jnp.float32)
    cos, sin = rope(x, seq_len=seq_len)
    cos = jax.block_until_ready(cos)
    sin = jax.block_until_ready(sin)

    ref_cos, ref_sin = _reference(seq_len, dim, base=10000.0)

    assert cos.shape == (seq_len, dim) and sin.shape == (seq_len, dim)
    assert cos.dtype == x.dtype and sin.dtype == x.dtype
    assert jnp.allclose(cos, ref_cos, atol=1e-5, rtol=1e-5)
    assert jnp.allclose(sin, ref_sin, atol=1e-5, rtol=1e-5)
    print("KERNEL_OK")
</pallas_src>

<mosaic_0001>
module attributes {stable_mosaic.version = 11 : i64} {
  func.func @_rope_cache_kernel(%arg0: i32, %arg1: memref<1x64xf32, #tpu.memory_space<vmem>>, %arg2: memref<256x64xf32, #tpu.memory_space<vmem>>, %arg3: memref<256x64xf32, #tpu.memory_space<vmem>>) attributes {dimension_semantics = [#tpu.dimension_semantics<parallel>], iteration_bounds = array<i64: 1>, scalar_prefetch = 0 : i64, scratch_operands = 0 : i64, tpu.core_type = #tpu.core_type<tc>, window_params = [{pipeline_mode = #tpu.pipeline_mode<synchronous>, transform_indices = @transform_0, window_bounds = array<i64: 1, 64>}, {transform_indices = @transform_1, window_bounds = array<i64: 256, 64>}, {transform_indices = @transform_2, window_bounds = array<i64: 256, 64>}]} {
    %0 = tpu.iota {dimensions = array<i32: 0>} : vector<256x64xi32>
    %c256_i32 = arith.constant 256 : i32
    %1 = arith.muli %arg0, %c256_i32 : i32
    %2 = vector.broadcast %1 : i32 to vector<256x64xi32>
    %3 = arith.addi %0, %2 : vector<256x64xi32>
    %4 = arith.sitofp %3 : vector<256x64xi32> to vector<256x64xf32>
    %c0 = arith.constant 0 : index
    %c0_0 = arith.constant 0 : index
    %5 = vector.load %arg1[%c0, %c0_0] : memref<1x64xf32, #tpu.memory_space<vmem>>, vector<1x64xf32>
    %6 = vector.broadcast %5 : vector<1x64xf32> to vector<256x64xf32>
    %7 = arith.mulf %4, %6 : vector<256x64xf32>
    %8 = math.cos %7 : vector<256x64xf32>
    %c0_1 = arith.constant 0 : index
    %c0_2 = arith.constant 0 : index
    %9 = vector.load %arg2[%c0_1, %c0_2] : memref<256x64xf32, #tpu.memory_space<vmem>>, vector<256x64xf32>
    tpu.vector_store %arg2[%c0_1, %c0_2], %8 {strides = array<i32>} : memref<256x64xf32, #tpu.memory_space<vmem>>, vector<256x64xf32>,
    %10 = math.sin %7 : vector<256x64xf32>
    %c0_3 = arith.constant 0 : index
    %c0_4 = arith.constant 0 : index
    %11 = vector.load %arg3[%c0_3, %c0_4] : memref<256x64xf32, #tpu.memory_space<vmem>>, vector<256x64xf32>
    tpu.vector_store %arg3[%c0_3, %c0_4], %10 {strides = array<i32>} : memref<256x64xf32, #tpu.memory_space<vmem>>, vector<256x64xf32>,
    return
  }
  func.func @transform_0(%arg0: i32) -> (i32, i32) {
    %c0_i32 = arith.constant 0 : i32
    %c0_i32_0 = arith.constant 0 : i32
    %c0_i32_1 = arith.constant 0 : i32
    return %c0_i32, %c0_i32_0 : i32, i32
  }
  func.func @transform_1(%arg0: i32) -> (i32, i32) {
    %c0_i32 = arith.constant 0 : i32
    %c0_i32_0 = arith.constant 0 : i32
    return %arg0, %c0_i32 : i32, i32
  }
  func.func @transform_2(%arg0: i32) -> (i32, i32) {
    %c0_i32 = arith.constant 0 : i32
    %c0_i32_0 = arith.constant 0 : i32
    return %arg0, %c0_i32 : i32, i32
  }
}

</mosaic_0001>

<bundles_post_ra>
// kernel: tpu_custom_call.1
= control target key start
LH: loop header
LB: loop body
LE: loop exit
PB: predicated region body
PF: predicated region fallthrough
CT: control target
= control target key end

     0   :  { %8 = vsyncpa [#allocation3], 0  ;;  %s10349_s12 = smov [#allocation2]   ;;  %s17215_s0 = inlined_call_operand.hbm [shape: f32[1,64], index: 0, kind: input, shape index: {}]   ;;  %s17216_s1 = inlined_call_operand.vmem [shape: f32[256,64], index: 1, kind: output, shape index: {0}]   ;;  %s17217_s2 = inlined_call_operand.vmem [shape: f32[256,64], index: 2, kind: output, shape index: {1}]  }
   0x1   :  { %s14_s11 = sshll.u32 %s17215_s0, 4  ;;  %s16_s13 = sshll.u32 %s10349_s12, 4  ;;  %s15_s11 = int_to_ptr.hbm [resolvable:$true] %s14_s11  ;;  %s17_s13 = int_to_ptr.vmem [resolvable:$true] %s16_s13 }
   0x2   :  { %19 = dma.hbm_to_vmem [thread:$0]  %s15_s11, 16, %s17_s13, [#allocation3]  }
   0x3   :  { %10347 = dma.done.wait [#allocation3], 16  }
   0x4   :  { %10348 = vsyncadd [#allocation3], 4294967280  ;;  %v24_v0 = vlaneseq  ;;  %v10378_v3 = vld [vmem:[#allocation2] ss:$0 sm:$0xff]  ;;  %v17228_v15 = vmov 2102212464  }
   0x5   :  { %v17232_v17 = vmov 920167782   ;;  %v17230_v22 = vmov 1326507024   ;;  %v17220_v24 = vmov 683565275  }
   0x6   :  { %v10375_v1 = vshrl.u32 %v24_v0, 7  ;;  %v17224_v26 = vmov 2475754826   ;;  %v17222_v29 = vmov 2131351028  }
   0x8   :  { %v91_v2 = vcvt.s32.f32 %v10375_v1  ;;  %v26_v10 = vadd.s32 8, %v10375_v1  ;;  %v27_v56 = vadd.s32 16, %v10375_v1 }
   0xa   :  { %v10381_v4 = vmul.f32 %v10378_v3, %v91_v2  ;;  %v92_v12 = vcvt.s32.f32 %v26_v10  ;;  %v93_v62 = vcvt.s32.f32 %v27_v56 }
   0xc   :  { %17589 = vst [vmem:[#allocation5_spill] sm:$0xff] %v10381_v4  ;;  %v162_v5 = vand.u32 2139095040, %v10381_v4  ;;  %v10388_v14 = vmul.f32 %v10378_v3, %v92_v12  ;;  %v17219_v19 = vand.u32 2147483647, %v10381_v4  ;;  %v10455_v10 = vmul.f32 %v10378_v3, %v93_v62 }
   0xe   :  { %v163_v6 = vshrl.u32 %v162_v5, 23  ;;  %17590 = vst [vmem:[#allocation6_spill] sm:$0xff] %v10388_v14  ;;  %v166_v34 = vand.u32 8388607, %v17219_v19  ;;  %v316_v36 = vand.u32 2139095040, %v10388_v14 }
   0xf   :  { %17591 = vst [vmem:[#allocation7_spill] sm:$0xff] %v10455_v10 }
  0x10   :  { %v10121_v7 = vadd.s32 4294967169, %v163_v6  ;;  %v167_v41 = vor.u32 8388608, %v166_v34  ;;  %v317_v43 = vshrl.u32 %v316_v36, 23 }
  0x12   :  { %v169_v8 = vadd.s32 1, %v10121_v7  ;;  %v10438_v48 = vshll.u32 %v167_v41, 8  ;;  %v10124_v49 = vadd.s32 4294967169, %v317_v43 }
  0x14   :  { %vm170_vm0 = vcmp.gt.s32.totalorder %v169_v8, 0  ;;  %v208_v52 = vand.u32 65535, %v10438_v48  ;;  %v323_v54 = vadd.s32 1, %v10124_v49  ;;  %v209_v57 = vshrl.u32 %v10438_v48, 16 }
  0x15   :  { %v171_v9 = vsel %vm170_vm0, %v169_v8, 0 }
  0x16   :  { %v173_v11 = vand.u32 31, %v171_v9  ;;  %v10394_v20 = vshrl.u32 %v171_v9, 5  ;;  %vm324_vm5 = vcmp.gt.s32.totalorder %v323_v54, 0 }
  0x17   :  { %v325_v63 = vsel %vm324_vm5, %v323_v54, 0 }
  0x18   :  { %v10385_v13 = vsub.s32 32, %v173_v11  ;;  %v185_v16 = vshll.u32 %v17228_v15, %v173_v11  ;;  %v188_v21 = vshll.u32 %v17232_v17, %v173_v11  ;;  %v176_v25 = vshll.u32 %v17220_v24, %v173_v11 }
  0x19   :  { %v179_v27 = vshll.u32 %v17224_v26, %v173_v11  ;;  %v182_v31 = vshll.u32 %v17222_v29, %v173_v11  ;;  %vm194_vm1 = vcmp.lt.s32.totalorder %v10394_v20, 4  ;;  %vm191_vm2 = vcmp.lt.s32.totalorder %v10394_v20, 1 }
  0x1a   :  { %v186_v18 = vshrl.u32 %v17232_v17, %v10385_v13  ;;  %v189_v23 = vshrl.u32 %v17230_v22, %v10385_v13  ;;  %v177_v28 = vshrl.u32 %v17224_v26, %v10385_v13  ;;  %v180_v30 = vshrl.u32 %v17222_v29, %v10385_v13 }
  0x1b   :  { %v183_v32 = vshrl.u32 %v17228_v15, %v10385_v13  ;;  %vm193_vm3 = vcmp.lt.s32.totalorder %v10394_v20, 3  ;;  %vm192_vm4 = vcmp.lt.s32.totalorder %v10394_v20, 2  ;;  %v327_v9 = vand.u32 31, %v325_v63 }
  0x1c   :  { %v187_v33 = vor.u32 %v186_v18, %v185_v16  ;;  %v190_v35 = vor.u32 %v189_v23, %v188_v21  ;;  %v10412_v37 = vor.u32 %v177_v28, %v176_v25  ;;  %v10414_v38 = vor.u32 %v180_v30, %v179_v27 }
  0x1d   :  { %v10416_v39 = vor.u32 %v183_v32, %v182_v31  ;;  %v10461_v23 = vsub.s32 32, %v327_v9  ;;  %v17226_v27 = vmov 0   ;;  %v17218_v30 = vand.u32 2147483647, %v10388_v14 }
  0x1e   :  { %v200_v40 = vsel %vm194_vm1, %v187_v33, 920167782  ;;  %v204_v42 = vsel %vm194_vm1, %v190_v35, 1326507024  ;;  %v199_v44 = vsel %vm191_vm2, %v10412_v37, %v10414_v38  ;;  %v470_v32 = vand.u32 2139095040, %v10455_v10 }
  0x1f   :  { %v201_v45 = vsel %vm193_vm3, %v10416_v39, %v200_v40  ;;  %v203_v46 = vsel %vm191_vm2, %v10414_v38, %v10416_v39  ;;  %v205_v47 = vsel %vm193_vm3, %v187_v33, %v204_v42  ;;  %v339_v33 = vshll.u32 %v17228_v15, %v327_v9 }
  0x20   :  { %v202_v50 = vsel %vm192_vm4, %v199_v44, %v201_v45  ;;  %v206_v51 = vsel %vm192_vm4, %v203_v46, %v205_v47  ;;  %v340_v35 = vshrl.u32 %v17232_v17, %v10461_v23  ;;  %v342_v36 = vshll.u32 %v17232_v17, %v327_v9 }
  0x21   :  { %v233_v53 = vshrl.u32 %v202_v50, 16  ;;  %v211_v55 = vshrl.u32 %v206_v51, 16  ;;  %v232_v58 = vand.u32 65535, %v202_v50  ;;  %v210_v60 = vand.u32 65535, %v206_v51 }
  0x22   :  { %v343_v40 = vshrl.u32 %v17230_v22, %v10461_v23  ;;  %v320_v43 = vand.u32 8388607, %v17218_v30  ;;  %v10479_v44 = vshrl.u32 %v325_v63, 5  ;;  %v330_v46 = vshll.u32 %v17220_v24, %v327_v9 }
  0x23   :  { %v235_v59 = vmul.u32 %v233_v53, %v208_v52  ;;  %v10447_v61 = vmul.u32 %v211_v55, %v208_v52  ;;  %v234_v0 = vmul.u32 %v232_v58, %v208_v52  ;;  %v10449_v2 = vmul.u32 %v232_v58, %v209_v57 }
  0x24   :  { %v212_v6 = vmul.u32 %v210_v60, %v208_v52  ;;  %v10451_v7 = vmul.u32 %v210_v60, %v209_v57  ;;  %v237_v21 = vmul.u32 %v233_v53, %v209_v57  ;;  %v215_v25 = vmul.u32 %v211_v55, %v209_v57 }
  0x25   :  { %v238_v5 = vshll.u32 %v235_v59, 16  ;;  %v216_v8 = vshll.u32 %v10447_v61, 16  ;;  %v240_v11 = vshll.u32 %v10449_v2, 16  ;;  %v331_v47 = vshrl.u32 %v17224_v26, %v10461_v23 }
  0x26   :  { %v218_v16 = vshll.u32 %v10451_v7, 16  ;;  %v471_v49 = vshrl.u32 %v470_v32, 23  ;;  %v333_v50 = vshll.u32 %v17224_v26, %v327_v9  ;;  %v334_v51 = vshrl.u32 %v17222_v29, %v10461_v23 }
  0x27   :  { %vm242_vm6 = vc.u32 %v234_v0, %v238_v5  ;;  %v10458_v12 = vadd.s32 %v238_v5, %v234_v0  ;;  %vm220_vm7 = vc.u32 %v212_v6, %v216_v8  ;;  %v222_v18 = vadd.s32 %v216_v8, %v212_v6 }
  0x28   :  { %v243_v28 = vsel %vm242_vm6, 1, %v17226_v27  ;;  %v221_v31 = vsel %vm220_vm7, 1, %v17226_v27  ;;  %v336_v52 = vshll.u32 %v17222_v29, %v327_v9  ;;  %v337_v53 = vshrl.u32 %v17228_v15, %v10461_v23 }
  0x29   :  { %vm246_vm8 = vc.u32 %v10458_v12, %v240_v11  ;;  %vm224_vm9 = vc.u32 %v222_v18, %v218_v16  ;;  %v245_v34 = vadd.s32 %v243_v28, %v237_v21  ;;  %v223_v41 = vadd.s32 %v221_v31, %v215_v25 }
  0x2a   :  { %v247_v42 = vsel %vm246_vm8, 1, %v17226_v27  ;;  %v225_v45 = vsel %vm224_vm9, 1, %v17226_v27  ;;  %v239_v54 = vshrl.u32 %v235_v59, 16  ;;  %v341_v56 = vor.u32 %v340_v35, %v339_v33 }
  0x2b   :  { %v249_v55 = vadd.s32 %v247_v42, %v245_v34  ;;  %v344_v57 = vor.u32 %v343_v40, %v342_v36  ;;  %v217_v58 = vshrl.u32 %v10447_v61, 16  ;;  %v227_v60 = vadd.s32 %v225_v45, %v223_v41 }
  0x2c   :  { %vm348_vm10 = vcmp.lt.s32.totalorder %v10479_v44, 4  ;;  %v241_v62 = vshrl.u32 %v10449_v2, 16  ;;  %v321_v63 = vor.u32 8388608, %v320_v43  ;;  %v10127_v0 = vadd.s32 4294967169, %v471_v49 }
  0x2d   :  { %v10494_v5 = vor.u32 %v331_v47, %v330_v46  ;;  %v10496_v6 = vor.u32 %v334_v51, %v333_v50  ;;  %v10498_v8 = vor.u32 %v337_v53, %v336_v52  ;;  %vm345_vm11 = vcmp.lt.s32.totalorder %v10479_v44, 1 }
  0x2e   :  { %v250_v59 = vadd.s32 %v249_v55, %v239_v54  ;;  %vm347_vm12 = vcmp.lt.s32.totalorder %v10479_v44, 3  ;;  %v354_v61 = vsel %vm348_vm10, %v341_v56, 920167782  ;;  %v358_v9 = vsel %vm348_vm10, %v344_v57, 1326507024 }
  0x2f   :  { %v175_v16 = vshrl.u32 %v17220_v24, %v10385_v13  ;;  %v219_v18 = vshrl.u32 %v10451_v7, 16  ;;  %v228_v21 = vadd.s32 %v227_v60, %v217_v58  ;;  %v196_v25 = vsel %vm194_vm1, %v10416_v39, 2102212464 }
  0x30   :  { %vm346_vm13 = vcmp.lt.s32.totalorder %v10479_v44, 2  ;;  %v353_v28 = vsel %vm345_vm11, %v10494_v5, %v10496_v6  ;;  %v355_v31 = vsel %vm347_vm12, %v10498_v8, %v354_v61  ;;  %v357_v13 = vsel %vm345_vm11, %v10496_v6, %v10498_v8 }
  0x31   :  { %v359_v7 = vsel %vm347_vm12, %v341_v56, %v358_v9  ;;  %v251_v39 = vadd.s32 %v250_v59, %v241_v62  ;;  %v10526_v32 = vshll.u32 %v321_v63, 8  ;;  %v477_v33 = vadd.s32 1, %v10127_v0 }
  0x32   :  { %v195_v34 = vsel %vm191_vm2, %v175_v16, %v10412_v37  ;;  %v197_v35 = vsel %vm193_vm3, %v10414_v38, %v196_v25  ;;  %v10534_v36 = vadd.s32 %v228_v21, %v219_v18  ;;  %v10539_v40 = vadd.s32 %v10458_v12, %v240_v11 }
  0x33   :  { %17592 = vst [vmem:[#allocation8_spill] sm:$0xff] %v10526_v32  ;;  %v356_v41 = vsel %vm346_vm13, %v353_v28, %v355_v31  ;;  %v360_v42 = vsel %vm346_vm13, %v357_v13, %v359_v7  ;;  %v28_v43 = vadd.s32 24, %v10375_v1  ;;  %v10547_v37 = vadd.s32 32, %v10375_v1 }
  0x34   :  { %17593 = vst [vmem:[#allocation9_spill] sm:$0xff] %v10534_v36  ;;  %v10550_v38 = vadd.s32 40, %v10375_v1  ;;  %v10553_v45 = vadd.s32 48, %v10375_v1  ;;  %v10556_v2 = vadd.s32 56, %v10375_v1  ;;  %v198_v11 = vsel %vm192_vm4, %v195_v34, %v197_v35 }
  0x35   :  { %17594 = vst [vmem:[#allocation10_spill] sm:$0xff] %v10539_v40  ;;  %v255_v12 = vadd.s32 1, %v251_v39  ;;  %vm478_vm14 = vcmp.gt.s32.totalorder %v477_v33, 0  ;;  %vm254_vm15 = vc.u32 %v10534_v36, %v10539_v40  ;;  %v362_v46 = vand.u32 65535, %v10526_v32 }
  0x36   :  { %v365_v47 = vshrl.u32 %v360_v42, 16  ;;  %v387_v49 = vshrl.u32 %v356_v41, 16  ;;  %v10564_v50 = vadd.s32 64, %v10375_v1  ;;  %v10567_v51 = vadd.s32 72, %v10375_v1 }
  0x37   :  { %v10570_v52 = vadd.s32 80, %v10375_v1  ;;  %v10573_v20 = vadd.s32 88, %v10375_v1  ;;  %v10576_v53 = vadd.s32 96, %v10375_v1  ;;  %v10579_v54 = vadd.s32 104, %v10375_v1 }
  0x38   :  { %v252_v55 = vmul.u32 %v10438_v48, %v198_v11  ;;  %v479_v56 = vsel %vm478_vm14, %v477_v33, 0  ;;  %v10583_v57 = vadd.s32 112, %v10375_v1  ;;  %v10586_v58 = vadd.s32 120, %v10375_v1 }
  0x39   :  { %17595 = vst [vmem:[#allocation11_spill] sm:$0xff] %v10579_v54  ;;  %v10589_v60 = vadd.s32 128, %v10375_v1  ;;  %v256_v62 = vsel %vm254_vm15, %v255_v12, %v251_v39  ;;  %v364_v63 = vand.u32 65535, %v360_v42  ;;  %v10591_v0 = vmul.u32 %v365_v47, %v362_v46 }
  0x3a   :  { %17596 = vst [vmem:[#allocation12_spill] sm:$0xff] %v10583_v57  ;;  %v386_v59 = vand.u32 65535, %v356_v41  ;;  %v10593_v61 = vmul.u32 %v387_v49, %v362_v46  ;;  %v10596_v9 = vadd.s32 136, %v10375_v1  ;;  %v10599_v48 = vadd.s32 144, %v10375_v1 }
  0x3b   :  { %17597 = vst [vmem:[#allocation13_spill] sm:$0xff] %v10586_v58  ;;  %v363_v16 = vshrl.u32 %v10526_v32, 16  ;;  %v481_v18 = vand.u32 31, %v479_v56  ;;  %v10603_v21 = vadd.s32 152, %v10375_v1  ;;  %v10606_v25 = vadd.s32 160, %v10375_v1 }
  0x3c   :  { %17598 = vst [vmem:[#allocation14_spill] sm:$0xff] %v10589_v60  ;;  %v10609_v28 = vadd.s32 168, %v10375_v1  ;;  %v10611_v31 = vadd.s32 %v256_v62, %v252_v55  ;;  %v10614_v13 = vadd.s32 176, %v10375_v1  ;;  %v10617_v7 = vadd.s32 184, %v10375_v1 }
  0x3d   :  { %17599 = vst [vmem:[#allocation15_spill] sm:$0xff] %v10596_v9  ;;  %v10620_v39 = vadd.s32 192, %v10375_v1  ;;  %v94_v33 = vcvt.s32.f32 %v28_v43  ;;  %v366_v34 = vmul.u32 %v364_v63, %v362_v46  ;;  %v370_v35 = vshll.u32 %v10591_v0, 16 }
  0x3e   :  { %17600 = vst [vmem:[#allocation16_spill] sm:$0xff] %v10599_v48  ;;  %v388_v41 = vmul.u32 %v386_v59, %v362_v46  ;;  %v392_v42 = vshll.u32 %v10593_v61, 16  ;;  %v10625_v11 = vadd.s32 200, %v10375_v1  ;;  %v10628_v12 = vadd.s32 208, %v10375_v1 }
  0x3f   :  { %17601 = vst [vmem:[#allocation17_spill] sm:$0xff] %v10603_v21  ;;  %v10630_v55 = vmul.u32 %v386_v59, %v363_v16  ;;  %v10632_v62 = vsub.s32 32, %v481_v18  ;;  %v10635_v30 = vadd.s32 216, %v10375_v1  ;;  %v10638_v43 = vadd.s32 224, %v10375_v1 }
  0x40   :  { %17602 = vst [vmem:[#allocation18_spill] sm:$0xff] %v10606_v25  ;;  %v10641_v46 = vadd.s32 232, %v10375_v1  ;;  %v258_v19 = vadd.s32 536870912, %v10611_v31  ;;  %v10645_v24 = vadd.s32 240, %v10375_v1  ;;  %v10648_v29 = vmul.f32 %v10378_v3, %v94_v33 }
  0x41   :  { %17603 = vst [vmem:[#allocation19_spill] sm:$0xff] %v10609_v28  ;;  %v10650_v59 = vmul.u32 %v364_v63, %v363_v16  ;;  %v369_v27 = vmul.u32 %v365_v47, %v363_v16  ;;  %vm374_vm0 = vc.u32 %v366_v34, %v370_v35  ;;  %v391_v15 = vmul.u32 %v387_v49, %v363_v16 }
  0x42   :  { %17604 = vst [vmem:[#allocation20_spill] sm:$0xff] %v10614_v13  ;;  %vm396_vm1 = vc.u32 %v388_v41, %v392_v42  ;;  %v10654_v17 = vadd.s32 %v392_v42, %v388_v41  ;;  %v17615_v14 = vmov 920167782   ;;  %v10661_v33 = vshrl.u32 %v479_v56, 5 }
  0x43   :  { %17605 = vst [vmem:[#allocation21_spill] sm:$0xff] %v10617_v7  ;;  %v496_v4 = vshll.u32 %v17615_v14, %v481_v18  ;;  %v17618_v63 = vmov 2102212464   ;;  %v494_v47 = vshrl.u32 %v17615_v14, %v10632_v62  ;;  %v372_v49 = vshll.u32 %v10650_v59, 16 }
  0x44   :  { %17606 = vst [vmem:[#allocation22_spill] sm:$0xff] %v10620_v39  ;;  %v17619_v16 = vmov 0   ;;  %v376_v41 = vadd.s32 %v370_v35, %v366_v34  ;;  %v17620_v22 = vmov 2475754826   ;;  %v17621_v36 = vmov 2131351028  }
  0x45   :  { %17607 = vst [vmem:[#allocation23_spill] sm:$0xff] %v10625_v11  ;;  %v375_v26 = vsel %vm374_vm0, 1, %v17619_v16  ;;  %v397_v42 = vsel %vm396_vm1, 1, %v17619_v16  ;;  %v487_v40 = vshll.u32 %v17620_v22, %v481_v18  ;;  %v490_v56 = vshll.u32 %v17621_v36, %v481_v18 }
  0x46   :  { %17608 = vst [vmem:[#allocation24_spill] sm:$0xff] %v10628_v12  ;;  %v491_v12 = vshrl.u32 %v17618_v63, %v10632_v62  ;;  %v17622_v11 = vshll.u32 %v10630_v55, 16  ;;  %v17623_v39 = vmov 683565275   ;;  %v485_v34 = vshrl.u32 %v17620_v22, %v10632_v62 }
  0x47   :  { %17609 = vst [vmem:[#allocation25_spill] sm:$0xff] %v10632_v62  ;;  %v484_v7 = vshll.u32 %v17623_v39, %v481_v18  ;;  %v10682_v13 = vadd.s32 248, %v10375_v1  ;;  %v17625_v28 = vand.u32 2147483647, %v10455_v10  ;;  %vm502_vm3 = vcmp.lt.s32.totalorder %v10661_v33, 4 }
  0x48   :  { %17610 = vst [vmem:[#allocation26_spill] sm:$0xff] %v10635_v30  ;;  %v493_v30 = vshll.u32 %v17618_v63, %v481_v18  ;;  %vm400_vm2 = vc.u32 %v10654_v17, %v17622_v11  ;;  %v377_v63 = vadd.s32 %v375_v26, %v369_v27  ;;  %vm378_vm4 = vc.u32 %v376_v41, %v372_v49 }
  0x49   :  { %17611 = vst [vmem:[#allocation27_spill] sm:$0xff] %v10638_v43  ;;  %v10659_v43 = vshrl.u32 %v258_v19, 30  ;;  %v488_v19 = vshrl.u32 %v17621_v36, %v10632_v62  ;;  %v399_v11 = vadd.s32 %v397_v42, %v391_v15  ;;  %v401_v18 = vsel %vm400_vm2, 1, %v17619_v16 }
  0x4a   :  { %17612 = vst [vmem:[#allocation28_spill] sm:$0xff] %v10641_v46  ;;  %v17616_v46 = vmov 1326507024   ;;  %v495_v36 = vor.u32 %v494_v47, %v493_v30  ;;  %v624_v1 = vand.u32 2139095040, %v10648_v29  ;;  %vm499_vm5 = vcmp.lt.s32.totalorder %v10661_v33, 1 }
  0x4b   :  { %17613 = vst [vmem:[#allocation29_spill] sm:$0xff] %v10645_v24  ;;  %v497_v24 = vshrl.u32 %v17616_v46, %v10632_v62  ;;  %v474_v46 = vand.u32 8388607, %v17625_v28  ;;  %v260_v14 = vshll.u32 %v10659_v43, 30  ;;  %v10689_v32 = vor.u32 %v488_v19, %v487_v40 }
  0x4c   :  { %17614 = vst [vmem:[#allocation30_spill] sm:$0xff] %v10648_v29  ;;  %v10691_v62 = vor.u32 %v491_v12, %v490_v56  ;;  %vm501_vm6 = vcmp.lt.s32.totalorder %v10661_v33, 3  ;;  %v379_v26 = vsel %vm378_vm4, 1, %v17619_v16  ;;  %v508_v27 = vsel %vm502_vm3, %v495_v36, 920167782 }
  0x4d   :  { %17617 = vst [vmem:[#allocation31_spill] sm:$0xff] %v10659_v43  ;;  %v498_v35 = vor.u32 %v497_v24, %v496_v4  ;;  %v10694_v4 = vor.u32 %v485_v34, %v484_v7  ;;  %v475_v15 = vor.u32 8388608, %v474_v46  ;;  %v625_v30 = vshrl.u32 %v624_v1, 23 }
  0x4e   :  { %17624 = vst [vmem:[#allocation32_spill] sm:$0xff] %v10682_v13  ;;  %v95_v40 = vcvt.s32.f32 %v10547_v37  ;;  %v371_v28 = vshrl.u32 %v10591_v0, 16  ;;  %v393_v7 = vshrl.u32 %v10593_v61, 16  ;;  %v403_v12 = vadd.s32 %v401_v18, %v399_v11 }
  0x4f   :  { %v512_v24 = vsel %vm502_vm3, %v498_v35, 1326507024  ;;  %vm500_vm7 = vcmp.lt.s32.totalorder %v10661_v33, 2  ;;  %v511_v47 = vsel %vm499_vm5, %v10689_v32, %v10691_v62  ;;  %v10130_v49 = vadd.s32 4294967169, %v625_v30 }
  0x50   :  { %v513_v46 = vsel %vm501_vm6, %v495_v36, %v512_v24  ;;  %v10714_v41 = vsub.s32 %v10611_v31, %v260_v14  ;;  %v381_v42 = vadd.s32 %v379_v26, %v377_v63  ;;  %v507_v0 = vsel %vm499_vm5, %v10694_v4, %v10689_v32 }
  0x51   :  { %v509_v61 = vsel %vm501_vm6, %v10691_v62, %v508_v27  ;;  %v10725_v34 = vshll.u32 %v475_v15, 8  ;;  %v631_v36 = vadd.s32 1, %v10130_v49  ;;  %v329_v63 = vshrl.u32 %v17623_v39, %v10461_v23 }
  0x52   :  { %v10733_v35 = vsel %vm500_vm7, %v511_v47, %v513_v46  ;;  %v395_v11 = vshrl.u32 %v10630_v55, 16  ;;  %v404_v18 = vadd.s32 %v403_v12, %v393_v7  ;;  %v10738_v1 = vsel %vm500_vm7, %v507_v0, %v509_v61 }
  0x53   :  { %vm632_vm8 = vcmp.gt.s32.totalorder %v631_v36, 0  ;;  %v263_v24 = vsub.s32 0, %v10714_v41  ;;  %v350_v26 = vsel %vm348_vm10, %v10498_v8, 2102212464  ;;  %v373_v23 = vshrl.u32 %v10650_v59, 16 }
  0x54   :  { %v382_v15 = vadd.s32 %v381_v42, %v371_v28  ;;  %vm262_vm9 = vcmp.lt.s32.totalorder %v10714_v41, 0  ;;  %v516_v27 = vand.u32 65535, %v10725_v34  ;;  %v17256_v30 = vshrl.u32 %v10733_v35, 16 }
  0x55   :  { %v633_v7 = vsel %vm632_vm8, %v631_v36, 0  ;;  %v17255_v49 = vshrl.u32 %v10738_v1, 16  ;;  %v349_v59 = vsel %vm345_vm11, %v329_v63, %v10494_v5  ;;  %v351_v28 = vsel %vm347_vm12, %v10496_v6, %v350_v26 }
  0x56   :  { %v405_v42 = vadd.s32 %v404_v18, %v395_v11  ;;  %v264_v0 = vsel %vm262_vm9, %v263_v24, %v10714_v41  ;;  %v10760_v61 = vadd.s32 %v382_v15, %v373_v23  ;;  %v17626_v36 = vshll.u32 %v10630_v55, 16  ;;  %v17629_v24 = vld [vmem:[#allocation8_spill] sm:$0xff] }
  0x57   :  { %v635_v47 = vand.u32 31, %v633_v7  ;;  %v517_v8 = vshrl.u32 %v10725_v34, 16  ;;  %v518_v12 = vand.u32 65535, %v10733_v35  ;;  %v10771_v5 = vmul.u32 %v17256_v30, %v516_v27 }
  0x58   :  { %v10765_v46 = vadd.s32 %v10654_v17, %v17626_v36  ;;  %v540_v6 = vand.u32 65535, %v10738_v1  ;;  %v10779_v17 = vmul.u32 %v17255_v49, %v516_v27  ;;  %v265_v26 = vclz %v264_v0 }
  0x59   :  { %v409_v23 = vadd.s32 1, %v405_v42  ;;  %v352_v36 = vsel %vm346_vm13, %v349_v59, %v351_v28  ;;  %v10788_v11 = vsub.s32 32, %v635_v47  ;;  %v520_v63 = vmul.u32 %v518_v12, %v516_v27 }
  0x5a   :  { %17627 = vst [vmem:[#allocation33_spill] sm:$0xff] %v10765_v46  ;;  %vm408_vm10 = vc.u32 %v10760_v61, %v10765_v46  ;;  %v524_v31 = vshll.u32 %v10771_v5, 16  ;;  %v10792_v18 = vmul.u32 %v540_v6, %v517_v8  ;;  %v10798_v15 = vmul.f32 %v10378_v3, %v95_v40 }
  0x5b   :  { %v542_v44 = vmul.u32 %v540_v6, %v516_v27  ;;  %v546_v59 = vshll.u32 %v10779_v17, 16  ;;  %v10801_v28 = vadd.s32 4294967294, %v265_v26  ;;  %v406_v14 = vmul.u32 %v17629_v24, %v352_v36 }
  0x5c   :  { %17628 = vst [vmem:[#allocation34_spill] sm:$0xff] %v10798_v15  ;;  %v410_v55 = vsel %vm408_vm10, %v409_v23, %v405_v42  ;;  %v10804_v56 = vmul.u32 %v518_v12, %v517_v8  ;;  %v17630_v19 = vmov 2102212464   ;;  %v17631_v30 = vmov 920167782  }
  0x5d   :  { %v647_v49 = vshll.u32 %v17630_v19, %v635_v47  ;;  %v648_v0 = vshrl.u32 %v17631_v30, %v10788_v11  ;;  %v650_v37 = vshll.u32 %v17631_v30, %v635_v47  ;;  %v17632_v40 = vmov 1326507024  }
  0x5e   :  { %v651_v10 = vshrl.u32 %v17632_v40, %v10788_v11  ;;  %vm10812_vm11 = vc.u32 %v520_v63, %v524_v31  ;;  %v10818_v12 = vshrl.u32 %v633_v7, 5  ;;  %vm10820_vm12 = vc.u32 %v542_v44, %v546_v59 }
  0x5f   :  { %v10824_v26 = vadd.s32 %v546_v59, %v542_v44  ;;  %v638_v23 = vshll.u32 %v17623_v39, %v635_v47  ;;  %v641_v36 = vshll.u32 %v17620_v22, %v635_v47  ;;  %v639_v43 = vshrl.u32 %v17620_v22, %v10788_v11 }
  0x60   :  { %v17637_v25 = vmov 2131351028   ;;  %v645_v7 = vshrl.u32 %v17630_v19, %v10788_v11  ;;  %v10835_v21 = vadd.s32 %v410_v55, %v406_v14  ;;  %v526_v44 = vshll.u32 %v10804_v56, 16 }
  0x61   :  { %v642_v6 = vshrl.u32 %v17637_v25, %v10788_v11  ;;  %v644_v42 = vshll.u32 %v17637_v25, %v635_v47  ;;  %v649_v59 = vor.u32 %v648_v0, %v647_v49  ;;  %v652_v48 = vor.u32 %v651_v10, %v650_v37 }
  0x62   :  { %v530_v9 = vadd.s32 %v524_v31, %v520_v63  ;;  %v17638_v60 = vand.u32 2147483647, %v10648_v29  ;;  %vm656_vm13 = vcmp.lt.s32.totalorder %v10818_v12, 4  ;;  %v778_v57 = vand.u32 2139095040, %v10798_v15 }
  0x63   :  { %v17639_v54 = vshrl.u32 %v10733_v35, 16  ;;  %v529_v14 = vsel %vm10812_vm11, 1, %v17619_v16  ;;  %v17640_v55 = vshrl.u32 %v10738_v1, 16  ;;  %v551_v10 = vsel %vm10820_vm12, 1, %v17619_v16 }
  0x64   :  { %v628_v58 = vand.u32 8388607, %v17638_v60  ;;  %v17641_v60 = vshll.u32 %v10792_v18, 16  ;;  %v10855_v31 = vor.u32 %v639_v43, %v638_v23  ;;  %v10857_v49 = vor.u32 %v642_v6, %v641_v36 }
  0x65   :  { %v523_v47 = vmul.u32 %v17639_v54, %v517_v8  ;;  %v545_v46 = vmul.u32 %v17640_v55, %v517_v8  ;;  %v10859_v54 = vor.u32 %v645_v7, %v644_v42  ;;  %vm653_vm15 = vcmp.lt.s32.totalorder %v10818_v12, 1 }
  0x66   :  { %vm554_vm14 = vc.u32 %v10824_v26, %v17641_v60  ;;  %vm655_vm0 = vcmp.lt.s32.totalorder %v10818_v12, 3  ;;  %v662_v35 = vsel %vm656_vm13, %v649_v59, 920167782  ;;  %v666_v1 = vsel %vm656_vm13, %v652_v48, 1326507024 }
  0x67   :  { %v412_v8 = vadd.s32 536870912, %v10835_v21  ;;  %vm532_vm1 = vc.u32 %v530_v9, %v526_v44  ;;  %v629_v63 = vor.u32 8388608, %v628_v58  ;;  %v779_v43 = vshrl.u32 %v778_v57, 23  ;;  %v17642_v9 = vld [vmem:[#allocation19_spill] sm:$0xff] }
  0x68   :  { %v531_v0 = vadd.s32 %v529_v14, %v523_v47  ;;  %v553_v37 = vadd.s32 %v551_v10, %v545_v46  ;;  %v555_v27 = vsel %vm554_vm14, 1, %v17619_v16  ;;  %vm654_vm2 = vcmp.lt.s32.totalorder %v10818_v12, 2 }
  0x69   :  { %v661_v6 = vsel %vm653_vm15, %v10855_v31, %v10857_v49  ;;  %v663_v48 = vsel %vm655_vm0, %v10859_v54, %v662_v35  ;;  %v665_v57 = vsel %vm653_vm15, %v10857_v49, %v10859_v54  ;;  %v667_v58 = vsel %vm655_vm0, %v649_v59, %v666_v1 }
  0x6a   :  { %vm10123_vm4 = vcmp.lt.s32.totalorder %v10801_v28, 0  ;;  %v533_v23 = vsel %vm532_vm1, 1, %v17619_v16  ;;  %v10889_v14 = vshll.u32 %v629_v63, 8  ;;  %v10133_v55 = vadd.s32 4294967169, %v779_v43 }
  0x6b   :  { %v547_v10 = vshrl.u32 %v10779_v17, 16  ;;  %v557_v60 = vadd.s32 %v555_v27, %v553_v37  ;;  %v10894_v59 = vsel %vm654_vm2, %v661_v6, %v663_v48  ;;  %v10898_v35 = vsel %vm654_vm2, %v665_v57, %v667_v58  ;;  %v17649_v37 = vld [vmem:[#allocation25_spill] sm:$0xff] }
  0x6c   :  { %v268_v1 = vsel %vm10123_vm4, 0, %v10801_v28  ;;  %v10901_v24 = vshrl.u32 %v412_v8, 30  ;;  %v525_v47 = vshrl.u32 %v10771_v5, 16  ;;  %v535_v63 = vadd.s32 %v533_v23, %v531_v0  ;;  %v17650_v5 = vld [vmem:[#allocation9_spill] sm:$0xff]  ;;  %v17651_v0 = vld [vmem:[#allocation10_spill] sm:$0xff] }
  0x6d   :  { %v483_v27 = vshrl.u32 %v17623_v39, %v17649_v37  ;;  %v504_v6 = vsel %vm502_vm3, %v10691_v62, 2102212464  ;;  %v670_v48 = vand.u32 65535, %v10889_v14  ;;  %v673_v28 = vshrl.u32 %v10898_v35, 16 }
  0x6e   :  { %17646 = vst [vmem:[#allocation8_spill] sm:$0xff] %v10901_v24  ;;  %v695_v8 = vshrl.u32 %v10894_v59, 16  ;;  %v785_v57 = vadd.s32 1, %v10133_v55  ;;  %v253_v58 = vadd.s32 %v17651_v0, %v17650_v5  ;;  %v273_v23 = vsub.s32 4294967266, %v268_v1 }
  0x6f   :  { %v549_v17 = vshrl.u32 %v10792_v18, 16  ;;  %v558_v43 = vadd.s32 %v557_v60, %v547_v10  ;;  %v269_v29 = vsub.s32 32, %v268_v1  ;;  %v414_v37 = vshll.u32 %v10901_v24, 30 }
  0x70   :  { %v527_v46 = vshrl.u32 %v10804_v56, 16  ;;  %v536_v62 = vadd.s32 %v535_v63, %v525_v47  ;;  %v503_v7 = vsel %vm499_vm5, %v483_v27, %v10694_v4  ;;  %v505_v55 = vsel %vm501_vm6, %v10689_v32, %v504_v6 }
  0x71   :  { %v671_v5 = vshrl.u32 %v10889_v14, 16  ;;  %v694_v0 = vand.u32 65535, %v10894_v59  ;;  %v672_v10 = vand.u32 65535, %v10898_v35  ;;  %v10928_v60 = vmul.u32 %v673_v28, %v670_v48 }
  0x72   :  { %v10930_v24 = vmul.u32 %v695_v8, %v670_v48  ;;  %vm786_vm3 = vcmp.gt.s32.totalorder %v785_v57, 0  ;;  %v274_v4 = vadd.s32 127, %v273_v23  ;;  %v559_v27 = vadd.s32 %v558_v43, %v549_v17 }
  0x73   :  { %v270_v36 = vshll.u32 %v10714_v41, %v268_v1  ;;  %v10936_v32 = vsub.s32 %v10835_v21, %v414_v37  ;;  %v10938_v6 = vadd.s32 %v536_v62, %v527_v46  ;;  %v17654_v59 = vshll.u32 %v10792_v18, 16 }
  0x74   :  { %v271_v42 = vshrl.u32 %v253_v58, %v269_v29  ;;  %v506_v47 = vsel %vm500_vm7, %v503_v7, %v505_v55  ;;  %v696_v56 = vmul.u32 %v694_v0, %v670_v48  ;;  %v787_v44 = vsel %vm786_vm3, %v785_v57, 0 }
  0x75   :  { %v10943_v35 = vadd.s32 %v10824_v26, %v17654_v59  ;;  %v674_v23 = vmul.u32 %v672_v10, %v670_v48  ;;  %v678_v43 = vshll.u32 %v10928_v60, 16  ;;  %v10948_v41 = vmul.u32 %v694_v0, %v671_v5 }
  0x76   :  { %v700_v21 = vshll.u32 %v10930_v24, 16  ;;  %v275_v17 = vshll.u32 %v274_v4, 23  ;;  %v563_v18 = vadd.s32 1, %v559_v27  ;;  %v10952_v37 = vmul.u32 %v672_v10, %v671_v5 }
  0x77   :  { %17655 = vst [vmem:[#allocation19_spill] sm:$0xff] %v10943_v35  ;;  %v417_v33 = vsub.s32 0, %v10936_v32  ;;  %vm562_vm5 = vc.u32 %v10938_v6, %v10943_v35  ;;  %v789_v7 = vand.u32 31, %v787_v44  ;;  %v272_v57 = vor.u32 %v271_v42, %v270_v36 }
  0x78   :  { %vm416_vm6 = vcmp.lt.s32.totalorder %v10936_v32, 0  ;;  %v560_v58 = vmul.u32 %v10725_v34, %v506_v47  ;;  %vm682_vm7 = vc.u32 %v674_v23, %v678_v43  ;;  %v17274_v62 = vshll.u32 %v10948_v41, 16 }
  0x79   :  { %vm704_vm8 = vc.u32 %v696_v56, %v700_v21  ;;  %v10962_v55 = vadd.s32 %v700_v21, %v696_v56  ;;  %v276_v0 = vor.u32 4788187, %v275_v17  ;;  %v564_v10 = vsel %vm562_vm5, %v563_v18, %v559_v27 }
  0x7a   :  { %v680_v4 = vshll.u32 %v10952_v37, 16  ;;  %v684_v59 = vadd.s32 %v678_v43, %v674_v23  ;;  %v418_v29 = vsel %vm416_vm6, %v417_v33, %v10936_v32  ;;  %v677_v1 = vmul.u32 %v673_v28, %v671_v5 }
  0x7b   :  { %v699_v48 = vmul.u32 %v695_v8, %v671_v5  ;;  %v10966_v42 = vsub.s32 32, %v789_v7  ;;  %v17658_v36 = vcvt.s32.f32 %v10550_v38  ;;  %v17660_v47 = vcvt.s32.f32 %v10553_v45 }
  0x7c   :  { %v683_v27 = vsel %vm682_vm7, 1, %v17619_v16  ;;  %v705_v23 = vsel %vm704_vm8, 1, %v17619_v16  ;;  %v17662_v43 = vcvt.s32.f32 %v10556_v2  ;;  %v279_v8 = vcvt.s32.f32 %v272_v57 }
  0x7d   :  { %v10971_v34 = vmul.f32 %v10378_v3, %v17658_v36  ;;  %v10976_v56 = vmul.f32 %v10378_v3, %v17660_v47  ;;  %v565_v5 = vadd.s32 %v564_v10, %v560_v58  ;;  %vm708_vm9 = vc.u32 %v10962_v55, %v17274_v62 }
  0x7e   :  { %v10983_v28 = vmul.f32 %v10378_v3, %v17662_v43  ;;  %v277_v38 = vand.u32 2147483647, %v276_v0  ;;  %v419_v45 = vclz %v418_v29  ;;  %vm686_vm10 = vc.u32 %v684_v59, %v680_v4 }
  0x7f   :  { %17659 = vst [vmem:[#allocation25_spill] sm:$0xff] %v10971_v34  ;;  %v17279_v21 = vand.u32 2147483647, %v10798_v15  ;;  %v685_v17 = vadd.s32 %v683_v27, %v677_v1  ;;  %v707_v18 = vadd.s32 %v705_v23, %v699_v48  ;;  %v801_v33 = vshll.u32 %v17630_v19, %v789_v7 }
  0x80   :  { %17661 = vst [vmem:[#allocation9_spill] sm:$0xff] %v10976_v56  ;;  %v802_v2 = vshrl.u32 %v17631_v30, %v10966_v42  ;;  %v709_v36 = vsel %vm708_vm9, 1, %v17619_v16  ;;  %v10993_v57 = vshrl.u32 %v787_v44, 5  ;;  %v804_v58 = vshll.u32 %v17631_v30, %v789_v7 }
  0x81   :  { %17663 = vst [vmem:[#allocation10_spill] sm:$0xff] %v10983_v28  ;;  %v805_v0 = vshrl.u32 %v17632_v40, %v10966_v42  ;;  %v566_v29 = vadd.s32 536870912, %v565_v5  ;;  %v687_v10 = vsel %vm686_vm10, 1, %v17619_v16  ;;  %v792_v1 = vshll.u32 %v17623_v39, %v789_v7 }
  0x82   :  { %v795_v48 = vshll.u32 %v17620_v22, %v789_v7  ;;  %v793_v4 = vshrl.u32 %v17620_v22, %v10966_v42  ;;  %v796_v59 = vshrl.u32 %v17637_v25, %v10966_v42  ;;  %v798_v44 = vshll.u32 %v17637_v25, %v789_v7 }
  0x83   :  { %v799_v47 = vshrl.u32 %v17630_v19, %v10966_v42  ;;  %v701_v27 = vshrl.u32 %v10930_v24, 16  ;;  %v711_v23 = vadd.s32 %v709_v36, %v707_v18  ;;  %v782_v43 = vand.u32 8388607, %v17279_v21 }
  0x84   :  { %v803_v62 = vor.u32 %v802_v2, %v801_v33  ;;  %v679_v13 = vshrl.u32 %v10928_v60, 16  ;;  %v689_v26 = vadd.s32 %v687_v10, %v685_v17  ;;  %v806_v28 = vor.u32 %v805_v0, %v804_v58 }
  0x85   :  { %vm810_vm11 = vcmp.lt.s32.totalorder %v10993_v57, 4  ;;  %v17664_v46 = vcvt.s32.f32 %v10564_v50  ;;  %v280_v63 = vmul.f32 %v279_v8, %v277_v38  ;;  %v10125_v56 = vadd.s32 4294967294, %v419_v45 }
  0x86   :  { %v11018_v35 = vshrl.u32 %v566_v29, 30  ;;  %v703_v24 = vshrl.u32 %v10948_v41, 16  ;;  %v11021_v18 = vor.u32 %v793_v4, %v792_v1  ;;  %v11023_v33 = vor.u32 %v796_v59, %v795_v48 }
  0x87   :  { %v11016_v7 = vmul.f32 %v10378_v3, %v17664_v46  ;;  %v11025_v60 = vor.u32 %v799_v47, %v798_v44  ;;  %v712_v17 = vadd.s32 %v711_v23, %v701_v27  ;;  %vm807_vm12 = vcmp.lt.s32.totalorder %v10993_v57, 1  ;;  %v17673_v23 = vld [vmem:[#allocation5_spill] sm:$0xff] }
  0x88   :  { %vm809_vm14 = vcmp.lt.s32.totalorder %v10993_v57, 3  ;;  %v816_v50 = vsel %vm810_vm11, %v803_v62, 920167782  ;;  %v681_v46 = vshrl.u32 %v10952_v37, 16  ;;  %v690_v8 = vadd.s32 %v689_v26, %v679_v13 }
  0x89   :  { %17665 = vst [vmem:[#allocation35_spill] sm:$0xff] %v11016_v7  ;;  %v783_v38 = vor.u32 8388608, %v782_v43  ;;  %v820_v45 = vsel %vm810_vm11, %v806_v28, 1326507024  ;;  %vm10126_vm1 = vcmp.lt.s32.totalorder %v10125_v56, 0  ;;  %v568_v2 = vshll.u32 %v11018_v35, 30 }
  0x8a   :  { %v637_v36 = vshrl.u32 %v17623_v39, %v10788_v11  ;;  %v658_v58 = vsel %vm656_vm13, %v10859_v54, 2102212464  ;;  %vm808_vm4 = vcmp.lt.s32.totalorder %v10993_v57, 2  ;;  %v815_v13 = vsel %vm807_vm12, %v11021_v18, %v11023_v33 }
  0x8b   :  { %v817_v37 = vsel %vm809_vm14, %v11025_v60, %v816_v50  ;;  %v932_v26 = vand.u32 2139095040, %v10971_v34  ;;  %v17666_v28 = vcvt.s32.f32 %v10567_v51  ;;  %v713_v0 = vadd.s32 %v712_v17, %v703_v24 }
  0x8c   :  { %v819_v54 = vsel %vm807_vm12, %v11023_v33, %v11025_v60  ;;  %v821_v29 = vsel %vm809_vm14, %v803_v62, %v820_v45  ;;  %v11060_v10 = vsel %vm10126_vm1, 0, %v10125_v56  ;;  %v11062_v1 = vadd.s32 %v690_v8, %v681_v46 }
  0x8d   :  { %v11052_v11 = vmul.f32 %v10378_v3, %v17666_v28  ;;  %v17668_v48 = vshll.u32 %v10948_v41, 16  ;;  %v11069_v3 = vshll.u32 %v783_v38, 8  ;;  %v11071_v4 = vsub.s32 %v565_v5, %v568_v2  ;;  %v11083_v41 = vld [vmem:[#allocation2] ss:$0 sm:$0xff] }
  0x8e   :  { %v657_v59 = vsel %vm653_vm15, %v637_v36, %v10855_v31  ;;  %v659_v62 = vsel %vm655_vm0, %v10857_v49, %v658_v58  ;;  %v11081_v56 = vsel %vm808_vm4, %v815_v13, %v817_v37  ;;  %v281_v5 = vxor.u32 2147483648, %v280_v63  ;;  %v17679_v36 = vld [vmem:[#allocation33_spill] sm:$0xff] }
  0x8f   :  { %17667 = vst [vmem:[#allocation36_spill] sm:$0xff] %v11052_v11  ;;  %v11067_v51 = vadd.s32 %v10962_v55, %v17668_v48  ;;  %v17669_v55 = vcvt.s32.f32 %v10570_v52  ;;  %v11092_v47 = vsel %vm808_vm4, %v819_v54, %v821_v29  ;;  %v933_v31 = vshrl.u32 %v932_v26, 23 }
  0x90   :  { %v17671_v27 = vcvt.s32.f32 %v10573_v20  ;;  %vm161_vm13 = vcmp.lt.s32.totalorder %v17673_v23, 0  ;;  %v427_v43 = vsub.s32 4294967266, %v11060_v10  ;;  %v717_v24 = vadd.s32 1, %v713_v0 }
  0x91   :  { %v11088_v44 = vmul.f32 %v11083_v41, %v17669_v55  ;;  %v660_v52 = vsel %vm654_vm2, %v657_v59, %v659_v62  ;;  %vm716_vm15 = vc.u32 %v11062_v1, %v11067_v51  ;;  %v824_v17 = vand.u32 65535, %v11069_v3 }
  0x92   :  { %v11097_v49 = vmul.f32 %v11083_v41, %v17671_v27  ;;  %v849_v50 = vshrl.u32 %v11081_v56, 16  ;;  %v17674_v20 = vcvt.s32.f32 %v10576_v53  ;;  %v17676_v8 = vand.u32 2147483647, %v17673_v23 }
  0x93   :  { %17670 = vst [vmem:[#allocation37_spill] sm:$0xff] %v11088_v44  ;;  %v571_v12 = vsub.s32 0, %v11071_v4  ;;  %v827_v45 = vshrl.u32 %v11092_v47, 16  ;;  %v282_v2 = vsel %vm161_vm13, %v281_v5, %v280_v63  ;;  %v407_v58 = vadd.s32 %v17679_v36, %v10760_v61  ;;  %v17680_v63 = vld [vmem:[#allocation11_spill] sm:$0xff] }
  0x94   :  { %17672 = vst [vmem:[#allocation38_spill] sm:$0xff] %v11097_v49  ;;  %v11110_v46 = vmul.f32 %v11083_v41, %v17674_v20  ;;  %vm11114_vm0 = vcmp.le.f32.partialorder %v17676_v8, 0.7853982  ;;  %vm570_vm2 = vcmp.lt.s32.totalorder %v11071_v4, 0  ;;  %v10136_v53 = vadd.s32 4294967169, %v933_v31 }
  0x95   :  { %v423_v13 = vsub.s32 32, %v11060_v10  ;;  %v428_v37 = vadd.s32 127, %v427_v43  ;;  %v714_v26 = vmul.u32 %v10889_v14, %v660_v52  ;;  %v718_v28 = vsel %vm716_vm15, %v717_v24, %v713_v0  ;;  %v17683_v14 = vld [vmem:[#allocation12_spill] sm:$0xff] }
  0x96   :  { %17675 = vst [vmem:[#allocation39_spill] sm:$0xff] %v11110_v46  ;;  %v825_v54 = vshrl.u32 %v11069_v3, 16  ;;  %v848_v29 = vand.u32 65535, %v11081_v56  ;;  %v11129_v48 = vmul.u32 %v849_v50, %v824_v17  ;;  %v939_v59 = vadd.s32 1, %v10136_v53  ;;  %v17686_v56 = vld [vmem:[#allocation13_spill] sm:$0xff] }
  0x97   :  { %v17681_v62 = vcvt.s32.f32 %v17680_v63  ;;  %v572_v55 = vsel %vm570_vm2, %v571_v12, %v11071_v4  ;;  %v826_v5 = vand.u32 65535, %v11092_v47  ;;  %v11138_v31 = vmul.u32 %v827_v45, %v824_v17 }
  0x98   :  { %v17684_v0 = vcvt.s32.f32 %v17683_v14  ;;  %v17687_v43 = vcvt.s32.f32 %v17686_v56  ;;  %v11153_v52 = vsel %vm11114_vm0, %v17673_v23, %v282_v2  ;;  %v424_v47 = vshll.u32 %v10936_v32, %v11060_v10  ;;  %v17689_v14 = vld [vmem:[#allocation14_spill] sm:$0xff]  ;;  %v17692_v10 = vld [vmem:[#allocation15_spill] sm:$0xff] }
  0x99   :  { %v11134_v61 = vmul.f32 %v11083_v41, %v17681_v62  ;;  %v425_v20 = vshrl.u32 %v407_v58, %v423_v13  ;;  %v429_v8 = vshll.u32 %v428_v37, 23  ;;  %v719_v12 = vadd.s32 %v718_v28, %v714_v26  ;;  %v17695_v37 = vld [vmem:[#allocation16_spill] sm:$0xff] }
  0x9a   :  { %v11143_v27 = vmul.f32 %v11083_v41, %v17684_v0  ;;  %v11148_v24 = vmul.f32 %v11083_v41, %v17687_v43  ;;  %vm940_vm3 = vcmp.gt.s32.totalorder %v939_v59, 0  ;;  %v573_v36 = vclz %v572_v55 }
  0x9b   :  { %17682 = vst [vmem:[#allocation33_spill] sm:$0xff] %v11134_v61  ;;  %v850_v53 = vmul.u32 %v848_v29, %v824_v17  ;;  %v11157_v63 = vmul.u32 %v848_v29, %v825_v54  ;;  %v854_v62 = vshll.u32 %v11129_v48, 16  ;;  %v17690_v0 = vcvt.s32.f32 %v17689_v14  ;;  %v17698_v29 = vld [vmem:[#allocation17_spill] sm:$0xff] }
  0x9c   :  { %17685 = vst [vmem:[#allocation11_spill] sm:$0xff] %v11143_v27  ;;  %v828_v2 = vmul.u32 %v826_v5, %v824_v17  ;;  %v11165_v43 = vmul.u32 %v826_v5, %v825_v54  ;;  %v832_v32 = vshll.u32 %v11138_v31, 16  ;;  %v17693_v58 = vcvt.s32.f32 %v17692_v10 }
  0x9d   :  { %17688 = vst [vmem:[#allocation12_spill] sm:$0xff] %v11148_v24  ;;  %v11163_v56 = vmul.f32 %v11083_v41, %v17690_v0  ;;  %v17696_v26 = vcvt.s32.f32 %v17695_v37  ;;  %v17699_v55 = vcvt.s32.f32 %v17698_v29  ;;  %v941_v17 = vsel %vm940_vm3, %v939_v59, 0 }
  0x9e   :  { %v11171_v13 = vmul.f32 %v11083_v41, %v17693_v58  ;;  %v11185_v5 = vmul.f32 %v11153_v52, %v11153_v52  ;;  %v426_v0 = vor.u32 %v425_v20, %v424_v47  ;;  %v430_v10 = vor.u32 4788187, %v429_v8 }
  0x9f   :  { %17691 = vst [vmem:[#allocation13_spill] sm:$0xff] %v11163_v56  ;;  %v11176_v28 = vmul.f32 %v11083_v41, %v17696_v26  ;;  %v11181_v14 = vmul.f32 %v11083_v41, %v17699_v55  ;;  %v720_v21 = vadd.s32 536870912, %v719_v12  ;;  %v10128_v58 = vadd.s32 4294967294, %v573_v36 }
  0xa0   :  { %17694 = vst [vmem:[#allocation14_spill] sm:$0xff] %v11171_v13  ;;  %vm858_vm5 = vc.u32 %v850_v53, %v854_v62  ;;  %v11188_v37 = vadd.s32 %v854_v62, %v850_v53  ;;  %v834_v26 = vshll.u32 %v11165_v43, 16  ;;  %vm836_vm6 = vc.u32 %v828_v2, %v832_v32 }
  0xa1   :  { %17697 = vst [vmem:[#allocation15_spill] sm:$0xff] %v11176_v28  ;;  %v838_v29 = vadd.s32 %v832_v32, %v828_v2  ;;  %v943_v55 = vand.u32 31, %v941_v17  ;;  %v17704_v47 = vcvt.s32.f32 %v17642_v9  ;;  %v288_v8 = vmul.f32 -0.001358992, %v11185_v5  ;;  %v17708_v9 = vld [vmem:[#allocation20_spill] sm:$0xff] }
  0xa2   :  { %17700 = vst [vmem:[#allocation16_spill] sm:$0xff] %v11181_v14  ;;  %v17701_v14 = vld [vmem:[#allocation18_spill] sm:$0xff]  ;;  %v853_v36 = vmul.u32 %v849_v50, %v825_v54  ;;  %v295_v53 = vmul.f32 -0.00019511016, %v11185_v5  ;;  %v11203_v62 = vshrl.u32 %v720_v21, 30  ;;  %v831_v13 = vmul.u32 %v827_v45, %v825_v54  ;;  %v17711_v50 = vld [vmem:[#allocation21_spill] sm:$0xff] }
  0xa3   :  { %v17702_v59 = vcvt.s32.f32 %v17701_v14  ;;  %v11199_v20 = vmul.f32 %v11083_v41, %v17704_v47  ;;  %v859_v2 = vsel %vm858_vm5, 1, %v17619_v16  ;;  %v431_v32 = vand.u32 2147483647, %v430_v10 }
  0xa4   :  { %17706 = vst [vmem:[#allocation40_spill] sm:$0xff] %v11203_v62  ;;  %v433_v14 = vcvt.s32.f32 %v426_v0  ;;  %v17709_v47 = vcvt.s32.f32 %v17708_v9  ;;  %vm10129_vm8 = vcmp.lt.s32.totalorder %v10128_v58, 0  ;;  %vm840_vm9 = vc.u32 %v838_v29, %v834_v26  ;;  %v17714_v0 = vld [vmem:[#allocation22_spill] sm:$0xff] }
  0xa5   :  { %v11194_v28 = vmul.f32 %v11083_v41, %v17702_v59  ;;  %17705 = vst [vmem:[#allocation18_spill] sm:$0xff] %v11199_v20  ;;  %v837_v59 = vsel %vm836_vm6, 1, %v17619_v16  ;;  %v11215_v21 = vsub.s32 32, %v943_v55  ;;  %v17712_v45 = vcvt.s32.f32 %v17711_v50 }
  0xa6   :  { %v11213_v20 = vmul.f32 %v11083_v41, %v17709_v47  ;;  %v17715_v10 = vcvt.s32.f32 %v17714_v0  ;;  %v861_v9 = vadd.s32 %v859_v2, %v853_v36  ;;  %v11229_v24 = vadd.f32 0.008332121, %v295_v53 }
  0xa7   :  { %17703 = vst [vmem:[#allocation17_spill] sm:$0xff] %v11194_v28  ;;  %v17707_v28 = vshll.u32 %v11157_v63, 16  ;;  %v11220_v54 = vmul.f32 %v11083_v41, %v17712_v45  ;;  %v722_v47 = vshll.u32 %v11203_v62, 30  ;;  %v839_v26 = vadd.s32 %v837_v59, %v831_v13 }
  0xa8   :  { %17710 = vst [vmem:[#allocation20_spill] sm:$0xff] %v11213_v20  ;;  %v11225_v56 = vmul.f32 %v11083_v41, %v17715_v10  ;;  %v11233_v20 = vmul.f32 %v433_v14, %v431_v32  ;;  %v11235_v50 = vsel %vm10129_vm8, 0, %v10128_v58  ;;  %v841_v45 = vsel %vm840_vm9, 1, %v17619_v16 }
  0xa9   :  { %vm862_vm7 = vc.u32 %v11188_v37, %v17707_v28  ;;  %17713 = vst [vmem:[#allocation21_spill] sm:$0xff] %v11220_v54  ;;  %v11227_v28 = vadd.f32 0.041655596, %v288_v8  ;;  %v791_v8 = vshrl.u32 %v17623_v39, %v10966_v42  ;;  %v855_v36 = vshrl.u32 %v11129_v48, 16 }
  0xaa   :  { %17716 = vst [vmem:[#allocation22_spill] sm:$0xff] %v11225_v56  ;;  %v863_v29 = vsel %vm862_vm7, 1, %v17619_v16  ;;  %v958_v53 = vshll.u32 %v17631_v30, %v943_v55  ;;  %v959_v13 = vshrl.u32 %v17632_v40, %v11215_v21  ;;  %v11245_v59 = vshrl.u32 %v941_v17, 5  ;;  %v17717_v56 = vld [vmem:[#allocation6_spill] sm:$0xff] }
  0xab   :  { %v865_v2 = vadd.s32 %v863_v29, %v861_v9  ;;  %v955_v58 = vshll.u32 %v17630_v19, %v943_v55  ;;  %v956_v32 = vshrl.u32 %v17631_v30, %v11215_v21  ;;  %v11250_v14 = vsub.s32 %v719_v12, %v722_v47 }
  0xac   :  { %v812_v42 = vsel %vm810_vm11, %v11025_v60, 2102212464  ;;  %v833_v48 = vshrl.u32 %v11138_v31, 16  ;;  %v843_v10 = vadd.s32 %v841_v45, %v839_v26  ;;  %v949_v0 = vshll.u32 %v17620_v22, %v943_v55 }
  0xad   :  { %v950_v17 = vshrl.u32 %v17637_v25, %v11215_v21  ;;  %v952_v9 = vshll.u32 %v17637_v25, %v943_v55  ;;  %v953_v29 = vshrl.u32 %v17630_v19, %v11215_v21  ;;  %vm315_vm10 = vcmp.lt.s32.totalorder %v17717_v56, 0 }
  0xae   :  { %v857_v12 = vshrl.u32 %v11157_v63, 16  ;;  %v946_v47 = vshll.u32 %v17623_v39, %v943_v55  ;;  %v947_v60 = vshrl.u32 %v17620_v22, %v11215_v21  ;;  %v960_v31 = vor.u32 %v959_v13, %v958_v53 }
  0xaf   :  { %v866_v26 = vadd.s32 %v865_v2, %v855_v36  ;;  %v17718_v45 = vand.u32 2147483647, %v10971_v34  ;;  %v957_v27 = vor.u32 %v956_v32, %v955_v58  ;;  %vm964_vm11 = vcmp.lt.s32.totalorder %v11245_v59, 4 }
  0xb0   :  { %v435_v61 = vxor.u32 2147483648, %v11233_v20  ;;  %v581_v46 = vsub.s32 4294967266, %v11235_v50  ;;  %v835_v49 = vshrl.u32 %v11165_v43, 16  ;;  %v844_v44 = vadd.s32 %v843_v10, %v833_v48 }
  0xb1   :  { %v936_v54 = vand.u32 8388607, %v17718_v45  ;;  %v811_v55 = vsel %vm807_vm12, %v791_v8, %v11021_v18  ;;  %v813_v36 = vsel %vm809_vm14, %v11023_v33, %v812_v42  ;;  %v11279_v53 = vor.u32 %v950_v17, %v949_v0  ;;  %v17722_v42 = vld [vmem:[#allocation19_spill] sm:$0xff] }
  0xb2   :  { %v11281_v13 = vor.u32 %v953_v29, %v952_v9  ;;  %v17719_v2 = vand.u32 2147483647, %v17717_v56  ;;  %v11289_v43 = vor.u32 %v947_v60, %v946_v47  ;;  %vm961_vm15 = vcmp.lt.s32.totalorder %v11245_v59, 1 }
  0xb3   :  { %vm963_vm12 = vcmp.lt.s32.totalorder %v11245_v59, 3  ;;  %v974_v18 = vsel %vm964_vm11, %v960_v31, 1326507024  ;;  %v725_v33 = vsub.s32 0, %v11250_v14  ;;  %v867_v0 = vadd.s32 %v866_v26, %v857_v12  ;;  %v17724_v31 = vld [vmem:[#allocation9_spill] sm:$0xff] }
  0xb4   :  { %vm11285_vm1 = vcmp.le.f32.partialorder %v17719_v2, 0.7853982  ;;  %v937_v8 = vor.u32 8388608, %v936_v54  ;;  %v970_v32 = vsel %vm964_vm11, %v957_v27, 920167782  ;;  %v561_v48 = vadd.s32 %v17722_v42, %v10938_v6 }
  0xb5   :  { %vm724_vm14 = vcmp.lt.s32.totalorder %v11250_v14, 0  ;;  %v11301_v10 = vadd.s32 %v844_v44, %v835_v49  ;;  %v17723_v17 = vshll.u32 %v11157_v63, 16  ;;  %v577_v29 = vsub.s32 32, %v11235_v50 }
  0xb6   :  { %vm962_vm2 = vcmp.lt.s32.totalorder %v11245_v59, 2  ;;  %v973_v54 = vsel %vm961_vm15, %v11279_v53, %v11281_v13  ;;  %v975_v6 = vsel %vm963_vm12, %v957_v27, %v974_v18  ;;  %v582_v12 = vadd.s32 127, %v581_v46  ;;  %v17725_v46 = vld [vmem:[#allocation31_spill] sm:$0xff] }
  0xb7   :  { %v11306_v9 = vadd.s32 %v11188_v37, %v17723_v17  ;;  %v814_v44 = vsel %vm808_vm4, %v811_v55, %v813_v36  ;;  %v969_v49 = vsel %vm961_vm15, %v11289_v43, %v11279_v53  ;;  %v971_v63 = vsel %vm963_vm12, %v11281_v13, %v970_v32 }
  0xb8   :  { %v726_v37 = vsel %vm724_vm14, %v725_v33, %v11250_v14  ;;  %v871_v47 = vadd.s32 1, %v867_v0  ;;  %v11326_v60 = vshll.u32 %v937_v8, 8  ;;  %v1086_v27 = vand.u32 2139095040, %v17724_v31 }
  0xb9   :  { %v283_v26 = vsub.s32 4, %v17725_v46  ;;  %v290_v57 = vmul.f32 %v11227_v28, %v11185_v5  ;;  %vm870_vm4 = vc.u32 %v11301_v10, %v11306_v9  ;;  %v11336_v45 = vsel %vm962_vm2, %v973_v54, %v975_v6  ;;  %v17726_v6 = vld [vmem:[#allocation23_spill] sm:$0xff] }
  0xba   :  { %v297_v55 = vmul.f32 %v11229_v24, %v11185_v5  ;;  %v436_v36 = vsel %vm315_vm10, %v435_v61, %v11233_v20  ;;  %v578_v2 = vshll.u32 %v11071_v4, %v11235_v50  ;;  %v11347_v28 = vsel %vm962_vm2, %v969_v49, %v971_v63  ;;  %v17729_v4 = vld [vmem:[#allocation24_spill] sm:$0xff] }
  0xbb   :  { %v579_v18 = vshrl.u32 %v561_v48, %v577_v29  ;;  %v583_v33 = vshll.u32 %v582_v12, 23  ;;  %v727_v8 = vclz %v726_v37  ;;  %v868_v32 = vmul.u32 %v11069_v3, %v814_v44  ;;  %v17732_v48 = vld [vmem:[#allocation26_spill] sm:$0xff] }
  0xbc   :  { %v872_v42 = vsel %vm870_vm4, %v871_v47, %v867_v0  ;;  %v978_v17 = vand.u32 65535, %v11326_v60  ;;  %v981_v24 = vshrl.u32 %v11336_v45, 16  ;;  %v1087_v54 = vshrl.u32 %v1086_v27, 23 }
  0xbd   :  { %v17727_v61 = vcvt.s32.f32 %v17726_v6  ;;  %v17730_v50 = vcvt.s32.f32 %v17729_v4  ;;  %v17733_v29 = vcvt.s32.f32 %v17732_v48  ;;  %v1003_v0 = vshrl.u32 %v11347_v28, 16 }
  0xbe   :  { %v284_v12 = vsel %vm161_vm13, %v283_v26, %v17725_v46  ;;  %v291_v44 = vadd.f32 -0.4999988, %v290_v57  ;;  %v298_v63 = vadd.f32 -0.16666654, %v297_v55  ;;  %v11374_v37 = vsel %vm11285_vm1, %v17717_v56, %v436_v36  ;;  %v17735_v46 = vld [vmem:[#allocation27_spill] sm:$0xff] }
  0xbf   :  { %v11355_v20 = vmul.f32 %v11083_v41, %v17727_v61  ;;  %v11360_v49 = vmul.f32 %v11083_v41, %v17730_v50  ;;  %v11365_v3 = vmul.f32 %v11083_v41, %v17733_v29  ;;  %v580_v47 = vor.u32 %v579_v18, %v578_v2 }
  0xc0   :  { %v584_v27 = vor.u32 4788187, %v583_v33  ;;  %v10131_v6 = vadd.s32 4294967294, %v727_v8  ;;  %v11376_v61 = vadd.s32 %v872_v42, %v868_v32  ;;  %v979_v4 = vshrl.u32 %v11326_v60, 16 }
  0xc1   :  { %17728 = vst [vmem:[#allocation19_spill] sm:$0xff] %v11355_v20  ;;  %v980_v50 = vand.u32 65535, %v11336_v45  ;;  %v11380_v48 = vmul.u32 %v981_v24, %v978_v17  ;;  %v10139_v29 = vadd.s32 4294967169, %v1087_v54  ;;  %v17736_v26 = vcvt.s32.f32 %v17735_v46  ;;  %v17739_v46 = vld [vmem:[#allocation28_spill] sm:$0xff] }
  0xc2   :  { %17731 = vst [vmem:[#allocation31_spill] sm:$0xff] %v11360_v49  ;;  %v11389_v55 = vsel %vm11114_vm0, 0, %v284_v12  ;;  %v1002_v36 = vand.u32 65535, %v11347_v28  ;;  %v11392_v2 = vmul.u32 %v1003_v0, %v978_v17  ;;  %v292_v18 = vmul.f32 %v291_v44, %v11185_v5 }
  0xc3   :  { %17734 = vst [vmem:[#allocation23_spill] sm:$0xff] %v11365_v3  ;;  %v11385_v57 = vmul.f32 %v11083_v41, %v17736_v26  ;;  %v299_v45 = vmul.f32 %v298_v63, %v11185_v5  ;;  %v11397_v33 = vand.u32 3, %v11389_v55  ;;  %v11401_v8 = vmul.f32 %v11374_v37, %v11374_v37  ;;  %v17742_v3 = vld [vmem:[#allocation7_spill] sm:$0xff] }
  0xc4   :  { %17738 = vst [vmem:[#allocation26_spill] sm:$0xff] %v11389_v55  ;;  %v585_v32 = vand.u32 2147483647, %v584_v27  ;;  %v587_v42 = vcvt.s32.f32 %v580_v47  ;;  %vm10132_vm13 = vcmp.lt.s32.totalorder %v10131_v6, 0  ;;  %v874_v38 = vadd.s32 536870912, %v11376_v61 }
  0xc5   :  { %17737 = vst [vmem:[#allocation24_spill] sm:$0xff] %v11385_v57  ;;  %v982_v54 = vmul.u32 %v980_v50, %v978_v17  ;;  %v11404_v28 = vmul.u32 %v980_v50, %v979_v4  ;;  %v986_v12 = vshll.u32 %v11380_v48, 16  ;;  %v1093_v44 = vadd.s32 1, %v10139_v29 }
  0xc6   :  { %v17740_v5 = vcvt.s32.f32 %v17739_v46  ;;  %v1004_v26 = vmul.u32 %v1002_v36, %v978_v17  ;;  %v11412_v55 = vmul.u32 %v1002_v36, %v979_v4  ;;  %v1008_v27 = vshll.u32 %v11392_v2, 16  ;;  %v17744_v46 = vld [vmem:[#allocation8_spill] sm:$0xff] }
  0xc7   :  { %v300_v47 = vadd.f32 1.0, %v299_v45  ;;  %vm308_vm0 = vcmp.eq.s32.totalorder %v11397_v33, 2  ;;  %v442_v57 = vmul.f32 -0.001358992, %v11401_v8  ;;  %v449_v50 = vmul.f32 -0.00019511016, %v11401_v8 }
  0xc8   :  { %v11410_v63 = vmul.f32 %v11083_v41, %v17740_v5  ;;  %vm469_vm3 = vcmp.lt.s32.totalorder %v17742_v3, 0  ;;  %v11419_v29 = vadd.f32 1.0, %v292_v18  ;;  %vm305_vm5 = vcmp.eq.s32.totalorder %v11397_v33, 0 }
  0xc9   :  { %v437_v5 = vsub.s32 4, %v17744_v46  ;;  %v588_v17 = vmul.f32 %v587_v42, %v585_v32  ;;  %v11424_v36 = vsel %vm10132_vm13, 0, %v10131_v6  ;;  %v988_v45 = vshll.u32 %v11404_v28, 16 }
  0xca   :  { %17741 = vst [vmem:[#allocation27_spill] sm:$0xff] %v11410_v63  ;;  %v11426_v63 = vshrl.u32 %v874_v38, 30  ;;  %vm11429_vm6 = vc.u32 %v982_v54, %v986_v12  ;;  %vm1094_vm7 = vcmp.gt.s32.totalorder %v1093_v44, 0  ;;  %v992_v20 = vadd.s32 %v986_v12, %v982_v54 }
  0xcb   :  { %17743 = vst [vmem:[#allocation28_spill] sm:$0xff] %v11419_v29  ;;  %vm1012_vm8 = vc.u32 %v1004_v26, %v1008_v27  ;;  %v11434_v34 = vadd.s32 %v1008_v27, %v1004_v26  ;;  %v11437_v32 = vmul.f32 %v300_v47, %v11153_v52  ;;  %v443_v6 = vadd.f32 0.041655596, %v442_v57 }
  0xcc   :  { %17745 = vst [vmem:[#allocation8_spill] sm:$0xff] %v11426_v63  ;;  %v450_v42 = vadd.f32 0.008332121, %v449_v50  ;;  %v17749_v38 = vand.u32 2147483647, %v17742_v3  ;;  %v438_v54 = vsel %vm315_vm10, %v437_v5, %v17744_v46  ;;  %v985_v12 = vmul.u32 %v981_v24, %v979_v4 }
  0xcd   :  { %17748 = vst [vmem:[#allocation41_spill] sm:$0xff] %v11437_v32  ;;  %v1007_v18 = vmul.u32 %v1003_v0, %v979_v4  ;;  %v1095_v62 = vsel %vm1094_vm7, %v1093_v44, 0  ;;  %v735_v52 = vsub.s32 4294967266, %v11424_v36  ;;  %v991_v57 = vsel %vm11429_vm6, 1, %v17619_v16 }
  0xce   :  { %vm11441_vm9 = vcmp.le.f32.partialorder %v17749_v38, 0.7853982  ;;  %v1013_v27 = vsel %vm1012_vm8, 1, %v17619_v16  ;;  %v589_v47 = vxor.u32 2147483648, %v588_v17  ;;  %v876_v50 = vshll.u32 %v11426_v63, 30 }
  0xcf   :  { %vm994_vm14 = vc.u32 %v992_v20, %v988_v45  ;;  %v17752_v38 = vshll.u32 %v11412_v55, 16  ;;  %v444_v0 = vmul.f32 %v443_v6, %v11401_v8  ;;  %v451_v4 = vmul.f32 %v450_v42, %v11401_v8 }
  0xd0   :  { %v1097_v44 = vand.u32 31, %v1095_v62  ;;  %v11463_v49 = vsel %vm11285_vm1, 0, %v438_v54  ;;  %v715_v46 = vadd.s32 %v11067_v51, %v11062_v1  ;;  %v993_v5 = vadd.s32 %v991_v57, %v985_v12 }
  0xd1   :  { %vm1016_vm10 = vc.u32 %v11434_v34, %v17752_v38  ;;  %17753 = vst [vmem:[#allocation42_spill] sm:$0xff] %v11463_v49  ;;  %v1015_v20 = vadd.s32 %v1013_v27, %v1007_v18  ;;  %v731_v45 = vsub.s32 32, %v11424_v36  ;;  %v736_v26 = vadd.s32 127, %v735_v52 }
  0xd2   :  { %v995_v38 = vsel %vm994_vm14, 1, %v17619_v16  ;;  %v1017_v24 = vsel %vm1016_vm10, 1, %v17619_v16  ;;  %v17754_v6 = vxor.u32 2147483648, %v11419_v29  ;;  %v11478_v42 = vand.u32 3, %v11463_v49 }
  0xd3   :  { %v590_v1 = vsel %vm469_vm3, %v589_v47, %v588_v17  ;;  %v11483_v51 = vsub.s32 %v11376_v61, %v876_v50  ;;  %v17755_v18 = vxor.u32 2147483648, %v11437_v32  ;;  %v445_v12 = vadd.f32 -0.4999988, %v444_v0 }
  0xd4   :  { %v11475_v58 = vsel %vm308_vm0, %v17754_v6, %v11437_v32  ;;  %v452_v52 = vadd.f32 -0.16666654, %v451_v4  ;;  %v11492_v57 = vsub.s32 32, %v1097_v44  ;;  %v987_v27 = vshrl.u32 %v11380_v48, 16 }
  0xd5   :  { %v11490_v54 = vsel %vm305_vm5, %v11419_v29, %v17755_v18  ;;  %v997_v6 = vadd.s32 %v995_v38, %v993_v5  ;;  %v1009_v49 = vshrl.u32 %v11392_v2, 16  ;;  %v1019_v17 = vadd.s32 %v1017_v24, %v1015_v20 }
  0xd6   :  { %v11499_v61 = vsel %vm11441_vm9, %v17742_v3, %v590_v1  ;;  %v732_v47 = vshll.u32 %v11250_v14, %v11424_v36  ;;  %v733_v50 = vshrl.u32 %v715_v46, %v731_v45  ;;  %v737_v18 = vshll.u32 %v736_v26, 23 }
  0xd7   :  { %vm878_vm1 = vcmp.lt.s32.totalorder %v11483_v51, 0  ;;  %v945_v0 = vshrl.u32 %v17623_v39, %v11215_v21  ;;  %v966_v48 = vsel %vm964_vm11, %v11281_v13, 2102212464  ;;  %v17313_v2 = vand.u32 2147483647, %v17724_v31 }
  0xd8   :  { %v879_v24 = vsub.s32 0, %v11483_v51  ;;  %v989_v4 = vshrl.u32 %v11404_v28, 16  ;;  %v1109_v5 = vshll.u32 %v17630_v19, %v1097_v44  ;;  %v1110_v14 = vshrl.u32 %v17631_v30, %v11492_v57 }
  0xd9   :  { %v998_v36 = vadd.s32 %v997_v6, %v987_v27  ;;  %v1011_v26 = vshrl.u32 %v11412_v55, 16  ;;  %v1020_v46 = vadd.s32 %v1019_v17, %v1009_v49  ;;  %v11516_v21 = vshrl.u32 %v1095_v62, 5 }
  0xda   :  { %v1100_v20 = vshll.u32 %v17623_v39, %v1097_v44  ;;  %v1103_v13 = vshll.u32 %v17620_v22, %v1097_v44  ;;  %v1112_v45 = vshll.u32 %v17631_v30, %v1097_v44  ;;  %v1113_v28 = vshrl.u32 %v17632_v40, %v11492_v57 }
  0xdb   :  { %v1101_v38 = vshrl.u32 %v17620_v22, %v11492_v57  ;;  %v1104_v1 = vshrl.u32 %v17637_v25, %v11492_v57  ;;  %v1106_v27 = vshll.u32 %v17637_v25, %v1097_v44  ;;  %v1107_v62 = vshrl.u32 %v17630_v19, %v11492_v57 }
  0xdc   :  { %vm304_vm11 = vcmp.lt.s32.totalorder %v11397_v33, 2  ;;  %v734_v49 = vor.u32 %v733_v50, %v732_v47  ;;  %v738_v6 = vor.u32 4788187, %v737_v18  ;;  %v1090_v17 = vand.u32 8388607, %v17313_v2 }
  0xdd   :  { %v1111_v29 = vor.u32 %v1110_v14, %v1109_v5  ;;  %v880_v32 = vsel %vm878_vm1, %v879_v24, %v11483_v51  ;;  %v965_v63 = vsel %vm961_vm15, %v945_v0, %v11289_v43  ;;  %v1021_v44 = vadd.s32 %v1020_v46, %v1011_v26  ;;  %v17757_v0 = vld [vmem:[#allocation10_spill] sm:$0xff] }
  0xde   :  { %vm1118_vm4 = vcmp.lt.s32.totalorder %v11516_v21, 4  ;;  %v967_v47 = vsel %vm963_vm12, %v11279_v53, %v966_v48  ;;  %v11543_v50 = vadd.s32 %v998_v36, %v989_v4  ;;  %v17756_v18 = vshll.u32 %v11412_v55, 16 }
  0xdf   :  { %v1114_v14 = vor.u32 %v1113_v28, %v1112_v45  ;;  %v11550_v24 = vor.u32 %v1101_v38, %v1100_v20  ;;  %v11552_v2 = vor.u32 %v1104_v1, %v1103_v13  ;;  %v11554_v43 = vor.u32 %v1107_v62, %v1106_v27  ;;  %v17758_v62 = vld [vmem:[#allocation29_spill] sm:$0xff] }
  0xe0   :  { %v11548_v5 = vadd.s32 %v11434_v34, %v17756_v18  ;;  %v1240_v26 = vand.u32 2139095040, %v17757_v0  ;;  %v881_v46 = vclz %v880_v32  ;;  %vm1115_vm15 = vcmp.lt.s32.totalorder %v11516_v21, 1 }
  0xe1   :  { %vm1117_vm12 = vcmp.lt.s32.totalorder %v11516_v21, 3  ;;  %v1124_v53 = vsel %vm1118_vm4, %v1111_v29, 920167782  ;;  %v446_v34 = vmul.f32 %v445_v12, %v11401_v8  ;;  %v968_v55 = vsel %vm962_vm2, %v965_v63, %v967_v47 }
  0xe2   :  { %v1025_v48 = vadd.s32 1, %v1021_v44  ;;  %v1091_v4 = vor.u32 8388608, %v1090_v17  ;;  %v453_v36 = vmul.f32 %v452_v52, %v11401_v8  ;;  %v11567_v20 = vmul.f32 %v11499_v61, %v11499_v61 }
  0xe3   :  { %vm1024_vm13 = vc.u32 %v11543_v50, %v11548_v5  ;;  %v1128_v32 = vsel %vm1118_vm4, %v1114_v14, 1326507024  ;;  %vm1116_vm0 = vcmp.lt.s32.totalorder %v11516_v21, 2  ;;  %v1123_v59 = vsel %vm1115_vm15, %v11550_v24, %v11552_v2 }
  0xe4   :  { %v1125_v8 = vsel %vm1117_vm12, %v11554_v43, %v1124_v53  ;;  %v1241_v63 = vshrl.u32 %v1240_v26, 23  ;;  %v739_v12 = vand.u32 2147483647, %v738_v6  ;;  %v741_v52 = vcvt.s32.f32 %v734_v49  ;;  %v17761_v49 = vld [vmem:[#allocation32_spill] sm:$0xff] }
  0xe5   :  { %v10134_v13 = vadd.s32 4294967294, %v881_v46  ;;  %v1022_v45 = vmul.u32 %v11326_v60, %v968_v55  ;;  %v1026_v28 = vsel %vm1024_vm13, %v1025_v48, %v1021_v44  ;;  %v1127_v38 = vsel %vm1115_vm15, %v11552_v2, %v11554_v43 }
  0xe6   :  { %v1129_v1 = vsel %vm1117_vm12, %v1111_v29, %v1128_v32  ;;  %v11588_v27 = vshll.u32 %v1091_v4, 8  ;;  %v17759_v17 = vcvt.s32.f32 %v17758_v62  ;;  %v17762_v6 = vcvt.s32.f32 %v17761_v49 }
  0xe7   :  { %v603_v44 = vmul.f32 -0.00019511016, %v11567_v20  ;;  %v11603_v18 = vsel %vm1116_vm0, %v1123_v59, %v1125_v8  ;;  %vm17373_vm2 = vweird.f32 %v17673_v23  ;;  %v311_v29 = vsel %vm304_vm11, %v11490_v54, %v11475_v58 }
  0xe8   :  { %v11593_v47 = vmul.f32 %v11083_v41, %v17759_v17  ;;  %v11598_v60 = vmul.f32 %v11083_v41, %v17762_v6  ;;  %v454_v14 = vadd.f32 1.0, %v453_v36  ;;  %v10142_v26 = vadd.s32 4294967169, %v1241_v63  ;;  %v17767_v63 = vld [vmem:[#allocation30_spill] sm:$0xff] }
  0xe9   :  { %v742_v46 = vmul.f32 %v741_v52, %v739_v12  ;;  %vm10135_vm5 = vcmp.lt.s32.totalorder %v10134_v13, 0  ;;  %v11610_v53 = vadd.s32 %v1026_v28, %v1022_v45  ;;  %v11614_v41 = vsel %vm1116_vm0, %v1127_v38, %v1129_v1 }
  0xea   :  { %17760 = vst [vmem:[#allocation29_spill] sm:$0xff] %v11593_v47  ;;  %v11616_v55 = vadd.f32 1.0, %v446_v34  ;;  %vm459_vm6 = vcmp.eq.s32.totalorder %v11478_v42, 0  ;;  %vm462_vm7 = vcmp.eq.s32.totalorder %v11478_v42, 2  ;;  %v1132_v48 = vand.u32 65535, %v11588_v27 }
  0xeb   :  { %17763 = vst [vmem:[#allocation32_spill] sm:$0xff] %v11598_v60  ;;  %v1157_v33 = vshrl.u32 %v11603_v18, 16  ;;  %v11624_v58 = vsel %vm17373_vm2, nan, %v311_v29  ;;  %v591_v54 = vsub.s32 4, %v11018_v35  ;;  %v596_v4 = vmul.f32 -0.001358992, %v11567_v20 }
  0xec   :  { %17764 = vst [vmem:[#allocation43_spill] sm:$0xff] %v11616_v55  ;;  %v604_v36 = vadd.f32 0.008332121, %v603_v44  ;;  %v11629_v34 = vmul.f32 %v454_v14, %v11374_v37  ;;  %v884_v32 = vsel %vm10135_vm5, 0, %v10134_v13  ;;  %v1135_v59 = vshrl.u32 %v11614_v41, 16 }
  0xed   :  { %17765 = vst [vmem:[#allocation44_spill] sm:$0xff] %v11624_v58  ;;  %v1247_v8 = vadd.s32 1, %v10142_v26  ;;  %v17768_v12 = vand.u32 2147483647, %v17767_v63  ;;  %vm623_vm14 = vcmp.lt.s32.totalorder %v17767_v63, 0  ;;  %v743_v45 = vxor.u32 2147483648, %v742_v46 }
  0xee   :  { %17766 = vst [vmem:[#allocation45_spill] sm:$0xff] %v11629_v34  ;;  %v1028_v28 = vadd.s32 536870912, %v11610_v53  ;;  %v1133_v37 = vshrl.u32 %v11588_v27, 16  ;;  %v1156_v13 = vand.u32 65535, %v11603_v18  ;;  %v11643_v1 = vmul.u32 %v1157_v33, %v1132_v48 }
  0xef   :  { %vm11634_vm8 = vcmp.le.f32.partialorder %v17768_v12, 0.7853982  ;;  %vm458_vm10 = vcmp.lt.s32.totalorder %v11478_v42, 2  ;;  %v592_v62 = vsel %vm469_vm3, %v591_v54, %v11018_v35  ;;  %v597_v17 = vadd.f32 0.041655596, %v596_v4 }
  0xf0   :  { %v605_v49 = vmul.f32 %v604_v36, %v11567_v20  ;;  %v889_v6 = vsub.s32 4294967266, %v884_v32  ;;  %v1134_v29 = vand.u32 65535, %v11614_v41  ;;  %v11652_v14 = vmul.u32 %v1135_v59, %v1132_v48 }
  0xf1   :  { %vm1248_vm1 = vcmp.gt.s32.totalorder %v1247_v8, 0  ;;  %v744_v18 = vsel %vm623_vm14, %v743_v45, %v742_v46  ;;  %v869_v26 = vadd.s32 %v11306_v9, %v11301_v10  ;;  %v885_v12 = vsub.s32 32, %v884_v32 }
  0xf2   :  { %v11658_v38 = vshrl.u32 %v1028_v28, 30  ;;  %v17772_v35 = vxor.u32 2147483648, %v11616_v55  ;;  %v1158_v4 = vmul.u32 %v1156_v13, %v1132_v48  ;;  %v11665_v41 = vmul.u32 %v1156_v13, %v1133_v37 }
  0xf3   :  { %v1162_v36 = vshll.u32 %v11643_v1, 16  ;;  %v598_v44 = vmul.f32 %v597_v17, %v11567_v20  ;;  %v606_v46 = vadd.f32 -0.16666654, %v605_v49  ;;  %v890_v45 = vadd.s32 127, %v889_v6 }
  0xf4   :  { %17771 = vst [vmem:[#allocation46_spill] sm:$0xff] %v11658_v38  ;;  %v464_v54 = vsel %vm462_vm7, %v17772_v35, %v11629_v34  ;;  %v1249_v23 = vsel %vm1248_vm1, %v1247_v8, 0  ;;  %v11672_v10 = vsel %vm11634_vm8, %v17767_v63, %v744_v18  ;;  %v1136_v9 = vmul.u32 %v1134_v29, %v1132_v48 }
  0xf5   :  { %v11674_v28 = vmul.u32 %v1134_v29, %v1133_v37  ;;  %v1140_v35 = vshll.u32 %v11652_v14, 16  ;;  %v17773_v13 = vxor.u32 2147483648, %v11629_v34  ;;  %v886_v17 = vshll.u32 %v11483_v51, %v884_v32 }
  0xf6   :  { %v887_v49 = vshrl.u32 %v869_v26, %v885_v12  ;;  %v1030_v8 = vshll.u32 %v11658_v38, 30  ;;  %v17319_v6 = vshll.u32 %v11665_v41, 16  ;;  %vm1166_vm3 = vc.u32 %v1158_v4, %v1162_v36 }
  0xf7   :  { %v461_v58 = vsel %vm459_vm6, %v11616_v55, %v17773_v13  ;;  %v11685_v18 = vadd.s32 %v1162_v36, %v1158_v4  ;;  %v1251_v48 = vand.u32 31, %v1249_v23  ;;  %v599_v29 = vadd.f32 -0.4999988, %v598_v44 }
  0xf8   :  { %v607_v60 = vmul.f32 %v606_v46, %v11567_v20  ;;  %v11690_v34 = vmul.f32 %v11672_v10, %v11672_v10  ;;  %v891_v47 = vshll.u32 %v890_v45, 23  ;;  %v1142_v13 = vshll.u32 %v11674_v28, 16 }
  0xf9   :  { %vm1144_vm11 = vc.u32 %v1136_v9, %v1140_v35  ;;  %v1146_v51 = vadd.s32 %v1140_v35, %v1136_v9  ;;  %v1161_v32 = vmul.u32 %v1157_v33, %v1133_v37  ;;  %v11695_v26 = vsel %vm11441_vm9, 0, %v592_v62 }
  0xfa   :  { %17774 = vst [vmem:[#allocation47_spill] sm:$0xff] %v11695_v26  ;;  %v888_v12 = vor.u32 %v887_v49, %v886_v17  ;;  %v11698_v4 = vsub.s32 %v11610_v53, %v1030_v8  ;;  %v1167_v44 = vsel %vm1166_vm3, 1, %v17619_v16  ;;  %v11703_v36 = vsel %vm458_vm10, %v461_v58, %v464_v54 }
  0xfb   :  { %v1139_v46 = vmul.u32 %v1135_v59, %v1133_v37  ;;  %vm1170_vm13 = vc.u32 %v11685_v18, %v17319_v6  ;;  %v11708_v33 = vsub.s32 32, %v1251_v48  ;;  %v11711_v11 = vmul.f32 %v599_v29, %v11567_v20 }
  0xfc   :  { %v11713_v62 = vadd.f32 1.0, %v607_v60  ;;  %v11716_v53 = vmul.f32 -0.001358992, %v11690_v34  ;;  %v1145_v45 = vsel %vm1144_vm11, 1, %v17619_v16  ;;  %v757_v42 = vmul.f32 -0.00019511016, %v11690_v34 }
  0xfd   :  { %v892_v58 = vor.u32 4788187, %v891_v47  ;;  %vm1148_vm9 = vc.u32 %v1146_v51, %v1142_v13  ;;  %v1169_v59 = vadd.s32 %v1167_v44, %v1161_v32  ;;  %v895_v37 = vcvt.s32.f32 %v888_v12 }
  0xfe   :  { %vm1032_vm5 = vcmp.lt.s32.totalorder %v11698_v4, 0  ;;  %v1171_v54 = vsel %vm1170_vm13, 1, %v17619_v16  ;;  %v1033_v60 = vsub.s32 0, %v11698_v4  ;;  %v1147_v9 = vadd.s32 %v1145_v45, %v1139_v46 }
  0xff   :  { %v1263_v35 = vshll.u32 %v17630_v19, %v1251_v48  ;;  %v1264_v17 = vshrl.u32 %v17631_v30, %v11708_v33  ;;  %v1149_v49 = vsel %vm1148_vm9, 1, %v17619_v16  ;;  %v11728_v47 = vshrl.u32 %v1249_v23, 5 }
 0x100   :  { %v1266_v8 = vshll.u32 %v17631_v30, %v1251_v48  ;;  %v1267_v29 = vshrl.u32 %v17632_v40, %v11708_v33  ;;  %v1163_v13 = vshrl.u32 %v11643_v1, 16  ;;  %v1173_v51 = vadd.s32 %v1171_v54, %v1169_v59 }
 0x101   :  { %v1254_v32 = vshll.u32 %v17623_v39, %v1251_v48  ;;  %v1257_v12 = vshll.u32 %v17620_v22, %v1251_v48  ;;  %v1255_v44 = vshrl.u32 %v17620_v22, %v11708_v33  ;;  %v1258_v46 = vshrl.u32 %v17637_v25, %v11708_v33 }
 0x102   :  { %v1260_v23 = vshll.u32 %v17637_v25, %v1251_v48  ;;  %v1261_v45 = vshrl.u32 %v17630_v19, %v11708_v33  ;;  %v893_v6 = vand.u32 2147483647, %v892_v58  ;;  %v1141_v20 = vshrl.u32 %v11652_v14, 16 }
 0x103   :  { %v1151_v1 = vadd.s32 %v1149_v49, %v1147_v9  ;;  %v1265_v59 = vor.u32 %v1264_v17, %v1263_v35  ;;  %v1099_v54 = vshrl.u32 %v17623_v39, %v11492_v57  ;;  %v17775_v55 = vand.u32 2147483647, %v17757_v0 }
 0x104   :  { %v1268_v38 = vor.u32 %v1267_v29, %v1266_v8  ;;  %vm1272_vm6 = vcmp.lt.s32.totalorder %v11728_v47, 4  ;;  %v1034_v48 = vsel %vm1032_vm5, %v1033_v60, %v11698_v4  ;;  %v1120_v58 = vsel %vm1118_vm4, %v11554_v43, 2102212464 }
 0x105   :  { %v1244_v31 = vand.u32 8388607, %v17775_v55  ;;  %v1143_v14 = vshrl.u32 %v11674_v28, 16  ;;  %v1165_v9 = vshrl.u32 %v11665_v41, 16  ;;  %v1174_v35 = vadd.s32 %v1173_v51, %v1163_v13 }
 0x106   :  { %v11757_v57 = vor.u32 %v1255_v44, %v1254_v32  ;;  %v11759_v17 = vor.u32 %v1258_v46, %v1257_v12  ;;  %v11761_v55 = vor.u32 %v1261_v45, %v1260_v23  ;;  %v1152_v49 = vadd.s32 %v1151_v1, %v1141_v20  ;;  %v17778_v23 = vld [vmem:[#allocation40_spill] sm:$0xff] }
 0x107   :  { %vm1269_vm7 = vcmp.lt.s32.totalorder %v11728_v47, 1  ;;  %vm1271_vm10 = vcmp.lt.s32.totalorder %v11728_v47, 3  ;;  %v1278_v60 = vsel %vm1272_vm6, %v1265_v59, 920167782  ;;  %v758_v43 = vadd.f32 0.008332121, %v757_v42 }
 0x108   :  { %v896_v8 = vmul.f32 %v895_v37, %v893_v6  ;;  %v1245_v28 = vor.u32 8388608, %v1244_v31  ;;  %v1282_v29 = vsel %vm1272_vm6, %v1268_v38, 1326507024  ;;  %v1035_v13 = vclz %v1034_v48 }
 0x109   :  { %v1119_v51 = vsel %vm1115_vm15, %v1099_v54, %v11550_v24  ;;  %v1121_v20 = vsel %vm1117_vm12, %v11552_v2, %v1120_v58  ;;  %v17776_v32 = vshll.u32 %v11665_v41, 16  ;;  %v1175_v42 = vadd.s32 %v1174_v35, %v1165_v9 }
 0x10a   :  { %vm1270_vm4 = vcmp.lt.s32.totalorder %v11728_v47, 2  ;;  %v1277_v31 = vsel %vm1269_vm7, %v11757_v57, %v11759_v17  ;;  %v1279_v24 = vsel %vm1271_vm10, %v11761_v55, %v1278_v60  ;;  %vm17372_vm15 = vweird.f32 %v17717_v56 }
 0x10b   :  { %v11778_v12 = vadd.s32 %v11685_v18, %v17776_v32  ;;  %v11789_v2 = vadd.s32 %v1152_v49, %v1143_v14  ;;  %v1281_v38 = vsel %vm1269_vm7, %v11759_v17, %v11761_v55  ;;  %v1283_v41 = vsel %vm1271_vm10, %v1265_v59, %v1282_v29 }
 0x10c   :  { %v1394_v6 = vand.u32 2139095040, %v11016_v7  ;;  %v11799_v18 = vand.u32 3, %v11695_v26  ;;  %vm777_vm12 = vcmp.lt.s32.totalorder %v10798_v15, 0  ;;  %v897_v37 = vxor.u32 2147483648, %v896_v8 }
 0x10d   :  { %v11802_v44 = vshll.u32 %v1245_v28, 8  ;;  %v11805_v46 = vadd.f32 1.0, %v11711_v11  ;;  %v745_v45 = vsub.s32 4, %v17778_v23  ;;  %v751_v1 = vadd.f32 0.041655596, %v11716_v53 }
 0x10e   :  { %v11811_v59 = vsel %vm1270_vm4, %v1277_v31, %v1279_v24  ;;  %v10137_v54 = vadd.s32 4294967294, %v1035_v13  ;;  %v1122_v48 = vsel %vm1116_vm0, %v1119_v51, %v1121_v20  ;;  %v1179_v58 = vadd.s32 1, %v1175_v42 }
 0x10f   :  { %17777 = vst [vmem:[#allocation48_spill] sm:$0xff] %v11805_v46  ;;  %v11817_v14 = vsel %vm1270_vm4, %v1281_v38, %v1283_v41  ;;  %v11821_v11 = vmul.f32 %v11713_v62, %v11499_v61  ;;  %v759_v9 = vmul.f32 %v758_v43, %v11690_v34  ;;  %vm1178_vm1 = vc.u32 %v11789_v2, %v11778_v12 }
 0x110   :  { %v1395_v53 = vshrl.u32 %v1394_v6, 23  ;;  %v17780_v35 = vand.u32 2147483647, %v10798_v15  ;;  %v898_v49 = vsel %vm777_vm12, %v897_v37, %v896_v8  ;;  %v1286_v60 = vand.u32 65535, %v11802_v44 }
 0x111   :  { %17779 = vst [vmem:[#allocation40_spill] sm:$0xff] %v11821_v11  ;;  %v1311_v61 = vshrl.u32 %v11811_v59, 16  ;;  %vm613_vm0 = vcmp.eq.s32.totalorder %v11799_v18, 0  ;;  %v17325_v62 = vxor.u32 2147483648, %v11805_v46  ;;  %v1176_v43 = vmul.u32 %v11588_v27, %v1122_v48 }
 0x112   :  { %vm11828_vm3 = vcmp.le.f32.partialorder %v17780_v35, 0.7853982  ;;  %v1289_v28 = vshrl.u32 %v11817_v14, 16  ;;  %v746_v29 = vsel %vm623_vm14, %v745_v45, %v17778_v23  ;;  %v752_v13 = vmul.f32 %v751_v1, %v11690_v34 }
 0x113   :  { %vm10138_vm11 = vcmp.lt.s32.totalorder %v10137_v54, 0  ;;  %v1180_v8 = vsel %vm1178_vm1, %v1179_v58, %v1175_v42  ;;  %v17326_v51 = vxor.u32 2147483648, %v11821_v11  ;;  %v760_v20 = vadd.f32 -0.16666654, %v759_v9 }
 0x114   :  { %v11848_v32 = vsel %vm11828_vm3, %v10798_v15, %v898_v49  ;;  %v10145_v31 = vadd.s32 4294967169, %v1395_v53  ;;  %vm616_vm13 = vcmp.eq.s32.totalorder %v11799_v18, 2  ;;  %v1287_v27 = vshrl.u32 %v11802_v44, 16 }
 0x115   :  { %v1310_v24 = vand.u32 65535, %v11811_v59  ;;  %v11853_v38 = vmul.u32 %v1311_v61, %v1286_v60  ;;  %v1038_v41 = vsel %vm10138_vm11, 0, %v10137_v54  ;;  %v11855_v6 = vadd.s32 %v1180_v8, %v1176_v43  ;;  %v17785_v8 = vld [vmem:[#allocation8_spill] sm:$0xff] }
 0x116   :  { %v1288_v42 = vand.u32 65535, %v11817_v14  ;;  %v11858_v37 = vmul.u32 %v1289_v28, %v1286_v60  ;;  %v11863_v23 = vsel %vm17372_vm15, nan, %v11703_v36  ;;  %v11867_v45 = vsel %vm11634_vm8, 0, %v746_v29 }
 0x117   :  { %17783 = vst [vmem:[#allocation49_spill] sm:$0xff] %v11863_v23  ;;  %v753_v1 = vadd.f32 -0.4999988, %v752_v13  ;;  %v11871_v59 = vmul.f32 %v11848_v32, %v11848_v32  ;;  %vm612_vm14 = vcmp.lt.s32.totalorder %v11799_v18, 2  ;;  %v615_v54 = vsel %vm613_vm0, %v11805_v46, %v17326_v51 }
 0x118   :  { %17784 = vst [vmem:[#allocation50_spill] sm:$0xff] %v11867_v45  ;;  %v618_v36 = vsel %vm616_vm13, %v17325_v62, %v11821_v11  ;;  %v761_v52 = vmul.f32 %v760_v20, %v11690_v34  ;;  %v1401_v48 = vadd.s32 1, %v10145_v31  ;;  %v1043_v58 = vsub.s32 4294967266, %v1038_v41 }
 0x119   :  { %v1312_v14 = vmul.u32 %v1310_v24, %v1286_v60  ;;  %v11883_v9 = vmul.u32 %v1310_v24, %v1287_v27  ;;  %v1316_v53 = vshll.u32 %v11853_v38, 16  ;;  %v1182_v35 = vadd.s32 536870912, %v11855_v6 }
 0x11a   :  { %v1290_v49 = vmul.u32 %v1288_v42, %v1286_v60  ;;  %v11887_v43 = vmul.u32 %v1288_v42, %v1287_v27  ;;  %v1294_v29 = vshll.u32 %v11858_v37, 16  ;;  %v754_v13 = vmul.f32 %v753_v1, %v11690_v34 }
 0x11b   :  { %v899_v62 = vsub.s32 4, %v17785_v8  ;;  %v904_v20 = vmul.f32 -0.001358992, %v11871_v59  ;;  %v911_v31 = vmul.f32 -0.00019511016, %v11871_v59  ;;  %v762_v51 = vadd.f32 1.0, %v761_v52 }
 0x11c   :  { %v1023_v24 = vadd.s32 %v11548_v5, %v11543_v50  ;;  %v1039_v46 = vsub.s32 32, %v1038_v41  ;;  %vm1402_vm8 = vcmp.gt.s32.totalorder %v1401_v48, 0  ;;  %v1044_v11 = vadd.s32 127, %v1043_v58 }
 0x11d   :  { %vm1320_vm9 = vc.u32 %v1312_v14, %v1316_v53  ;;  %v11897_v42 = vadd.s32 %v1316_v53, %v1312_v14  ;;  %v11899_v56 = vshrl.u32 %v1182_v35, 30  ;;  %v1296_v34 = vshll.u32 %v11887_v43, 16 }
 0x11e   :  { %vm1298_vm5 = vc.u32 %v1290_v49, %v1294_v29  ;;  %v1300_v1 = vadd.s32 %v1294_v29, %v1290_v49  ;;  %v905_v23 = vadd.f32 0.041655596, %v904_v20  ;;  %v912_v26 = vadd.f32 0.008332121, %v911_v31 }
 0x11f   :  { %17786 = vst [vmem:[#allocation8_spill] sm:$0xff] %v11899_v56  ;;  %v1315_v52 = vmul.u32 %v1311_v61, %v1287_v27  ;;  %v1403_v63 = vsel %vm1402_vm8, %v1401_v48, 0  ;;  %v1040_v50 = vshll.u32 %v11698_v4, %v1038_v41  ;;  %v1041_v5 = vshrl.u32 %v1023_v24, %v1039_v46 }
 0x120   :  { %v1293_v0 = vmul.u32 %v1289_v28, %v1287_v27  ;;  %v1321_v58 = vsel %vm1320_vm9, 1, %v17619_v16  ;;  %v11904_v60 = vadd.f32 1.0, %v754_v13  ;;  %v1045_v14 = vshll.u32 %v1044_v11, 23  ;;  %v17790_v27 = vld [vmem:[#allocation36_spill] sm:$0xff] }
 0x121   :  { %v1299_v53 = vsel %vm1298_vm5, 1, %v17619_v16  ;;  %v17788_v35 = vshll.u32 %v11883_v9, 16  ;;  %v11911_v49 = vmul.f32 %v762_v51, %v11672_v10  ;;  %v1184_v61 = vshll.u32 %v11899_v56, 30 }
 0x122   :  { %17787 = vst [vmem:[#allocation51_spill] sm:$0xff] %v11904_v60  ;;  %vm1302_vm0 = vc.u32 %v1300_v1, %v1296_v34  ;;  %v1405_v4 = vand.u32 31, %v1403_v63  ;;  %v11916_v46 = vsel %vm612_vm14, %v615_v54, %v618_v36  ;;  %v906_v28 = vmul.f32 %v905_v23, %v11871_v59 }
 0x123   :  { %vm1324_vm1 = vc.u32 %v11897_v42, %v17788_v35  ;;  %17789 = vst [vmem:[#allocation52_spill] sm:$0xff] %v11911_v49  ;;  %v1323_v11 = vadd.s32 %v1321_v58, %v1315_v52  ;;  %v1548_v41 = vand.u32 2139095040, %v17790_v27  ;;  %v913_v48 = vmul.f32 %v912_v26, %v11871_v59 }
 0x124   :  { %v1042_v29 = vor.u32 %v1041_v5, %v1040_v50  ;;  %v1301_v13 = vadd.s32 %v1299_v53, %v1293_v0  ;;  %v1325_v10 = vsel %vm1324_vm1, 1, %v17619_v16  ;;  %v11923_v51 = vand.u32 3, %v11867_v45 }
 0x125   :  { %v11928_v18 = vsel %vm777_vm12, %v899_v62, %v17785_v8  ;;  %v1046_v54 = vor.u32 4788187, %v1045_v14  ;;  %v1303_v23 = vsel %vm1302_vm0, 1, %v17619_v16  ;;  %v17336_v36 = vxor.u32 2147483648, %v11911_v49 }
 0x126   :  { %17791 = vst [vmem:[#allocation53_spill] sm:$0xff] %v11923_v51  ;;  %v17335_v20 = vxor.u32 2147483648, %v11904_v60  ;;  %v11934_v26 = vsub.s32 %v11855_v6, %v1184_v61  ;;  %v11936_v0 = vsub.s32 32, %v1405_v4  ;;  %v11938_v31 = vadd.f32 -0.4999988, %v906_v28 }
 0x127   :  { %v1317_v24 = vshrl.u32 %v11853_v38, 16  ;;  %v1327_v34 = vadd.s32 %v1325_v10, %v1323_v11  ;;  %v1549_v1 = vshrl.u32 %v1548_v41, 23  ;;  %v914_v62 = vadd.f32 -0.16666654, %v913_v48 }
 0x128   :  { %v1049_v8 = vcvt.s32.f32 %v1042_v29  ;;  %v1295_v52 = vshrl.u32 %v11858_v37, 16  ;;  %v1305_v50 = vadd.s32 %v1303_v23, %v1301_v13  ;;  %v1047_v5 = vand.u32 2147483647, %v1046_v54 }
 0x129   :  { %v1253_v58 = vshrl.u32 %v17623_v39, %v11708_v33  ;;  %v1274_v6 = vsel %vm1272_vm6, %v11761_v55, 2102212464  ;;  %v17337_v14 = vand.u32 2147483647, %v11016_v7  ;;  %vm1186_vm12 = vcmp.lt.s32.totalorder %v11934_v26, 0 }
 0x12a   :  { %v1187_v38 = vsub.s32 0, %v11934_v26  ;;  %v1420_v53 = vshll.u32 %v17631_v30, %v1405_v4  ;;  %v1421_v37 = vshrl.u32 %v17632_v40, %v11936_v0  ;;  %v1319_v35 = vshrl.u32 %v11883_v9, 16 }
 0x12b   :  { %v1328_v61 = vadd.s32 %v1327_v34, %v1317_v24  ;;  %v11954_v28 = vshrl.u32 %v1403_v63, 5  ;;  %v10148_v33 = vadd.s32 4294967169, %v1549_v1  ;;  %v1297_v11 = vshrl.u32 %v11887_v43, 16  ;;  %v17792_v34 = vld [vmem:[#allocation25_spill] sm:$0xff] }
 0x12c   :  { %v1306_v55 = vadd.s32 %v1305_v50, %v1295_v52  ;;  %v1411_v41 = vshll.u32 %v17620_v22, %v1405_v4  ;;  %v1414_v48 = vshll.u32 %v17637_v25, %v1405_v4  ;;  %v1412_v29 = vshrl.u32 %v17637_v25, %v11936_v0 }
 0x12d   :  { %v1415_v13 = vshrl.u32 %v17630_v19, %v11936_v0  ;;  %v1417_v10 = vshll.u32 %v17630_v19, %v1405_v4  ;;  %v1418_v63 = vshrl.u32 %v17631_v30, %v11936_v0  ;;  %vm17371_vm6 = vweird.f32 %v17742_v3 }
 0x12e   :  { %vm770_vm11 = vcmp.eq.s32.totalorder %v11923_v51, 2  ;;  %v1188_v43 = vsel %vm1186_vm12, %v1187_v38, %v11934_v26  ;;  %v1273_v54 = vsel %vm1269_vm7, %v1253_v58, %v11757_v57  ;;  %v1275_v23 = vsel %vm1271_vm10, %v11759_v17, %v1274_v6 }
 0x12f   :  { %v1422_v24 = vor.u32 %v1421_v37, %v1420_v53  ;;  %vm931_vm13 = vcmp.lt.s32.totalorder %v17792_v34, 0  ;;  %v1329_v1 = vadd.s32 %v1328_v61, %v1319_v35  ;;  %v1398_v52 = vand.u32 8388607, %v17337_v14 }
 0x130   :  { %vm1426_vm14 = vcmp.lt.s32.totalorder %v11954_v28, 4  ;;  %v1555_v50 = vadd.s32 1, %v10148_v33  ;;  %vm767_vm8 = vcmp.eq.s32.totalorder %v11923_v51, 0  ;;  %v11982_v38 = vadd.s32 %v1306_v55, %v1297_v11 }
 0x131   :  { %v17793_v57 = vshll.u32 %v11883_v9, 16  ;;  %v1408_v17 = vshll.u32 %v17623_v39, %v1405_v4  ;;  %v1409_v6 = vshrl.u32 %v17620_v22, %v11936_v0  ;;  %v1050_v53 = vmul.f32 %v1049_v8, %v1047_v5 }
 0x132   :  { %v11992_v37 = vor.u32 %v1412_v29, %v1411_v41  ;;  %v11994_v35 = vor.u32 %v1415_v13, %v1414_v48  ;;  %v1419_v61 = vor.u32 %v1418_v63, %v1417_v10  ;;  %v1189_v33 = vclz %v1188_v43  ;;  %v17794_v29 = vld [vmem:[#allocation46_spill] sm:$0xff] }
 0x133   :  { %v11987_v58 = vadd.s32 %v11897_v42, %v17793_v57  ;;  %vm1423_vm7 = vcmp.lt.s32.totalorder %v11954_v28, 1  ;;  %vm1425_vm10 = vcmp.lt.s32.totalorder %v11954_v28, 3  ;;  %v1436_v9 = vsel %vm1426_vm14, %v1422_v24, 1326507024 }
 0x134   :  { %v1276_v42 = vsel %vm1270_vm4, %v1273_v54, %v1275_v23  ;;  %v1333_v4 = vadd.s32 1, %v1329_v1  ;;  %v1399_v11 = vor.u32 8388608, %v1398_v52  ;;  %vm1556_vm9 = vcmp.gt.s32.totalorder %v1555_v50, 0 }
 0x135   :  { %v915_v8 = vmul.f32 %v914_v62, %v11871_v59  ;;  %vm1332_vm5 = vc.u32 %v11982_v38, %v11987_v58  ;;  %v12005_v5 = vor.u32 %v1409_v6, %v1408_v17  ;;  %vm1424_vm1 = vcmp.lt.s32.totalorder %v11954_v28, 2 }
 0x136   :  { %v1432_v55 = vsel %vm1426_vm14, %v1419_v61, 920167782  ;;  %v1435_v47 = vsel %vm1423_vm7, %v11992_v37, %v11994_v35  ;;  %v1437_v41 = vsel %vm1425_vm10, %v1419_v61, %v1436_v9  ;;  %v1557_v48 = vsel %vm1556_vm9, %v1555_v50, 0 }
 0x137   :  { %v1051_v62 = vxor.u32 2147483648, %v1050_v53  ;;  %v1053_v13 = vsub.s32 4, %v17794_v29  ;;  %v10140_v10 = vadd.s32 4294967294, %v1189_v33  ;;  %v1330_v63 = vmul.u32 %v11802_v44, %v1276_v42 }
 0x138   :  { %v908_v43 = vmul.f32 %v11938_v31, %v11871_v59  ;;  %v1334_v54 = vsel %vm1332_vm5, %v1333_v4, %v1329_v1  ;;  %v12020_v23 = vshll.u32 %v1399_v11, 8  ;;  %v1559_v24 = vand.u32 31, %v1557_v48 }
 0x139   :  { %v916_v52 = vadd.f32 1.0, %v915_v8  ;;  %v1431_v57 = vsel %vm1423_vm7, %v12005_v5, %v11992_v37  ;;  %v1433_v50 = vsel %vm1425_vm10, %v11994_v35, %v1432_v55  ;;  %v12031_v44 = vsel %vm1424_vm1, %v1435_v47, %v1437_v41 }
 0x13a   :  { %v12036_v59 = vsel %vm17371_vm6, nan, %v11916_v46  ;;  %v12043_v31 = vsel %vm770_vm11, %v17335_v20, %v11911_v49  ;;  %v12048_v1 = vsel %vm11828_vm3, 0, %v11928_v18  ;;  %v17798_v17 = vand.u32 2147483647, %v17792_v34 }
 0x13b   :  { %17795 = vst [vmem:[#allocation46_spill] sm:$0xff] %v12036_v59  ;;  %v1052_v46 = vsel %vm931_vm13, %v1051_v62, %v1050_v53  ;;  %vm10141_vm0 = vcmp.lt.s32.totalorder %v10140_v10, 0  ;;  %v12058_v61 = vadd.s32 %v1334_v54, %v1330_v63  ;;  %v12060_v33 = vsub.s32 32, %v1559_v24 }
 0x13c   :  { %17796 = vst [vmem:[#allocation54_spill] sm:$0xff] %v12043_v31  ;;  %vm12052_vm4 = vcmp.le.f32.partialorder %v17798_v17, 0.7853982  ;;  %v12067_v21 = vsel %vm767_vm8, %v11904_v60, %v17336_v36  ;;  %v12071_v18 = vsel %vm1424_vm1, %v1431_v57, %v1433_v50  ;;  %v1440_v9 = vand.u32 65535, %v12020_v23 }
 0x13d   :  { %17797 = vst [vmem:[#allocation55_spill] sm:$0xff] %v12048_v1  ;;  %v17338_v53 = vshrl.u32 %v12031_v44, 16  ;;  %v12075_v42 = vadd.f32 1.0, %v908_v43  ;;  %v12078_v4 = vmul.f32 %v916_v52, %v11848_v32  ;;  %v12081_v11 = vand.u32 3, %v12048_v1 }
 0x13e   :  { %17801 = vst [vmem:[#allocation56_spill] sm:$0xff] %v12067_v21  ;;  %v12086_v8 = vsel %vm931_vm13, %v1053_v13, %v17794_v29  ;;  %v12091_v55 = vsel %vm12052_vm4, %v17792_v34, %v1052_v46  ;;  %v12093_v47 = vsel %vm10141_vm0, 0, %v10140_v10  ;;  %v1441_v41 = vshrl.u32 %v12020_v23, 16 }
 0x13f   :  { %17802 = vst [vmem:[#allocation57_spill] sm:$0xff] %v12075_v42  ;;  %v1336_v62 = vadd.s32 536870912, %v12058_v61  ;;  %v1465_v63 = vshrl.u32 %v12071_v18, 16  ;;  %v1571_v43 = vshll.u32 %v17630_v19, %v1559_v24  ;;  %v1572_v29 = vshrl.u32 %v17631_v30, %v12060_v33 }
 0x140   :  { %17803 = vst [vmem:[#allocation58_spill] sm:$0xff] %v12078_v4  ;;  %v1442_v13 = vand.u32 65535, %v12031_v44  ;;  %v12105_v54 = vmul.u32 %v17338_v53, %v1440_v9  ;;  %v1464_v10 = vand.u32 65535, %v12071_v18  ;;  %v12108_v52 = vshrl.u32 %v1557_v48, 5 }
 0x141   :  { %v1562_v57 = vshll.u32 %v17623_v39, %v1559_v24  ;;  %v1565_v50 = vshll.u32 %v17620_v22, %v1559_v24  ;;  %v1574_v17 = vshll.u32 %v17631_v30, %v1559_v24  ;;  %v1575_v46 = vshrl.u32 %v17632_v40, %v12060_v33 }
 0x142   :  { %v1563_v20 = vshrl.u32 %v17620_v22, %v12060_v33  ;;  %v1566_v36 = vshrl.u32 %v17637_v25, %v12060_v33  ;;  %v1568_v14 = vshll.u32 %v17637_v25, %v1559_v24  ;;  %v1569_v48 = vshrl.u32 %v17630_v19, %v12060_v33 }
 0x143   :  { %v12124_v18 = vmul.f32 %v12091_v55, %v12091_v55  ;;  %v1197_v53 = vsub.s32 4294967266, %v12093_v47  ;;  %v12127_v32 = vmul.u32 %v1465_v63, %v1440_v9  ;;  %v1573_v60 = vor.u32 %v1572_v29, %v1571_v43 }
 0x144   :  { %v12129_v49 = vshrl.u32 %v1336_v62, 30  ;;  %v1466_v3 = vmul.u32 %v1464_v10, %v1440_v9  ;;  %v17805_v1 = vand.u32 2147483647, %v17790_v27  ;;  %vm1580_vm3 = vcmp.lt.s32.totalorder %v12108_v52, 4 }
 0x145   :  { %v1444_v24 = vmul.u32 %v1442_v13, %v1440_v9  ;;  %v12134_v59 = vmul.u32 %v1442_v13, %v1441_v41  ;;  %v12136_v7 = vmul.u32 %v1464_v10, %v1441_v41  ;;  %v1576_v34 = vor.u32 %v1575_v46, %v1574_v17 }
 0x146   :  { %17804 = vst [vmem:[#allocation59_spill] sm:$0xff] %v12129_v49  ;;  %v1552_v45 = vand.u32 8388607, %v17805_v1  ;;  %v1448_v21 = vshll.u32 %v12105_v54, 16  ;;  %v12139_v31 = vor.u32 %v1563_v20, %v1562_v57  ;;  %v12141_v56 = vor.u32 %v1566_v36, %v1565_v50 }
 0x147   :  { %v12143_v62 = vor.u32 %v1569_v48, %v1568_v14  ;;  %v1470_v43 = vshll.u32 %v12127_v32, 16  ;;  %vm1577_vm12 = vcmp.lt.s32.totalorder %v12108_v52, 1  ;;  %vm1579_vm11 = vcmp.lt.s32.totalorder %v12108_v52, 3 }
 0x148   :  { %v1586_v1 = vsel %vm1580_vm3, %v1573_v60, 920167782  ;;  %v1058_v9 = vmul.f32 -0.001358992, %v12124_v18  ;;  %v1177_v29 = vadd.s32 %v11778_v12, %v11789_v2  ;;  %v1193_v20 = vsub.s32 32, %v12093_v47 }
 0x149   :  { %v1553_v36 = vor.u32 8388608, %v1552_v45  ;;  %v1198_v13 = vadd.s32 127, %v1197_v53  ;;  %v1338_v14 = vshll.u32 %v12129_v49, 30  ;;  %v1450_v10 = vshll.u32 %v12134_v59, 16 }
 0x14a   :  { %v1590_v57 = vsel %vm1580_vm3, %v1576_v34, 1326507024  ;;  %vm12158_vm13 = vc.u32 %v1444_v24, %v1448_v21  ;;  %vm1578_vm8 = vcmp.lt.s32.totalorder %v12108_v52, 2  ;;  %v1585_v12 = vsel %vm1577_vm12, %v12139_v31, %v12141_v56 }
 0x14b   :  { %v1587_v2 = vsel %vm1579_vm11, %v12143_v62, %v1586_v1  ;;  %v1454_v45 = vadd.s32 %v1448_v21, %v1444_v24  ;;  %vm1474_vm9 = vc.u32 %v1466_v3, %v1470_v43  ;;  %v12171_v34 = vadd.s32 %v1470_v43, %v1466_v3 }
 0x14c   :  { %v1194_v17 = vshll.u32 %v11934_v26, %v12093_v47  ;;  %v1589_v46 = vsel %vm1577_vm12, %v12141_v56, %v12143_v62  ;;  %v1591_v48 = vsel %vm1579_vm11, %v1573_v60, %v1590_v57  ;;  %v12181_v27 = vshll.u32 %v1553_v36, 8 }
 0x14d   :  { %v1195_v1 = vshrl.u32 %v1177_v29, %v1193_v20  ;;  %v17808_v21 = vshrl.u32 %v12031_v44, 16  ;;  %v1469_v53 = vmul.u32 %v1465_v63, %v1441_v41  ;;  %v12187_v3 = vsel %vm1578_vm8, %v1585_v12, %v1587_v2 }
 0x14e   :  { %v1065_v26 = vmul.f32 -0.00019511016, %v12124_v18  ;;  %v1199_v47 = vshll.u32 %v1198_v13, 23  ;;  %v1453_v43 = vsel %vm12158_vm13, 1, %v17619_v16  ;;  %v1475_v60 = vsel %vm1474_vm9, 1, %v17619_v16 }
 0x14f   :  { %v1447_v24 = vmul.u32 %v17808_v21, %v1441_v41  ;;  %v12195_v36 = vsub.s32 %v12058_v61, %v1338_v14  ;;  %vm1456_vm5 = vc.u32 %v1454_v45, %v1450_v10  ;;  %v17809_v44 = vshll.u32 %v12136_v7, 16  ;;  %v17811_v45 = vld [vmem:[#allocation37_spill] sm:$0xff] }
 0x150   :  { %v12202_v41 = vsel %vm1578_vm8, %v1589_v46, %v1591_v48  ;;  %v12208_v29 = vsel %vm12052_vm4, 0, %v12086_v8  ;;  %v1594_v20 = vand.u32 65535, %v12181_v27  ;;  %v1619_v61 = vshrl.u32 %v12187_v3, 16 }
 0x151   :  { %vm1478_vm0 = vc.u32 %v12171_v34, %v17809_v44  ;;  %17810 = vst [vmem:[#allocation60_spill] sm:$0xff] %v12208_v29  ;;  %v1059_v13 = vadd.f32 0.041655596, %v1058_v9  ;;  %v1196_v14 = vor.u32 %v1195_v1, %v1194_v17  ;;  %v1455_v10 = vadd.s32 %v1453_v43, %v1447_v24 }
 0x152   :  { %v1477_v57 = vadd.s32 %v1475_v60, %v1469_v53  ;;  %v1457_v50 = vsel %vm1456_vm5, 1, %v17619_v16  ;;  %v1479_v12 = vsel %vm1478_vm0, 1, %v17619_v16  ;;  %v1597_v2 = vshrl.u32 %v12202_v41, 16 }
 0x153   :  { %v1702_v46 = vand.u32 2139095040, %v17811_v45  ;;  %v1066_v8 = vadd.f32 0.008332121, %v1065_v26  ;;  %v1200_v48 = vor.u32 4788187, %v1199_v47  ;;  %v1341_v21 = vsub.s32 0, %v12195_v36 }
 0x154   :  { %vm1340_vm4 = vcmp.lt.s32.totalorder %v12195_v36, 0  ;;  %v1595_v9 = vshrl.u32 %v12181_v27, 16  ;;  %v1618_v53 = vand.u32 65535, %v12187_v3  ;;  %v12221_v17 = vmul.u32 %v1619_v61, %v1594_v20 }
 0x155   :  { %v1449_v1 = vshrl.u32 %v12105_v54, 16  ;;  %v1459_v24 = vadd.s32 %v1457_v50, %v1455_v10  ;;  %v1471_v43 = vshrl.u32 %v12127_v32, 16  ;;  %v1481_v60 = vadd.s32 %v1479_v12, %v1477_v57 }
 0x156   :  { %v1203_v44 = vcvt.s32.f32 %v1196_v14  ;;  %v1596_v26 = vand.u32 65535, %v12202_v41  ;;  %v12226_v47 = vmul.u32 %v1597_v2, %v1594_v20  ;;  %v1703_v6 = vshrl.u32 %v1702_v46, 23 }
 0x157   :  { %v1201_v63 = vand.u32 2147483647, %v1200_v48  ;;  %v1342_v49 = vsel %vm1340_vm4, %v1341_v21, %v12195_v36  ;;  %v1407_v3 = vshrl.u32 %v17623_v39, %v11936_v0  ;;  %v1428_v54 = vsel %vm1426_vm14, %v11994_v35, 2102212464 }
 0x158   :  { %v1620_v10 = vmul.u32 %v1618_v53, %v1594_v20  ;;  %v12234_v50 = vmul.u32 %v1618_v53, %v1595_v9  ;;  %v1624_v32 = vshll.u32 %v12221_v17, 16  ;;  %v10151_v14 = vadd.s32 4294967169, %v1703_v6 }
 0x159   :  { %v1451_v41 = vshrl.u32 %v12134_v59, 16  ;;  %v1460_v57 = vadd.s32 %v1459_v24, %v1449_v1  ;;  %v1473_v12 = vshrl.u32 %v12136_v7, 16  ;;  %v1482_v46 = vadd.s32 %v1481_v60, %v1471_v43 }
 0x15a   :  { %v1598_v48 = vmul.u32 %v1596_v26, %v1594_v20  ;;  %v12239_v21 = vmul.u32 %v1596_v26, %v1595_v9  ;;  %v1602_v0 = vshll.u32 %v12226_v47, 16  ;;  %v1709_v15 = vadd.s32 1, %v10151_v14 }
 0x15b   :  { %v1343_v51 = vclz %v1342_v49  ;;  %v1427_v35 = vsel %vm1423_vm7, %v1407_v3, %v12005_v5  ;;  %v1429_v6 = vsel %vm1425_vm10, %v11992_v37, %v1428_v54  ;;  %v17358_v59 = vand.u32 2147483647, %v17811_v45 }
 0x15c   :  { %v1626_v53 = vshll.u32 %v12234_v50, 16  ;;  %vm1628_vm14 = vc.u32 %v1620_v10, %v1624_v32  ;;  %v12250_v20 = vadd.s32 %v1624_v32, %v1620_v10  ;;  %vm1710_vm13 = vcmp.gt.s32.totalorder %v1709_v15, 0 }
 0x15d   :  { %v12252_v1 = vadd.s32 %v1460_v57, %v1451_v41  ;;  %v17812_v49 = vshll.u32 %v12136_v7, 16  ;;  %v1483_v5 = vadd.s32 %v1482_v46, %v1473_v12  ;;  %v1711_v43 = vsel %vm1710_vm13, %v1709_v15, 0 }
 0x15e   :  { %v1604_v60 = vshll.u32 %v12239_v21, 16  ;;  %v1608_v37 = vadd.s32 %v1602_v0, %v1598_v48  ;;  %v1623_v26 = vmul.u32 %v1619_v61, %v1595_v9  ;;  %v1713_v3 = vand.u32 31, %v1711_v43 }
 0x15f   :  { %v12257_v24 = vadd.s32 %v12171_v34, %v17812_v49  ;;  %v12261_v54 = vmul.f32 %v1059_v13, %v12124_v18  ;;  %v12264_v10 = vmul.f32 %v1066_v8, %v12124_v18  ;;  %vm1606_vm7 = vc.u32 %v1598_v48, %v1602_v0 }
 0x160   :  { %v1629_v32 = vsel %vm1628_vm14, 1, %v17619_v16  ;;  %v12267_v7 = vmul.f32 %v1203_v44, %v1201_v63  ;;  %v1430_v34 = vsel %vm1424_vm1, %v1427_v35, %v1429_v6  ;;  %vm1632_vm10 = vc.u32 %v12250_v20, %v1626_v53 }
 0x161   :  { %v12274_v15 = vsub.s32 32, %v1713_v3  ;;  %v10143_v61 = vadd.s32 4294967294, %v1343_v51  ;;  %vm1486_vm9 = vc.u32 %v12252_v1, %v12257_v24  ;;  %v1487_v13 = vadd.s32 1, %v1483_v5 }
 0x162   :  { %v1601_v8 = vmul.u32 %v1597_v2, %v1595_v9  ;;  %v1607_v14 = vsel %vm1606_vm7, 1, %v17619_v16  ;;  %vm12279_vm5 = vc.u32 %v1608_v37, %v1604_v60  ;;  %v1631_v28 = vadd.s32 %v1629_v32, %v1623_v26  ;;  %v17815_v32 = vld [vmem:[#allocation9_spill] sm:$0xff] }
 0x163   :  { %v1706_v44 = vand.u32 8388607, %v17358_v59  ;;  %v1633_v41 = vsel %vm1632_vm10, 1, %v17619_v16  ;;  %v1719_v57 = vshll.u32 %v17620_v22, %v1713_v3  ;;  %v1722_v51 = vshll.u32 %v17637_v25, %v1713_v3 }
 0x164   :  { %v1725_v12 = vshll.u32 %v17630_v19, %v1713_v3  ;;  %v1720_v2 = vshrl.u32 %v17637_v25, %v12274_v15  ;;  %v1723_v9 = vshrl.u32 %v17630_v19, %v12274_v15  ;;  %v1726_v46 = vshrl.u32 %v17631_v30, %v12274_v15 }
 0x165   :  { %v1728_v48 = vshll.u32 %v17631_v30, %v1713_v3  ;;  %vm10144_vm1 = vcmp.lt.s32.totalorder %v10143_v61, 0  ;;  %v1484_v0 = vmul.u32 %v12020_v23, %v1430_v34  ;;  %v1609_v35 = vadd.s32 %v1607_v14, %v1601_v8 }
 0x166   :  { %v12297_v6 = vshrl.u32 %v1711_v43, 5  ;;  %v1488_v49 = vsel %vm1486_vm9, %v1487_v13, %v1483_v5  ;;  %v1611_v60 = vsel %vm12279_vm5, 1, %v17619_v16  ;;  %v1625_v37 = vshrl.u32 %v12221_v17, 16 }
 0x167   :  { %v1729_v26 = vshrl.u32 %v17632_v40, %v12274_v15  ;;  %vm1085_vm0 = vcmp.lt.s32.totalorder %v17815_v32, 0  ;;  %v1635_v59 = vadd.s32 %v1633_v41, %v1631_v28  ;;  %v1707_v23 = vor.u32 8388608, %v1706_v44 }
 0x168   :  { %v1716_v43 = vshll.u32 %v17623_v39, %v1713_v3  ;;  %v1717_v34 = vshrl.u32 %v17620_v22, %v12274_v15  ;;  %v12312_v8 = vor.u32 %v1720_v2, %v1719_v57  ;;  %v12314_v5 = vor.u32 %v1723_v9, %v1722_v51 }
 0x169   :  { %v1727_v13 = vor.u32 %v1726_v46, %v1725_v12  ;;  %v1730_v14 = vor.u32 %v1729_v26, %v1728_v48  ;;  %v1603_v17 = vshrl.u32 %v12226_v47, 16  ;;  %v1613_v63 = vadd.s32 %v1611_v60, %v1609_v35 }
 0x16a   :  { %vm1731_vm4 = vcmp.lt.s32.totalorder %v12297_v6, 1  ;;  %vm1734_vm14 = vcmp.lt.s32.totalorder %v12297_v6, 4  ;;  %v12320_v28 = vsel %vm10144_vm1, 0, %v10143_v61  ;;  %v12322_v3 = vadd.s32 %v1488_v49, %v1484_v0  ;;  %v17819_v0 = vld [vmem:[#allocation38_spill] sm:$0xff] }
 0x16b   :  { %v1561_v44 = vshrl.u32 %v17623_v39, %v12060_v33  ;;  %v1627_v41 = vshrl.u32 %v12234_v50, 16  ;;  %v17816_v57 = vand.u32 2147483647, %v17815_v32  ;;  %v1636_v47 = vadd.s32 %v1635_v59, %v1625_v37 }
 0x16c   :  { %v12333_v12 = vor.u32 %v1717_v34, %v1716_v43  ;;  %vm1733_vm7 = vcmp.lt.s32.totalorder %v12297_v6, 3  ;;  %v12336_v61 = vshll.u32 %v1707_v23, 8  ;;  %vm1732_vm10 = vcmp.lt.s32.totalorder %v12297_v6, 2 }
 0x16d   :  { %vm12329_vm13 = vcmp.le.f32.partialorder %v17816_v57, 0.7853982  ;;  %v1740_v33 = vsel %vm1734_vm14, %v1727_v13, 920167782  ;;  %v1743_v2 = vsel %vm1731_vm4, %v12312_v8, %v12314_v5  ;;  %v1744_v9 = vsel %vm1734_vm14, %v1730_v14, 1326507024 }
 0x16e   :  { %v1582_v59 = vsel %vm1580_vm3, %v12143_v62, 2102212464  ;;  %v1605_v46 = vshrl.u32 %v12239_v21, 16  ;;  %v1614_v48 = vadd.s32 %v1613_v63, %v1603_v17  ;;  %v1856_v35 = vand.u32 2139095040, %v17819_v0 }
 0x16f   :  { %v1205_v49 = vxor.u32 2147483648, %v12267_v7  ;;  %v1351_v60 = vsub.s32 4294967266, %v12320_v28  ;;  %v1490_v37 = vadd.s32 536870912, %v12322_v3  ;;  %v1745_v26 = vsel %vm1733_vm7, %v1727_v13, %v1744_v9 }
 0x170   :  { %vm924_vm9 = vcmp.eq.s32.totalorder %v12081_v11, 2  ;;  %v1581_v62 = vsel %vm1577_vm12, %v1561_v44, %v12139_v31  ;;  %v1739_v21 = vsel %vm1731_vm4, %v12333_v12, %v12312_v8  ;;  %v1741_v23 = vsel %vm1733_vm7, %v12314_v5, %v1740_v33 }
 0x171   :  { %v1746_v43 = vsel %vm1732_vm10, %v1743_v2, %v1745_v26  ;;  %v1583_v34 = vsel %vm1579_vm11, %v12141_v56, %v1582_v59  ;;  %v1637_v13 = vadd.s32 %v1636_v47, %v1627_v41  ;;  %v1748_v14 = vand.u32 65535, %v12336_v61 }
 0x172   :  { %v1751_v31 = vshrl.u32 %v1746_v43, 16  ;;  %v1061_v17 = vadd.f32 -0.4999988, %v12261_v54  ;;  %v12375_v63 = vadd.s32 %v1614_v48, %v1605_v46  ;;  %v12380_v44 = vadd.s32 %v12250_v20, %v1626_v53 }
 0x173   :  { %v1857_v57 = vshrl.u32 %v1856_v35, 23  ;;  %v1068_v33 = vadd.f32 -0.16666654, %v12264_v10  ;;  %v1206_v56 = vsel %vm1085_vm0, %v1205_v49, %v12267_v7  ;;  %v1331_v41 = vadd.s32 %v11987_v58, %v11982_v38 }
 0x174   :  { %v1742_v54 = vsel %vm1732_vm10, %v1739_v21, %v1741_v23  ;;  %v1347_v47 = vsub.s32 32, %v12320_v28  ;;  %v1352_v2 = vadd.s32 127, %v1351_v60  ;;  %v12391_v50 = vshrl.u32 %v1490_v37, 30 }
 0x175   :  { %v1584_v53 = vsel %vm1578_vm8, %v1581_v62, %v1583_v34  ;;  %v1641_v20 = vadd.s32 1, %v1637_v13  ;;  %v1749_v10 = vshrl.u32 %v12336_v61, 16  ;;  %v1750_v9 = vand.u32 65535, %v1746_v43 }
 0x176   :  { %17820 = vst [vmem:[#allocation61_spill] sm:$0xff] %v12391_v50  ;;  %v12396_v59 = vmul.u32 %v1751_v31, %v1748_v14  ;;  %vm1640_vm3 = vc.u32 %v12375_v63, %v12380_v44  ;;  %v1772_v38 = vand.u32 65535, %v1742_v54  ;;  %v1773_v58 = vshrl.u32 %v1742_v54, 16 }
 0x177   :  { %v10154_v7 = vadd.s32 4294967169, %v1857_v57  ;;  %vm921_vm12 = vcmp.eq.s32.totalorder %v12081_v11, 0  ;;  %v1062_v46 = vmul.f32 %v1061_v17, %v12124_v18  ;;  %v1069_v48 = vmul.f32 %v1068_v33, %v12124_v18 }
 0x178   :  { %v12406_v52 = vsel %vm12329_vm13, %v17815_v32, %v1206_v56  ;;  %v1348_v35 = vshll.u32 %v12195_v36, %v12320_v28  ;;  %v1349_v49 = vshrl.u32 %v1331_v41, %v1347_v47  ;;  %v1353_v60 = vshll.u32 %v1352_v2, 23 }
 0x179   :  { %v1492_v37 = vshll.u32 %v12391_v50, 30  ;;  %v1638_v26 = vmul.u32 %v12181_v27, %v1584_v53  ;;  %v1642_v62 = vsel %vm1640_vm3, %v1641_v20, %v1637_v13  ;;  %v1752_v21 = vmul.u32 %v1750_v9, %v1748_v14 }
 0x17a   :  { %v12412_v23 = vmul.u32 %v1750_v9, %v1749_v10  ;;  %v1756_v18 = vshll.u32 %v12396_v59, 16  ;;  %v1774_v43 = vmul.u32 %v1772_v38, %v1748_v14  ;;  %v12415_v34 = vmul.u32 %v1773_v58, %v1748_v14 }
 0x17b   :  { %v12417_v17 = vmul.u32 %v1772_v38, %v1749_v10  ;;  %v1863_v57 = vadd.s32 1, %v10154_v7  ;;  %v17821_v36 = vxor.u32 2147483648, %v12075_v42  ;;  %v12426_v27 = vadd.f32 1.0, %v1062_v46 }
 0x17c   :  { %v1070_v13 = vadd.f32 1.0, %v1069_v48  ;;  %v12430_v33 = vmul.f32 %v12406_v52, %v12406_v52  ;;  %v1350_v56 = vor.u32 %v1349_v49, %v1348_v35  ;;  %v1354_v14 = vor.u32 4788187, %v1353_v60 }
 0x17d   :  { %v12424_v28 = vsel %vm924_vm9, %v17821_v36, %v12078_v4  ;;  %17822 = vst [vmem:[#allocation62_spill] sm:$0xff] %v12426_v27  ;;  %v12433_v41 = vsub.s32 %v12322_v3, %v1492_v37  ;;  %v1778_v54 = vshll.u32 %v12415_v34, 16  ;;  %v12436_v47 = vadd.s32 %v1642_v62, %v1638_v26 }
 0x17e   :  { %v1758_v2 = vshll.u32 %v12412_v23, 16  ;;  %vm1760_vm11 = vc.u32 %v1752_v21, %v1756_v18  ;;  %v1762_v53 = vadd.s32 %v1756_v18, %v1752_v21  ;;  %v17359_v20 = vshll.u32 %v12417_v17, 16 }
 0x17f   :  { %vm1782_vm8 = vc.u32 %v1774_v43, %v1778_v54  ;;  %v12440_v9 = vadd.s32 %v1778_v54, %v1774_v43  ;;  %vm1864_vm5 = vcmp.gt.s32.totalorder %v1863_v57, 0  ;;  %v12443_v38 = vmul.f32 %v1070_v13, %v12091_v55 }
 0x180   :  { %v1212_v3 = vmul.f32 -0.001358992, %v12430_v33  ;;  %v1755_v7 = vmul.u32 %v1751_v31, %v1749_v10  ;;  %v1865_v46 = vsel %vm1864_vm5, %v1863_v57, 0  ;;  %v1219_v48 = vmul.f32 -0.00019511016, %v12430_v33 }
 0x181   :  { %17823 = vst [vmem:[#allocation63_spill] sm:$0xff] %v12443_v38  ;;  %v1357_v35 = vcvt.s32.f32 %v1350_v56  ;;  %v1761_v49 = vsel %vm1760_vm11, 1, %v17619_v16  ;;  %v1777_v60 = vmul.u32 %v1773_v58, %v1749_v10  ;;  %v1355_v37 = vand.u32 2147483647, %v1354_v14 }
 0x182   :  { %vm1764_vm1 = vc.u32 %v1762_v53, %v1758_v2  ;;  %v1783_v26 = vsel %vm1782_vm8, 1, %v17619_v16  ;;  %v1867_v62 = vand.u32 31, %v1865_v46  ;;  %v17824_v21 = vxor.u32 2147483648, %v12078_v4 }
 0x183   :  { %v1495_v31 = vsub.s32 0, %v12433_v41  ;;  %v1644_v18 = vadd.s32 536870912, %v12436_v47  ;;  %vm1786_vm9 = vc.u32 %v12440_v9, %v17359_v20  ;;  %v12462_v10 = vand.u32 3, %v12208_v29 }
 0x184   :  { %v12454_v55 = vsel %vm921_vm12, %v12075_v42, %v17824_v21  ;;  %vm1494_vm3 = vcmp.lt.s32.totalorder %v12433_v41, 0  ;;  %v1763_v58 = vadd.s32 %v1761_v49, %v1755_v7  ;;  %v12465_v43 = vsub.s32 32, %v1867_v62 }
 0x185   :  { %v1765_v13 = vsel %vm1764_vm1, 1, %v17619_v16  ;;  %v1785_v56 = vadd.s32 %v1783_v26, %v1777_v60  ;;  %v12470_v14 = vadd.f32 0.041655596, %v1212_v3  ;;  %v1220_v54 = vadd.f32 0.008332121, %v1219_v48  ;;  %v17826_v48 = vld [vmem:[#allocation10_spill] sm:$0xff] }
 0x186   :  { %v12472_v2 = vmul.f32 %v1357_v35, %v1355_v37  ;;  %v1787_v53 = vsel %vm1786_vm9, 1, %v17619_v16  ;;  %v1496_v21 = vsel %vm1494_vm3, %v1495_v31, %v12433_v41  ;;  %v12476_v20 = vshrl.u32 %v1644_v18, 30 }
 0x187   :  { %v1757_v7 = vshrl.u32 %v12396_v59, 16  ;;  %v1767_v57 = vadd.s32 %v1765_v13, %v1763_v58  ;;  %v1779_v36 = vshrl.u32 %v12415_v34, 16  ;;  %v1879_v60 = vshll.u32 %v17630_v19, %v1867_v62 }
 0x188   :  { %17825 = vst [vmem:[#allocation64_spill] sm:$0xff] %v12476_v20  ;;  %v1880_v3 = vshrl.u32 %v17631_v30, %v12465_v43  ;;  %vm17374_vm12 = vcmp.lt.s32.totalorder %v17826_v48, 0  ;;  %v1789_v35 = vadd.s32 %v1787_v53, %v1785_v56  ;;  %v12485_v37 = vshrl.u32 %v1865_v46, 5 }
 0x189   :  { %v1882_v26 = vshll.u32 %v17631_v30, %v1867_v62  ;;  %v1883_v59 = vshrl.u32 %v17632_v40, %v12465_v43  ;;  %v1873_v31 = vshll.u32 %v17620_v22, %v1867_v62  ;;  %v1874_v34 = vshrl.u32 %v17637_v25, %v12465_v43 }
 0x18a   :  { %v1876_v18 = vshll.u32 %v17637_v25, %v1867_v62  ;;  %v1877_v58 = vshrl.u32 %v17630_v19, %v12465_v43  ;;  %vm1075_vm11 = vcmp.eq.s32.totalorder %v12462_v10, 0  ;;  %vm1078_vm8 = vcmp.eq.s32.totalorder %v12462_v10, 2  ;;  %v17828_v25 = vld [vmem:[#allocation53_spill] sm:$0xff] }
 0x18b   :  { %v1497_v46 = vclz %v1496_v21  ;;  %v1870_v13 = vshll.u32 %v17623_v39, %v1867_v62  ;;  %v1871_v56 = vshrl.u32 %v17620_v22, %v12465_v43  ;;  %v1884_v53 = vor.u32 %v1883_v59, %v1882_v26 }
 0x18c   :  { %v1646_v49 = vshll.u32 %v12476_v20, 30  ;;  %v1715_v42 = vshrl.u32 %v17623_v39, %v12274_v15  ;;  %v17827_v4 = vand.u32 2147483647, %v17819_v0  ;;  %v1881_v45 = vor.u32 %v1880_v3, %v1879_v60 }
 0x18d   :  { %v1736_v50 = vsel %vm1734_vm14, %v12314_v5, 2102212464  ;;  %v1781_v21 = vshrl.u32 %v12417_v17, 16  ;;  %v1790_v62 = vadd.s32 %v1789_v35, %v1779_v36  ;;  %vm1888_vm5 = vcmp.lt.s32.totalorder %v12485_v37, 4 }
 0x18e   :  { %v1860_v29 = vand.u32 8388607, %v17827_v4  ;;  %vm766_vm1 = vcmp.lt.s32.totalorder %v17828_v25, 2  ;;  %v1759_v26 = vshrl.u32 %v12412_v23, 16  ;;  %v1768_v59 = vadd.s32 %v1767_v57, %v1757_v7 }
 0x18f   :  { %v12513_v20 = vor.u32 %v1874_v34, %v1873_v31  ;;  %v12515_v15 = vor.u32 %v1877_v58, %v1876_v18  ;;  %vm920_vm9 = vcmp.lt.s32.totalorder %v12081_v11, 2  ;;  %vm1074_vm3 = vcmp.lt.s32.totalorder %v12462_v10, 2  ;;  %v17830_v34 = vld [vmem:[#allocation30_spill] sm:$0xff]  ;;  %v17832_v58 = vld [vmem:[#allocation8_spill] sm:$0xff] }
 0x190   :  { %v12519_v4 = vor.u32 %v1871_v56, %v1870_v13  ;;  %vm1885_vm14 = vcmp.lt.s32.totalorder %v12485_v37, 1  ;;  %vm1887_vm6 = vcmp.lt.s32.totalorder %v12485_v37, 3  ;;  %v1898_v5 = vsel %vm1888_vm5, %v1884_v53, 1326507024 }
 0x191   :  { %v1221_v23 = vmul.f32 %v1220_v54, %v12430_v33  ;;  %v1359_v57 = vxor.u32 2147483648, %v12472_v2  ;;  %v1861_v36 = vor.u32 8388608, %v1860_v29  ;;  %v1894_v7 = vsel %vm1888_vm5, %v1881_v45, 920167782 }
 0x192   :  { %v1735_v60 = vsel %vm1731_vm4, %v1715_v42, %v12333_v12  ;;  %v1737_v3 = vsel %vm1733_vm7, %v12312_v8, %v1736_v50  ;;  %v17829_v35 = vshll.u32 %v12417_v17, 16  ;;  %v1791_v54 = vadd.s32 %v1790_v62, %v1781_v21  ;;  %v17831_v12 = vld [vmem:[#allocation34_spill] sm:$0xff] }
 0x193   :  { %vm764_vm15 = vweird.f32 %v17830_v34  ;;  %v12541_v29 = vadd.s32 %v1768_v59, %v1759_v26  ;;  %vm1886_vm2 = vcmp.lt.s32.totalorder %v12485_v37, 2  ;;  %v1897_v42 = vsel %vm1885_vm14, %v12513_v20, %v12515_v15 }
 0x194   :  { %v12538_v31 = vadd.s32 %v12440_v9, %v17829_v35  ;;  %v1899_v8 = vsel %vm1887_vm6, %v1881_v45, %v1898_v5  ;;  %vm17475_vm4 = vweird.f32 %v17831_v12  ;;  %v10146_v50 = vadd.s32 4294967294, %v1497_v46  ;;  %v17838_v35 = vld [vmem:[#allocation54_spill] sm:$0xff] }
 0x195   :  { %v12552_v17 = vsub.s32 %v12436_v47, %v1646_v49  ;;  %v1893_v9 = vsel %vm1885_vm14, %v12519_v4, %v12513_v20  ;;  %v1895_v18 = vsel %vm1887_vm6, %v12515_v15, %v1894_v7  ;;  %v1207_v13 = vsub.s32 4, %v17832_v58 }
 0x196   :  { %v17833_v56 = vand.u32 2147483647, %v17826_v48  ;;  %v1360_v47 = vsel %vm17374_vm12, %v1359_v57, %v12472_v2  ;;  %v12571_v49 = vshll.u32 %v1861_v36, 8  ;;  %v1214_v46 = vmul.f32 %v12470_v14, %v12430_v33 }
 0x197   :  { %v1738_v53 = vsel %vm1732_vm10, %v1735_v60, %v1737_v3  ;;  %v1795_v21 = vadd.s32 1, %v1791_v54  ;;  %v12579_v62 = vsel %vm1886_vm2, %v1897_v42, %v1899_v8  ;;  %v17836_v26 = vxor.u32 2147483648, %v12443_v38  ;;  %v17839_v42 = vld [vmem:[#allocation56_spill] sm:$0xff] }
 0x198   :  { %vm12564_vm7 = vcmp.le.f32.partialorder %v17833_v56, 0.7853982  ;;  %v17837_v2 = vxor.u32 2147483648, %v12426_v27  ;;  %vm1794_vm10 = vc.u32 %v12541_v29, %v12538_v31  ;;  %v12595_v6 = vsel %vm1886_vm2, %v1893_v9, %v1895_v18 }
 0x199   :  { %v1077_v59 = vsel %vm1075_vm11, %v12426_v27, %v17836_v26  ;;  %v1222_v5 = vadd.f32 -0.16666654, %v1221_v23  ;;  %v12600_v57 = vsel %vm12564_vm7, %v17826_v48, %v1360_v47  ;;  %vm10147_vm11 = vcmp.lt.s32.totalorder %v10146_v50, 0  ;;  %v17840_v47 = vld [vmem:[#allocation25_spill] sm:$0xff] }
 0x19a   :  { %v1080_v14 = vsel %vm1078_vm8, %v17837_v2, %v12443_v38  ;;  %v1649_v36 = vsub.s32 0, %v12552_v17  ;;  %vm1648_vm12 = vcmp.lt.s32.totalorder %v12552_v17, 0  ;;  %v1792_v7 = vmul.u32 %v12336_v61, %v1738_v53 }
 0x19b   :  { %v1902_v60 = vand.u32 65535, %v12571_v49  ;;  %v1905_v3 = vshrl.u32 %v12579_v62, 16  ;;  %v773_v23 = vsel %vm766_vm1, %v17839_v42, %v17838_v35  ;;  %v1215_v8 = vadd.f32 -0.4999988, %v1214_v46 }
 0x19c   :  { %v1796_v9 = vsel %vm1794_vm10, %v1795_v21, %v1791_v54  ;;  %v1927_v18 = vshrl.u32 %v12595_v6, 16  ;;  %v927_v56 = vsel %vm920_vm9, %v12454_v55, %v12424_v28  ;;  %vm17427_vm8 = vweird.f32 %v17840_v47 }
 0x19d   :  { %v1081_v61 = vsel %vm1074_vm3, %v1077_v59, %v1080_v14  ;;  %v1208_v53 = vsel %vm1085_vm0, %v1207_v13, %v17832_v58  ;;  %v1223_v25 = vmul.f32 %v1222_v5, %v12430_v33  ;;  %v12625_v54 = vmul.f32 %v12600_v57, %v12600_v57  ;;  %v17844_v14 = vld [vmem:[#allocation39_spill] sm:$0xff] }
 0x19e   :  { %v1500_v46 = vsel %vm10147_vm11, 0, %v10146_v50  ;;  %v1650_v11 = vsel %vm1648_vm12, %v1649_v36, %v12552_v17  ;;  %v12629_v28 = vadd.s32 %v1796_v9, %v1792_v7  ;;  %v1903_v55 = vshrl.u32 %v12571_v49, 16 }
 0x19f   :  { %v1904_v10 = vand.u32 65535, %v12579_v62  ;;  %v12633_v21 = vmul.u32 %v1905_v3, %v1902_v60  ;;  %v12637_v58 = vsel %vm764_vm15, nan, %v773_v23  ;;  %v1216_v13 = vmul.f32 %v1215_v8, %v12430_v33 }
 0x1a0   :  { %17841 = vst [vmem:[#allocation53_spill] sm:$0xff] %v12637_v58  ;;  %v1926_v26 = vand.u32 65535, %v12595_v6  ;;  %v12641_v59 = vmul.u32 %v1927_v18, %v1902_v60  ;;  %v12645_v50 = vsel %vm17475_vm4, nan, %v927_v56  ;;  %v12649_v2 = vsel %vm12329_vm13, 0, %v1208_v53 }
 0x1a1   :  { %17842 = vst [vmem:[#allocation8_spill] sm:$0xff] %v12645_v50  ;;  %v1505_v62 = vsub.s32 4294967266, %v1500_v46  ;;  %v2010_v5 = vand.u32 2139095040, %v17844_v14  ;;  %v12654_v36 = vsel %vm17427_vm8, nan, %v1081_v61  ;;  %v1224_v33 = vadd.f32 1.0, %v1223_v25 }
 0x1a2   :  { %17843 = vst [vmem:[#allocation54_spill] sm:$0xff] %v12649_v2  ;;  %v1373_v6 = vmul.f32 -0.00019511016, %v12625_v54  ;;  %v1651_v7 = vclz %v1650_v11  ;;  %v1798_v35 = vadd.s32 536870912, %v12629_v28  ;;  %v1906_v42 = vmul.u32 %v1904_v10, %v1902_v60 }
 0x1a3   :  { %17845 = vst [vmem:[#allocation56_spill] sm:$0xff] %v12654_v36  ;;  %v12658_v23 = vmul.u32 %v1904_v10, %v1903_v55  ;;  %v1910_v51 = vshll.u32 %v12633_v21, 16  ;;  %v12661_v8 = vadd.f32 1.0, %v1216_v13  ;;  %v1928_v9 = vmul.u32 %v1926_v26, %v1902_v60 }
 0x1a4   :  { %v12663_v56 = vmul.u32 %v1926_v26, %v1903_v55  ;;  %v1932_v53 = vshll.u32 %v12641_v59, 16  ;;  %v1485_v61 = vadd.s32 %v12257_v24, %v12252_v1  ;;  %v1501_v25 = vsub.s32 32, %v1500_v46 }
 0x1a5   :  { %17846 = vst [vmem:[#allocation65_spill] sm:$0xff] %v12661_v8  ;;  %v1506_v47 = vadd.s32 127, %v1505_v62  ;;  %v2011_v11 = vshrl.u32 %v2010_v5, 23  ;;  %v12669_v27 = vmul.f32 %v1224_v33, %v12406_v52  ;;  %v1366_v10 = vmul.f32 -0.001358992, %v12625_v54 }
 0x1a6   :  { %v1374_v38 = vadd.f32 0.008332121, %v1373_v6  ;;  %v10149_v12 = vadd.s32 4294967294, %v1651_v7  ;;  %v12672_v13 = vshrl.u32 %v1798_v35, 30  ;;  %v1912_v60 = vshll.u32 %v12658_v23, 16 }
 0x1a7   :  { %17847 = vst [vmem:[#allocation66_spill] sm:$0xff] %v12669_v27  ;;  %vm1914_vm0 = vc.u32 %v1906_v42, %v1910_v51  ;;  %v10157_v26 = vadd.s32 4294967169, %v2011_v11  ;;  %v1916_v34 = vadd.s32 %v1910_v51, %v1906_v42  ;;  %v17382_v36 = vshll.u32 %v12663_v56, 16 }
 0x1a8   :  { %vm1936_vm13 = vc.u32 %v1928_v9, %v1932_v53  ;;  %v12676_v1 = vadd.s32 %v1932_v53, %v1928_v9  ;;  %v1502_v24 = vshll.u32 %v12433_v41, %v1500_v46  ;;  %v1503_v52 = vshrl.u32 %v1485_v61, %v1501_v25 }
 0x1a9   :  { %v1507_v62 = vshll.u32 %v1506_v47, 23  ;;  %v2017_v5 = vadd.s32 1, %v10157_v26  ;;  %v1367_v33 = vadd.f32 0.041655596, %v1366_v10  ;;  %vm10150_vm12 = vcmp.lt.s32.totalorder %v10149_v12, 0 }
 0x1aa   :  { %v1909_v6 = vmul.u32 %v1905_v3, %v1903_v55  ;;  %v1931_v7 = vmul.u32 %v1927_v18, %v1903_v55  ;;  %v1800_v35 = vshll.u32 %v12672_v13, 30  ;;  %v1915_v50 = vsel %vm1914_vm0, 1, %v17619_v16  ;;  %v17848_v55 = vld [vmem:[#allocation59_spill] sm:$0xff] }
 0x1ab   :  { %v1937_v42 = vsel %vm1936_vm13, 1, %v17619_v16  ;;  %vm2018_vm1 = vcmp.gt.s32.totalorder %v2017_v5, 0  ;;  %v1375_v51 = vmul.f32 %v1374_v38, %v12625_v54  ;;  %vm1918_vm9 = vc.u32 %v1916_v34, %v1912_v60 }
 0x1ac   :  { %vm1940_vm3 = vc.u32 %v12676_v1, %v17382_v36  ;;  %v2019_v41 = vsel %vm2018_vm1, %v2017_v5, 0  ;;  %v12687_v47 = vand.u32 3, %v12649_v2  ;;  %v1504_v3 = vor.u32 %v1503_v52, %v1502_v24 }
 0x1ad   :  { %v1508_v18 = vor.u32 4788187, %v1507_v62  ;;  %v2021_v46 = vand.u32 31, %v2019_v41  ;;  %v12691_v53 = vsel %vm10150_vm12, 0, %v10149_v12  ;;  %v1917_v61 = vadd.s32 %v1915_v50, %v1909_v6 }
 0x1ae   :  { %v1939_v25 = vadd.s32 %v1937_v42, %v1931_v7  ;;  %v12695_v34 = vsub.s32 %v12629_v28, %v1800_v35  ;;  %v1919_v11 = vsel %vm1918_vm9, 1, %v17619_v16  ;;  %v1941_v10 = vsel %vm1940_vm3, 1, %v17619_v16 }
 0x1af   :  { %v12701_v26 = vmul.f32 %v1367_v33, %v12625_v54  ;;  %v12703_v24 = vadd.f32 -0.16666654, %v1375_v51  ;;  %v12705_v12 = vsub.s32 32, %v2021_v46  ;;  %v1509_v50 = vand.u32 2147483647, %v1508_v18 }
 0x1b0   :  { %v1511_v52 = vcvt.s32.f32 %v1504_v3  ;;  %v1639_v62 = vadd.s32 %v12380_v44, %v12375_v63  ;;  %v1659_v28 = vsub.s32 4294967266, %v12691_v53  ;;  %v1911_v5 = vshrl.u32 %v12633_v21, 16 }
 0x1b1   :  { %v1921_v6 = vadd.s32 %v1919_v11, %v1917_v61  ;;  %v1933_v7 = vshrl.u32 %v12641_v59, 16  ;;  %v1943_v35 = vadd.s32 %v1941_v10, %v1939_v25  ;;  %vm1802_vm10 = vcmp.lt.s32.totalorder %v12695_v34, 0 }
 0x1b2   :  { %v1869_v33 = vshrl.u32 %v17623_v39, %v12465_v43  ;;  %v1890_v42 = vsel %vm1888_vm5, %v12515_v15, 2102212464  ;;  %v1803_v63 = vsub.s32 0, %v12695_v34  ;;  %v1913_v44 = vshrl.u32 %v12658_v23, 16 }
 0x1b3   :  { %v2033_v21 = vshll.u32 %v17630_v19, %v2021_v46  ;;  %v2034_v59 = vshrl.u32 %v17631_v30, %v12705_v12  ;;  %v1935_v3 = vshrl.u32 %v12663_v56, 16  ;;  %v12725_v18 = vshrl.u32 %v2019_v41, 5 }
 0x1b4   :  { %v2036_v43 = vshll.u32 %v17631_v30, %v2021_v46  ;;  %v2037_v15 = vshrl.u32 %v17632_v40, %v12705_v12  ;;  %v1922_v61 = vadd.s32 %v1921_v6, %v1911_v5  ;;  %v1944_v25 = vadd.s32 %v1943_v35, %v1933_v7  ;;  %v17850_v35 = vld [vmem:[#allocation35_spill] sm:$0xff] }
 0x1b5   :  { %v2024_v11 = vshll.u32 %v17623_v39, %v2021_v46  ;;  %v2027_v23 = vshll.u32 %v17620_v22, %v2021_v46  ;;  %v2025_v10 = vshrl.u32 %v17620_v22, %v12705_v12  ;;  %v17849_v60 = vmov 2131351028  }
 0x1b6   :  { %v2028_v38 = vshrl.u32 %v17849_v60, %v12705_v12  ;;  %v2030_v41 = vshll.u32 %v17849_v60, %v2021_v46  ;;  %v2031_v9 = vshrl.u32 %v17630_v19, %v12705_v12  ;;  %vm1232_vm5 = vcmp.eq.s32.totalorder %v12687_v47, 2 }
 0x1b7   :  { %v1512_v36 = vmul.f32 %v1511_v52, %v1509_v50  ;;  %v1655_v5 = vsub.s32 32, %v12691_v53  ;;  %v1660_v6 = vadd.s32 127, %v1659_v28  ;;  %v2035_v7 = vor.u32 %v2034_v59, %v2033_v21 }
 0x1b8   :  { %vm1229_vm11 = vcmp.eq.s32.totalorder %v12687_v47, 0  ;;  %vm1393_vm0 = vcmp.lt.s32.totalorder %v17850_v35, 0  ;;  %v1889_v51 = vsel %vm1885_vm14, %v1869_v33, %v12519_v4  ;;  %v17851_v46 = vand.u32 2147483647, %v17844_v14 }
 0x1b9   :  { %v2038_v58 = vor.u32 %v2037_v15, %v2036_v43  ;;  %vm2042_vm13 = vcmp.lt.s32.totalorder %v12725_v18, 4  ;;  %v1804_v50 = vsel %vm1802_vm10, %v1803_v63, %v12695_v34  ;;  %v1891_v52 = vsel %vm1887_vm6, %v12513_v20, %v1890_v42 }
 0x1ba   :  { %v2014_v2 = vand.u32 8388607, %v17851_v46  ;;  %v17852_v28 = vshll.u32 %v12663_v56, 16  ;;  %v1945_v4 = vadd.s32 %v1944_v25, %v1935_v3  ;;  %v12760_v33 = vadd.s32 %v1922_v61, %v1913_v44  ;;  %v17853_v56 = vld [vmem:[#allocation33_spill] sm:$0xff] }
 0x1bb   :  { %v12762_v59 = vor.u32 %v2025_v10, %v2024_v11  ;;  %v12764_v43 = vor.u32 %v2028_v38, %v2027_v23  ;;  %v12766_v15 = vor.u32 %v2031_v9, %v2030_v41  ;;  %vm1228_vm14 = vcmp.lt.s32.totalorder %v12687_v47, 2 }
 0x1bc   :  { %v12758_v21 = vadd.s32 %v12676_v1, %v17852_v28  ;;  %vm2039_vm12 = vcmp.lt.s32.totalorder %v12725_v18, 1  ;;  %vm2041_vm6 = vcmp.lt.s32.totalorder %v12725_v18, 3  ;;  %v2048_v20 = vsel %vm2042_vm13, %v2035_v7, 920167782 }
 0x1bd   :  { %v2164_v1 = vand.u32 2139095040, %v17853_v56  ;;  %v1656_v42 = vshll.u32 %v12552_v17, %v12691_v53  ;;  %v1805_v63 = vclz %v1804_v50  ;;  %v2015_v44 = vor.u32 8388608, %v2014_v2 }
 0x1be   :  { %v2052_v9 = vsel %vm2042_vm13, %v2038_v58, 1326507024  ;;  %v1657_v38 = vshrl.u32 %v1639_v62, %v1655_v5  ;;  %v1661_v3 = vshll.u32 %v1660_v6, 23  ;;  %v1892_v61 = vsel %vm1886_vm2, %v1889_v51, %v1891_v52 }
 0x1bf   :  { %v1949_v25 = vadd.s32 1, %v1945_v4  ;;  %vm1948_vm1 = vc.u32 %v12760_v33, %v12758_v21  ;;  %vm2040_vm9 = vcmp.lt.s32.totalorder %v12725_v18, 2  ;;  %v2047_v17 = vsel %vm2039_vm12, %v12762_v59, %v12764_v43 }
 0x1c0   :  { %v2049_v58 = vsel %vm2041_vm6, %v12766_v15, %v2048_v20  ;;  %v1513_v2 = vxor.u32 2147483648, %v1512_v36  ;;  %v2051_v37 = vsel %vm2039_vm12, %v12764_v43, %v12766_v15  ;;  %v2053_v53 = vsel %vm2041_vm6, %v2035_v7, %v2052_v9 }
 0x1c1   :  { %v2165_v62 = vshrl.u32 %v2164_v1, 23  ;;  %v17854_v51 = vand.u32 2147483647, %v17850_v35  ;;  %v10152_v23 = vadd.s32 4294967294, %v1805_v63  ;;  %v1946_v10 = vmul.u32 %v12571_v49, %v1892_v61 }
 0x1c2   :  { %v12803_v41 = vshll.u32 %v2015_v44, 8  ;;  %v17857_v5 = vsub.s32 4, %v17848_v55  ;;  %vm17858_vm3 = vcmp.lt.s32.totalorder %v17826_v48, 0  ;;  %v1369_v7 = vadd.f32 -0.4999988, %v12701_v26 }
 0x1c3   :  { %vm12798_vm2 = vcmp.le.f32.partialorder %v17854_v51, 0.7853982  ;;  %v1950_v46 = vsel %vm1948_vm1, %v1949_v25, %v1945_v4  ;;  %v12813_v50 = vsel %vm2040_vm9, %v2047_v17, %v2049_v58  ;;  %v17859_v52 = vxor.u32 2147483648, %v12661_v8 }
 0x1c4   :  { %v1362_v6 = vsel %vm17858_vm3, %v17857_v5, %v17848_v55  ;;  %v1658_v28 = vor.u32 %v1657_v38, %v1656_v42  ;;  %v1662_v20 = vor.u32 4788187, %v1661_v3  ;;  %v12822_v1 = vsel %vm2040_vm9, %v2051_v37, %v2053_v53 }
 0x1c5   :  { %v1234_v49 = vsel %vm1232_vm5, %v17859_v52, %v12669_v27  ;;  %v17860_v55 = vxor.u32 2147483648, %v12669_v27  ;;  %v1377_v4 = vmul.f32 %v12703_v24, %v12625_v54  ;;  %v1514_v63 = vsel %vm1393_vm0, %v1513_v2, %v1512_v36 }
 0x1c6   :  { %v10160_v44 = vadd.s32 4294967169, %v2165_v62  ;;  %vm10153_vm10 = vcmp.lt.s32.totalorder %v10152_v23, 0  ;;  %v12833_v42 = vadd.s32 %v1950_v46, %v1946_v10  ;;  %v2056_v9 = vand.u32 65535, %v12803_v41  ;;  %v17864_v46 = vld [vmem:[#allocation36_spill] sm:$0xff] }
 0x1c7   :  { %v1231_v26 = vsel %vm1229_vm11, %v12661_v8, %v17860_v55  ;;  %v2081_v38 = vshrl.u32 %v12813_v50, 16  ;;  %vm17389_vm5 = vweird.f32 %v17815_v32  ;;  %v12840_v3 = vsel %vm12564_vm7, 0, %v1362_v6 }
 0x1c8   :  { %17861 = vst [vmem:[#allocation59_spill] sm:$0xff] %v12840_v3  ;;  %v1370_v61 = vmul.f32 %v1369_v7, %v12625_v54  ;;  %v2059_v24 = vshrl.u32 %v12822_v1, 16  ;;  %v1235_v36 = vsel %vm1228_vm14, %v1231_v26, %v1234_v49  ;;  %v12847_v25 = vand.u32 3, %v12840_v3 }
 0x1c9   :  { %v1663_v17 = vand.u32 2147483647, %v1662_v20  ;;  %v1665_v58 = vcvt.s32.f32 %v1658_v28  ;;  %v1378_v2 = vadd.f32 1.0, %v1377_v4  ;;  %v12852_v37 = vsel %vm12798_vm2, %v17850_v35, %v1514_v63  ;;  %v17869_v20 = vld [vmem:[#allocation61_spill] sm:$0xff] }
 0x1ca   :  { %v12854_v45 = vsel %vm10153_vm10, 0, %v10152_v23  ;;  %v2171_v53 = vadd.s32 1, %v10160_v44  ;;  %v1952_v54 = vadd.s32 536870912, %v12833_v42  ;;  %v2057_v62 = vshrl.u32 %v12803_v41, 16 }
 0x1cb   :  { %v2080_v47 = vand.u32 65535, %v12813_v50  ;;  %v12859_v51 = vmul.u32 %v2081_v38, %v2056_v9  ;;  %v12863_v10 = vsel %vm17389_vm5, nan, %v1235_v36  ;;  %v12865_v5 = vadd.f32 1.0, %v1370_v61 }
 0x1cc   :  { %17862 = vst [vmem:[#allocation67_spill] sm:$0xff] %v12863_v10  ;;  %v2058_v6 = vand.u32 65535, %v12822_v1  ;;  %v12868_v7 = vmul.u32 %v2059_v24, %v2056_v9  ;;  %vm1386_vm7 = vcmp.eq.s32.totalorder %v12847_v25, 2  ;;  %v12873_v23 = vmul.f32 %v12852_v37, %v12852_v37 }
 0x1cd   :  { %17863 = vst [vmem:[#allocation68_spill] sm:$0xff] %v12865_v5  ;;  %v17865_v50 = vand.u32 2147483647, %v17864_v46  ;;  %vm1547_vm14 = vcmp.lt.s32.totalorder %v17864_v46, 0  ;;  %v1666_v49 = vmul.f32 %v1665_v58, %v1663_v17  ;;  %v12883_v28 = vmul.f32 %v1378_v2, %v12600_v57 }
 0x1ce   :  { %vm1383_vm1 = vcmp.eq.s32.totalorder %v12847_v25, 0  ;;  %v1813_v55 = vsub.s32 4294967266, %v12854_v45  ;;  %vm2172_vm3 = vcmp.gt.s32.totalorder %v2171_v53, 0  ;;  %v12888_v26 = vshrl.u32 %v1952_v54, 30 }
 0x1cf   :  { %vm12877_vm11 = vcmp.le.f32.partialorder %v17865_v50, 0.7853982  ;;  %17868 = vst [vmem:[#allocation69_spill] sm:$0xff] %v12883_v28  ;;  %v2082_v4 = vmul.u32 %v2080_v47, %v2056_v9  ;;  %v12890_v63 = vmul.u32 %v2080_v47, %v2057_v62  ;;  %v2086_v44 = vshll.u32 %v12859_v51, 16 }
 0x1d0   :  { %17870 = vst [vmem:[#allocation61_spill] sm:$0xff] %v12888_v26  ;;  %v2060_v36 = vmul.u32 %v2058_v6, %v2056_v9  ;;  %v12894_v17 = vmul.u32 %v2058_v6, %v2057_v62  ;;  %v2064_v57 = vshll.u32 %v12868_v7, 16  ;;  %v1520_v58 = vmul.f32 -0.001358992, %v12873_v23 }
 0x1d1   :  { %v1527_v2 = vmul.f32 -0.00019511016, %v12873_v23  ;;  %v1667_v50 = vxor.u32 2147483648, %v1666_v49  ;;  %v2173_v1 = vsel %vm2172_vm3, %v2171_v53, 0  ;;  %v1793_v47 = vadd.s32 %v12538_v31, %v12541_v29 }
 0x1d2   :  { %v1809_v32 = vsub.s32 32, %v12854_v45  ;;  %v1814_v8 = vadd.s32 127, %v1813_v55  ;;  %v1954_v9 = vshll.u32 %v12888_v26, 30  ;;  %vm2090_vm10 = vc.u32 %v2082_v4, %v2086_v44 }
 0x1d3   :  { %v12905_v61 = vadd.s32 %v2086_v44, %v2082_v4  ;;  %v2066_v27 = vshll.u32 %v12894_v17, 16  ;;  %vm2068_vm5 = vc.u32 %v2060_v36, %v2064_v57  ;;  %v2070_v10 = vadd.s32 %v2064_v57, %v2060_v36 }
 0x1d4   :  { %v2175_v53 = vand.u32 31, %v2173_v1  ;;  %v1521_v3 = vadd.f32 0.041655596, %v1520_v58  ;;  %v1528_v54 = vadd.f32 0.008332121, %v1527_v2  ;;  %v1668_v31 = vsel %vm1547_vm14, %v1667_v50, %v1666_v49 }
 0x1d5   :  { %v2085_v29 = vmul.u32 %v2081_v38, %v2057_v62  ;;  %v1810_v55 = vshll.u32 %v12695_v34, %v12854_v45  ;;  %v1811_v14 = vshrl.u32 %v1793_v47, %v1809_v32  ;;  %v2063_v26 = vmul.u32 %v2059_v24, %v2057_v62 }
 0x1d6   :  { %v2091_v6 = vsel %vm2090_vm10, 1, %v17619_v16  ;;  %v1815_v4 = vshll.u32 %v1814_v8, 23  ;;  %v12914_v44 = vsub.s32 %v12833_v42, %v1954_v9  ;;  %v2069_v36 = vsel %vm2068_vm5, 1, %v17619_v16 }
 0x1d7   :  { %v17871_v57 = vshll.u32 %v12890_v63, 16  ;;  %v17872_v38 = vxor.u32 2147483648, %v12865_v5  ;;  %v12930_v32 = vsel %vm12877_vm11, %v17864_v46, %v1668_v31  ;;  %vm2072_vm10 = vc.u32 %v2070_v10, %v2066_v27 }
 0x1d8   :  { %v12932_v8 = vsub.s32 32, %v2175_v53  ;;  %v17873_v42 = vxor.u32 2147483648, %v12883_v28  ;;  %v12942_v45 = vmul.f32 %v1521_v3, %v12873_v23  ;;  %v1529_v62 = vmul.f32 %v1528_v54, %v12873_v23 }
 0x1d9   :  { %vm2094_vm3 = vc.u32 %v12905_v61, %v17871_v57  ;;  %v12925_v34 = vsel %vm1386_vm7, %v17872_v38, %v12883_v28  ;;  %v2093_v49 = vadd.s32 %v2091_v6, %v2085_v29  ;;  %v1812_v58 = vor.u32 %v1811_v14, %v1810_v55 }
 0x1da   :  { %v12939_v24 = vsel %vm1383_vm1, %v12865_v5, %v17873_v42  ;;  %v2071_v2 = vadd.s32 %v2069_v36, %v2063_v26  ;;  %v2095_v50 = vsel %vm2094_vm3, 1, %v17619_v16  ;;  %v17394_v27 = vand.u32 2147483647, %v17853_v56 }
 0x1db   :  { %v12949_v10 = vmul.f32 %v12930_v32, %v12930_v32  ;;  %v1816_v47 = vor.u32 4788187, %v1815_v4  ;;  %vm1956_vm5 = vcmp.lt.s32.totalorder %v12914_v44, 0  ;;  %v2073_v9 = vsel %vm2072_vm10, 1, %v17619_v16 }
 0x1dc   :  { %v1957_v3 = vsub.s32 0, %v12914_v44  ;;  %v2087_v54 = vshrl.u32 %v12859_v51, 16  ;;  %v2190_v14 = vshll.u32 %v17631_v30, %v2175_v53  ;;  %v2191_v26 = vshrl.u32 %v17632_v40, %v12932_v8 }
 0x1dd   :  { %v2097_v6 = vadd.s32 %v2095_v50, %v2093_v49  ;;  %v12958_v31 = vshrl.u32 %v2173_v1, 5  ;;  %v2187_v29 = vshll.u32 %v17630_v19, %v2175_v53  ;;  %v2188_v55 = vshrl.u32 %v17631_v30, %v12932_v8 }
 0x1de   :  { %v1819_v4 = vcvt.s32.f32 %v1812_v58  ;;  %v2065_v36 = vshrl.u32 %v12868_v7, 16  ;;  %v2075_v57 = vadd.s32 %v2073_v9, %v2071_v2  ;;  %v2168_v51 = vand.u32 8388607, %v17394_v27 }
 0x1df   :  { %vm1382_vm7 = vcmp.lt.s32.totalorder %v12847_v25, 2  ;;  %v2181_v38 = vshll.u32 %v17620_v22, %v2175_v53  ;;  %v2182_v1 = vshrl.u32 %v17849_v60, %v12932_v8  ;;  %v2184_v42 = vshll.u32 %v17849_v60, %v2175_v53  ;;  %v17876_v25 = vld [vmem:[#allocation37_spill] sm:$0xff] }
 0x1e0   :  { %v2185_v49 = vshrl.u32 %v17630_v19, %v12932_v8  ;;  %v1958_v7 = vsel %vm1956_vm5, %v1957_v3, %v12914_v44  ;;  %v2178_v58 = vshll.u32 %v17623_v39, %v2175_v53  ;;  %v2179_v2 = vshrl.u32 %v17620_v22, %v12932_v8 }
 0x1e1   :  { %v2192_v50 = vor.u32 %v2191_v26, %v2190_v14  ;;  %v2089_v9 = vshrl.u32 %v12890_v63, 16  ;;  %v2098_v27 = vadd.s32 %v2097_v6, %v2087_v54  ;;  %v2189_v5 = vor.u32 %v2188_v55, %v2187_v29 }
 0x1e2   :  { %vm2196_vm1 = vcmp.lt.s32.totalorder %v12958_v31, 4  ;;  %v1817_v28 = vand.u32 2147483647, %v1816_v47  ;;  %v2023_v56 = vshrl.u32 %v17623_v39, %v12705_v12  ;;  %v2067_v0 = vshrl.u32 %v12894_v17, 16 }
 0x1e3   :  { %v2076_v60 = vadd.s32 %v2075_v57, %v2065_v36  ;;  %vm17402_vm3 = vweird.f32 %v17826_v48  ;;  %v1959_v53 = vclz %v1958_v7  ;;  %v2044_v3 = vsel %vm2042_vm13, %v12766_v15, 2102212464 }
 0x1e4   :  { %v12988_v14 = vor.u32 %v2182_v1, %v2181_v38  ;;  %v12990_v54 = vor.u32 %v2185_v49, %v2184_v42  ;;  %v12992_v26 = vor.u32 %v2179_v2, %v2178_v58  ;;  %vm2193_vm10 = vcmp.lt.s32.totalorder %v12958_v31, 1 }
 0x1e5   :  { %vm2195_vm5 = vcmp.lt.s32.totalorder %v12958_v31, 3  ;;  %v2206_v12 = vsel %vm2196_vm1, %v2192_v50, 1326507024  ;;  %v1530_v17 = vadd.f32 -0.16666654, %v1529_v62  ;;  %v2099_v47 = vadd.s32 %v2098_v27, %v2089_v9  ;;  %v17877_v50 = vld [vmem:[#allocation11_spill] sm:$0xff] }
 0x1e6   :  { %v2169_v6 = vor.u32 8388608, %v2168_v51  ;;  %v2202_v29 = vsel %vm2196_vm1, %v2189_v5, 920167782  ;;  %v2043_v15 = vsel %vm2039_vm12, %v2023_v56, %v12762_v59  ;;  %v2045_v55 = vsel %vm2041_vm6, %v12764_v43, %v2044_v3 }
 0x1e7   :  { %v13006_v36 = vadd.s32 %v2076_v60, %v2067_v0  ;;  %v17874_v57 = vshll.u32 %v12890_v63, 16  ;;  %v1681_v62 = vmul.f32 -0.00019511016, %v12949_v10  ;;  %vm2194_vm13 = vcmp.lt.s32.totalorder %v12958_v31, 2 }
 0x1e8   :  { %v2205_v59 = vsel %vm2193_vm10, %v12988_v14, %v12990_v54  ;;  %v2207_v56 = vsel %vm2195_vm5, %v2189_v5, %v2206_v12  ;;  %v1820_v43 = vmul.f32 %v1819_v4, %v1817_v28  ;;  %v10155_v0 = vadd.s32 4294967294, %v1959_v53 }
 0x1e9   :  { %v13011_v38 = vadd.s32 %v12905_v61, %v17874_v57  ;;  %v2201_v60 = vsel %vm2193_vm10, %v12992_v26, %v12988_v14  ;;  %v2203_v63 = vsel %vm2195_vm5, %v12990_v54, %v2202_v29  ;;  %v17875_v61 = vsub.s32 4, %v17869_v20 }
 0x1ea   :  { %v2046_v5 = vsel %vm2040_vm9, %v2043_v15, %v2045_v55  ;;  %v2103_v28 = vadd.s32 1, %v2099_v47  ;;  %v13035_v4 = vshll.u32 %v2169_v6, 8  ;;  %v1389_v51 = vsel %vm1382_vm7, %v12939_v24, %v12925_v34 }
 0x1eb   :  { %v1516_v27 = vsel %vm1393_vm0, %v17875_v61, %v17869_v20  ;;  %v1523_v1 = vadd.f32 -0.4999988, %v12942_v45  ;;  %vm2102_vm12 = vc.u32 %v13006_v36, %v13011_v38  ;;  %v13046_v42 = vsel %vm2194_vm13, %v2205_v59, %v2207_v56  ;;  %v17884_v61 = vld [vmem:[#allocation64_spill] sm:$0xff] }
 0x1ec   :  { %v1531_v18 = vmul.f32 %v1530_v17, %v12873_v23  ;;  %v1674_v20 = vmul.f32 -0.001358992, %v12949_v10  ;;  %v1682_v49 = vadd.f32 0.008332121, %v1681_v62  ;;  %v13052_v7 = vsel %vm2194_vm13, %v2201_v60, %v2203_v63 }
 0x1ed   :  { %vm1701_vm0 = vcmp.lt.s32.totalorder %v17876_v25, 0  ;;  %v1821_v34 = vxor.u32 2147483648, %v1820_v43  ;;  %vm10156_vm6 = vcmp.lt.s32.totalorder %v10155_v0, 0  ;;  %v2100_v24 = vmul.u32 %v12803_v41, %v2046_v5 }
 0x1ee   :  { %v2104_v45 = vsel %vm2102_vm12, %v2103_v28, %v2099_v47  ;;  %v2210_v58 = vand.u32 65535, %v13035_v4  ;;  %v2213_v2 = vshrl.u32 %v13046_v42, 16  ;;  %v2318_v9 = vand.u32 2139095040, %v17877_v50 }
 0x1ef   :  { %v13061_v53 = vsel %vm17402_vm3, nan, %v1389_v51  ;;  %v13065_v3 = vsel %vm12798_vm2, 0, %v1516_v27  ;;  %v1524_v12 = vmul.f32 %v1523_v1, %v12873_v23  ;;  %v2235_v17 = vshrl.u32 %v13052_v7, 16 }
 0x1f0   :  { %17878 = vst [vmem:[#allocation70_spill] sm:$0xff] %v13061_v53  ;;  %v1532_v41 = vadd.f32 1.0, %v1531_v18  ;;  %v13070_v47 = vand.u32 3, %v13065_v3  ;;  %v1675_v6 = vadd.f32 0.041655596, %v1674_v20  ;;  %v1683_v29 = vmul.f32 %v1682_v49, %v12949_v10 }
 0x1f1   :  { %17879 = vst [vmem:[#allocation71_spill] sm:$0xff] %v13065_v3  ;;  %v17880_v15 = vand.u32 2147483647, %v17876_v25  ;;  %v1822_v11 = vsel %vm1701_vm0, %v1821_v34, %v1820_v43  ;;  %v13082_v23 = vsel %vm10156_vm6, 0, %v10155_v0  ;;  %v13084_v57 = vadd.s32 %v2104_v45, %v2100_v24 }
 0x1f2   :  { %v2211_v62 = vshrl.u32 %v13035_v4, 16  ;;  %v2212_v59 = vand.u32 65535, %v13046_v42  ;;  %v13088_v56 = vmul.u32 %v2213_v2, %v2210_v58  ;;  %v2319_v60 = vshrl.u32 %v2318_v9, 23 }
 0x1f3   :  { %vm13075_vm9 = vcmp.le.f32.partialorder %v17880_v15, 0.7853982  ;;  %v13090_v63 = vadd.f32 1.0, %v1524_v12  ;;  %v1669_v27 = vsub.s32 4, %v17884_v61  ;;  %v2234_v5 = vand.u32 65535, %v13052_v7 }
 0x1f4   :  { %v13094_v28 = vmul.u32 %v2235_v17, %v2210_v58  ;;  %v13097_v43 = vmul.f32 %v1532_v41, %v12852_v37  ;;  %vm1537_vm2 = vcmp.eq.s32.totalorder %v13070_v47, 0  ;;  %v1676_v0 = vmul.f32 %v1675_v6, %v12949_v10 }
 0x1f5   :  { %17883 = vst [vmem:[#allocation72_spill] sm:$0xff] %v13090_v63  ;;  %v1684_v51 = vadd.f32 -0.16666654, %v1683_v29  ;;  %v10163_v1 = vadd.s32 4294967169, %v2319_v60  ;;  %vm1540_vm7 = vcmp.eq.s32.totalorder %v13070_v47, 2  ;;  %v13105_v42 = vsel %vm13075_vm9, %v17876_v25, %v1822_v11 }
 0x1f6   :  { %17885 = vst [vmem:[#allocation64_spill] sm:$0xff] %v13097_v43  ;;  %v1967_v18 = vsub.s32 4294967266, %v13082_v23  ;;  %v2106_v20 = vadd.s32 536870912, %v13084_v57  ;;  %v2214_v49 = vmul.u32 %v2212_v59, %v2210_v58  ;;  %v13109_v37 = vmul.u32 %v2212_v59, %v2211_v62 }
 0x1f7   :  { %v2218_v7 = vshll.u32 %v13088_v56, 16  ;;  %v2325_v34 = vadd.s32 1, %v10163_v1  ;;  %v1670_v24 = vsel %vm1547_vm14, %v1669_v27, %v17884_v61  ;;  %v2236_v45 = vmul.u32 %v2234_v5, %v2210_v58 }
 0x1f8   :  { %v13115_v9 = vmul.u32 %v2234_v5, %v2211_v62  ;;  %v2240_v12 = vshll.u32 %v13094_v28, 16  ;;  %vm1536_vm12 = vcmp.lt.s32.totalorder %v13070_v47, 2  ;;  %v17404_v6 = vxor.u32 2147483648, %v13090_v63 }
 0x1f9   :  { %v1677_v29 = vadd.f32 -0.4999988, %v1676_v0  ;;  %v1685_v15 = vmul.f32 %v1684_v51, %v12949_v10  ;;  %v13124_v11 = vmul.f32 %v13105_v42, %v13105_v42  ;;  %v1947_v58 = vadd.s32 %v12758_v21, %v12760_v33 }
 0x1fa   :  { %v1963_v59 = vsub.s32 32, %v13082_v23  ;;  %v1968_v60 = vadd.s32 127, %v1967_v18  ;;  %v13129_v61 = vshrl.u32 %v2106_v20, 30  ;;  %v2220_v27 = vshll.u32 %v13109_v37, 16 }
 0x1fb   :  { %vm13132_vm14 = vc.u32 %v2214_v49, %v2218_v7  ;;  %vm2326_vm6 = vcmp.gt.s32.totalorder %v2325_v34, 0  ;;  %v2224_v0 = vadd.s32 %v2218_v7, %v2214_v49  ;;  %vm2244_vm3 = vc.u32 %v2236_v45, %v2240_v12 }
 0x1fc   :  { %17886 = vst [vmem:[#allocation73_spill] sm:$0xff] %v13129_v61  ;;  %v13137_v1 = vadd.s32 %v2240_v12, %v2236_v45  ;;  %v1542_v21 = vsel %vm1540_vm7, %v17404_v6, %v13097_v43  ;;  %v1678_v33 = vmul.f32 %v1677_v29, %v12949_v10  ;;  %v1686_v18 = vadd.f32 1.0, %v1685_v15 }
 0x1fd   :  { %v1828_v20 = vmul.f32 -0.001358992, %v13124_v11  ;;  %v1964_v41 = vshll.u32 %v12914_v44, %v13082_v23  ;;  %v2217_v49 = vmul.u32 %v2213_v2, %v2211_v62  ;;  %v2239_v7 = vmul.u32 %v2235_v17, %v2211_v62 }
 0x1fe   :  { %v2327_v51 = vsel %vm2326_vm6, %v2325_v34, 0  ;;  %v1965_v48 = vshrl.u32 %v1947_v58, %v1963_v59  ;;  %v1969_v45 = vshll.u32 %v1968_v60, 23  ;;  %v2223_v12 = vsel %vm13132_vm14, 1, %v17619_v16 }
 0x1ff   :  { %v2245_v53 = vsel %vm2244_vm3, 1, %v17619_v16  ;;  %v17889_v6 = vxor.u32 2147483648, %v13097_v43  ;;  %v2108_v29 = vshll.u32 %v13129_v61, 30  ;;  %vm2226_vm7 = vc.u32 %v2224_v0, %v2220_v27 }
 0x200   :  { %v17890_v44 = vshll.u32 %v13115_v9, 16  ;;  %v13161_v2 = vadd.f32 1.0, %v1678_v33  ;;  %v13164_v17 = vmul.f32 %v1686_v18, %v12930_v32  ;;  %v1835_v23 = vmul.f32 -0.00019511016, %v13124_v11 }
 0x201   :  { %v1539_v10 = vsel %vm1537_vm2, %v13090_v63, %v17889_v6  ;;  %v2329_v62 = vand.u32 31, %v2327_v51  ;;  %v13169_v34 = vsel %vm12877_vm11, 0, %v1670_v24  ;;  %v1829_v6 = vadd.f32 0.041655596, %v1828_v20 }
 0x202   :  { %vm2248_vm6 = vc.u32 %v13137_v1, %v17890_v44  ;;  %17891 = vst [vmem:[#allocation74_spill] sm:$0xff] %v13161_v2  ;;  %v2225_v15 = vadd.s32 %v2223_v12, %v2217_v49  ;;  %v2247_v58 = vadd.s32 %v2245_v53, %v2239_v7  ;;  %v1966_v59 = vor.u32 %v1965_v48, %v1964_v41 }
 0x203   :  { %17892 = vst [vmem:[#allocation75_spill] sm:$0xff] %v13164_v17  ;;  %v1970_v60 = vor.u32 4788187, %v1969_v45  ;;  %v2227_v27 = vsel %vm2226_vm7, 1, %v17619_v16  ;;  %v2249_v5 = vsel %vm2248_vm6, 1, %v17619_v16  ;;  %v13175_v32 = vsel %vm1536_vm12, %v1539_v10, %v1542_v21 }
 0x204   :  { %17893 = vst [vmem:[#allocation76_spill] sm:$0xff] %v13169_v34  ;;  %v13178_v0 = vand.u32 3, %v13169_v34  ;;  %v13182_v24 = vsub.s32 %v13084_v57, %v2108_v29  ;;  %v1836_v41 = vadd.f32 0.008332121, %v1835_v23  ;;  %v13186_v33 = vsub.s32 32, %v2329_v62 }
 0x205   :  { %v2219_v18 = vshrl.u32 %v13088_v56, 16  ;;  %v2229_v47 = vadd.s32 %v2227_v27, %v2225_v15  ;;  %v2241_v21 = vshrl.u32 %v13094_v28, 16  ;;  %v2251_v20 = vadd.s32 %v2249_v5, %v2247_v58  ;;  %v17894_v58 = vld [vmem:[#allocation12_spill] sm:$0xff]  ;;  %v17896_v28 = vld [vmem:[#allocation38_spill] sm:$0xff] }
 0x206   :  { %v1830_v49 = vmul.f32 %v1829_v6, %v13124_v11  ;;  %v1971_v7 = vand.u32 2147483647, %v1970_v60  ;;  %v1973_v45 = vcvt.s32.f32 %v1966_v59  ;;  %v2177_v57 = vshrl.u32 %v17623_v39, %v12932_v8 }
 0x207   :  { %vm1694_vm11 = vcmp.eq.s32.totalorder %v13178_v0, 2  ;;  %vm2110_vm3 = vcmp.lt.s32.totalorder %v13182_v24, 0  ;;  %v2111_v12 = vsub.s32 0, %v13182_v24  ;;  %v2198_v56 = vsel %vm2196_vm1, %v12990_v54, 2102212464 }
 0x208   :  { %v2221_v10 = vshrl.u32 %v13109_v37, 16  ;;  %v2243_v29 = vshrl.u32 %v13115_v9, 16  ;;  %v2341_v44 = vshll.u32 %v17630_v19, %v2329_v62  ;;  %v2342_v8 = vshrl.u32 %v17631_v30, %v13186_v33 }
 0x209   :  { %vm1691_vm2 = vcmp.eq.s32.totalorder %v13178_v0, 0  ;;  %v2230_v23 = vadd.s32 %v2229_v47, %v2219_v18  ;;  %v2252_v6 = vadd.s32 %v2251_v20, %v2241_v21  ;;  %v13206_v15 = vshrl.u32 %v2327_v51, 5 }
 0x20a   :  { %v2472_v59 = vand.u32 2139095040, %v17894_v58  ;;  %v2332_v54 = vshll.u32 %v17623_v39, %v2329_v62  ;;  %v2335_v60 = vshll.u32 %v17620_v22, %v2329_v62  ;;  %v2344_v37 = vshll.u32 %v17631_v30, %v2329_v62 }
 0x20b   :  { %v2345_v27 = vshrl.u32 %v17632_v40, %v13186_v33  ;;  %vm17426_vm1 = vweird.f32 %v17850_v35  ;;  %v2333_v5 = vshrl.u32 %v17620_v22, %v13186_v33  ;;  %v17895_v18 = vmov 2131351028  }
 0x20c   :  { %v2336_v51 = vshrl.u32 %v17895_v18, %v13186_v33  ;;  %v2338_v47 = vshll.u32 %v17895_v18, %v2329_v62  ;;  %v2339_v21 = vshrl.u32 %v17630_v19, %v13186_v33  ;;  %vm1690_vm12 = vcmp.lt.s32.totalorder %v13178_v0, 2 }
 0x20d   :  { %v1837_v20 = vmul.f32 %v1836_v41, %v13124_v11  ;;  %v1974_v52 = vmul.f32 %v1973_v45, %v1971_v7  ;;  %v2197_v53 = vsel %vm2193_vm10, %v2177_v57, %v12992_v26  ;;  %v2343_v48 = vor.u32 %v2342_v8, %v2341_v44 }
 0x20e   :  { %vm1855_vm14 = vcmp.lt.s32.totalorder %v17896_v28, 0  ;;  %v2112_v63 = vsel %vm2110_vm3, %v2111_v12, %v13182_v24  ;;  %v17897_v62 = vand.u32 2147483647, %v17877_v50  ;;  %vm2350_vm7 = vcmp.lt.s32.totalorder %v13206_v15, 4 }
 0x20f   :  { %v2473_v34 = vshrl.u32 %v2472_v59, 23  ;;  %v2199_v41 = vsel %vm2195_vm5, %v12988_v14, %v2198_v56  ;;  %v17898_v7 = vshll.u32 %v13115_v9, 16  ;;  %v2253_v45 = vadd.s32 %v2252_v6, %v2243_v29 }
 0x210   :  { %v2322_v43 = vand.u32 8388607, %v17897_v62  ;;  %v2346_v57 = vor.u32 %v2345_v27, %v2344_v37  ;;  %v13242_v44 = vadd.s32 %v2230_v23, %v2221_v10  ;;  %v13244_v12 = vor.u32 %v2333_v5, %v2332_v54 }
 0x211   :  { %v13240_v26 = vadd.s32 %v13137_v1, %v17898_v7  ;;  %v13246_v8 = vor.u32 %v2336_v51, %v2335_v60  ;;  %v13248_v62 = vor.u32 %v2339_v21, %v2338_v47  ;;  %v2113_v59 = vclz %v2112_v63 }
 0x212   :  { %vm2347_vm10 = vcmp.lt.s32.totalorder %v13206_v15, 1  ;;  %vm2349_vm5 = vcmp.lt.s32.totalorder %v13206_v15, 3  ;;  %v2356_v14 = vsel %vm2350_vm7, %v2343_v48, 920167782  ;;  %v1831_v9 = vadd.f32 -0.4999988, %v1830_v49 }
 0x213   :  { %v2200_v1 = vsel %vm2194_vm13, %v2197_v53, %v2199_v41  ;;  %v2323_v56 = vor.u32 8388608, %v2322_v43  ;;  %v10166_v10 = vadd.s32 4294967169, %v2473_v34  ;;  %v17899_v29 = vxor.u32 2147483648, %v13161_v2 }
 0x214   :  { %v1838_v63 = vadd.f32 -0.16666654, %v1837_v20  ;;  %v2257_v6 = vadd.s32 1, %v2253_v45  ;;  %v2360_v54 = vsel %vm2350_vm7, %v2346_v57, 1326507024  ;;  %vm2256_vm6 = vc.u32 %v13242_v44, %v13240_v26 }
 0x215   :  { %v1696_v23 = vsel %vm1694_vm11, %v17899_v29, %v13164_v17  ;;  %vm2348_vm3 = vcmp.lt.s32.totalorder %v13206_v15, 2  ;;  %v2355_v31 = vsel %vm2347_vm10, %v13244_v12, %v13246_v8  ;;  %v2357_v43 = vsel %vm2349_vm5, %v13248_v62, %v2356_v14 }
 0x216   :  { %v17900_v34 = vxor.u32 2147483648, %v13164_v17  ;;  %v1975_v49 = vxor.u32 2147483648, %v1974_v52  ;;  %v10158_v60 = vadd.s32 4294967294, %v2113_v59  ;;  %v2254_v37 = vmul.u32 %v13035_v4, %v2200_v1 }
 0x217   :  { %v2359_v27 = vsel %vm2347_vm10, %v13246_v8, %v13248_v62  ;;  %v2361_v5 = vsel %vm2349_vm5, %v2343_v48, %v2360_v54  ;;  %v13285_v51 = vshll.u32 %v2323_v56, 8  ;;  %v2479_v47 = vadd.s32 1, %v10166_v10 }
 0x218   :  { %v1693_v53 = vsel %vm1691_vm2, %v13161_v2, %v17900_v34  ;;  %v13290_v21 = vsel %vm17426_vm1, nan, %v13175_v32  ;;  %vm17425_vm13 = vweird.f32 %v17864_v46  ;;  %v2258_v20 = vsel %vm2256_vm6, %v2257_v6, %v2253_v45 }
 0x219   :  { %17901 = vst [vmem:[#allocation77_spill] sm:$0xff] %v13290_v21  ;;  %v13295_v4 = vsel %vm2348_vm3, %v2355_v31, %v2357_v43  ;;  %v1697_v41 = vsel %vm1690_vm12, %v1693_v53, %v1696_v23  ;;  %v17902_v48 = vsub.s32 4, %v12672_v13  ;;  %v1832_v57 = vmul.f32 %v1831_v9, %v13124_v11 }
 0x21a   :  { %v1839_v32 = vmul.f32 %v1838_v63, %v13124_v11  ;;  %v17903_v59 = vand.u32 2147483647, %v17896_v28  ;;  %v1976_v0 = vsel %vm1855_vm14, %v1975_v49, %v1974_v52  ;;  %vm10159_vm2 = vcmp.lt.s32.totalorder %v10158_v60, 0  ;;  %v17908_v52 = vld [vmem:[#allocation61_spill] sm:$0xff] }
 0x21b   :  { %v1824_v7 = vsel %vm1701_vm0, %v17902_v48, %v12672_v13  ;;  %v2362_v14 = vsel %vm2348_vm3, %v2359_v27, %v2361_v5  ;;  %v13316_v1 = vadd.s32 %v2258_v20, %v2254_v37  ;;  %v2364_v13 = vand.u32 65535, %v13285_v51 }
 0x21c   :  { %vm13308_vm11 = vcmp.le.f32.partialorder %v17903_v59, 0.7853982  ;;  %v2389_v9 = vshrl.u32 %v13295_v4, 16  ;;  %vm2480_vm0 = vcmp.gt.s32.totalorder %v2479_v47, 0  ;;  %v13322_v11 = vsel %vm17425_vm13, nan, %v1697_v41 }
 0x21d   :  { %17906 = vst [vmem:[#allocation78_spill] sm:$0xff] %v13322_v11  ;;  %v13326_v56 = vsel %vm13075_vm9, 0, %v1824_v7  ;;  %v1977_v10 = vsub.s32 4, %v17908_v52  ;;  %v2481_v29 = vsel %vm2480_vm0, %v2479_v47, 0  ;;  %v13329_v23 = vadd.f32 1.0, %v1832_v57 }
 0x21e   :  { %17907 = vst [vmem:[#allocation79_spill] sm:$0xff] %v13326_v56  ;;  %v1840_v63 = vadd.f32 1.0, %v1839_v32  ;;  %v13334_v6 = vsel %vm13308_vm11, %v17896_v28, %v1976_v0  ;;  %v2367_v54 = vshrl.u32 %v2362_v14, 16  ;;  %v13337_v31 = vand.u32 3, %v13326_v56 }
 0x21f   :  { %17909 = vst [vmem:[#allocation61_spill] sm:$0xff] %v13329_v23  ;;  %v13339_v43 = vsel %vm10159_vm2, 0, %v10158_v60  ;;  %v17413_v55 = vand.u32 2147483647, %v17894_v58  ;;  %v2483_v34 = vand.u32 31, %v2481_v29  ;;  %v2260_v53 = vadd.s32 536870912, %v13316_v1 }
 0x220   :  { %v2366_v49 = vand.u32 65535, %v2362_v14  ;;  %v2388_v37 = vand.u32 65535, %v13295_v4  ;;  %v13344_v27 = vmul.u32 %v2389_v9, %v2364_v13  ;;  %v13349_v5 = vsel %vm1855_vm14, %v1977_v10, %v17908_v52 }
 0x221   :  { %v13353_v47 = vmul.f32 %v13334_v6, %v13334_v6  ;;  %v2365_v60 = vshrl.u32 %v13285_v51, 16  ;;  %v13356_v20 = vsub.s32 32, %v2483_v34  ;;  %v13359_v41 = vmul.f32 %v1840_v63, %v13105_v42 }
 0x222   :  { %v2101_v48 = vadd.s32 %v13011_v38, %v13006_v36  ;;  %v13364_v7 = vmul.u32 %v2367_v54, %v2364_v13  ;;  %v2117_v32 = vsub.s32 32, %v13339_v43  ;;  %v2121_v59 = vsub.s32 4294967266, %v13339_v43 }
 0x223   :  { %17910 = vst [vmem:[#allocation80_spill] sm:$0xff] %v13359_v41  ;;  %v1982_v57 = vmul.f32 -0.001358992, %v13353_v47  ;;  %v2476_v0 = vand.u32 8388607, %v17413_v55  ;;  %v13371_v14 = vshrl.u32 %v2260_v53, 30  ;;  %v2368_v42 = vmul.u32 %v2366_v49, %v2364_v13 }
 0x224   :  { %v2390_v52 = vmul.u32 %v2388_v37, %v2364_v13  ;;  %v2394_v10 = vshll.u32 %v13344_v27, 16  ;;  %v13374_v63 = vmul.u32 %v2366_v49, %v2365_v60  ;;  %v13376_v36 = vmul.u32 %v2388_v37, %v2365_v60 }
 0x225   :  { %v2495_v38 = vshll.u32 %v17630_v19, %v2483_v34  ;;  %v2496_v4 = vshrl.u32 %v17631_v30, %v13356_v20  ;;  %v2372_v46 = vshll.u32 %v13364_v7, 16  ;;  %v13382_v2 = vshrl.u32 %v2481_v29, 5 }
 0x226   :  { %v2498_v53 = vshll.u32 %v17631_v30, %v2483_v34  ;;  %v2499_v13 = vshrl.u32 %v17632_v40, %v13356_v20  ;;  %v2489_v55 = vshll.u32 %v17620_v22, %v2483_v34  ;;  %v2490_v49 = vshrl.u32 %v17895_v18, %v13356_v20 }
 0x227   :  { %v2492_v37 = vshll.u32 %v17895_v18, %v2483_v34  ;;  %v2493_v17 = vshrl.u32 %v17630_v19, %v13356_v20  ;;  %vm2398_vm9 = vc.u32 %v2390_v52, %v2394_v10  ;;  %v2486_v35 = vshll.u32 %v17623_v39, %v2483_v34 }
 0x228   :  { %v2487_v29 = vshrl.u32 %v17620_v22, %v13356_v20  ;;  %v2500_v56 = vor.u32 %v2499_v13, %v2498_v53  ;;  %v2371_v11 = vmul.u32 %v2367_v54, %v2365_v60  ;;  %v2396_v21 = vshll.u32 %v13376_v36, 16 }
 0x229   :  { %v13397_v3 = vadd.s32 %v2394_v10, %v2390_v52  ;;  %v2497_v58 = vor.u32 %v2496_v4, %v2495_v38  ;;  %vm1848_vm12 = vcmp.eq.s32.totalorder %v13337_v31, 2  ;;  %v2374_v50 = vshll.u32 %v13374_v63, 16 }
 0x22a   :  { %vm2376_vm14 = vc.u32 %v2368_v42, %v2372_v46  ;;  %v2378_v28 = vadd.s32 %v2372_v46, %v2368_v42  ;;  %vm2504_vm6 = vcmp.lt.s32.totalorder %v13382_v2, 4  ;;  %v2393_v61 = vmul.u32 %v2389_v9, %v2365_v60 }
 0x22b   :  { %v2399_v34 = vsel %vm2398_vm9, 1, %v17619_v16  ;;  %v13403_v25 = vor.u32 %v2490_v49, %v2489_v55  ;;  %v13405_v53 = vor.u32 %v2493_v17, %v2492_v37  ;;  %v13407_v54 = vor.u32 %v2487_v29, %v2486_v35 }
 0x22c   :  { %vm2501_vm2 = vcmp.lt.s32.totalorder %v13382_v2, 1  ;;  %vm2503_vm0 = vcmp.lt.s32.totalorder %v13382_v2, 3  ;;  %v2514_v4 = vsel %vm2504_vm6, %v2500_v56, 1326507024  ;;  %v2377_v46 = vsel %vm2376_vm14, 1, %v17619_v16 }
 0x22d   :  { %vm2402_vm13 = vc.u32 %v13397_v3, %v2396_v21  ;;  %v2477_v9 = vor.u32 8388608, %v2476_v0  ;;  %v2510_v17 = vsel %vm2504_vm6, %v2497_v58, 920167782  ;;  %v1989_v35 = vmul.f32 -0.00019511016, %v13353_v47 }
 0x22e   :  { %v2122_v55 = vadd.s32 127, %v2121_v59  ;;  %v2262_v60 = vshll.u32 %v13371_v14, 30  ;;  %vm2380_vm9 = vc.u32 %v2378_v28, %v2374_v50  ;;  %v2401_v42 = vadd.s32 %v2399_v34, %v2393_v61 }
 0x22f   :  { %vm2502_vm1 = vcmp.lt.s32.totalorder %v13382_v2, 2  ;;  %v2513_v56 = vsel %vm2501_vm2, %v13403_v25, %v13405_v53  ;;  %v2515_v0 = vsel %vm2503_vm0, %v2497_v58, %v2514_v4  ;;  %v2379_v52 = vadd.s32 %v2377_v46, %v2371_v11 }
 0x230   :  { %v2403_v10 = vsel %vm2402_vm13, 1, %v17619_v16  ;;  %v2509_v59 = vsel %vm2501_vm2, %v13407_v54, %v13403_v25  ;;  %v2511_v50 = vsel %vm2503_vm0, %v13405_v53, %v2510_v17  ;;  %v2118_v61 = vshll.u32 %v13182_v24, %v13339_v43 }
 0x231   :  { %v2119_v28 = vshrl.u32 %v2101_v48, %v2117_v32  ;;  %v2381_v38 = vsel %vm2380_vm9, 1, %v17619_v16  ;;  %v13439_v13 = vshll.u32 %v2477_v9, 8  ;;  %v13444_v58 = vsel %vm13308_vm11, 0, %v13349_v5 }
 0x232   :  { %17911 = vst [vmem:[#allocation81_spill] sm:$0xff] %v13444_v58  ;;  %v1983_v11 = vadd.f32 0.041655596, %v1982_v57  ;;  %v2123_v49 = vshll.u32 %v2122_v55, 23  ;;  %v13448_v37 = vsel %vm2502_vm1, %v2513_v56, %v2515_v0  ;;  %v13451_v29 = vsub.s32 %v13316_v1, %v2262_v60 }
 0x233   :  { %v2395_v24 = vshrl.u32 %v13344_v27, 16  ;;  %v2405_v43 = vadd.s32 %v2403_v10, %v2401_v42  ;;  %v13456_v48 = vsel %vm2502_vm1, %v2509_v59, %v2511_v50  ;;  %v17428_v45 = vxor.u32 2147483648, %v13359_v41 }
 0x234   :  { %v1990_v5 = vadd.f32 0.008332121, %v1989_v35  ;;  %v2373_v57 = vshrl.u32 %v13364_v7, 16  ;;  %v2383_v32 = vadd.s32 %v2381_v38, %v2379_v52  ;;  %v17912_v34 = vxor.u32 2147483648, %v13329_v23 }
 0x235   :  { %v2120_v4 = vor.u32 %v2119_v28, %v2118_v61  ;;  %v2518_v27 = vand.u32 65535, %v13439_v13  ;;  %v2521_v46 = vshrl.u32 %v13448_v37, 16  ;;  %v1984_v9 = vmul.f32 %v1983_v11, %v13353_v47 }
 0x236   :  { %v13465_v1 = vsel %vm1848_vm12, %v17912_v34, %v13359_v41  ;;  %v2124_v17 = vor.u32 4788187, %v2123_v49  ;;  %v2331_v35 = vshrl.u32 %v17623_v39, %v13186_v33  ;;  %v2543_v7 = vshrl.u32 %v13456_v48, 16 }
 0x237   :  { %v2265_v55 = vsub.s32 0, %v13451_v29  ;;  %v2352_v60 = vsel %vm2350_vm7, %v13248_v62, 2102212464  ;;  %v2397_v42 = vshrl.u32 %v13376_v36, 16  ;;  %v2406_v56 = vadd.s32 %v2405_v43, %v2395_v24  ;;  %v17913_v43 = vld [vmem:[#allocation13_spill] sm:$0xff] }
 0x238   :  { %v1991_v0 = vmul.f32 %v1990_v5, %v13353_v47  ;;  %vm2264_vm13 = vcmp.lt.s32.totalorder %v13451_v29, 0  ;;  %v2375_v52 = vshrl.u32 %v13374_v63, 16  ;;  %v2384_v10 = vadd.s32 %v2383_v32, %v2373_v57  ;;  %v17914_v32 = vld [vmem:[#allocation39_spill] sm:$0xff] }
 0x239   :  { %vm1845_vm11 = vcmp.eq.s32.totalorder %v13337_v31, 0  ;;  %v2127_v33 = vcvt.s32.f32 %v2120_v4  ;;  %v2519_v59 = vshrl.u32 %v13439_v13, 16  ;;  %v2520_v50 = vand.u32 65535, %v13448_v37 }
 0x23a   :  { %v13484_v61 = vmul.u32 %v2521_v46, %v2518_v27  ;;  %v2351_v62 = vsel %vm2347_vm10, %v2331_v35, %v13244_v12  ;;  %v2353_v28 = vsel %vm2349_vm5, %v13246_v8, %v2352_v60  ;;  %v2542_v63 = vand.u32 65535, %v13456_v48 }
 0x23b   :  { %v13493_v38 = vmul.u32 %v2543_v7, %v2518_v27  ;;  %v2125_v11 = vand.u32 2147483647, %v2124_v17  ;;  %v2266_v49 = vsel %vm2264_vm13, %v2265_v55, %v13451_v29  ;;  %v2407_v24 = vadd.s32 %v2406_v56, %v2397_v42 }
 0x23c   :  { %v2626_v37 = vand.u32 2139095040, %v17913_v43  ;;  %v1985_v5 = vadd.f32 -0.4999988, %v1984_v9  ;;  %v1992_v57 = vadd.f32 -0.16666654, %v1991_v0  ;;  %vm2009_vm7 = vcmp.lt.s32.totalorder %v17914_v32, 0 }
 0x23d   :  { %v13498_v34 = vadd.s32 %v2384_v10, %v2375_v52  ;;  %v13503_v12 = vadd.s32 %v13397_v3, %v2396_v21  ;;  %vm1844_vm10 = vcmp.lt.s32.totalorder %v13337_v31, 2  ;;  %v2354_v8 = vsel %vm2348_vm3, %v2351_v62, %v2353_v28 }
 0x23e   :  { %v2522_v48 = vmul.u32 %v2520_v50, %v2518_v27  ;;  %v13508_v4 = vmul.u32 %v2520_v50, %v2519_v59  ;;  %v2526_v9 = vshll.u32 %v13484_v61, 16  ;;  %v2267_v17 = vclz %v2266_v49 }
 0x23f   :  { %v2544_v35 = vmul.u32 %v2542_v63, %v2518_v27  ;;  %v13511_v55 = vmul.u32 %v2542_v63, %v2519_v59  ;;  %v2548_v60 = vshll.u32 %v13493_v38, 16  ;;  %v13515_v36 = vand.u32 3, %v13444_v58 }
 0x240   :  { %v17915_v3 = vand.u32 2147483647, %v17914_v32  ;;  %v2128_v15 = vmul.f32 %v2127_v33, %v2125_v11  ;;  %v2411_v42 = vadd.s32 1, %v2407_v24  ;;  %v2627_v56 = vshrl.u32 %v2626_v37, 23 }
 0x241   :  { %v1986_v0 = vmul.f32 %v1985_v5, %v13353_v47  ;;  %v1993_v27 = vmul.f32 %v1992_v57, %v13353_v47  ;;  %v2408_v52 = vmul.u32 %v13285_v51, %v2354_v8  ;;  %vm2410_vm3 = vc.u32 %v13498_v34, %v13503_v12 }
 0x242   :  { %vm13519_vm5 = vcmp.le.f32.partialorder %v17915_v3, 0.7853982  ;;  %v2528_v10 = vshll.u32 %v13508_v4, 16  ;;  %vm2530_vm12 = vc.u32 %v2522_v48, %v2526_v9  ;;  %v2532_v50 = vadd.s32 %v2526_v9, %v2522_v48 }
 0x243   :  { %v10169_v62 = vadd.s32 4294967169, %v2627_v56  ;;  %v10161_v28 = vadd.s32 4294967294, %v2267_v17  ;;  %v2550_v63 = vshll.u32 %v13511_v55, 16  ;;  %vm2552_vm14 = vc.u32 %v2544_v35, %v2548_v60 }
 0x244   :  { %v13530_v33 = vadd.s32 %v2548_v60, %v2544_v35  ;;  %v2129_v11 = vxor.u32 2147483648, %v2128_v15  ;;  %v2412_v49 = vsel %vm2410_vm3, %v2411_v42, %v2407_v24  ;;  %v2525_v37 = vmul.u32 %v2521_v46, %v2519_v59 }
 0x245   :  { %v2633_v47 = vadd.s32 1, %v10169_v62  ;;  %v1847_v51 = vsel %vm1845_vm11, %v13329_v23, %v17428_v45  ;;  %v1994_v5 = vadd.f32 1.0, %v1993_v27  ;;  %v2531_v57 = vsel %vm2530_vm12, 1, %v17619_v16 }
 0x246   :  { %v2547_v8 = vmul.u32 %v2543_v7, %v2519_v59  ;;  %v13538_v48 = vadd.f32 1.0, %v1986_v0  ;;  %vm2534_vm9 = vc.u32 %v2532_v50, %v2528_v10  ;;  %v2553_v9 = vsel %vm2552_vm14, 1, %v17619_v16 }
 0x247   :  { %vm2634_vm13 = vcmp.gt.s32.totalorder %v2633_v47, 0  ;;  %vm10162_vm8 = vcmp.lt.s32.totalorder %v10161_v28, 0  ;;  %v13541_v24 = vadd.s32 %v2412_v49, %v2408_v52  ;;  %vm2556_vm3 = vc.u32 %v13530_v33, %v2550_v63 }
 0x248   :  { %17918 = vst [vmem:[#allocation82_spill] sm:$0xff] %v13538_v48  ;;  %v2635_v46 = vsel %vm2634_vm13, %v2633_v47, 0  ;;  %v2130_v17 = vsel %vm2009_vm7, %v2129_v11, %v2128_v15  ;;  %v2533_v35 = vadd.s32 %v2531_v57, %v2525_v37  ;;  %v17429_v7 = vand.u32 2147483647, %v17913_v43 }
 0x249   :  { %v2637_v59 = vand.u32 31, %v2635_v46  ;;  %v13552_v60 = vsel %vm1844_vm10, %v1847_v51, %v13465_v1  ;;  %v13555_v3 = vmul.f32 %v1994_v5, %v13334_v6  ;;  %v2535_v42 = vsel %vm2534_vm9, 1, %v17619_v16 }
 0x24a   :  { %v2555_v56 = vadd.s32 %v2553_v9, %v2547_v8  ;;  %v13559_v27 = vsel %vm10162_vm8, 0, %v10161_v28  ;;  %v2557_v15 = vsel %vm2556_vm3, 1, %v17619_v16  ;;  %v13567_v31 = vsel %vm13519_vm5, %v17914_v32, %v2130_v17 }
 0x24b   :  { %17919 = vst [vmem:[#allocation83_spill] sm:$0xff] %v13555_v3  ;;  %v13562_v52 = vsub.s32 32, %v2637_v59  ;;  %v13571_v6 = vadd.s32 %v13240_v26, %v13242_v44  ;;  %v2271_v1 = vsub.s32 32, %v13559_v27  ;;  %v2414_v10 = vadd.s32 536870912, %v13541_v24 }
 0x24c   :  { %v2527_v50 = vshrl.u32 %v13484_v61, 16  ;;  %v2537_v62 = vadd.s32 %v2535_v42, %v2533_v35  ;;  %v2549_v28 = vshrl.u32 %v13493_v38, 16  ;;  %v2630_v11 = vand.u32 8388607, %v17429_v7 }
 0x24d   :  { %v2559_v49 = vadd.s32 %v2557_v15, %v2555_v56  ;;  %v2643_v37 = vshll.u32 %v17620_v22, %v2637_v59  ;;  %v2646_v47 = vshll.u32 %v17895_v18, %v2637_v59  ;;  %v2649_v26 = vshll.u32 %v17630_v19, %v2637_v59 }
 0x24e   :  { %v2644_v44 = vshrl.u32 %v17895_v18, %v13562_v52  ;;  %v2647_v51 = vshrl.u32 %v17630_v19, %v13562_v52  ;;  %v2650_v61 = vshrl.u32 %v17631_v30, %v13562_v52  ;;  %v2652_v38 = vshll.u32 %v17631_v30, %v2637_v59 }
 0x24f   :  { %v13589_v5 = vshrl.u32 %v2414_v10, 30  ;;  %v2485_v57 = vshrl.u32 %v17623_v39, %v13356_v20  ;;  %v2506_v8 = vsel %vm2504_vm6, %v13405_v53, 2102212464  ;;  %v13596_v9 = vshrl.u32 %v2635_v46, 5 }
 0x250   :  { %v2529_v17 = vshrl.u32 %v13508_v4, 16  ;;  %v2551_v35 = vshrl.u32 %v13511_v55, 16  ;;  %v2631_v42 = vor.u32 8388608, %v2630_v11  ;;  %v2653_v56 = vshrl.u32 %v17632_v40, %v13562_v52 }
 0x251   :  { %v2538_v15 = vadd.s32 %v2537_v62, %v2527_v50  ;;  %v2560_v10 = vadd.s32 %v2559_v49, %v2549_v28  ;;  %v2640_v45 = vshll.u32 %v17623_v39, %v2637_v59  ;;  %v2641_v20 = vshrl.u32 %v17620_v22, %v13562_v52  ;;  %v17920_v49 = vld [vmem:[#allocation37_spill] sm:$0xff] }
 0x252   :  { %v13605_v7 = vor.u32 %v2644_v44, %v2643_v37  ;;  %v13607_v53 = vor.u32 %v2647_v51, %v2646_v47  ;;  %v2651_v46 = vor.u32 %v2650_v61, %v2649_v26  ;;  %v2654_v0 = vor.u32 %v2653_v56, %v2652_v38  ;;  %v17921_v44 = vld [vmem:[#allocation14_spill] sm:$0xff] }
 0x253   :  { %vm1999_vm8 = vcmp.eq.s32.totalorder %v13515_v36, 0  ;;  %vm2002_vm6 = vcmp.eq.s32.totalorder %v13515_v36, 2  ;;  %v2275_v4 = vsub.s32 4294967266, %v13559_v27  ;;  %v2416_v50 = vshll.u32 %v13589_v5, 30 }
 0x254   :  { %vm2655_vm11 = vcmp.lt.s32.totalorder %v13596_v9, 1  ;;  %vm2658_vm10 = vcmp.lt.s32.totalorder %v13596_v9, 4  ;;  %v2505_v59 = vsel %vm2501_vm2, %v2485_v57, %v13407_v54  ;;  %v2507_v62 = vsel %vm2503_vm0, %v13403_v25, %v2506_v8 }
 0x255   :  { %v13624_v28 = vadd.s32 %v13530_v33, %v2550_v63  ;;  %v13626_v11 = vshll.u32 %v2631_v42, 8  ;;  %vm17474_vm12 = vweird.f32 %v17920_v49  ;;  %v13629_v37 = vadd.s32 %v2538_v15, %v2529_v17 }
 0x256   :  { %v2561_v47 = vadd.s32 %v2560_v10, %v2551_v35  ;;  %v13631_v26 = vor.u32 %v2641_v20, %v2640_v45  ;;  %vm2657_vm2 = vcmp.lt.s32.totalorder %v13596_v9, 3  ;;  %vm2656_vm14 = vcmp.lt.s32.totalorder %v13596_v9, 2 }
 0x257   :  { %v2664_v25 = vsel %vm2658_vm10, %v2651_v46, 920167782  ;;  %v2667_v54 = vsel %vm2655_vm11, %v13605_v7, %v13607_v53  ;;  %v2668_v55 = vsel %vm2658_vm10, %v2654_v0, 1326507024  ;;  %v17430_v63 = vxor.u32 2147483648, %v13555_v3 }
 0x258   :  { %v2276_v33 = vadd.s32 127, %v2275_v4  ;;  %v13645_v45 = vsub.s32 %v13541_v24, %v2416_v50  ;;  %v2780_v51 = vand.u32 2139095040, %v17921_v44  ;;  %v13650_v61 = vmul.f32 %v13567_v31, %v13567_v31 }
 0x259   :  { %v2508_v38 = vsel %vm2502_vm1, %v2505_v59, %v2507_v62  ;;  %v2669_v57 = vsel %vm2657_vm2, %v2651_v46, %v2668_v55  ;;  %v2672_v0 = vand.u32 65535, %v13626_v11  ;;  %v2565_v8 = vadd.s32 1, %v2561_v47 }
 0x25a   :  { %v2663_v24 = vsel %vm2655_vm11, %v13631_v26, %v13605_v7  ;;  %v2665_v17 = vsel %vm2657_vm2, %v13607_v53, %v2664_v25  ;;  %v2670_v35 = vsel %vm2656_vm14, %v2667_v54, %v2669_v57  ;;  %v2272_v2 = vshll.u32 %v13451_v29, %v13559_v27  ;;  %v17922_v27 = vld [vmem:[#allocation73_spill] sm:$0xff] }
 0x25b   :  { %v2273_v42 = vshrl.u32 %v13571_v6, %v2271_v1  ;;  %vm2564_vm1 = vc.u32 %v13629_v37, %v13624_v28  ;;  %v2675_v56 = vshrl.u32 %v2670_v35, 16  ;;  %v2277_v15 = vshll.u32 %v2276_v33, 23 }
 0x25c   :  { %v2419_v10 = vsub.s32 0, %v13645_v45  ;;  %v2562_v20 = vmul.u32 %v13439_v13, %v2508_v38  ;;  %v2781_v46 = vshrl.u32 %v2780_v51, 23  ;;  %vm2418_vm0 = vcmp.lt.s32.totalorder %v13645_v45, 0 }
 0x25d   :  { %v2666_v4 = vsel %vm2656_vm14, %v2663_v24, %v2665_v17  ;;  %v2673_v50 = vshrl.u32 %v13626_v11, 16  ;;  %v2674_v29 = vand.u32 65535, %v2670_v35  ;;  %vm1998_vm9 = vcmp.lt.s32.totalorder %v13515_v36, 2 }
 0x25e   :  { %v2131_v6 = vsub.s32 4, %v17922_v27  ;;  %v2566_v1 = vsel %vm2564_vm1, %v2565_v8, %v2561_v47  ;;  %v13679_v59 = vmul.u32 %v2675_v56, %v2672_v0  ;;  %v2001_v13 = vsel %vm1999_vm8, %v13538_v48, %v17430_v63  ;;  %v17925_v8 = vld [vmem:[#allocation38_spill] sm:$0xff] }
 0x25f   :  { %v17923_v62 = vxor.u32 2147483648, %v13538_v48  ;;  %v2143_v54 = vmul.f32 -0.00019511016, %v13650_v61  ;;  %v2274_v55 = vor.u32 %v2273_v42, %v2272_v2  ;;  %v2420_v33 = vsel %vm2418_vm0, %v2419_v10, %v13645_v45 }
 0x260   :  { %v2696_v47 = vand.u32 65535, %v2666_v4  ;;  %v2697_v51 = vshrl.u32 %v2666_v4, 16  ;;  %v10172_v38 = vadd.s32 4294967169, %v2781_v46  ;;  %v13696_v57 = vsel %vm17474_vm12, nan, %v13552_v60 }
 0x261   :  { %v2004_v25 = vsel %vm2002_vm6, %v17923_v62, %v13555_v3  ;;  %17924 = vst [vmem:[#allocation73_spill] sm:$0xff] %v13696_v57  ;;  %vm17473_vm13 = vweird.f32 %v17925_v8  ;;  %v2278_v24 = vor.u32 4788187, %v2277_v15  ;;  %v13699_v17 = vadd.s32 %v2566_v1, %v2562_v20 }
 0x262   :  { %v13701_v35 = vmul.u32 %v2674_v29, %v2673_v50  ;;  %v2005_v2 = vsel %vm1998_vm9, %v2001_v13, %v2004_v25  ;;  %v2132_v42 = vsel %vm2009_vm7, %v2131_v6, %v17922_v27  ;;  %v2676_v10 = vmul.u32 %v2674_v29, %v2672_v0 }
 0x263   :  { %v2680_v46 = vshll.u32 %v13679_v59, 16  ;;  %v2136_v60 = vmul.f32 -0.001358992, %v13650_v61  ;;  %v2144_v4 = vadd.f32 0.008332121, %v2143_v54  ;;  %v2281_v62 = vcvt.s32.f32 %v2274_v55 }
 0x264   :  { %v2421_v63 = vclz %v2420_v33  ;;  %v2698_v15 = vmul.u32 %v2696_v47, %v2672_v0  ;;  %v2699_v20 = vmul.u32 %v2697_v51, %v2672_v0  ;;  %v13710_v1 = vmul.u32 %v2696_v47, %v2673_v50 }
 0x265   :  { %v2787_v48 = vadd.s32 1, %v10172_v38  ;;  %v2279_v3 = vand.u32 2147483647, %v2278_v24  ;;  %v2568_v36 = vadd.s32 536870912, %v13699_v17  ;;  %v2682_v13 = vshll.u32 %v13701_v35, 16 }
 0x266   :  { %vm2684_vm7 = vc.u32 %v2676_v10, %v2680_v46  ;;  %v2686_v29 = vadd.s32 %v2680_v46, %v2676_v10  ;;  %v2702_v6 = vshll.u32 %v2699_v20, 16  ;;  %v17436_v25 = vshll.u32 %v13710_v1, 16 }
 0x267   :  { %v2137_v54 = vadd.f32 0.041655596, %v2136_v60  ;;  %v2145_v55 = vmul.f32 %v2144_v4, %v13650_v61  ;;  %v10164_v33 = vadd.s32 4294967294, %v2421_v63  ;;  %v2701_v0 = vmul.u32 %v2697_v51, %v2673_v50 }
 0x268   :  { %v2679_v47 = vmul.u32 %v2675_v56, %v2673_v50  ;;  %vm2706_vm3 = vc.u32 %v2698_v15, %v2702_v6  ;;  %v13717_v38 = vadd.s32 %v2702_v6, %v2698_v15  ;;  %vm2788_vm8 = vcmp.gt.s32.totalorder %v2787_v48, 0  ;;  %v17929_v6 = vld [vmem:[#allocation33_spill] sm:$0xff] }
 0x269   :  { %v13719_v24 = vmul.f32 %v2281_v62, %v2279_v3  ;;  %v2685_v49 = vsel %vm2684_vm7, 1, %v17619_v16  ;;  %v2707_v27 = vsel %vm2706_vm3, 1, %v17619_v16  ;;  %v2789_v10 = vsel %vm2788_vm8, %v2787_v48, 0 }
 0x26a   :  { %v13723_v46 = vshrl.u32 %v2568_v36, 30  ;;  %vm2688_vm6 = vc.u32 %v2686_v29, %v2682_v13  ;;  %vm2710_vm1 = vc.u32 %v13717_v38, %v17436_v25  ;;  %v17926_v63 = vand.u32 2147483647, %v17921_v44 }
 0x26b   :  { %v13732_v50 = vsel %vm13519_vm5, 0, %v2132_v42  ;;  %vm10165_vm0 = vcmp.lt.s32.totalorder %v10164_v33, 0  ;;  %v2709_v3 = vadd.s32 %v2707_v27, %v2701_v0  ;;  %v2791_v51 = vand.u32 31, %v2789_v10 }
 0x26c   :  { %v2784_v56 = vand.u32 8388607, %v17926_v63  ;;  %17927 = vst [vmem:[#allocation84_spill] sm:$0xff] %v13732_v50  ;;  %v13736_v48 = vsel %vm17473_vm13, nan, %v2005_v2  ;;  %v2138_v60 = vmul.f32 %v2137_v54, %v13650_v61  ;;  %v2687_v4 = vadd.s32 %v2685_v49, %v2679_v47 }
 0x26d   :  { %17928 = vst [vmem:[#allocation85_spill] sm:$0xff] %v13736_v48  ;;  %v2711_v62 = vsel %vm2710_vm1, 1, %v17619_v16  ;;  %v2146_v15 = vadd.f32 -0.16666654, %v2145_v55  ;;  %v2689_v13 = vsel %vm2688_vm6, 1, %v17619_v16  ;;  %v13742_v21 = vsub.s32 32, %v2791_v51 }
 0x26e   :  { %v2283_v42 = vxor.u32 2147483648, %v13719_v24  ;;  %v13745_v27 = vsel %vm10165_vm0, 0, %v10164_v33  ;;  %v2570_v29 = vshll.u32 %v13723_v46, 30  ;;  %v2785_v2 = vor.u32 8388608, %v2784_v56 }
 0x26f   :  { %vm2163_vm5 = vcmp.lt.s32.totalorder %v17929_v6, 0  ;;  %v2639_v49 = vshrl.u32 %v17623_v39, %v13562_v52  ;;  %v2660_v54 = vsel %vm2658_vm10, %v13607_v53, 2102212464  ;;  %v2703_v55 = vshrl.u32 %v2699_v20, 16 }
 0x270   :  { %v2713_v0 = vadd.s32 %v2711_v62, %v2709_v3  ;;  %v2681_v47 = vshrl.u32 %v13679_v59, 16  ;;  %v2691_v63 = vadd.s32 %v2689_v13, %v2687_v4  ;;  %v2797_v33 = vshll.u32 %v17620_v22, %v2791_v51 }
 0x271   :  { %v2803_v36 = vshll.u32 %v17630_v19, %v2791_v51  ;;  %v2798_v56 = vshrl.u32 %v17895_v18, %v13742_v21  ;;  %v2800_v25 = vshll.u32 %v17895_v18, %v2791_v51  ;;  %v2801_v52 = vshrl.u32 %v17630_v19, %v13742_v21 }
 0x272   :  { %v2804_v53 = vshrl.u32 %v17631_v30, %v13742_v21  ;;  %v13765_v20 = vsub.s32 %v13699_v17, %v2570_v29  ;;  %v13767_v59 = vshrl.u32 %v2789_v10, 5  ;;  %v2806_v3 = vshll.u32 %v17631_v30, %v2791_v51 }
 0x273   :  { %v2807_v4 = vshrl.u32 %v17632_v40, %v13742_v21  ;;  %v2705_v62 = vshrl.u32 %v13710_v1, 16  ;;  %v2714_v13 = vadd.s32 %v2713_v0, %v2703_v55  ;;  %v2794_v8 = vshll.u32 %v17623_v39, %v2791_v51 }
 0x274   :  { %v2795_v23 = vshrl.u32 %v17620_v22, %v13742_v21  ;;  %v17930_v41 = vand.u32 2147483647, %v17929_v6  ;;  %v2683_v10 = vshrl.u32 %v13701_v35, 16  ;;  %v2692_v29 = vadd.s32 %v2691_v63, %v2681_v47 }
 0x275   :  { %v2805_v58 = vor.u32 %v2804_v53, %v2803_v36  ;;  %v2808_v48 = vor.u32 %v2807_v4, %v2806_v3  ;;  %v2659_v55 = vsel %vm2655_vm11, %v2639_v49, %v13631_v26  ;;  %v2661_v51 = vsel %vm2657_vm2, %v13605_v7, %v2660_v54 }
 0x276   :  { %vm13778_vm10 = vcmp.le.f32.partialorder %v17930_v41, 0.7853982  ;;  %v13789_v0 = vor.u32 %v2798_v56, %v2797_v33  ;;  %v13791_v57 = vor.u32 %v2801_v52, %v2800_v25  ;;  %vm2572_vm9 = vcmp.lt.s32.totalorder %v13765_v20, 0 }
 0x277   :  { %v2573_v41 = vsub.s32 0, %v13765_v20  ;;  %vm2809_vm7 = vcmp.lt.s32.totalorder %v13767_v59, 1  ;;  %vm2812_vm3 = vcmp.lt.s32.totalorder %v13767_v59, 4  ;;  %v2715_v35 = vadd.s32 %v2714_v13, %v2705_v62 }
 0x278   :  { %v13797_v36 = vor.u32 %v2795_v23, %v2794_v8  ;;  %vm2811_vm11 = vcmp.lt.s32.totalorder %v13767_v59, 3  ;;  %v13800_v26 = vshll.u32 %v2785_v2, 8  ;;  %v13802_v7 = vadd.s32 %v2692_v29, %v2683_v10 }
 0x279   :  { %v17933_v25 = vshll.u32 %v13710_v1, 16  ;;  %v2818_v54 = vsel %vm2812_vm3, %v2805_v58, 920167782  ;;  %v2822_v47 = vsel %vm2812_vm3, %v2808_v48, 1326507024  ;;  %v2147_v23 = vmul.f32 %v2146_v15, %v13650_v61 }
 0x27a   :  { %v2139_v63 = vadd.f32 -0.4999988, %v2138_v60  ;;  %vm2810_vm2 = vcmp.lt.s32.totalorder %v13767_v59, 2  ;;  %v2821_v8 = vsel %vm2809_vm7, %v13789_v0, %v13791_v57  ;;  %v2284_v1 = vsel %vm2163_vm5, %v2283_v42, %v13719_v24 }
 0x27b   :  { %v13807_v49 = vadd.s32 %v13717_v38, %v17933_v25  ;;  %v2429_v38 = vsub.s32 4294967266, %v13745_v27  ;;  %v2574_v48 = vsel %vm2572_vm9, %v2573_v41, %v13765_v20  ;;  %v2823_v60 = vsel %vm2811_vm11, %v2805_v58, %v2822_v47 }
 0x27c   :  { %v2662_v15 = vsel %vm2656_vm14, %v2659_v55, %v2661_v51  ;;  %v2719_v2 = vadd.s32 1, %v2715_v35  ;;  %v2817_v33 = vsel %vm2809_vm7, %v13797_v36, %v13789_v0  ;;  %v2819_v24 = vsel %vm2811_vm11, %v13791_v57, %v2818_v54 }
 0x27d   :  { %vm2718_vm8 = vc.u32 %v13802_v7, %v13807_v49  ;;  %v2824_v42 = vsel %vm2810_vm2, %v2821_v8, %v2823_v60  ;;  %v2826_v58 = vand.u32 65535, %v13800_v26  ;;  %v2827_v9 = vshrl.u32 %v13800_v26, 16 }
 0x27e   :  { %v2140_v56 = vmul.f32 %v2139_v63, %v13650_v61  ;;  %v2148_v52 = vadd.f32 1.0, %v2147_v23  ;;  %v17934_v53 = vsub.s32 4, %v13371_v14  ;;  %v2575_v4 = vclz %v2574_v48 }
 0x27f   :  { %v2716_v62 = vmul.u32 %v13626_v11, %v2662_v15  ;;  %v2820_v13 = vsel %vm2810_vm2, %v2817_v33, %v2819_v24  ;;  %v2828_v10 = vand.u32 65535, %v2824_v42  ;;  %v2829_v29 = vshrl.u32 %v2824_v42, 16 }
 0x280   :  { %v2286_v3 = vsel %vm2163_vm5, %v17934_v53, %v13371_v14  ;;  %v13855_v55 = vsel %vm13778_vm10, %v17929_v6, %v2284_v1  ;;  %v2409_v61 = vadd.s32 %v13503_v12, %v13498_v34  ;;  %v2425_v51 = vsub.s32 32, %v13745_v27  ;;  %v17938_v53 = vld [vmem:[#allocation15_spill] sm:$0xff] }
 0x281   :  { %v2720_v41 = vsel %vm2718_vm8, %v2719_v2, %v2715_v35  ;;  %v2430_v14 = vadd.s32 127, %v2429_v38  ;;  %v2830_v25 = vmul.u32 %v2828_v10, %v2826_v58  ;;  %v13860_v54 = vmul.u32 %v2829_v29, %v2826_v58 }
 0x282   :  { %v13862_v11 = vmul.u32 %v2828_v10, %v2827_v9  ;;  %v13864_v47 = vadd.f32 1.0, %v2140_v56  ;;  %v13867_v63 = vmul.f32 %v2148_v52, %v13567_v31  ;;  %v2850_v23 = vand.u32 65535, %v2820_v13 }
 0x283   :  { %v2851_v8 = vshrl.u32 %v2820_v13, 16  ;;  %v13871_v1 = vmul.f32 %v13855_v55, %v13855_v55  ;;  %v10167_v34 = vadd.s32 4294967294, %v2575_v4  ;;  %v13873_v12 = vadd.s32 %v2720_v41, %v2716_v62 }
 0x284   :  { %17935 = vst [vmem:[#allocation86_spill] sm:$0xff] %v13864_v47  ;;  %v2834_v35 = vshll.u32 %v13860_v54, 16  ;;  %v2426_v38 = vshll.u32 %v13645_v45, %v13745_v27  ;;  %v2833_v48 = vmul.u32 %v2829_v29, %v2827_v9  ;;  %v2836_v60 = vshll.u32 %v13862_v11, 16 }
 0x285   :  { %17936 = vst [vmem:[#allocation87_spill] sm:$0xff] %v13867_v63  ;;  %v2853_v15 = vmul.u32 %v2851_v8, %v2826_v58  ;;  %v2427_v31 = vshrl.u32 %v2409_v61, %v2425_v51  ;;  %v2431_v2 = vshll.u32 %v2430_v14, 23  ;;  %v13880_v24 = vand.u32 3, %v13732_v50 }
 0x286   :  { %vm2838_vm14 = vc.u32 %v2830_v25, %v2834_v35  ;;  %v2840_v33 = vadd.s32 %v2834_v35, %v2830_v25  ;;  %v13884_v42 = vsel %vm13778_vm10, 0, %v2286_v3  ;;  %v13887_v52 = vmul.u32 %v2850_v23, %v2827_v9 }
 0x287   :  { %17937 = vst [vmem:[#allocation88_spill] sm:$0xff] %v13884_v42  ;;  %v2839_v56 = vsel %vm2838_vm14, 1, %v17619_v16  ;;  %v2290_v45 = vmul.f32 -0.001358992, %v13871_v1  ;;  %vm10168_vm6 = vcmp.lt.s32.totalorder %v10167_v34, 0  ;;  %v2722_v27 = vadd.s32 536870912, %v13873_v12 }
 0x288   :  { %v2934_v4 = vand.u32 2139095040, %v17938_v53  ;;  %v2841_v62 = vadd.s32 %v2839_v56, %v2833_v48  ;;  %vm2842_vm1 = vc.u32 %v2840_v33, %v2836_v60  ;;  %v2852_v13 = vmul.u32 %v2850_v23, %v2826_v58 }
 0x289   :  { %v2856_v10 = vshll.u32 %v2853_v15, 16  ;;  %v2428_v3 = vor.u32 %v2427_v31, %v2426_v38  ;;  %v2432_v61 = vor.u32 4788187, %v2431_v2  ;;  %vm2153_vm0 = vcmp.eq.s32.totalorder %v13880_v24, 0 }
 0x28a   :  { %vm2156_vm5 = vcmp.eq.s32.totalorder %v13880_v24, 2  ;;  %v13896_v51 = vsel %vm10168_vm6, 0, %v10167_v34  ;;  %v2843_v41 = vsel %vm2842_vm1, 1, %v17619_v16  ;;  %v2855_v14 = vmul.u32 %v2851_v8, %v2827_v9 }
 0x28b   :  { %v2858_v25 = vshll.u32 %v13887_v52, 16  ;;  %v2291_v35 = vadd.f32 0.041655596, %v2290_v45  ;;  %v2297_v58 = vmul.f32 -0.00019511016, %v13871_v1  ;;  %v13901_v23 = vshrl.u32 %v2722_v27, 30 }
 0x28c   :  { %v2835_v48 = vshrl.u32 %v13860_v54, 16  ;;  %v2845_v38 = vadd.s32 %v2843_v41, %v2841_v62  ;;  %vm2860_vm10 = vc.u32 %v2852_v13, %v2856_v10  ;;  %v2862_v60 = vadd.s32 %v2856_v10, %v2852_v13  ;;  %v17939_v62 = vld [vmem:[#allocation11_spill] sm:$0xff] }
 0x28d   :  { %v2935_v31 = vshrl.u32 %v2934_v4, 23  ;;  %v2433_v2 = vand.u32 2147483647, %v2432_v61  ;;  %v2435_v33 = vcvt.s32.f32 %v2428_v3  ;;  %v2583_v34 = vsub.s32 4294967266, %v13896_v51 }
 0x28e   :  { %v2861_v56 = vsel %vm2860_vm10, 1, %v17619_v16  ;;  %v2857_v9 = vshrl.u32 %v2853_v15, 16  ;;  %vm2864_vm9 = vc.u32 %v2862_v60, %v2858_v25  ;;  %v2724_v17 = vshll.u32 %v13901_v23, 30 }
 0x28f   :  { %v2863_v8 = vadd.s32 %v2861_v56, %v2855_v14  ;;  %v10175_v45 = vadd.s32 4294967169, %v2935_v31  ;;  %v2793_v27 = vshrl.u32 %v17623_v39, %v13742_v21  ;;  %v2814_v54 = vsel %vm2812_vm3, %v13791_v57, 2102212464 }
 0x290   :  { %v2865_v4 = vsel %vm2864_vm9, 1, %v17619_v16  ;;  %vm2317_vm8 = vcmp.lt.s32.totalorder %v17939_v62, 0  ;;  %v2837_v13 = vshrl.u32 %v13862_v11, 16  ;;  %v2846_v10 = vadd.s32 %v2845_v38, %v2835_v48 }
 0x291   :  { %v2867_v15 = vadd.s32 %v2865_v4, %v2863_v8  ;;  %v2941_v3 = vadd.s32 1, %v10175_v45  ;;  %v2298_v61 = vadd.f32 0.008332121, %v2297_v58  ;;  %v2436_v41 = vmul.f32 %v2435_v33, %v2433_v2 }
 0x292   :  { %v2563_v14 = vadd.s32 %v13624_v28, %v13629_v37  ;;  %v2859_v21 = vshrl.u32 %v13887_v52, 16  ;;  %v2579_v31 = vsub.s32 32, %v13896_v51  ;;  %v2584_v56 = vadd.s32 127, %v2583_v34 }
 0x293   :  { %v2868_v57 = vadd.s32 %v2867_v15, %v2857_v9  ;;  %vm2942_vm3 = vcmp.gt.s32.totalorder %v2941_v3, 0  ;;  %v2813_v29 = vsel %vm2809_vm7, %v2793_v27, %v13797_v36  ;;  %v2815_v11 = vsel %vm2811_vm11, %v13789_v0, %v2814_v54 }
 0x294   :  { %v17443_v58 = vand.u32 2147483647, %v17938_v53  ;;  %v2943_v48 = vsel %vm2942_vm3, %v2941_v3, 0  ;;  %v17940_v28 = vand.u32 2147483647, %v17939_v62  ;;  %v13933_v52 = vsub.s32 %v13873_v12, %v2724_v17 }
 0x295   :  { %v13935_v38 = vadd.s32 %v2846_v10, %v2837_v13  ;;  %v13937_v2 = vadd.s32 %v2862_v60, %v2858_v25  ;;  %v2945_v36 = vand.u32 31, %v2943_v48  ;;  %v17943_v33 = vxor.u32 2147483648, %v13867_v63 }
 0x296   :  { %vm13928_vm14 = vcmp.le.f32.partialorder %v17940_v28, 0.7853982  ;;  %v17944_v34 = vxor.u32 2147483648, %v13864_v47  ;;  %v13954_v12 = vand.u32 3, %v13884_v42  ;;  %v2869_v17 = vadd.s32 %v2868_v57, %v2859_v21 }
 0x297   :  { %v13944_v0 = vsel %vm2153_vm0, %v13864_v47, %v17943_v33  ;;  %v2292_v25 = vmul.f32 %v2291_v35, %v13871_v1  ;;  %v2299_v60 = vmul.f32 %v2298_v61, %v13871_v1  ;;  %v2437_v8 = vxor.u32 2147483648, %v2436_v41 }
 0x298   :  { %v13951_v9 = vsel %vm2156_vm5, %v17944_v34, %v13867_v63  ;;  %v13958_v45 = vsub.s32 32, %v2945_v36  ;;  %v2580_v27 = vshll.u32 %v13765_v20, %v13896_v51  ;;  %v2581_v54 = vshrl.u32 %v2563_v14, %v2579_v31 }
 0x299   :  { %v2585_v4 = vshll.u32 %v2584_v56, 23  ;;  %v2816_v13 = vsel %vm2810_vm2, %v2813_v29, %v2815_v11  ;;  %vm2726_vm7 = vcmp.lt.s32.totalorder %v13933_v52, 0  ;;  %v2727_v10 = vsub.s32 0, %v13933_v52 }
 0x29a   :  { %vm2872_vm11 = vc.u32 %v13935_v38, %v13937_v2  ;;  %v2938_v35 = vand.u32 8388607, %v17443_v58  ;;  %v2873_v15 = vadd.s32 1, %v2869_v17  ;;  %v2951_v3 = vshll.u32 %v17620_v22, %v2945_v36 }
 0x29b   :  { %v2954_v20 = vshll.u32 %v17895_v18, %v2945_v36  ;;  %v2957_v51 = vshll.u32 %v17630_v19, %v2945_v36  ;;  %v2952_v59 = vshrl.u32 %v17895_v18, %v13958_v45  ;;  %v2955_v29 = vshrl.u32 %v17630_v19, %v13958_v45 }
 0x29c   :  { %v2958_v61 = vshrl.u32 %v17631_v30, %v13958_v45  ;;  %v2960_v14 = vshll.u32 %v17631_v30, %v2945_v36  ;;  %v2293_v21 = vadd.f32 -0.4999988, %v2292_v25  ;;  %v2438_v31 = vsel %vm2317_vm8, %v2437_v8, %v2436_v41 }
 0x29d   :  { %v2582_v56 = vor.u32 %v2581_v54, %v2580_v27  ;;  %v13982_v57 = vshrl.u32 %v2943_v48, 5  ;;  %vm2152_vm2 = vcmp.lt.s32.totalorder %v13880_v24, 2  ;;  %v2586_v11 = vor.u32 4788187, %v2585_v4 }
 0x29e   :  { %v2870_v28 = vmul.u32 %v13800_v26, %v2816_v13  ;;  %v2939_v33 = vor.u32 8388608, %v2938_v35  ;;  %v2961_v34 = vshrl.u32 %v17632_v40, %v13958_v45  ;;  %v2728_v58 = vsel %vm2726_vm7, %v2727_v10, %v13933_v52 }
 0x29f   :  { %v2874_v41 = vsel %vm2872_vm11, %v2873_v15, %v2869_v17  ;;  %v2948_v48 = vshll.u32 %v17623_v39, %v2945_v36  ;;  %v2949_v25 = vshrl.u32 %v17620_v22, %v13958_v45  ;;  %v13997_v8 = vor.u32 %v2952_v59, %v2951_v3 }
 0x2a0   :  { %v13999_v26 = vor.u32 %v2955_v29, %v2954_v20  ;;  %v2959_v27 = vor.u32 %v2958_v61, %v2957_v51  ;;  %v2962_v54 = vor.u32 %v2961_v34, %v2960_v14  ;;  %v2300_v4 = vadd.f32 -0.16666654, %v2299_v60  ;;  %v17945_v60 = vld [vmem:[#allocation16_spill] sm:$0xff] }
 0x2a1   :  { %v14004_v13 = vsel %vm13928_vm14, %v17939_v62, %v2438_v31  ;;  %vm2963_vm6 = vcmp.lt.s32.totalorder %v13982_v57, 1  ;;  %vm2966_vm1 = vcmp.lt.s32.totalorder %v13982_v57, 4  ;;  %vm17452_vm0 = vweird.f32 %v17914_v32 }
 0x2a2   :  { %v2587_v36 = vand.u32 2147483647, %v2586_v11  ;;  %v2589_v17 = vcvt.s32.f32 %v2582_v56  ;;  %v2729_v10 = vclz %v2728_v58  ;;  %v14009_v35 = vshll.u32 %v2939_v33, 8 }
 0x2a3   :  { %v14011_v15 = vadd.s32 %v2874_v41, %v2870_v28  ;;  %v14013_v3 = vor.u32 %v2949_v25, %v2948_v48  ;;  %vm2965_vm5 = vcmp.lt.s32.totalorder %v13982_v57, 3  ;;  %v3088_v20 = vand.u32 2139095040, %v17945_v60 }
 0x2a4   :  { %vm2964_vm10 = vcmp.lt.s32.totalorder %v13982_v57, 2  ;;  %v2972_v51 = vsel %vm2966_vm1, %v2959_v27, 920167782  ;;  %v2975_v58 = vsel %vm2963_vm6, %v13997_v8, %v13999_v26  ;;  %v2976_v59 = vsel %vm2966_vm1, %v2962_v54, 1326507024 }
 0x2a5   :  { %v2294_v29 = vmul.f32 %v2293_v21, %v13871_v1  ;;  %v2301_v61 = vmul.f32 %v2300_v4, %v13871_v1  ;;  %v2439_v14 = vsub.s32 4, %v13589_v5  ;;  %v14031_v31 = vmul.f32 %v14004_v13, %v14004_v13 }
 0x2a6   :  { %v2590_v56 = vmul.f32 %v2589_v17, %v2587_v36  ;;  %v10170_v11 = vadd.s32 4294967294, %v2729_v10  ;;  %v2977_v28 = vsel %vm2965_vm5, %v2959_v27, %v2976_v59  ;;  %v2980_v33 = vand.u32 65535, %v14009_v35  ;;  %v17947_v10 = vld [vmem:[#allocation12_spill] sm:$0xff] }
 0x2a7   :  { %v2971_v21 = vsel %vm2963_vm6, %v14013_v3, %v13997_v8  ;;  %v2973_v1 = vsel %vm2965_vm5, %v13999_v26, %v2972_v51  ;;  %v2978_v34 = vsel %vm2964_vm10, %v2975_v58, %v2977_v28  ;;  %v3089_v41 = vshrl.u32 %v3088_v20, 23 }
 0x2a8   :  { %v2876_v48 = vadd.s32 536870912, %v14011_v15  ;;  %v2981_v25 = vshrl.u32 %v14009_v35, 16  ;;  %v2982_v27 = vand.u32 65535, %v2978_v34  ;;  %v2983_v54 = vshrl.u32 %v2978_v34, 16 }
 0x2a9   :  { %v2159_v4 = vsel %vm2152_vm2, %v13944_v0, %v13951_v9  ;;  %v14051_v36 = vadd.f32 1.0, %v2294_v29  ;;  %v2302_v17 = vadd.f32 1.0, %v2301_v61  ;;  %vm2471_vm9 = vcmp.lt.s32.totalorder %v17947_v10, 0 }
 0x2aa   :  { %v2440_v20 = vsel %vm2317_vm8, %v2439_v14, %v13589_v5  ;;  %v2444_v51 = vmul.f32 -0.001358992, %v14031_v31  ;;  %v2974_v58 = vsel %vm2964_vm10, %v2971_v21, %v2973_v1  ;;  %v14060_v59 = vmul.u32 %v2983_v54, %v2980_v33 }
 0x2ab   :  { %17946 = vst [vmem:[#allocation89_spill] sm:$0xff] %v14051_v36  ;;  %v2451_v28 = vmul.f32 -0.00019511016, %v14031_v31  ;;  %v2591_v24 = vxor.u32 2147483648, %v2590_v56  ;;  %vm10171_vm3 = vcmp.lt.s32.totalorder %v10170_v11, 0  ;;  %v10178_v0 = vadd.s32 4294967169, %v3089_v41 }
 0x2ac   :  { %v14063_v9 = vshrl.u32 %v2876_v48, 30  ;;  %v2984_v29 = vmul.u32 %v2982_v27, %v2980_v33  ;;  %v14065_v61 = vmul.u32 %v2982_v27, %v2981_v25  ;;  %v2988_v34 = vshll.u32 %v14060_v59, 16 }
 0x2ad   :  { %v14070_v5 = vsel %vm17452_vm0, nan, %v2159_v4  ;;  %vm2310_vm8 = vcmp.eq.s32.totalorder %v13954_v12, 2  ;;  %v3004_v14 = vand.u32 65535, %v2974_v58  ;;  %v3005_v21 = vshrl.u32 %v2974_v58, 16 }
 0x2ae   :  { %17948 = vst [vmem:[#allocation90_spill] sm:$0xff] %v14070_v5  ;;  %v14074_v1 = vmul.f32 %v2302_v17, %v13855_v55  ;;  %v14078_v41 = vsel %vm13928_vm14, 0, %v2440_v20  ;;  %v2445_v48 = vadd.f32 0.041655596, %v2444_v51  ;;  %v17951_v27 = vand.u32 2147483647, %v17947_v10 }
 0x2af   :  { %17950 = vst [vmem:[#allocation92_spill] sm:$0xff] %v14078_v41  ;;  %v2452_v32 = vadd.f32 0.008332121, %v2451_v28  ;;  %v2592_v58 = vsel %vm2471_vm9, %v2591_v24, %v2590_v56  ;;  %v14090_v55 = vsel %vm10171_vm3, 0, %v10170_v11  ;;  %v2878_v37 = vshll.u32 %v14063_v9, 30 }
 0x2b0   :  { %17949 = vst [vmem:[#allocation91_spill] sm:$0xff] %v14074_v1  ;;  %vm14082_vm7 = vcmp.le.f32.partialorder %v17951_v27, 0.7853982  ;;  %v2990_v17 = vshll.u32 %v14065_v61, 16  ;;  %vm2992_vm14 = vc.u32 %v2984_v29, %v2988_v34  ;;  %v3095_v20 = vadd.s32 1, %v10178_v0 }
 0x2b1   :  { %vm2307_vm11 = vcmp.eq.s32.totalorder %v13954_v12, 0  ;;  %v2994_v51 = vadd.s32 %v2988_v34, %v2984_v29  ;;  %v3006_v27 = vmul.u32 %v3004_v14, %v2980_v33  ;;  %v3007_v63 = vmul.u32 %v3005_v21, %v2980_v33 }
 0x2b2   :  { %v14095_v42 = vmul.u32 %v3004_v14, %v2981_v25  ;;  %v2446_v56 = vmul.f32 %v2445_v48, %v14031_v31  ;;  %v2737_v11 = vsub.s32 4294967266, %v14090_v55  ;;  %v2987_v24 = vmul.u32 %v2983_v54, %v2981_v25 }
 0x2b3   :  { %v2993_v4 = vsel %vm2992_vm14, 1, %v17619_v16  ;;  %v3009_v50 = vmul.u32 %v3005_v21, %v2981_v25  ;;  %v3010_v5 = vshll.u32 %v3007_v63, 16  ;;  %v2453_v53 = vmul.f32 %v2452_v32, %v14031_v31 }
 0x2b4   :  { %v3012_v0 = vshll.u32 %v14095_v42, 16  ;;  %v14106_v33 = vsel %vm14082_vm7, %v17947_v10, %v2592_v58  ;;  %v2717_v29 = vadd.s32 %v13807_v49, %v13802_v7  ;;  %vm2996_vm2 = vc.u32 %v2994_v51, %v2990_v17 }
 0x2b5   :  { %v14111_v34 = vsub.s32 %v14011_v15, %v2878_v37  ;;  %vm3014_vm3 = vc.u32 %v3006_v27, %v3010_v5  ;;  %v3016_v54 = vadd.s32 %v3010_v5, %v3006_v27  ;;  %vm3096_vm14 = vcmp.gt.s32.totalorder %v3095_v20, 0 }
 0x2b6   :  { %v2733_v25 = vsub.s32 32, %v14090_v55  ;;  %v2995_v14 = vadd.s32 %v2993_v4, %v2987_v24  ;;  %v3015_v32 = vsel %vm3014_vm3, 1, %v17619_v16  ;;  %v3097_v21 = vsel %vm3096_vm14, %v3095_v20, 0 }
 0x2b7   :  { %v2738_v48 = vadd.s32 127, %v2737_v11  ;;  %v2997_v58 = vsel %vm2996_vm2, 1, %v17619_v16  ;;  %v3017_v28 = vadd.s32 %v3015_v32, %v3009_v50  ;;  %vm3018_vm0 = vc.u32 %v3016_v54, %v3012_v0 }
 0x2b8   :  { %v17954_v7 = vxor.u32 2147483648, %v14051_v36  ;;  %v2447_v15 = vadd.f32 -0.4999988, %v2446_v56  ;;  %v3019_v5 = vsel %vm3018_vm0, 1, %v17619_v16  ;;  %v3099_v37 = vand.u32 31, %v3097_v21 }
 0x2b9   :  { %v2454_v4 = vadd.f32 -0.16666654, %v2453_v53  ;;  %v2881_v17 = vsub.s32 0, %v14111_v34  ;;  %v3011_v20 = vshrl.u32 %v3007_v63, 16  ;;  %v3021_v51 = vadd.s32 %v3019_v5, %v3017_v28 }
 0x2ba   :  { %v14121_v49 = vsel %vm2310_vm8, %v17954_v7, %v14074_v1  ;;  %v14127_v50 = vmul.f32 %v14106_v33, %v14106_v33  ;;  %vm2880_vm2 = vcmp.lt.s32.totalorder %v14111_v34, 0  ;;  %v2989_v27 = vshrl.u32 %v14060_v59, 16 }
 0x2bb   :  { %v2999_v11 = vadd.s32 %v2997_v58, %v2995_v14  ;;  %v2734_v56 = vshll.u32 %v13933_v52, %v14090_v55  ;;  %v2735_v24 = vshrl.u32 %v2717_v29, %v2733_v25  ;;  %v2739_v32 = vshll.u32 %v2738_v48, 23 }
 0x2bc   :  { %v2947_v53 = vshrl.u32 %v17623_v39, %v13958_v45  ;;  %v17955_v63 = vxor.u32 2147483648, %v14074_v1  ;;  %v2448_v7 = vmul.f32 %v2447_v15, %v14031_v31  ;;  %v14144_v59 = vand.u32 3, %v14078_v41 }
 0x2bd   :  { %v14146_v14 = vsub.s32 32, %v3099_v37  ;;  %v2882_v52 = vsel %vm2880_vm2, %v2881_v17, %v14111_v34  ;;  %v2968_v45 = vsel %vm2966_vm1, %v13999_v26, 2102212464  ;;  %v3013_v55 = vshrl.u32 %v14095_v42, 16 }
 0x2be   :  { %v14140_v28 = vsel %vm2307_vm11, %v14051_v36, %v17955_v63  ;;  %v3022_v29 = vadd.s32 %v3021_v51, %v3011_v20  ;;  %v2455_v25 = vmul.f32 %v2454_v4, %v14031_v31  ;;  %v2605_v48 = vmul.f32 -0.00019511016, %v14127_v50 }
 0x2bf   :  { %v2991_v58 = vshrl.u32 %v14065_v61, 16  ;;  %v3000_v15 = vadd.s32 %v2999_v11, %v2989_v27  ;;  %v2736_v5 = vor.u32 %v2735_v24, %v2734_v56  ;;  %v2740_v63 = vor.u32 4788187, %v2739_v32 }
 0x2c0   :  { %v2967_v17 = vsel %vm2963_vm6, %v2947_v53, %v14013_v3  ;;  %v17460_v36 = vand.u32 2147483647, %v17945_v60  ;;  %v2883_v1 = vclz %v2882_v52  ;;  %v2969_v42 = vsel %vm2965_vm5, %v13997_v8, %v2968_v45 }
 0x2c1   :  { %v3111_v26 = vshll.u32 %v17630_v19, %v3099_v37  ;;  %v3112_v31 = vshrl.u32 %v17631_v30, %v14146_v14  ;;  %v3023_v61 = vadd.s32 %v3022_v29, %v3013_v55  ;;  %v14166_v4 = vshrl.u32 %v3097_v21, 5 }
 0x2c2   :  { %v3114_v20 = vshll.u32 %v17631_v30, %v3099_v37  ;;  %v3115_v3 = vshrl.u32 %v17632_v40, %v14146_v14  ;;  %vm2306_vm6 = vcmp.lt.s32.totalorder %v13954_v12, 2  ;;  %v14172_v51 = vadd.s32 %v3000_v15, %v2991_v58 }
 0x2c3   :  { %v14174_v27 = vadd.s32 %v3016_v54, %v3012_v0  ;;  %v3102_v8 = vshll.u32 %v17623_v39, %v3099_v37  ;;  %v3105_v11 = vshll.u32 %v17620_v22, %v3099_v37  ;;  %v3103_v56 = vshrl.u32 %v17620_v22, %v14146_v14 }
 0x2c4   :  { %v3106_v21 = vshrl.u32 %v17895_v18, %v14146_v14  ;;  %v3108_v24 = vshll.u32 %v17895_v18, %v3099_v37  ;;  %v3109_v32 = vshrl.u32 %v17630_v19, %v14146_v14  ;;  %v2456_v53 = vadd.f32 1.0, %v2455_v25 }
 0x2c5   :  { %v2970_v0 = vsel %vm2964_vm10, %v2967_v17, %v2969_v42  ;;  %v3092_v54 = vand.u32 8388607, %v17460_v36  ;;  %v3113_v52 = vor.u32 %v3112_v31, %v3111_v26  ;;  %v10173_v45 = vadd.s32 4294967294, %v2883_v1 }
 0x2c6   :  { %v3027_v55 = vadd.s32 1, %v3023_v61  ;;  %v3116_v29 = vor.u32 %v3115_v3, %v3114_v20  ;;  %vm3120_vm1 = vcmp.lt.s32.totalorder %v14166_v4, 4  ;;  %v2598_v58 = vmul.f32 -0.001358992, %v14127_v50 }
 0x2c7   :  { %v2606_v15 = vadd.f32 0.008332121, %v2605_v48  ;;  %v2743_v37 = vcvt.s32.f32 %v2736_v5  ;;  %vm3026_vm0 = vc.u32 %v14172_v51, %v14174_v27  ;;  %v2741_v25 = vand.u32 2147483647, %v2740_v63 }
 0x2c8   :  { %v14193_v41 = vor.u32 %v3103_v56, %v3102_v8  ;;  %v14195_v57 = vor.u32 %v3106_v21, %v3105_v11  ;;  %v14197_v17 = vor.u32 %v3109_v32, %v3108_v24  ;;  %v3024_v1 = vmul.u32 %v14009_v35, %v2970_v0 }
 0x2c9   :  { %vm3117_vm5 = vcmp.lt.s32.totalorder %v14166_v4, 1  ;;  %vm3119_vm10 = vcmp.lt.s32.totalorder %v14166_v4, 3  ;;  %v3126_v48 = vsel %vm3120_vm1, %v3113_v52, 920167782  ;;  %vm10174_vm8 = vcmp.lt.s32.totalorder %v10173_v45, 0 }
 0x2ca   :  { %v3028_v5 = vsel %vm3026_vm0, %v3027_v55, %v3023_v61  ;;  %v3093_v42 = vor.u32 8388608, %v3092_v54  ;;  %v3130_v63 = vsel %vm3120_vm1, %v3116_v29, 1326507024  ;;  %v14206_v26 = vadd.f32 1.0, %v2448_v7 }
 0x2cb   :  { %v14209_v31 = vmul.f32 %v2456_v53, %v14004_v13  ;;  %v2599_v20 = vadd.f32 0.041655596, %v2598_v58  ;;  %v2607_v35 = vmul.f32 %v2606_v15, %v14127_v50  ;;  %vm17472_vm11 = vweird.f32 %v17929_v6 }
 0x2cc   :  { %17956 = vst [vmem:[#allocation93_spill] sm:$0xff] %v14206_v26  ;;  %v2744_v3 = vmul.f32 %v2743_v37, %v2741_v25  ;;  %vm3118_vm3 = vcmp.lt.s32.totalorder %v14166_v4, 2  ;;  %v3125_v61 = vsel %vm3117_vm5, %v14193_v41, %v14195_v57  ;;  %v3127_v7 = vsel %vm3119_vm10, %v14197_v17, %v3126_v48 }
 0x2cd   :  { %17957 = vst [vmem:[#allocation94_spill] sm:$0xff] %v14209_v31  ;;  %v2886_v8 = vsel %vm10174_vm8, 0, %v10173_v45  ;;  %v14221_v13 = vadd.s32 %v3028_v5, %v3024_v1  ;;  %v3129_v11 = vsel %vm3117_vm5, %v14195_v57, %v14197_v17  ;;  %v3131_v56 = vsel %vm3119_vm10, %v3113_v52, %v3130_v63 }
 0x2ce   :  { %v2313_v21 = vsel %vm2306_vm6, %v14140_v28, %v14121_v49  ;;  %vm2460_vm14 = vcmp.lt.s32.totalorder %v14144_v59, 2  ;;  %vm2464_vm2 = vcmp.eq.s32.totalorder %v14144_v59, 2  ;;  %v14235_v24 = vshll.u32 %v3093_v42, 8 }
 0x2cf   :  { %v17459_v32 = vxor.u32 2147483648, %v14209_v31  ;;  %v17458_v53 = vxor.u32 2147483648, %v14206_v26  ;;  %v2593_v0 = vsub.s32 4, %v13723_v46  ;;  %v14242_v54 = vsel %vm3118_vm3, %v3125_v61, %v3127_v7  ;;  %v17961_v7 = vld [vmem:[#allocation17_spill] sm:$0xff] }
 0x2d0   :  { %v2600_v52 = vmul.f32 %v2599_v20, %v14127_v50  ;;  %v2608_v12 = vadd.f32 -0.16666654, %v2607_v35  ;;  %v2891_v49 = vsub.s32 4294967266, %v2886_v8  ;;  %v14247_v28 = vsel %vm3118_vm3, %v3129_v11, %v3131_v56 }
 0x2d1   :  { %vm2461_vm6 = vcmp.eq.s32.totalorder %v14144_v59, 0  ;;  %vm2625_vm0 = vcmp.lt.s32.totalorder %v17913_v43, 0  ;;  %v2745_v45 = vxor.u32 2147483648, %v2744_v3  ;;  %v3030_v55 = vadd.s32 536870912, %v14221_v13 }
 0x2d2   :  { %v2871_v29 = vadd.s32 %v13937_v2, %v13935_v38  ;;  %v2887_v58 = vsub.s32 32, %v2886_v8  ;;  %v3134_v15 = vand.u32 65535, %v14235_v24  ;;  %v3159_v37 = vshrl.u32 %v14242_v54, 16 }
 0x2d3   :  { %v2466_v25 = vsel %vm2464_vm2, %v17458_v53, %v14209_v31  ;;  %v2594_v1 = vsel %vm2471_vm9, %v2593_v0, %v13723_v46  ;;  %v17958_v48 = vand.u32 2147483647, %v17913_v43  ;;  %v3137_v38 = vshrl.u32 %v14247_v28, 16 }
 0x2d4   :  { %v2463_v2 = vsel %vm2461_vm6, %v14206_v26, %v17459_v32  ;;  %v2601_v42 = vadd.f32 -0.4999988, %v2600_v52  ;;  %v2609_v63 = vmul.f32 %v2608_v12, %v14127_v50  ;;  %v2892_v20 = vadd.s32 127, %v2891_v49 }
 0x2d5   :  { %vm14266_vm8 = vcmp.le.f32.partialorder %v17958_v48, 0.7853982  ;;  %v2746_v35 = vsel %vm2625_vm0, %v2745_v45, %v2744_v3  ;;  %v2888_v46 = vshll.u32 %v14111_v34, %v2886_v8  ;;  %v14278_v61 = vshrl.u32 %v3030_v55, 30 }
 0x2d6   :  { %v3242_v11 = vand.u32 2139095040, %v17961_v7  ;;  %v2889_v56 = vshrl.u32 %v2871_v29, %v2887_v58  ;;  %v3135_v0 = vshrl.u32 %v14235_v24, 16  ;;  %v3158_v48 = vand.u32 65535, %v14242_v54 }
 0x2d7   :  { %v14283_v53 = vmul.u32 %v3159_v37, %v3134_v15  ;;  %v14287_v52 = vsel %vm17472_vm11, nan, %v2313_v21  ;;  %vm17461_vm9 = vweird.f32 %v17939_v62  ;;  %v3136_v3 = vand.u32 65535, %v14247_v28 }
 0x2d8   :  { %17962 = vst [vmem:[#allocation95_spill] sm:$0xff] %v14287_v52  ;;  %v14291_v34 = vmul.u32 %v3137_v38, %v3134_v15  ;;  %v2467_v8 = vsel %vm2460_vm14, %v2463_v2, %v2466_v25  ;;  %v14297_v12 = vsel %vm14082_vm7, 0, %v2594_v1  ;;  %v2602_v54 = vmul.f32 %v2601_v42, %v14127_v50 }
 0x2d9   :  { %17963 = vst [vmem:[#allocation96_spill] sm:$0xff] %v14297_v12  ;;  %v2893_v49 = vshll.u32 %v2892_v20, 23  ;;  %v2610_v45 = vadd.f32 1.0, %v2609_v63  ;;  %v14303_v21 = vsel %vm14266_vm8, %v17913_v43, %v2746_v35  ;;  %v3032_v28 = vshll.u32 %v14278_v61, 30 }
 0x2da   :  { %v3243_v55 = vshrl.u32 %v3242_v11, 23  ;;  %v2890_v29 = vor.u32 %v2889_v56, %v2888_v46  ;;  %v3160_v58 = vmul.u32 %v3158_v48, %v3134_v15  ;;  %v14306_v59 = vmul.u32 %v3158_v48, %v3135_v0 }
 0x2db   :  { %v3164_v47 = vshll.u32 %v14283_v53, 16  ;;  %v3138_v25 = vmul.u32 %v3136_v3, %v3134_v15  ;;  %v14309_v1 = vmul.u32 %v3136_v3, %v3135_v0  ;;  %v3142_v50 = vshll.u32 %v14291_v34, 16 }
 0x2dc   :  { %v10181_v2 = vadd.s32 4294967169, %v3243_v55  ;;  %v14314_v42 = vsel %vm17461_vm9, nan, %v2467_v8  ;;  %v14316_v63 = vadd.f32 1.0, %v2602_v54  ;;  %v14319_v20 = vand.u32 3, %v14297_v12 }
 0x2dd   :  { %17964 = vst [vmem:[#allocation97_spill] sm:$0xff] %v14314_v42  ;;  %v2894_v35 = vor.u32 4788187, %v2893_v49  ;;  %v14322_v46 = vmul.f32 %v2610_v45, %v14106_v33  ;;  %v14326_v15 = vmul.f32 %v14303_v21, %v14303_v21  ;;  %v14329_v11 = vsub.s32 %v14221_v13, %v3032_v28 }
 0x2de   :  { %17965 = vst [vmem:[#allocation98_spill] sm:$0xff] %v14316_v63  ;;  %v3249_v56 = vadd.s32 1, %v10181_v2  ;;  %v2897_v48 = vcvt.s32.f32 %v2890_v29  ;;  %v17462_v3 = vshll.u32 %v14306_v59, 16  ;;  %vm3168_vm7 = vc.u32 %v3160_v58, %v3164_v47 }
 0x2df   :  { %17966 = vst [vmem:[#allocation99_spill] sm:$0xff] %v14322_v46  ;;  %v14332_v8 = vadd.s32 %v3164_v47, %v3160_v58  ;;  %v3144_v54 = vshll.u32 %v14309_v1, 16  ;;  %vm3146_vm14 = vc.u32 %v3138_v25, %v3142_v50  ;;  %v3148_v49 = vadd.s32 %v3142_v50, %v3138_v25 }
 0x2e0   :  { %vm3250_vm2 = vcmp.gt.s32.totalorder %v3249_v56, 0  ;;  %v2895_v33 = vand.u32 2147483647, %v2894_v35  ;;  %v3163_v45 = vmul.u32 %v3159_v37, %v3135_v0  ;;  %v17464_v55 = vand.u32 2147483647, %v17961_v7 }
 0x2e1   :  { %v3251_v32 = vsel %vm3250_vm2, %v3249_v56, 0  ;;  %v3035_v13 = vsub.s32 0, %v14329_v11  ;;  %v3141_v28 = vmul.u32 %v3137_v38, %v3135_v0  ;;  %v3169_v29 = vsel %vm3168_vm7, 1, %v17619_v16 }
 0x2e2   :  { %v3253_v2 = vand.u32 31, %v3251_v32  ;;  %vm3034_vm6 = vcmp.lt.s32.totalorder %v14329_v11, 0  ;;  %v3147_v58 = vsel %vm3146_vm14, 1, %v17619_v16  ;;  %vm3172_vm9 = vc.u32 %v14332_v8, %v17462_v3 }
 0x2e3   :  { %vm3150_vm2 = vc.u32 %v3148_v49, %v3144_v54  ;;  %v14349_v38 = vmul.f32 -0.001358992, %v14326_v15  ;;  %v14352_v0 = vmul.f32 -0.00019511016, %v14326_v15  ;;  %v2898_v50 = vmul.f32 %v2897_v48, %v2895_v33 }
 0x2e4   :  { %v14346_v25 = vsub.s32 32, %v3253_v2  ;;  %v3171_v35 = vadd.s32 %v3169_v29, %v3163_v45  ;;  %vm2779_vm7 = vcmp.lt.s32.totalorder %v17921_v44, 0  ;;  %v3036_v56 = vsel %vm3034_vm6, %v3035_v13, %v14329_v11 }
 0x2e5   :  { %v3149_v36 = vadd.s32 %v3147_v58, %v3141_v28  ;;  %v3173_v37 = vsel %vm3172_vm9, 1, %v17619_v16  ;;  %v3246_v54 = vand.u32 8388607, %v17464_v55  ;;  %v3151_v49 = vsel %vm3150_vm2, 1, %v17619_v16 }
 0x2e6   :  { %v3259_v47 = vshll.u32 %v17620_v22, %v3253_v2  ;;  %v3262_v3 = vshll.u32 %v17895_v18, %v3253_v2  ;;  %v3265_v62 = vshll.u32 %v17630_v19, %v3253_v2  ;;  %v3260_v48 = vshrl.u32 %v17895_v18, %v14346_v25 }
 0x2e7   :  { %v3263_v33 = vshrl.u32 %v17630_v19, %v14346_v25  ;;  %v3266_v45 = vshrl.u32 %v17631_v30, %v14346_v25  ;;  %v3268_v13 = vshll.u32 %v17631_v30, %v3253_v2  ;;  %v2899_v28 = vxor.u32 2147483648, %v2898_v50 }
 0x2e8   :  { %v3165_v29 = vshrl.u32 %v14283_v53, 16  ;;  %v3175_v58 = vadd.s32 %v3173_v37, %v3171_v35  ;;  %v14371_v55 = vshrl.u32 %v3251_v32, 5  ;;  %vm2618_vm9 = vcmp.eq.s32.totalorder %v14319_v20, 2 }
 0x2e9   :  { %v3143_v26 = vshrl.u32 %v14291_v34, 16  ;;  %v3153_v31 = vadd.s32 %v3151_v49, %v3149_v36  ;;  %v3247_v6 = vor.u32 8388608, %v3246_v54  ;;  %v3269_v12 = vshrl.u32 %v17632_v40, %v14346_v25 }
 0x2ea   :  { %v3037_v42 = vclz %v3036_v56  ;;  %v3101_v52 = vshrl.u32 %v17623_v39, %v14146_v14  ;;  %v3256_v7 = vshll.u32 %v17623_v39, %v3253_v2  ;;  %v3257_v53 = vshrl.u32 %v17620_v22, %v14346_v25 }
 0x2eb   :  { %vm2615_vm14 = vcmp.eq.s32.totalorder %v14319_v20, 0  ;;  %v17967_v32 = vand.u32 2147483647, %v17921_v44  ;;  %v14389_v36 = vor.u32 %v3260_v48, %v3259_v47  ;;  %v14391_v37 = vor.u32 %v3263_v33, %v3262_v3 }
 0x2ec   :  { %v3267_v35 = vor.u32 %v3266_v45, %v3265_v62  ;;  %v3270_v56 = vor.u32 %v3269_v12, %v3268_v13  ;;  %v3167_v14 = vshrl.u32 %v14306_v59, 16  ;;  %v3176_v2 = vadd.s32 %v3175_v58, %v3165_v29  ;;  %v17970_v62 = vld [vmem:[#allocation18_spill] sm:$0xff] }
 0x2ed   :  { %vm14385_vm6 = vcmp.le.f32.partialorder %v17967_v32, 0.7853982  ;;  %vm3271_vm2 = vcmp.lt.s32.totalorder %v14371_v55, 1  ;;  %vm3274_vm11 = vcmp.lt.s32.totalorder %v14371_v55, 4  ;;  %v3122_v54 = vsel %vm3120_vm1, %v14197_v17, 2102212464 }
 0x2ee   :  { %v3145_v49 = vshrl.u32 %v14309_v1, 16  ;;  %v3154_v32 = vadd.s32 %v3153_v31, %v3143_v26  ;;  %v14400_v47 = vshll.u32 %v3247_v6, 8  ;;  %v10176_v3 = vadd.s32 4294967294, %v3037_v42 }
 0x2ef   :  { %v14402_v48 = vor.u32 %v3257_v53, %v3256_v7  ;;  %vm3273_vm13 = vcmp.lt.s32.totalorder %v14371_v55, 3  ;;  %v3396_v12 = vand.u32 2139095040, %v17970_v62  ;;  %vm2614_vm12 = vcmp.lt.s32.totalorder %v14319_v20, 2 }
 0x2f0   :  { %vm3272_vm4 = vcmp.lt.s32.totalorder %v14371_v55, 2  ;;  %v3280_v33 = vsel %vm3274_vm11, %v3267_v35, 920167782  ;;  %v3283_v6 = vsel %vm3271_vm2, %v14389_v36, %v14391_v37  ;;  %v3284_v17 = vsel %vm3274_vm11, %v3270_v56, 1326507024 }
 0x2f1   :  { %v2900_v26 = vsel %vm2779_vm7, %v2899_v28, %v2898_v50  ;;  %v3121_v31 = vsel %vm3117_vm5, %v3101_v52, %v14193_v41  ;;  %v3123_v7 = vsel %vm3119_vm10, %v14195_v57, %v3122_v54  ;;  %v3177_v1 = vadd.s32 %v3176_v2, %v3167_v14 }
 0x2f2   :  { %v14424_v42 = vadd.s32 %v3154_v32, %v3145_v49  ;;  %v17971_v45 = vshll.u32 %v14306_v59, 16  ;;  %v3285_v29 = vsel %vm3273_vm13, %v3267_v35, %v3284_v17  ;;  %v3288_v50 = vand.u32 65535, %v14400_v47 }
 0x2f3   :  { %vm10177_vm1 = vcmp.lt.s32.totalorder %v10176_v3, 0  ;;  %v3279_v41 = vsel %vm3271_vm2, %v14402_v48, %v14389_v36  ;;  %v3281_v57 = vsel %vm3273_vm13, %v14391_v37, %v3280_v33  ;;  %v3286_v52 = vsel %vm3272_vm4, %v3283_v6, %v3285_v29 }
 0x2f4   :  { %v14429_v13 = vadd.s32 %v14332_v8, %v17971_v45  ;;  %v3289_v59 = vshrl.u32 %v14400_v47, 16  ;;  %v3290_v8 = vand.u32 65535, %v3286_v52  ;;  %v3291_v28 = vshrl.u32 %v3286_v52, 16 }
 0x2f5   :  { %v3397_v58 = vshrl.u32 %v3396_v12, 23  ;;  %v17972_v53 = vxor.u32 2147483648, %v14316_v63  ;;  %v17973_v56 = vsub.s32 4, %v13901_v23  ;;  %v3124_v2 = vsel %vm3118_vm3, %v3121_v31, %v3123_v7 }
 0x2f6   :  { %v3181_v54 = vadd.s32 1, %v3177_v1  ;;  %v2760_v49 = vadd.f32 0.008332121, %v14352_v0  ;;  %vm3180_vm5 = vc.u32 %v14424_v42, %v14429_v13  ;;  %v3282_v32 = vsel %vm3272_vm4, %v3279_v41, %v3281_v57 }
 0x2f7   :  { %v2620_v35 = vsel %vm2618_vm9, %v17972_v53, %v14322_v46  ;;  %v2748_v14 = vsel %vm2625_vm0, %v17973_v56, %v13901_v23  ;;  %v14461_v12 = vmul.u32 %v3291_v28, %v3288_v50  ;;  %v17974_v33 = vxor.u32 2147483648, %v14322_v46 }
 0x2f8   :  { %v2753_v4 = vadd.f32 0.041655596, %v14349_v38  ;;  %v14472_v0 = vsel %vm14385_vm6, %v17921_v44, %v2900_v26  ;;  %v3040_v6 = vsel %vm10177_vm1, 0, %v10176_v3  ;;  %v3178_v17 = vmul.u32 %v14235_v24, %v3124_v2 }
 0x2f9   :  { %v2617_v23 = vsel %vm2615_vm14, %v14316_v63, %v17974_v33  ;;  %v14476_v31 = vmul.u32 %v3290_v8, %v3289_v59  ;;  %v3312_v7 = vand.u32 65535, %v3282_v32  ;;  %v10184_v45 = vadd.s32 4294967169, %v3397_v58 }
 0x2fa   :  { %v3182_v29 = vsel %vm3180_vm5, %v3181_v54, %v3177_v1  ;;  %v3292_v41 = vmul.u32 %v3290_v8, %v3288_v50  ;;  %v3296_v57 = vshll.u32 %v14461_v12, 16  ;;  %v3313_v52 = vshrl.u32 %v3282_v32, 16 }
 0x2fb   :  { %v2761_v38 = vmul.f32 %v2760_v49, %v14326_v15  ;;  %v3025_v53 = vadd.s32 %v14174_v27, %v14172_v51  ;;  %v3041_v26 = vsub.s32 32, %v3040_v6  ;;  %v3045_v56 = vsub.s32 4294967266, %v3040_v6 }
 0x2fc   :  { %v14484_v3 = vsel %vm2614_vm12, %v2617_v23, %v2620_v35  ;;  %v14488_v24 = vsel %vm14266_vm8, 0, %v2748_v14  ;;  %v2754_v1 = vmul.f32 %v2753_v4, %v14326_v15  ;;  %v14493_v8 = vmul.f32 %v14472_v0, %v14472_v0 }
 0x2fd   :  { %17975 = vst [vmem:[#allocation100_spill] sm:$0xff] %v14488_v24  ;;  %v14495_v58 = vadd.s32 %v3182_v29, %v3178_v17  ;;  %v3298_v51 = vshll.u32 %v14476_v31, 16  ;;  %v3314_v27 = vmul.u32 %v3312_v7, %v3288_v50  ;;  %v3403_v2 = vadd.s32 1, %v10184_v45 }
 0x2fe   :  { %vm3300_vm10 = vc.u32 %v3292_v41, %v3296_v57  ;;  %v3302_v20 = vadd.s32 %v3296_v57, %v3292_v41  ;;  %v3315_v35 = vmul.u32 %v3313_v52, %v3288_v50  ;;  %v14498_v54 = vmul.u32 %v3312_v7, %v3289_v59 }
 0x2ff   :  { %v2762_v5 = vadd.f32 -0.16666654, %v2761_v38  ;;  %v3042_v14 = vshll.u32 %v14329_v11, %v3040_v6  ;;  %v3043_v49 = vshrl.u32 %v3025_v53, %v3041_v26  ;;  %v3046_v32 = vadd.s32 127, %v3045_v56 }
 0x300   :  { %v3295_v33 = vmul.u32 %v3291_v28, %v3289_v59  ;;  %v3317_v23 = vmul.u32 %v3313_v52, %v3289_v59  ;;  %v3318_v4 = vshll.u32 %v3315_v35, 16  ;;  %v3320_v17 = vshll.u32 %v14498_v54, 16 }
 0x301   :  { %v2906_v29 = vmul.f32 -0.001358992, %v14493_v8  ;;  %v2913_v63 = vmul.f32 -0.00019511016, %v14493_v8  ;;  %v3184_v45 = vadd.s32 536870912, %v14495_v58  ;;  %v3301_v50 = vsel %vm3300_vm10, 1, %v17619_v16 }
 0x302   :  { %vm3304_vm12 = vc.u32 %v3302_v20, %v3298_v51  ;;  %vm3322_vm3 = vc.u32 %v3314_v27, %v3318_v4  ;;  %v3324_v7 = vadd.s32 %v3318_v4, %v3314_v27  ;;  %vm3404_vm0 = vcmp.gt.s32.totalorder %v3403_v2, 0 }
 0x303   :  { %v3044_v11 = vor.u32 %v3043_v49, %v3042_v14  ;;  %v3047_v6 = vshll.u32 %v3046_v32, 23  ;;  %v3323_v28 = vsel %vm3322_vm3, 1, %v17619_v16  ;;  %v3405_v59 = vsel %vm3404_vm0, %v3403_v2, 0 }
 0x304   :  { %v3303_v41 = vadd.s32 %v3301_v50, %v3295_v33  ;;  %v3325_v57 = vadd.s32 %v3323_v28, %v3317_v23  ;;  %vm3326_vm8 = vc.u32 %v3324_v7, %v3320_v17  ;;  %v17478_v52 = vand.u32 2147483647, %v17970_v62 }
 0x305   :  { %v14508_v38 = vshrl.u32 %v3184_v45, 30  ;;  %v3305_v53 = vsel %vm3304_vm12, 1, %v17619_v16  ;;  %v3327_v26 = vsel %vm3326_vm8, 1, %v17619_v16  ;;  %v3407_v56 = vand.u32 31, %v3405_v59 }
 0x306   :  { %v2755_v51 = vadd.f32 -0.4999988, %v2754_v1  ;;  %v2907_v27 = vadd.f32 0.041655596, %v2906_v29  ;;  %v3319_v20 = vshrl.u32 %v3315_v35, 16  ;;  %v3329_v14 = vadd.s32 %v3327_v26, %v3325_v57 }
 0x307   :  { %17976 = vst [vmem:[#allocation101_spill] sm:$0xff] %v14508_v38  ;;  %v14513_v49 = vmul.f32 %v2762_v5, %v14326_v15  ;;  %v2914_v2 = vadd.f32 0.008332121, %v2913_v63  ;;  %v3048_v32 = vor.u32 4788187, %v3047_v6  ;;  %v14515_v33 = vsub.s32 32, %v3407_v56 }
 0x308   :  { %v3051_v23 = vcvt.s32.f32 %v3044_v11  ;;  %v3297_v4 = vshrl.u32 %v14461_v12, 16  ;;  %v3307_v45 = vadd.s32 %v3305_v53, %v3303_v41  ;;  %v3400_v50 = vand.u32 8388607, %v17478_v52 }
 0x309   :  { %v3186_v28 = vshll.u32 %v14508_v38, 30  ;;  %v3255_v1 = vshrl.u32 %v17623_v39, %v14346_v25  ;;  %v3276_v35 = vsel %vm3274_vm11, %v14391_v37, 2102212464  ;;  %v3299_v63 = vshrl.u32 %v14476_v31, 16 }
 0x30a   :  { %v3321_v5 = vshrl.u32 %v14498_v54, 16  ;;  %v3330_v29 = vadd.s32 %v3329_v14, %v3319_v20  ;;  %v3413_v12 = vshll.u32 %v17620_v22, %v3407_v56  ;;  %v3419_v11 = vshll.u32 %v17630_v19, %v3407_v56 }
 0x30b   :  { %v3414_v6 = vshrl.u32 %v17895_v18, %v14515_v33  ;;  %v3416_v41 = vshll.u32 %v17895_v18, %v3407_v56  ;;  %v3417_v25 = vshrl.u32 %v17630_v19, %v14515_v33  ;;  %v3420_v37 = vshrl.u32 %v17631_v30, %v14515_v33 }
 0x30c   :  { %v3308_v57 = vadd.s32 %v3307_v45, %v3297_v4  ;;  %v14537_v31 = vshrl.u32 %v3405_v59, 5  ;;  %v3422_v54 = vshll.u32 %v17631_v30, %v3407_v56  ;;  %v3423_v53 = vshrl.u32 %v17632_v40, %v14515_v33 }
 0x30d   :  { %v3049_v26 = vand.u32 2147483647, %v3048_v32  ;;  %v14543_v20 = vsub.s32 %v14495_v58, %v3186_v28  ;;  %v3410_v14 = vshll.u32 %v17623_v39, %v3407_v56  ;;  %v3411_v52 = vshrl.u32 %v17620_v22, %v14515_v33 }
 0x30e   :  { %v3275_v4 = vsel %vm3271_vm2, %v3255_v1, %v14402_v48  ;;  %v3401_v59 = vor.u32 8388608, %v3400_v50  ;;  %v3421_v45 = vor.u32 %v3420_v37, %v3419_v11  ;;  %v3424_v46 = vor.u32 %v3423_v53, %v3422_v54 }
 0x30f   :  { %v3277_v62 = vsel %vm3273_vm13, %v14389_v36, %v3276_v35  ;;  %v3331_v32 = vadd.s32 %v3330_v29, %v3321_v5  ;;  %v14554_v38 = vor.u32 %v3414_v6, %v3413_v12  ;;  %v14556_v58 = vor.u32 %v3417_v25, %v3416_v41  ;;  %v17977_v6 = vld [vmem:[#allocation15_spill] sm:$0xff] }
 0x310   :  { %v14558_v56 = vadd.s32 %v3308_v57, %v3299_v63  ;;  %v14560_v28 = vadd.s32 %v3324_v7, %v3320_v17  ;;  %vm3425_vm11 = vcmp.lt.s32.totalorder %v14537_v31, 1  ;;  %vm3428_vm9 = vcmp.lt.s32.totalorder %v14537_v31, 4 }
 0x311   :  { %vm2612_vm14 = vweird.f32 %v17947_v10  ;;  %v3052_v48 = vmul.f32 %v3051_v23, %v3049_v26  ;;  %vm3188_vm2 = vcmp.lt.s32.totalorder %v14543_v20, 0  ;;  %v14566_v50 = vor.u32 %v3411_v52, %v3410_v14 }
 0x312   :  { %vm3427_vm13 = vcmp.lt.s32.totalorder %v14537_v31, 3  ;;  %v3189_v36 = vsub.s32 0, %v14543_v20  ;;  %v3278_v1 = vsel %vm3272_vm4, %v3275_v4, %v3277_v62  ;;  %v3434_v17 = vsel %vm3428_vm9, %v3421_v45, 920167782 }
 0x313   :  { %v3438_v7 = vsel %vm3428_vm9, %v3424_v46, 1326507024  ;;  %v3335_v35 = vadd.s32 1, %v3331_v32  ;;  %vm3426_vm1 = vcmp.lt.s32.totalorder %v14537_v31, 2  ;;  %v3437_v52 = vsel %vm3425_vm11, %v14554_v38, %v14556_v58 }
 0x314   :  { %v14581_v23 = vshll.u32 %v3401_v59, 8  ;;  %v2908_v63 = vmul.f32 %v2907_v27, %v14493_v8  ;;  %v2915_v55 = vmul.f32 %v2914_v2, %v14493_v8  ;;  %vm3334_vm4 = vc.u32 %v14558_v56, %v14560_v28 }
 0x315   :  { %v3439_v46 = vsel %vm3427_vm13, %v3421_v45, %v3438_v7  ;;  %v2756_v62 = vmul.f32 %v2755_v51, %v14326_v15  ;;  %v2901_v5 = vsub.s32 4, %v14063_v9  ;;  %v3433_v29 = vsel %vm3425_vm11, %v14566_v50, %v14554_v38 }
 0x316   :  { %v3435_v27 = vsel %vm3427_vm13, %v14556_v58, %v3434_v17  ;;  %v3053_v2 = vxor.u32 2147483648, %v3052_v48  ;;  %v3190_v12 = vsel %vm3188_vm2, %v3189_v36, %v14543_v20  ;;  %v3332_v11 = vmul.u32 %v14400_v47, %v3278_v1 }
 0x317   :  { %v3440_v15 = vsel %vm3426_vm1, %v3437_v52, %v3439_v46  ;;  %v2764_v51 = vadd.f32 1.0, %v14513_v49  ;;  %vm2933_vm5 = vcmp.lt.s32.totalorder %v17977_v6, 0  ;;  %v3336_v41 = vsel %vm3334_vm4, %v3335_v35, %v3331_v32 }
 0x318   :  { %v3442_v25 = vand.u32 65535, %v14581_v23  ;;  %v2909_v37 = vadd.f32 -0.4999988, %v2908_v63  ;;  %v2916_v57 = vadd.f32 -0.16666654, %v2915_v55  ;;  %v3436_v54 = vsel %vm3426_vm1, %v3433_v29, %v3435_v27 }
 0x319   :  { %v3445_v53 = vshrl.u32 %v3440_v15, 16  ;;  %v14610_v26 = vand.u32 3, %v14488_v24  ;;  %v2902_v47 = vsel %vm2779_vm7, %v2901_v5, %v14063_v9  ;;  %v17978_v49 = vand.u32 2147483647, %v17977_v6 }
 0x31a   :  { %v3191_v4 = vclz %v3190_v12  ;;  %v14621_v59 = vadd.f32 1.0, %v2756_v62  ;;  %v3054_v45 = vsel %vm2933_vm5, %v3053_v2, %v3052_v48  ;;  %v14625_v32 = vadd.s32 %v3336_v41, %v3332_v11 }
 0x31b   :  { %vm14617_vm10 = vcmp.le.f32.partialorder %v17978_v49, 0.7853982  ;;  %v3443_v36 = vshrl.u32 %v14581_v23, 16  ;;  %v3444_v1 = vand.u32 65535, %v3440_v15  ;;  %v14628_v17 = vmul.u32 %v3445_v53, %v3442_v25 }
 0x31c   :  { %17981 = vst [vmem:[#allocation102_spill] sm:$0xff] %v14621_v59  ;;  %v3466_v9 = vand.u32 65535, %v3436_v54  ;;  %v3467_v7 = vshrl.u32 %v3436_v54, 16  ;;  %v14633_v35 = vsel %vm2612_vm14, nan, %v14484_v3  ;;  %v14636_v52 = vmul.f32 %v2764_v51, %v14303_v21 }
 0x31d   :  { %17982 = vst [vmem:[#allocation103_spill] sm:$0xff] %v14633_v35  ;;  %v2910_v63 = vmul.f32 %v2909_v37, %v14493_v8  ;;  %v2917_v48 = vmul.f32 %v2916_v57, %v14493_v8  ;;  %vm2772_vm7 = vcmp.eq.s32.totalorder %v14610_v26, 2  ;;  %v14643_v55 = vsel %vm14385_vm6, 0, %v2902_v47  ;;  %v17986_v37 = vld [vmem:[#allocation20_spill] sm:$0xff] }
 0x31e   :  { %17983 = vst [vmem:[#allocation104_spill] sm:$0xff] %v14636_v52  ;;  %v10179_v46 = vadd.s32 4294967294, %v3191_v4  ;;  %v14645_v62 = vmul.u32 %v3467_v7, %v3442_v25  ;;  %v17484_v5 = vxor.u32 2147483648, %v14621_v59  ;;  %v14649_v3 = vand.u32 3, %v14643_v55 }
 0x31f   :  { %17984 = vst [vmem:[#allocation105_spill] sm:$0xff] %v14643_v55  ;;  %v14654_v21 = vsel %vm14617_vm10, %v17977_v6, %v3054_v45  ;;  %v3338_v8 = vadd.s32 536870912, %v14625_v32  ;;  %v3446_v29 = vmul.u32 %v3444_v1, %v3442_v25  ;;  %v14657_v27 = vmul.u32 %v3444_v1, %v3443_v36 }
 0x320   :  { %v3450_v34 = vshll.u32 %v14628_v17, 16  ;;  %v14660_v2 = vmul.u32 %v3466_v9, %v3443_v36  ;;  %vm2769_vm6 = vcmp.eq.s32.totalorder %v14610_v26, 0  ;;  %v14664_v11 = vadd.f32 1.0, %v2910_v63 }
 0x321   :  { %v2918_v15 = vadd.f32 1.0, %v2917_v48  ;;  %vm10180_vm12 = vcmp.lt.s32.totalorder %v10179_v46, 0  ;;  %v3468_v51 = vmul.u32 %v3466_v9, %v3442_v25  ;;  %v3472_v41 = vshll.u32 %v14645_v62, 16 }
 0x322   :  { %17985 = vst [vmem:[#allocation106_spill] sm:$0xff] %v14664_v11  ;;  %v3550_v57 = vand.u32 2139095040, %v17986_v37  ;;  %v14673_v54 = vsel %vm2772_vm7, %v17484_v5, %v14636_v52  ;;  %vm2926_vm3 = vcmp.eq.s32.totalorder %v14649_v3, 2  ;;  %v14678_v47 = vmul.f32 %v14654_v21, %v14654_v21 }
 0x323   :  { %v14680_v49 = vshrl.u32 %v3338_v8, 30  ;;  %v3452_v25 = vshll.u32 %v14657_v27, 16  ;;  %vm3454_vm0 = vc.u32 %v3446_v29, %v3450_v34  ;;  %v3456_v4 = vadd.s32 %v3450_v34, %v3446_v29 }
 0x324   :  { %v17487_v45 = vshll.u32 %v14660_v2, 16  ;;  %v14685_v1 = vmul.f32 %v2918_v15, %v14472_v0  ;;  %v17488_v9 = vxor.u32 2147483648, %v14664_v11  ;;  %v14688_v63 = vsel %vm10180_vm12, 0, %v10179_v46 }
 0x325   :  { %v3471_v48 = vmul.u32 %v3467_v7, %v3443_v36  ;;  %v3449_v5 = vmul.u32 %v3445_v53, %v3443_v36  ;;  %vm3476_vm8 = vc.u32 %v3468_v51, %v3472_v41  ;;  %v14690_v12 = vadd.s32 %v3472_v41, %v3468_v51 }
 0x326   :  { %17987 = vst [vmem:[#allocation107_spill] sm:$0xff] %v14685_v1  ;;  %v3551_v8 = vshrl.u32 %v3550_v57, 23  ;;  %v3067_v10 = vmul.f32 -0.00019511016, %v14678_v47  ;;  %v3340_v55 = vshll.u32 %v14680_v49, 30  ;;  %v3455_v29 = vsel %vm3454_vm0, 1, %v17619_v16 }
 0x327   :  { %v3477_v34 = vsel %vm3476_vm8, 1, %v17619_v16  ;;  %v3199_v0 = vsub.s32 4294967266, %v14688_v63  ;;  %vm3458_vm2 = vc.u32 %v3456_v4, %v3452_v25  ;;  %vm3480_vm4 = vc.u32 %v14690_v12, %v17487_v45 }
 0x328   :  { %v10187_v53 = vadd.s32 4294967169, %v3551_v8  ;;  %v17988_v36 = vxor.u32 2147483648, %v14636_v52  ;;  %v3479_v51 = vadd.s32 %v3477_v34, %v3471_v48  ;;  %v14714_v41 = vsel %vm2926_vm3, %v17488_v9, %v14685_v1 }
 0x329   :  { %v3457_v57 = vadd.s32 %v3455_v29, %v3449_v5  ;;  %v3481_v25 = vsel %vm3480_vm4, 1, %v17619_v16  ;;  %v3060_v8 = vmul.f32 -0.001358992, %v14678_v47  ;;  %v14719_v45 = vsub.s32 %v14625_v32, %v3340_v55 }
 0x32a   :  { %v14705_v7 = vsel %vm2769_vm6, %v14621_v59, %v17988_v36  ;;  %v3557_v4 = vadd.s32 1, %v10187_v53  ;;  %v3068_v36 = vadd.f32 0.008332121, %v3067_v10  ;;  %v3459_v15 = vsel %vm3458_vm2, 1, %v17619_v16 }
 0x32b   :  { %v3179_v48 = vadd.s32 %v14429_v13, %v14424_v42  ;;  %v3195_v34 = vsub.s32 32, %v14688_v63  ;;  %v3200_v46 = vadd.s32 127, %v3199_v0  ;;  %v3409_v5 = vshrl.u32 %v17623_v39, %v14515_v33 }
 0x32c   :  { %vm3558_vm7 = vcmp.gt.s32.totalorder %v3557_v4, 0  ;;  %v3473_v29 = vshrl.u32 %v14645_v62, 16  ;;  %v3483_v53 = vadd.s32 %v3481_v25, %v3479_v51  ;;  %v3451_v10 = vshrl.u32 %v14628_v17, 16 }
 0x32d   :  { %v3559_v9 = vsel %vm3558_vm7, %v3557_v4, 0  ;;  %v3461_v32 = vadd.s32 %v3459_v15, %v3457_v57  ;;  %v17493_v55 = vand.u32 2147483647, %v17986_v37  ;;  %v14730_v52 = vadd.f32 0.041655596, %v3060_v8 }
 0x32e   :  { %v3561_v59 = vand.u32 31, %v3559_v9  ;;  %v3069_v42 = vmul.f32 %v3068_v36, %v14678_v47  ;;  %v3343_v13 = vsub.s32 0, %v14719_v45  ;;  %v3430_v33 = vsel %vm3428_vm9, %v14556_v58, 2102212464 }
 0x32f   :  { %v3196_v62 = vshll.u32 %v14543_v20, %v14688_v63  ;;  %v3197_v0 = vshrl.u32 %v3179_v48, %v3195_v34  ;;  %vm3342_vm6 = vcmp.lt.s32.totalorder %v14719_v45, 0  ;;  %v3201_v15 = vshll.u32 %v3200_v46, 23 }
 0x330   :  { %v14740_v17 = vsub.s32 32, %v3561_v59  ;;  %v3429_v51 = vsel %vm3425_vm11, %v3409_v5, %v14566_v50  ;;  %v3475_v57 = vshrl.u32 %v14660_v2, 16  ;;  %v3484_v25 = vadd.s32 %v3483_v53, %v3473_v29 }
 0x331   :  { %vm2923_vm12 = vcmp.eq.s32.totalorder %v14649_v3, 0  ;;  %v3431_v58 = vsel %vm3427_vm13, %v14554_v38, %v3430_v33  ;;  %v3453_v20 = vshrl.u32 %v14657_v27, 16  ;;  %v3462_v63 = vadd.s32 %v3461_v32, %v3451_v10 }
 0x332   :  { %v3554_v4 = vand.u32 8388607, %v17493_v55  ;;  %v3344_v46 = vsel %vm3342_vm6, %v3343_v13, %v14719_v45  ;;  %v3567_v8 = vshll.u32 %v17620_v22, %v3561_v59  ;;  %v3570_v50 = vshll.u32 %v17895_v18, %v3561_v59 }
 0x333   :  { %v3573_v36 = vshll.u32 %v17630_v19, %v3561_v59  ;;  %v3568_v48 = vshrl.u32 %v17895_v18, %v14740_v17  ;;  %v3571_v38 = vshrl.u32 %v17630_v19, %v14740_v17  ;;  %v3574_v27 = vshrl.u32 %v17631_v30, %v14740_v17 }
 0x334   :  { %v3576_v34 = vshll.u32 %v17631_v30, %v3561_v59  ;;  %v3198_v5 = vor.u32 %v3197_v0, %v3196_v62  ;;  %v3202_v29 = vor.u32 4788187, %v3201_v15  ;;  %v3485_v53 = vadd.s32 %v3484_v25, %v3475_v57 }
 0x335   :  { %v14764_v10 = vshrl.u32 %v3559_v9, 5  ;;  %vm2768_vm11 = vcmp.lt.s32.totalorder %v14610_v26, 2  ;;  %vm2922_vm9 = vcmp.lt.s32.totalorder %v14649_v3, 2  ;;  %v14768_v32 = vadd.s32 %v3462_v63, %v3453_v20 }
 0x336   :  { %v17989_v13 = vshll.u32 %v14660_v2, 16  ;;  %v3555_v55 = vor.u32 8388608, %v3554_v4  ;;  %v3577_v24 = vshrl.u32 %v17632_v40, %v14740_v17  ;;  %v3345_v62 = vclz %v3344_v46  ;;  %v17990_v4 = vld [vmem:[#allocation21_spill] sm:$0xff] }
 0x337   :  { %v3432_v9 = vsel %vm3426_vm1, %v3429_v51, %v3431_v58  ;;  %v3564_v0 = vshll.u32 %v17623_v39, %v3561_v59  ;;  %v3565_v15 = vshrl.u32 %v17620_v22, %v14740_v17  ;;  %v14782_v57 = vor.u32 %v3568_v48, %v3567_v8 }
 0x338   :  { %v14773_v33 = vadd.s32 %v14690_v12, %v17989_v13  ;;  %v14784_v25 = vor.u32 %v3571_v38, %v3570_v50  ;;  %v3575_v2 = vor.u32 %v3574_v27, %v3573_v36  ;;  %v3578_v12 = vor.u32 %v3577_v24, %v3576_v34 }
 0x339   :  { %v3205_v20 = vcvt.s32.f32 %v3198_v5  ;;  %v3489_v63 = vadd.s32 1, %v3485_v53  ;;  %vm3579_vm13 = vcmp.lt.s32.totalorder %v14764_v10, 1  ;;  %vm3582_vm3 = vcmp.lt.s32.totalorder %v14764_v10, 4 }
 0x33a   :  { %vm2766_vm0 = vweird.f32 %v17913_v43  ;;  %v3203_v31 = vand.u32 2147483647, %v3202_v29  ;;  %v3486_v59 = vmul.u32 %v14581_v23, %v3432_v9  ;;  %vm3488_vm1 = vc.u32 %v14768_v32, %v14773_v33 }
 0x33b   :  { %v14792_v51 = vshll.u32 %v3555_v55, 8  ;;  %vm17497_vm8 = vweird.f32 %v17921_v44  ;;  %v10182_v58 = vadd.s32 4294967294, %v3345_v62  ;;  %v14795_v24 = vor.u32 %v3565_v15, %v3564_v0 }
 0x33c   :  { %vm3581_vm2 = vcmp.lt.s32.totalorder %v14764_v10, 3  ;;  %v3704_v46 = vand.u32 2139095040, %v17990_v4  ;;  %vm3580_vm4 = vcmp.lt.s32.totalorder %v14764_v10, 2  ;;  %v3588_v8 = vsel %vm3582_vm3, %v3575_v2, 920167782 }
 0x33d   :  { %v3591_v23 = vsel %vm3579_vm13, %v14782_v57, %v14784_v25  ;;  %v3592_v55 = vsel %vm3582_vm3, %v3578_v12, 1326507024  ;;  %v17991_v50 = vxor.u32 2147483648, %v14685_v1  ;;  %v3062_v48 = vmul.f32 %v14730_v52, %v14678_v47 }
 0x33e   :  { %v3070_v38 = vadd.f32 -0.16666654, %v3069_v42  ;;  %v3490_v27 = vsel %vm3488_vm1, %v3489_v63, %v3485_v53  ;;  %v3206_v34 = vmul.f32 %v3205_v20, %v3203_v31  ;;  %v3593_v5 = vsel %vm3581_vm2, %v3575_v2, %v3592_v55 }
 0x33f   :  { %v2925_v36 = vsel %vm2923_vm12, %v14664_v11, %v17991_v50  ;;  %v3596_v29 = vand.u32 65535, %v14792_v51  ;;  %v3597_v13 = vshrl.u32 %v14792_v51, 16  ;;  %v3587_v62 = vsel %vm3579_vm13, %v14795_v24, %v14782_v57 }
 0x340   :  { %v3589_v9 = vsel %vm3581_vm2, %v14784_v25, %v3588_v8  ;;  %v3594_v52 = vsel %vm3580_vm4, %v3591_v23, %v3593_v5  ;;  %v3705_v42 = vshrl.u32 %v3704_v46, 23  ;;  %vm10183_vm7 = vcmp.lt.s32.totalorder %v10182_v58, 0 }
 0x341   :  { %v14828_v53 = vadd.s32 %v3490_v27, %v3486_v59  ;;  %v3598_v0 = vand.u32 65535, %v3594_v52  ;;  %v3599_v15 = vshrl.u32 %v3594_v52, 16  ;;  %v2775_v2 = vsel %vm2768_vm11, %v14705_v7, %v14673_v54 }
 0x342   :  { %v2929_v12 = vsel %vm2922_vm9, %v2925_v36, %v14714_v41  ;;  %v17992_v20 = vsub.s32 4, %v14278_v61  ;;  %vm3087_vm6 = vcmp.lt.s32.totalorder %v17945_v60, 0  ;;  %v3063_v31 = vadd.f32 -0.4999988, %v3062_v48 }
 0x343   :  { %v3071_v59 = vmul.f32 %v3070_v38, %v14678_v47  ;;  %v3590_v46 = vsel %vm3580_vm4, %v3587_v62, %v3589_v9  ;;  %v14846_v26 = vmul.u32 %v3599_v15, %v3596_v29  ;;  %v3207_v54 = vxor.u32 2147483648, %v3206_v34 }
 0x344   :  { %v3056_v63 = vsel %vm2933_vm5, %v17992_v20, %v14278_v61  ;;  %v14848_v7 = vsel %vm10183_vm7, 0, %v10182_v58  ;;  %v14850_v3 = vmul.u32 %v3598_v0, %v3597_v13  ;;  %v10190_v41 = vadd.s32 4294967169, %v3705_v42 }
 0x345   :  { %v3492_v8 = vadd.s32 536870912, %v14828_v53  ;;  %v3600_v23 = vmul.u32 %v3598_v0, %v3596_v29  ;;  %v3604_v61 = vshll.u32 %v14846_v26, 16  ;;  %v3620_v55 = vand.u32 65535, %v3590_v46 }
 0x346   :  { %v14856_v50 = vsel %vm2766_vm0, nan, %v2775_v2  ;;  %v14860_v36 = vsel %vm14617_vm10, 0, %v3056_v63  ;;  %v17995_v58 = vand.u32 2147483647, %v17945_v60  ;;  %v3621_v38 = vshrl.u32 %v3590_v46, 16 }
 0x347   :  { %17993 = vst [vmem:[#allocation108_spill] sm:$0xff] %v14856_v50  ;;  %v14870_v27 = vsel %vm17497_vm8, nan, %v2929_v12  ;;  %v3064_v5 = vmul.f32 %v3063_v31, %v14678_v47  ;;  %v3072_v62 = vadd.f32 1.0, %v3071_v59  ;;  %v3603_v9 = vmul.u32 %v3599_v15, %v3597_v13 }
 0x348   :  { %17994 = vst [vmem:[#allocation109_spill] sm:$0xff] %v14860_v36  ;;  %vm14864_vm5 = vcmp.le.f32.partialorder %v17995_v58, 0.7853982  ;;  %v14874_v52 = vand.u32 3, %v14860_v36  ;;  %v3208_v14 = vsel %vm3087_vm6, %v3207_v54, %v3206_v34  ;;  %v3353_v42 = vsub.s32 4294967266, %v14848_v7 }
 0x349   :  { %17998 = vst [vmem:[#allocation110_spill] sm:$0xff] %v14870_v27  ;;  %v3606_v0 = vshll.u32 %v14850_v3, 16  ;;  %v14880_v2 = vshrl.u32 %v3492_v8, 30  ;;  %vm3608_vm10 = vc.u32 %v3600_v23, %v3604_v61  ;;  %v3622_v20 = vmul.u32 %v3620_v55, %v3596_v29 }
 0x34a   :  { %v3711_v12 = vadd.s32 1, %v10190_v41  ;;  %v3609_v63 = vsel %vm3608_vm10, 1, %v17619_v16  ;;  %v3610_v47 = vadd.s32 %v3604_v61, %v3600_v23  ;;  %v3623_v31 = vmul.u32 %v3621_v38, %v3596_v29 }
 0x34b   :  { %v3624_v15 = vmul.u32 %v3620_v55, %v3597_v13  ;;  %v14883_v59 = vadd.f32 1.0, %v3064_v5  ;;  %v14886_v46 = vmul.f32 %v3072_v62, %v14654_v21  ;;  %v3333_v34 = vadd.s32 %v14560_v28, %v14558_v56 }
 0x34c   :  { %v3611_v54 = vadd.s32 %v3609_v63, %v3603_v9  ;;  %vm3612_vm12 = vc.u32 %v3610_v47, %v3606_v0  ;;  %v3625_v8 = vmul.u32 %v3621_v38, %v3597_v13  ;;  %v3626_v58 = vshll.u32 %v3623_v31, 16 }
 0x34d   :  { %17999 = vst [vmem:[#allocation111_spill] sm:$0xff] %v14883_v59  ;;  %v3628_v44 = vshll.u32 %v3624_v15, 16  ;;  %v14893_v41 = vsel %vm14864_vm5, %v17945_v60, %v3208_v14  ;;  %v3349_v29 = vsub.s32 32, %v14848_v7  ;;  %v3494_v23 = vshll.u32 %v14880_v2, 30 }
 0x34e   :  { %18000 = vst [vmem:[#allocation112_spill] sm:$0xff] %v14886_v46  ;;  %v3613_v21 = vsel %vm3612_vm12, 1, %v17619_v16  ;;  %v3354_v61 = vadd.s32 127, %v3353_v42  ;;  %vm3630_vm11 = vc.u32 %v3622_v20, %v3626_v58  ;;  %v3632_v55 = vadd.s32 %v3626_v58, %v3622_v20 }
 0x34f   :  { %vm3712_vm9 = vcmp.gt.s32.totalorder %v3711_v12, 0  ;;  %v3605_v56 = vshrl.u32 %v14846_v26, 16  ;;  %v3631_v28 = vsel %vm3630_vm11, 1, %v17619_v16  ;;  %v17496_v13 = vand.u32 2147483647, %v17990_v4 }
 0x350   :  { %v3713_v38 = vsel %vm3712_vm9, %v3711_v12, 0  ;;  %v3615_v5 = vadd.s32 %v3613_v21, %v3611_v54  ;;  %v3627_v62 = vshrl.u32 %v3623_v31, 16  ;;  %v3633_v9 = vadd.s32 %v3631_v28, %v3625_v8 }
 0x351   :  { %vm3634_vm1 = vc.u32 %v3632_v55, %v3628_v44  ;;  %v14902_v14 = vsub.s32 %v14828_v53, %v3494_v23  ;;  %v3563_v42 = vshrl.u32 %v17623_v39, %v14740_v17  ;;  %v3715_v20 = vand.u32 31, %v3713_v38 }
 0x352   :  { %v3635_v0 = vsel %vm3634_vm1, 1, %v17619_v16  ;;  %v14909_v26 = vmul.f32 %v14893_v41, %v14893_v41  ;;  %v3350_v12 = vshll.u32 %v14719_v45, %v14848_v7  ;;  %v3584_v63 = vsel %vm3582_vm3, %v14784_v25, 2102212464 }
 0x353   :  { %v3637_v47 = vadd.s32 %v3635_v0, %v3633_v9  ;;  %v3351_v53 = vshrl.u32 %v3333_v34, %v3349_v29  ;;  %v3355_v31 = vshll.u32 %v3354_v61, 23  ;;  %v3629_v54 = vshrl.u32 %v3624_v15, 16 }
 0x354   :  { %v14916_v8 = vsub.s32 32, %v3715_v20  ;;  %v3607_v17 = vshrl.u32 %v14850_v3, 16  ;;  %v3616_v58 = vadd.s32 %v3615_v5, %v3605_v56  ;;  %v3708_v21 = vand.u32 8388607, %v17496_v13 }
 0x355   :  { %v3638_v23 = vadd.s32 %v3637_v47, %v3627_v62  ;;  %vm3496_vm7 = vcmp.lt.s32.totalorder %v14902_v14, 0  ;;  %v3497_v45 = vsub.s32 0, %v14902_v14  ;;  %v3583_v25 = vsel %vm3579_vm13, %v3563_v42, %v14795_v24 }
 0x356   :  { %v3585_v7 = vsel %vm3581_vm2, %v14782_v57, %v3584_v63  ;;  %v14929_v15 = vadd.s32 %v3632_v55, %v3628_v44  ;;  %v3721_v3 = vshll.u32 %v17620_v22, %v3715_v20  ;;  %v3724_v34 = vshll.u32 %v17895_v18, %v3715_v20 }
 0x357   :  { %v3727_v29 = vshll.u32 %v17630_v19, %v3715_v20  ;;  %v3639_v61 = vadd.s32 %v3638_v23, %v3629_v54  ;;  %v3722_v56 = vshrl.u32 %v17895_v18, %v14916_v8  ;;  %v3725_v28 = vshrl.u32 %v17630_v19, %v14916_v8 }
 0x358   :  { %v3728_v24 = vshrl.u32 %v17631_v30, %v14916_v8  ;;  %v14940_v5 = vadd.s32 %v3616_v58, %v3607_v17  ;;  %v14942_v44 = vshrl.u32 %v3713_v38, 5  ;;  %v3730_v57 = vshll.u32 %v17631_v30, %v3715_v20 }
 0x359   :  { %v3731_v55 = vshrl.u32 %v17632_v40, %v14916_v8  ;;  %v3214_v62 = vmul.f32 -0.001358992, %v14909_v26  ;;  %v3352_v9 = vor.u32 %v3351_v53, %v3350_v12  ;;  %v3718_v42 = vshll.u32 %v17623_v39, %v3715_v20 }
 0x35a   :  { %v3719_v0 = vshrl.u32 %v17620_v22, %v14916_v8  ;;  %v3498_v63 = vsel %vm3496_vm7, %v3497_v45, %v14902_v14  ;;  %v3709_v47 = vor.u32 8388608, %v3708_v21  ;;  %v3729_v38 = vor.u32 %v3728_v24, %v3727_v29 }
 0x35b   :  { %v3732_v54 = vor.u32 %v3731_v55, %v3730_v57  ;;  %v3586_v17 = vsel %vm3580_vm4, %v3583_v25, %v3585_v7  ;;  %v3643_v58 = vadd.s32 1, %v3639_v61  ;;  %v14956_v23 = vor.u32 %v3722_v56, %v3721_v3 }
 0x35c   :  { %v14958_v13 = vor.u32 %v3725_v28, %v3724_v34  ;;  %v3356_v12 = vor.u32 4788187, %v3355_v31  ;;  %vm3642_vm13 = vc.u32 %v14940_v5, %v14929_v15  ;;  %vm3733_vm3 = vcmp.lt.s32.totalorder %v14942_v44, 1 }
 0x35d   :  { %vm3736_vm2 = vcmp.lt.s32.totalorder %v14942_v44, 4  ;;  %vm3077_vm10 = vcmp.eq.s32.totalorder %v14874_v52, 0  ;;  %v3221_v20 = vmul.f32 -0.00019511016, %v14909_v26  ;;  %v3499_v53 = vclz %v3498_v63 }
 0x35e   :  { %v14966_v10 = vor.u32 %v3719_v0, %v3718_v42  ;;  %vm3735_vm4 = vcmp.lt.s32.totalorder %v14942_v44, 3  ;;  %v3640_v21 = vmul.u32 %v14792_v51, %v3586_v17  ;;  %v3742_v31 = vsel %vm3736_vm2, %v3729_v38, 920167782 }
 0x35f   :  { %v3746_v45 = vsel %vm3736_vm2, %v3732_v54, 1326507024  ;;  %v14974_v25 = vshll.u32 %v3709_v47, 8  ;;  %v3215_v7 = vadd.f32 0.041655596, %v3214_v62  ;;  %v3644_v3 = vsel %vm3642_vm13, %v3643_v58, %v3639_v61  ;;  %v18001_v47 = vld [vmem:[#allocation101_spill] sm:$0xff] }
 0x360   :  { %vm3734_vm12 = vcmp.lt.s32.totalorder %v14942_v44, 2  ;;  %v3745_v34 = vsel %vm3733_vm3, %v14956_v23, %v14958_v13  ;;  %vm3076_vm11 = vcmp.lt.s32.totalorder %v14874_v52, 2  ;;  %vm3080_vm9 = vcmp.eq.s32.totalorder %v14874_v52, 2 }
 0x361   :  { %v3357_v51 = vand.u32 2147483647, %v3356_v12  ;;  %v3359_v29 = vcvt.s32.f32 %v3352_v9  ;;  %v3747_v56 = vsel %vm3735_vm4, %v3729_v38, %v3746_v45  ;;  %v3222_v28 = vadd.f32 0.008332121, %v3221_v20 }
 0x362   :  { %v10185_v24 = vadd.s32 4294967294, %v3499_v53  ;;  %v3741_v61 = vsel %vm3733_vm3, %v14966_v10, %v14956_v23  ;;  %v3743_v57 = vsel %vm3735_vm4, %v14958_v13, %v3742_v31  ;;  %v14992_v55 = vadd.s32 %v3644_v3, %v3640_v21  ;;  %v18002_v21 = vld [vmem:[#allocation17_spill] sm:$0xff] }
 0x363   :  { %v3748_v62 = vsel %vm3734_vm12, %v3745_v34, %v3747_v56  ;;  %v3750_v9 = vand.u32 65535, %v14974_v25  ;;  %v3751_v42 = vshrl.u32 %v14974_v25, 16  ;;  %vm3074_vm1 = vweird.f32 %v17977_v6 }
 0x364   :  { %v17505_v0 = vxor.u32 2147483648, %v14886_v46  ;;  %v17503_v63 = vxor.u32 2147483648, %v14883_v59  ;;  %v3209_v38 = vsub.s32 4, %v18001_v47  ;;  %v3216_v54 = vmul.f32 %v3215_v7, %v14909_v26 }
 0x365   :  { %v3360_v17 = vmul.f32 %v3359_v29, %v3357_v51  ;;  %v3744_v58 = vsel %vm3734_vm12, %v3741_v61, %v3743_v57  ;;  %v3752_v12 = vand.u32 65535, %v3748_v62  ;;  %v3753_v20 = vshrl.u32 %v3748_v62, 16 }
 0x366   :  { %v3223_v53 = vmul.f32 %v3222_v28, %v14909_v26  ;;  %v18003_v31 = vand.u32 2147483647, %v18002_v21  ;;  %vm3241_vm13 = vcmp.lt.s32.totalorder %v18002_v21, 0  ;;  %vm10186_vm8 = vcmp.lt.s32.totalorder %v10185_v24, 0 }
 0x367   :  { %v3646_v3 = vadd.s32 536870912, %v14992_v55  ;;  %v3754_v7 = vmul.u32 %v3752_v12, %v3750_v9  ;;  %v3755_v34 = vmul.u32 %v3753_v20, %v3750_v9  ;;  %v15014_v51 = vmul.u32 %v3752_v12, %v3751_v42 }
 0x368   :  { %vm15008_vm7 = vcmp.le.f32.partialorder %v18003_v31, 0.7853982  ;;  %v3082_v29 = vsel %vm3080_vm9, %v17503_v63, %v14886_v46  ;;  %v3210_v56 = vsel %vm3087_vm6, %v3209_v38, %v18001_v47  ;;  %v3774_v28 = vand.u32 65535, %v3744_v58 }
 0x369   :  { %v3775_v61 = vshrl.u32 %v3744_v58, 16  ;;  %v3079_v57 = vsel %vm3077_vm10, %v14883_v59, %v17505_v0  ;;  %v3217_v62 = vadd.f32 -0.4999988, %v3216_v54  ;;  %v3361_v12 = vxor.u32 2147483648, %v3360_v17 }
 0x36a   :  { %v3758_v31 = vshll.u32 %v3755_v34, 16  ;;  %v3502_v11 = vsel %vm10186_vm8, 0, %v10185_v24  ;;  %v3757_v1 = vmul.u32 %v3753_v20, %v3751_v42  ;;  %v3760_v43 = vshll.u32 %v15014_v51, 16 }
 0x36b   :  { %v3777_v63 = vmul.u32 %v3775_v61, %v3750_v9  ;;  %v3224_v36 = vadd.f32 -0.16666654, %v3223_v53  ;;  %v15030_v27 = vshrl.u32 %v3646_v3, 30  ;;  %v3083_v38 = vsel %vm3076_vm11, %v3079_v57, %v3082_v29  ;;  %v18007_v3 = vld [vmem:[#allocation22_spill] sm:$0xff] }
 0x36c   :  { %vm3762_vm6 = vc.u32 %v3754_v7, %v3758_v31  ;;  %v3764_v47 = vadd.s32 %v3758_v31, %v3754_v7  ;;  %v15036_v58 = vsel %vm14864_vm5, 0, %v3210_v56  ;;  %v3778_v0 = vmul.u32 %v3774_v28, %v3751_v42 }
 0x36d   :  { %18006 = vst [vmem:[#allocation101_spill] sm:$0xff] %v15036_v58  ;;  %v3763_v54 = vsel %vm3762_vm6, 1, %v17619_v16  ;;  %v15040_v24 = vand.u32 3, %v15036_v58  ;;  %v3362_v20 = vsel %vm3241_vm13, %v3361_v12, %v3360_v17  ;;  %v3507_v53 = vsub.s32 4294967266, %v3502_v11 }
 0x36e   :  { %v3858_v59 = vand.u32 2139095040, %v18007_v3  ;;  %v3765_v7 = vadd.s32 %v3763_v54, %v3757_v1  ;;  %vm3766_vm8 = vc.u32 %v3764_v47, %v3760_v43  ;;  %v3776_v52 = vmul.u32 %v3774_v28, %v3750_v9 }
 0x36f   :  { %v3780_v29 = vshll.u32 %v3777_v63, 16  ;;  %v15047_v48 = vsel %vm3074_vm1, nan, %v3083_v38  ;;  %v3218_v56 = vmul.f32 %v3217_v62, %v14909_v26  ;;  %v3225_v57 = vmul.f32 %v3224_v36, %v14909_v26 }
 0x370   :  { %18008 = vst [vmem:[#allocation113_spill] sm:$0xff] %v15047_v48  ;;  %v3648_v31 = vshll.u32 %v15030_v27, 30  ;;  %v15055_v17 = vsel %vm15008_vm7, %v18002_v21, %v3362_v20  ;;  %v3767_v1 = vsel %vm3766_vm8, 1, %v17619_v16  ;;  %v3779_v43 = vmul.u32 %v3775_v61, %v3751_v42 }
 0x371   :  { %v3782_v9 = vshll.u32 %v3778_v0, 16  ;;  %v3487_v28 = vadd.s32 %v14773_v33, %v14768_v32  ;;  %v3503_v12 = vsub.s32 32, %v3502_v11  ;;  %v3508_v47 = vadd.s32 127, %v3507_v53 }
 0x372   :  { %v3759_v38 = vshrl.u32 %v3755_v34, 16  ;;  %v3769_v62 = vadd.s32 %v3767_v1, %v3765_v7  ;;  %vm3784_vm5 = vc.u32 %v3776_v52, %v3780_v29  ;;  %v3786_v36 = vadd.s32 %v3780_v29, %v3776_v52 }
 0x373   :  { %v3859_v26 = vshrl.u32 %v3858_v59, 23  ;;  %v15060_v54 = vadd.f32 1.0, %v3218_v56  ;;  %v15064_v20 = vmul.f32 %v15055_v17, %v15055_v17  ;;  %v15067_v6 = vsub.s32 %v14992_v55, %v3648_v31 }
 0x374   :  { %v3785_v42 = vsel %vm3784_vm5, 1, %v17619_v16  ;;  %v3781_v61 = vshrl.u32 %v3777_v63, 16  ;;  %vm3788_vm10 = vc.u32 %v3786_v36, %v3782_v9  ;;  %v3504_v34 = vshll.u32 %v14902_v14, %v3502_v11 }
 0x375   :  { %18009 = vst [vmem:[#allocation114_spill] sm:$0xff] %v15060_v54  ;;  %v3787_v32 = vadd.s32 %v3785_v42, %v3779_v43  ;;  %v10193_v33 = vadd.s32 4294967169, %v3859_v26  ;;  %v3505_v53 = vshrl.u32 %v3487_v28, %v3503_v12  ;;  %v3509_v7 = vshll.u32 %v3508_v47, 23 }
 0x376   :  { %v3789_v59 = vsel %vm3788_vm10, 1, %v17619_v16  ;;  %v3761_v52 = vshrl.u32 %v15014_v51, 16  ;;  %v3770_v29 = vadd.s32 %v3769_v62, %v3759_v38  ;;  %v3226_v46 = vadd.f32 1.0, %v3225_v57 }
 0x377   :  { %v3791_v56 = vadd.s32 %v3789_v59, %v3787_v32  ;;  %v3865_v1 = vadd.s32 1, %v10193_v33  ;;  %v3651_v55 = vsub.s32 0, %v15067_v6  ;;  %v3717_v63 = vshrl.u32 %v17623_v39, %v14916_v8 }
 0x378   :  { %v3783_v31 = vshrl.u32 %v3778_v0, 16  ;;  %vm3650_vm11 = vcmp.lt.s32.totalorder %v15067_v6, 0  ;;  %v3738_v11 = vsel %vm3736_vm2, %v14958_v13, 2102212464  ;;  %v3375_v51 = vmul.f32 -0.00019511016, %v15064_v20 }
 0x379   :  { %v3792_v14 = vadd.s32 %v3791_v56, %v3781_v61  ;;  %vm3866_vm9 = vcmp.gt.s32.totalorder %v3865_v1, 0  ;;  %v3506_v43 = vor.u32 %v3505_v53, %v3504_v34  ;;  %v3510_v28 = vor.u32 4788187, %v3509_v7 }
 0x37a   :  { %v3867_v12 = vsel %vm3866_vm9, %v3865_v1, 0  ;;  %v15081_v57 = vadd.s32 %v3770_v29, %v3761_v52  ;;  %v15083_v47 = vadd.s32 %v3786_v36, %v3782_v9  ;;  %v17513_v8 = vand.u32 2147483647, %v18007_v3 }
 0x37b   :  { %v3869_v0 = vand.u32 31, %v3867_v12  ;;  %v3652_v38 = vsel %vm3650_vm11, %v3651_v55, %v15067_v6  ;;  %v3737_v13 = vsel %vm3733_vm3, %v3717_v63, %v14966_v10  ;;  %v3739_v62 = vsel %vm3735_vm4, %v14956_v23, %v3738_v11  ;;  %v18011_v11 = vld [vmem:[#allocation18_spill] sm:$0xff] }
 0x37c   :  { %v3793_v26 = vadd.s32 %v3792_v14, %v3783_v31  ;;  %v15094_v42 = vmul.f32 %v3226_v46, %v14893_v41  ;;  %v17511_v9 = vxor.u32 2147483648, %v15060_v54  ;;  %v3363_v36 = vsub.s32 4, %v14680_v49 }
 0x37d   :  { %v15098_v61 = vsub.s32 32, %v3869_v0  ;;  %v3368_v32 = vmul.f32 -0.001358992, %v15064_v20  ;;  %v3376_v33 = vadd.f32 0.008332121, %v3375_v51  ;;  %v3513_v53 = vcvt.s32.f32 %v3506_v43 }
 0x37e   :  { %18010 = vst [vmem:[#allocation115_spill] sm:$0xff] %v15094_v42  ;;  %v3511_v34 = vand.u32 2147483647, %v3510_v28  ;;  %vm3231_vm3 = vcmp.eq.s32.totalorder %v15040_v24, 0  ;;  %vm3234_vm2 = vcmp.eq.s32.totalorder %v15040_v24, 2  ;;  %v3653_v23 = vclz %v3652_v38 }
 0x37f   :  { %v3740_v46 = vsel %vm3734_vm12, %v3737_v13, %v3739_v62  ;;  %vm3796_vm4 = vc.u32 %v15081_v57, %v15083_v47  ;;  %v3862_v41 = vand.u32 8388607, %v17513_v8  ;;  %v3797_v10 = vadd.s32 1, %v3793_v26 }
 0x380   :  { %v3875_v7 = vshll.u32 %v17620_v22, %v3869_v0  ;;  %v3878_v59 = vshll.u32 %v17895_v18, %v3869_v0  ;;  %v3881_v52 = vshll.u32 %v17630_v19, %v3869_v0  ;;  %v3876_v29 = vshrl.u32 %v17895_v18, %v15098_v61 }
 0x381   :  { %v3879_v44 = vshrl.u32 %v17630_v19, %v15098_v61  ;;  %v3882_v56 = vshrl.u32 %v17631_v30, %v15098_v61  ;;  %v3884_v1 = vshll.u32 %v17631_v30, %v3869_v0  ;;  %v17512_v55 = vxor.u32 2147483648, %v15094_v42 }
 0x382   :  { %v3369_v63 = vadd.f32 0.041655596, %v3368_v32  ;;  %v3377_v31 = vmul.f32 %v3376_v33, %v15064_v20  ;;  %vm3395_vm12 = vcmp.lt.s32.totalorder %v18011_v11, 0  ;;  %v15122_v14 = vshrl.u32 %v3867_v12, 5 }
 0x383   :  { %vm3230_vm6 = vcmp.lt.s32.totalorder %v15040_v24, 2  ;;  %v3514_v51 = vmul.f32 %v3513_v53, %v3511_v34  ;;  %v3794_v43 = vmul.u32 %v14974_v25, %v3740_v46  ;;  %v3863_v28 = vor.u32 8388608, %v3862_v41 }
 0x384   :  { %v3885_v38 = vshrl.u32 %v17632_v40, %v15098_v61  ;;  %v10188_v13 = vadd.s32 4294967294, %v3653_v23  ;;  %v3798_v62 = vsel %vm3796_vm4, %v3797_v10, %v3793_v26  ;;  %v3872_v32 = vshll.u32 %v17623_v39, %v3869_v0 }
 0x385   :  { %v3873_v12 = vshrl.u32 %v17620_v22, %v15098_v61  ;;  %v18012_v33 = vand.u32 2147483647, %v18011_v11  ;;  %v15140_v25 = vor.u32 %v3876_v29, %v3875_v7  ;;  %v15142_v53 = vor.u32 %v3879_v44, %v3878_v59 }
 0x386   :  { %v3883_v23 = vor.u32 %v3882_v56, %v3881_v52  ;;  %v3886_v46 = vor.u32 %v3885_v38, %v3884_v1  ;;  %v3370_v41 = vmul.f32 %v3369_v63, %v15064_v20  ;;  %v3378_v26 = vadd.f32 -0.16666654, %v3377_v31  ;;  %v18015_v52 = vld [vmem:[#allocation19_spill] sm:$0xff] }
 0x387   :  { %vm15136_vm8 = vcmp.le.f32.partialorder %v18012_v33, 0.7853982  ;;  %vm3887_vm5 = vcmp.lt.s32.totalorder %v15122_v14, 1  ;;  %vm3890_vm10 = vcmp.lt.s32.totalorder %v15122_v14, 4  ;;  %v3364_v0 = vsel %vm3241_vm13, %v3363_v36, %v14680_v49 }
 0x388   :  { %v3515_v10 = vxor.u32 2147483648, %v3514_v51  ;;  %v15150_v33 = vadd.s32 %v3798_v62, %v3794_v43  ;;  %v15152_v7 = vshll.u32 %v3863_v28, 8  ;;  %vm10189_vm11 = vcmp.lt.s32.totalorder %v10188_v13, 0 }
 0x389   :  { %v15154_v59 = vor.u32 %v3873_v12, %v3872_v32  ;;  %vm3889_vm9 = vcmp.lt.s32.totalorder %v15122_v14, 3  ;;  %v4012_v29 = vand.u32 2139095040, %v18015_v52  ;;  %vm3888_vm4 = vcmp.lt.s32.totalorder %v15122_v14, 2 }
 0x38a   :  { %v3896_v44 = vsel %vm3890_vm10, %v3883_v23, 920167782  ;;  %v3899_v49 = vsel %vm3887_vm5, %v15140_v25, %v15142_v53  ;;  %v3900_v36 = vsel %vm3890_vm10, %v3886_v46, 1326507024  ;;  %v3233_v56 = vsel %vm3231_vm3, %v15060_v54, %v17512_v55 }
 0x38b   :  { %v3236_v1 = vsel %vm3234_vm2, %v17511_v9, %v15094_v42  ;;  %v3371_v63 = vadd.f32 -0.4999988, %v3370_v41  ;;  %v3379_v31 = vmul.f32 %v3378_v26, %v15064_v20  ;;  %v15178_v43 = vsel %vm10189_vm11, 0, %v10188_v13 }
 0x38c   :  { %v3800_v28 = vadd.s32 536870912, %v15150_v33  ;;  %v3901_v38 = vsel %vm3889_vm9, %v3883_v23, %v3900_v36  ;;  %v3904_v62 = vand.u32 65535, %v15152_v7  ;;  %v3895_v32 = vsel %vm3887_vm5, %v15154_v59, %v15140_v25 }
 0x38d   :  { %v3897_v12 = vsel %vm3889_vm9, %v15142_v53, %v3896_v44  ;;  %v3902_v13 = vsel %vm3888_vm4, %v3899_v49, %v3901_v38  ;;  %v3905_v46 = vshrl.u32 %v15152_v7, 16  ;;  %v3516_v41 = vsel %vm3395_vm12, %v3515_v10, %v3514_v51 }
 0x38e   :  { %v3906_v23 = vand.u32 65535, %v3902_v13  ;;  %v3907_v26 = vshrl.u32 %v3902_v13, 16  ;;  %v4013_v36 = vshrl.u32 %v4012_v29, 23  ;;  %v15198_v9 = vsel %vm3230_vm6, %v3233_v56, %v3236_v1 }
 0x38f   :  { %v15202_v55 = vsel %vm15008_vm7, 0, %v3364_v0  ;;  %v3372_v44 = vmul.f32 %v3371_v63, %v15064_v20  ;;  %v3380_v8 = vadd.f32 1.0, %v3379_v31  ;;  %v3661_v49 = vsub.s32 4294967266, %v15178_v43 }
 0x390   :  { %18016 = vst [vmem:[#allocation116_spill] sm:$0xff] %v15202_v55  ;;  %v15206_v38 = vshrl.u32 %v3800_v28, 30  ;;  %v3898_v51 = vsel %vm3888_vm4, %v3895_v32, %v3897_v12  ;;  %v3909_v10 = vmul.u32 %v3907_v26, %v3904_v62  ;;  %v15213_v24 = vsel %vm15136_vm8, %v18011_v11, %v3516_v41 }
 0x391   :  { %v3641_v45 = vadd.s32 %v14929_v15, %v14940_v5  ;;  %v3657_v0 = vsub.s32 32, %v15178_v43  ;;  %v3910_v20 = vmul.u32 %v3906_v23, %v3905_v46  ;;  %v3908_v29 = vmul.u32 %v3906_v23, %v3904_v62 }
 0x392   :  { %v3912_v56 = vshll.u32 %v3909_v10, 16  ;;  %v3928_v1 = vand.u32 65535, %v3898_v51  ;;  %v10196_v63 = vadd.s32 4294967169, %v4013_v36  ;;  %v15218_v31 = vadd.f32 1.0, %v3372_v44 }
 0x393   :  { %v15221_v28 = vmul.f32 %v3380_v8, %v15055_v17  ;;  %v15224_v32 = vand.u32 3, %v15202_v55  ;;  %v3929_v12 = vshrl.u32 %v3898_v51, 16  ;;  %v15228_v13 = vmul.f32 %v15213_v24, %v15213_v24 }
 0x394   :  { %18017 = vst [vmem:[#allocation117_spill] sm:$0xff] %v15218_v31  ;;  %v3662_v15 = vadd.s32 127, %v3661_v49  ;;  %v3802_v5 = vshll.u32 %v15206_v38, 30  ;;  %v3911_v41 = vmul.u32 %v3907_v26, %v3905_v46  ;;  %vm3228_vm7 = vweird.f32 %v17945_v60 }
 0x395   :  { %18018 = vst [vmem:[#allocation118_spill] sm:$0xff] %v15221_v28  ;;  %v3658_v23 = vshll.u32 %v15067_v6, %v15178_v43  ;;  %v3659_v36 = vshrl.u32 %v3641_v45, %v3657_v0  ;;  %v3871_v17 = vshrl.u32 %v17623_v39, %v15098_v61  ;;  %v3914_v8 = vshll.u32 %v3910_v20, 16 }
 0x396   :  { %v3892_v44 = vsel %vm3890_vm10, %v15142_v53, 2102212464  ;;  %vm3916_vm13 = vc.u32 %v3908_v29, %v3912_v56  ;;  %v3930_v51 = vmul.u32 %v3928_v1, %v3904_v62  ;;  %v4019_v49 = vadd.s32 1, %v10196_v63 }
 0x397   :  { %v3917_v54 = vsel %vm3916_vm13, 1, %v17619_v16  ;;  %v3918_v26 = vadd.s32 %v3912_v56, %v3908_v29  ;;  %v3931_v42 = vmul.u32 %v3929_v12, %v3904_v62  ;;  %v3932_v55 = vmul.u32 %v3928_v1, %v3905_v46 }
 0x398   :  { %v3663_v58 = vshll.u32 %v3662_v15, 23  ;;  %v15241_v6 = vsub.s32 %v15150_v33, %v3802_v5  ;;  %v3913_v43 = vshrl.u32 %v3909_v10, 16  ;;  %v3919_v45 = vadd.s32 %v3917_v54, %v3911_v41 }
 0x399   :  { %vm3920_vm3 = vc.u32 %v3918_v26, %v3914_v8  ;;  %v3933_v61 = vmul.u32 %v3929_v12, %v3905_v46  ;;  %v3934_v0 = vshll.u32 %v3931_v42, 16  ;;  %v3936_v48 = vshll.u32 %v3932_v55, 16 }
 0x39a   :  { %v3891_v53 = vsel %vm3887_vm5, %v3871_v17, %v15154_v59  ;;  %v3893_v29 = vsel %vm3889_vm9, %v15140_v25, %v3892_v44  ;;  %v3915_v62 = vshrl.u32 %v3910_v20, 16  ;;  %v3921_v56 = vsel %vm3920_vm3, 1, %v17619_v16 }
 0x39b   :  { %v3923_v1 = vadd.s32 %v3921_v56, %v3919_v45  ;;  %vm3938_vm2 = vc.u32 %v3930_v51, %v3934_v0  ;;  %v3940_v33 = vadd.s32 %v3934_v0, %v3930_v51  ;;  %vm4020_vm6 = vcmp.gt.s32.totalorder %v4019_v49, 0 }
 0x39c   :  { %vm3804_vm10 = vcmp.lt.s32.totalorder %v15241_v6, 0  ;;  %v3939_v54 = vsel %vm3938_vm2, 1, %v17619_v16  ;;  %v17520_v46 = vand.u32 2147483647, %v18015_v52  ;;  %v4021_v10 = vsel %vm4020_vm6, %v4019_v49, 0 }
 0x39d   :  { %v3924_v63 = vadd.s32 %v3923_v1, %v3913_v43  ;;  %v3935_v59 = vshrl.u32 %v3931_v42, 16  ;;  %v3941_v12 = vadd.s32 %v3939_v54, %v3933_v61  ;;  %vm3942_vm5 = vc.u32 %v3940_v33, %v3936_v48 }
 0x39e   :  { %v3805_v25 = vsub.s32 0, %v15241_v6  ;;  %v3894_v20 = vsel %vm3888_vm4, %v3891_v53, %v3893_v29  ;;  %v3943_v15 = vsel %vm3942_vm5, 1, %v17619_v16  ;;  %v4023_v5 = vand.u32 31, %v4021_v10 }
 0x39f   :  { %v15257_v41 = vadd.s32 %v3924_v63, %v3915_v62  ;;  %v3937_v17 = vshrl.u32 %v3932_v55, 16  ;;  %v15259_v8 = vadd.s32 %v3940_v33, %v3936_v48  ;;  %v3945_v44 = vadd.s32 %v3943_v15, %v3941_v12 }
 0x3a0   :  { %v15264_v42 = vsel %vm3228_vm7, nan, %v15198_v9  ;;  %v3517_v49 = vsub.s32 4, %v14880_v2  ;;  %v15268_v14 = vsub.s32 32, %v4023_v5  ;;  %v3522_v43 = vmul.f32 -0.001358992, %v15228_v13 }
 0x3a1   :  { %18019 = vst [vmem:[#allocation119_spill] sm:$0xff] %v15264_v42  ;;  %v3660_v45 = vor.u32 %v3659_v36, %v3658_v23  ;;  %v3946_v55 = vadd.s32 %v3945_v44, %v3935_v59  ;;  %vm3385_vm11 = vcmp.eq.s32.totalorder %v15224_v32, 0  ;;  %vm3388_vm9 = vcmp.eq.s32.totalorder %v15224_v32, 2 }
 0x3a2   :  { %v3664_v48 = vor.u32 4788187, %v3663_v58  ;;  %v3806_v9 = vsel %vm3804_vm10, %v3805_v25, %v15241_v6  ;;  %v3948_v61 = vmul.u32 %v15152_v7, %v3894_v20  ;;  %v4016_v0 = vand.u32 8388607, %v17520_v46 }
 0x3a3   :  { %v3947_v53 = vadd.s32 %v3946_v55, %v3937_v17  ;;  %vm3950_vm4 = vc.u32 %v15257_v41, %v15259_v8  ;;  %v4029_v23 = vshll.u32 %v17620_v22, %v4023_v5  ;;  %v4035_v36 = vshll.u32 %v17630_v19, %v4023_v5 }
 0x3a4   :  { %v4030_v58 = vshrl.u32 %v17895_v18, %v15268_v14  ;;  %v4032_v29 = vshll.u32 %v17895_v18, %v4023_v5  ;;  %v4033_v62 = vshrl.u32 %v17630_v19, %v15268_v14  ;;  %v4036_v7 = vshrl.u32 %v17631_v30, %v15268_v14 }
 0x3a5   :  { %vm3384_vm13 = vcmp.lt.s32.totalorder %v15224_v32, 2  ;;  %v3951_v56 = vadd.s32 1, %v3947_v53  ;;  %v15292_v1 = vshrl.u32 %v4021_v10, 5  ;;  %v4038_v33 = vshll.u32 %v17631_v30, %v4023_v5 }
 0x3a6   :  { %v4039_v54 = vshrl.u32 %v17632_v40, %v15268_v14  ;;  %v3529_v63 = vmul.f32 -0.00019511016, %v15228_v13  ;;  %v4017_v59 = vor.u32 8388608, %v4016_v0  ;;  %v4026_v12 = vshll.u32 %v17623_v39, %v4023_v5 }
 0x3a7   :  { %v4027_v25 = vshrl.u32 %v17620_v22, %v15268_v14  ;;  %v3807_v20 = vclz %v3806_v9  ;;  %v3952_v15 = vsel %vm3950_vm4, %v3951_v56, %v3947_v53  ;;  %v4037_v10 = vor.u32 %v4036_v7, %v4035_v36 }
 0x3a8   :  { %v4040_v17 = vor.u32 %v4039_v54, %v4038_v33  ;;  %v3523_v44 = vadd.f32 0.041655596, %v3522_v43  ;;  %v3953_v55 = vadd.s32 %v3952_v15, %v3948_v61  ;;  %v15304_v46 = vor.u32 %v4030_v58, %v4029_v23 }
 0x3a9   :  { %v15306_v51 = vor.u32 %v4033_v62, %v4032_v29  ;;  %vm17546_vm3 = vweird.f32 %v18002_v21  ;;  %v3665_v0 = vand.u32 2147483647, %v3664_v48  ;;  %v3667_v5 = vcvt.s32.f32 %v3660_v45 }
 0x3aa   :  { %vm4041_vm2 = vcmp.lt.s32.totalorder %v15292_v1, 1  ;;  %vm4044_vm6 = vcmp.lt.s32.totalorder %v15292_v1, 4  ;;  %v3530_v9 = vadd.f32 0.008332121, %v3529_v63  ;;  %v3954_v26 = vadd.s32 536870912, %v3953_v55 }
 0x3ab   :  { %v15311_v60 = vor.u32 %v4027_v25, %v4026_v12  ;;  %vm4043_vm10 = vcmp.lt.s32.totalorder %v15292_v1, 3  ;;  %v10191_v43 = vadd.s32 4294967294, %v3807_v20  ;;  %v4050_v61 = vsel %vm4044_vm6, %v4037_v10, 920167782 }
 0x3ac   :  { %v4054_v53 = vsel %vm4044_vm6, %v4040_v17, 1326507024  ;;  %v15318_v23 = vshll.u32 %v4017_v59, 8  ;;  %v3518_v45 = vsel %vm3395_vm12, %v3517_v49, %v14880_v2  ;;  %v15323_v48 = vshrl.u32 %v3954_v26, 30 }
 0x3ad   :  { %vm4042_vm5 = vcmp.lt.s32.totalorder %v15292_v1, 2  ;;  %v4053_v36 = vsel %vm4041_vm2, %v15304_v46, %v15306_v51  ;;  %v18020_v58 = vxor.u32 2147483648, %v15221_v28  ;;  %v18021_v62 = vxor.u32 2147483648, %v15218_v31 }
 0x3ae   :  { %v3668_v49 = vmul.f32 %v3667_v5, %v3665_v0  ;;  %v4055_v26 = vsel %vm4043_vm10, %v4037_v10, %v4054_v53  ;;  %v3524_v7 = vmul.f32 %v3523_v44, %v15228_v13  ;;  %v3531_v56 = vmul.f32 %v3530_v9, %v15228_v13 }
 0x3af   :  { %v3387_v29 = vsel %vm3385_vm11, %v15218_v31, %v18020_v58  ;;  %v3390_v2 = vsel %vm3388_vm9, %v18021_v62, %v15221_v28  ;;  %v4049_v33 = vsel %vm4041_vm2, %v15311_v60, %v15304_v46  ;;  %v4051_v54 = vsel %vm4043_vm10, %v15306_v51, %v4050_v61 }
 0x3b0   :  { %vm10192_vm12 = vcmp.lt.s32.totalorder %v10191_v43, 0  ;;  %v4056_v63 = vsel %vm4042_vm5, %v4053_v36, %v4055_v26  ;;  %v4058_v59 = vand.u32 65535, %v15318_v23  ;;  %v4059_v12 = vshrl.u32 %v15318_v23, 16 }
 0x3b1   :  { %v3391_v25 = vsel %vm3384_vm13, %v3387_v29, %v3390_v2  ;;  %v18022_v20 = vand.u32 2147483647, %v17986_v37  ;;  %vm3549_vm9 = vcmp.lt.s32.totalorder %v17986_v37, 0  ;;  %v3956_v10 = vshll.u32 %v15323_v48, 30 }
 0x3b2   :  { %v3669_v17 = vxor.u32 2147483648, %v3668_v49  ;;  %v4052_v44 = vsel %vm4042_vm5, %v4049_v33, %v4051_v54  ;;  %v4060_v0 = vand.u32 65535, %v4056_v63  ;;  %v4061_v5 = vshrl.u32 %v4056_v63, 16 }
 0x3b3   :  { %vm15359_vm11 = vcmp.le.f32.partialorder %v18022_v20, 0.7853982  ;;  %v15369_v32 = vsel %vm15136_vm8, 0, %v3518_v45  ;;  %v3525_v9 = vadd.f32 -0.4999988, %v3524_v7  ;;  %v3810_v53 = vsel %vm10192_vm12, 0, %v10191_v43 }
 0x3b4   :  { %18025 = vst [vmem:[#allocation120_spill] sm:$0xff] %v15369_v32  ;;  %v3532_v61 = vadd.f32 -0.16666654, %v3531_v56  ;;  %v15372_v36 = vand.u32 3, %v15369_v32  ;;  %v4062_v58 = vmul.u32 %v4060_v0, %v4058_v59  ;;  %v4063_v29 = vmul.u32 %v4061_v5, %v4058_v59 }
 0x3b5   :  { %v15374_v62 = vmul.u32 %v4060_v0, %v4059_v12  ;;  %v15378_v2 = vsel %vm17546_vm3, nan, %v3391_v25  ;;  %v15380_v26 = vsub.s32 %v3953_v55, %v3956_v10  ;;  %v4082_v33 = vand.u32 65535, %v4052_v44 }
 0x3b6   :  { %18026 = vst [vmem:[#allocation121_spill] sm:$0xff] %v15378_v2  ;;  %v4083_v34 = vshrl.u32 %v4052_v44, 16  ;;  %v3670_v45 = vsel %vm3549_vm9, %v3669_v17, %v3668_v49  ;;  %v3815_v7 = vsub.s32 4294967266, %v3810_v53  ;;  %v4065_v43 = vmul.u32 %v4061_v5, %v4059_v12 }
 0x3b7   :  { %v4066_v56 = vshll.u32 %v4063_v29, 16  ;;  %v3526_v54 = vmul.f32 %v3525_v9, %v15228_v13  ;;  %v3533_v63 = vmul.f32 %v3532_v61, %v15228_v13  ;;  %v4068_v20 = vshll.u32 %v15374_v62, 16 }
 0x3b8   :  { %v4085_v0 = vmul.u32 %v4083_v34, %v4058_v59  ;;  %v3671_v25 = vsub.s32 4, %v15030_v27  ;;  %v3795_v55 = vadd.s32 %v15083_v47, %v15081_v57  ;;  %v15393_v49 = vsel %vm15359_vm11, %v17986_v37, %v3670_v45  ;;  %v18027_v47 = vld [vmem:[#allocation31_spill] sm:$0xff] }
 0x3b9   :  { %vm4070_vm8 = vc.u32 %v4062_v58, %v4066_v56  ;;  %v4072_v10 = vadd.s32 %v4066_v56, %v4062_v58  ;;  %v3959_v17 = vsub.s32 0, %v15380_v26  ;;  %v4086_v13 = vmul.u32 %v4082_v33, %v4059_v12 }
 0x3ba   :  { %v4071_v44 = vsel %vm4070_vm8, 1, %v17619_v16  ;;  %v3811_v5 = vsub.s32 32, %v3810_v53  ;;  %v3816_v9 = vadd.s32 127, %v3815_v7  ;;  %vm3958_vm4 = vcmp.lt.s32.totalorder %v15380_v26, 0 }
 0x3bb   :  { %v4073_v61 = vadd.s32 %v4071_v44, %v4065_v43  ;;  %vm4074_vm13 = vc.u32 %v4072_v10, %v4068_v20  ;;  %v4084_v21 = vmul.u32 %v4082_v33, %v4058_v59  ;;  %v4088_v57 = vshll.u32 %v4085_v0, 16 }
 0x3bc   :  { %v4166_v58 = vand.u32 2139095040, %v18027_v47  ;;  %v3534_v56 = vadd.f32 1.0, %v3533_v63  ;;  %v15401_v45 = vmul.f32 %v15393_v49, %v15393_v49  ;;  %v3812_v31 = vshll.u32 %v15241_v6, %v3810_v53 }
 0x3bd   :  { %v4067_v28 = vshrl.u32 %v4063_v29, 16  ;;  %v3960_v32 = vsel %vm3958_vm4, %v3959_v17, %v15380_v26  ;;  %v4075_v7 = vsel %vm4074_vm13, 1, %v17619_v16  ;;  %v4087_v2 = vmul.u32 %v4083_v34, %v4059_v12 }
 0x3be   :  { %v4090_v42 = vshll.u32 %v4086_v13, 16  ;;  %v3813_v43 = vshrl.u32 %v3795_v55, %v3811_v5  ;;  %v3817_v20 = vshll.u32 %v3816_v9, 23  ;;  %v4025_v59 = vshrl.u32 %v17623_v39, %v15268_v14 }
 0x3bf   :  { %v4077_v33 = vadd.s32 %v4075_v7, %v4073_v61  ;;  %v4046_v63 = vsel %vm4044_vm6, %v15306_v51, 2102212464  ;;  %vm4092_vm12 = vc.u32 %v4084_v21, %v4088_v57  ;;  %v4094_v10 = vadd.s32 %v4088_v57, %v4084_v21 }
 0x3c0   :  { %v4167_v6 = vshrl.u32 %v4166_v58, 23  ;;  %v3961_v53 = vclz %v3960_v32  ;;  %v4069_v29 = vshrl.u32 %v15374_v62, 16  ;;  %v4093_v12 = vsel %vm4092_vm12, 1, %v17619_v16 }
 0x3c1   :  { %v4078_v17 = vadd.s32 %v4077_v33, %v4067_v28  ;;  %v4089_v34 = vshrl.u32 %v4085_v0, 16  ;;  %v4095_v55 = vadd.s32 %v4093_v12, %v4087_v2  ;;  %vm4096_vm8 = vc.u32 %v4094_v10, %v4090_v42 }
 0x3c2   :  { %v10199_v44 = vadd.s32 4294967169, %v4167_v6  ;;  %v3814_v5 = vor.u32 %v3813_v43, %v3812_v31  ;;  %v4045_v14 = vsel %vm4041_vm2, %v4025_v59, %v15311_v60  ;;  %v4047_v21 = vsel %vm4043_vm10, %v15304_v46, %v4046_v63 }
 0x3c3   :  { %v4097_v51 = vsel %vm4096_vm8, 1, %v17619_v16  ;;  %v3818_v32 = vor.u32 4788187, %v3817_v20  ;;  %v4091_v62 = vshrl.u32 %v4086_v13, 16  ;;  %v15420_v61 = vadd.f32 1.0, %v3526_v54 }
 0x3c4   :  { %v4099_v28 = vadd.s32 %v4097_v51, %v4095_v55  ;;  %v4173_v9 = vadd.s32 1, %v10199_v44  ;;  %v10194_v2 = vadd.s32 4294967294, %v3961_v53  ;;  %v15422_v0 = vadd.s32 %v4078_v17, %v4069_v29 }
 0x3c5   :  { %18028 = vst [vmem:[#allocation31_spill] sm:$0xff] %v15420_v61  ;;  %v15424_v31 = vadd.s32 %v4094_v10, %v4090_v42  ;;  %v3672_v60 = vsel %vm3549_vm9, %v3671_v25, %v15030_v27  ;;  %v4048_v46 = vsel %vm4042_vm5, %v4045_v14, %v4047_v21  ;;  %v15432_v13 = vmul.f32 %v3534_v56, %v15213_v24 }
 0x3c6   :  { %v4100_v57 = vadd.s32 %v4099_v28, %v4089_v34  ;;  %vm4174_vm2 = vcmp.gt.s32.totalorder %v4173_v9, 0  ;;  %v3683_v54 = vmul.f32 -0.00019511016, %v15401_v45  ;;  %v3821_v58 = vcvt.s32.f32 %v3814_v5 }
 0x3c7   :  { %18029 = vst [vmem:[#allocation122_spill] sm:$0xff] %v15432_v13  ;;  %v4175_v7 = vsel %vm4174_vm2, %v4173_v9, 0  ;;  %v3819_v43 = vand.u32 2147483647, %v3818_v32  ;;  %v17530_v42 = vand.u32 2147483647, %v18027_v47  ;;  %v4102_v27 = vmul.u32 %v15318_v23, %v4048_v46 }
 0x3c8   :  { %v4101_v20 = vadd.s32 %v4100_v57, %v4091_v62  ;;  %v4177_v59 = vand.u32 31, %v4175_v7  ;;  %vm3538_vm6 = vcmp.lt.s32.totalorder %v15372_v36, 2  ;;  %vm3539_vm10 = vcmp.eq.s32.totalorder %v15372_v36, 0 }
 0x3c9   :  { %vm10195_vm9 = vcmp.lt.s32.totalorder %v10194_v2, 0  ;;  %vm4104_vm5 = vc.u32 %v15422_v0, %v15424_v31  ;;  %vm3542_vm4 = vcmp.eq.s32.totalorder %v15372_v36, 2  ;;  %v15444_v24 = vsel %vm15359_vm11, 0, %v3672_v60 }
 0x3ca   :  { %18030 = vst [vmem:[#allocation123_spill] sm:$0xff] %v15444_v24  ;;  %v4105_v1 = vadd.s32 1, %v4101_v20  ;;  %v15446_v25 = vsub.s32 32, %v4177_v59  ;;  %v17529_v56 = vxor.u32 2147483648, %v15432_v13  ;;  %v17528_v33 = vxor.u32 2147483648, %v15420_v61 }
 0x3cb   :  { %v3676_v63 = vmul.f32 -0.001358992, %v15401_v45  ;;  %v3684_v10 = vadd.f32 0.008332121, %v3683_v54  ;;  %vm3703_vm13 = vcmp.lt.s32.totalorder %v17990_v4, 0  ;;  %v3822_v23 = vmul.f32 %v3821_v58, %v3819_v43 }
 0x3cc   :  { %v15452_v6 = vsel %vm10195_vm9, 0, %v10194_v2  ;;  %v4106_v53 = vsel %vm4104_vm5, %v4105_v1, %v4101_v20  ;;  %v4170_v15 = vand.u32 8388607, %v17530_v42  ;;  %v4183_v17 = vshll.u32 %v17620_v22, %v4177_v59 }
 0x3cd   :  { %v15456_v29 = vadd.s32 %v4106_v53, %v4102_v27  ;;  %v4186_v12 = vshll.u32 %v17895_v18, %v4177_v59  ;;  %v4189_v34 = vshll.u32 %v17630_v19, %v4177_v59  ;;  %v4184_v55 = vshrl.u32 %v17895_v18, %v15446_v25 }
 0x3ce   :  { %v4187_v44 = vshrl.u32 %v17630_v19, %v15446_v25  ;;  %v4190_v5 = vshrl.u32 %v17631_v30, %v15446_v25  ;;  %v4192_v14 = vshll.u32 %v17631_v30, %v4177_v59  ;;  %v3541_v21 = vsel %vm3539_vm10, %v15420_v61, %v17529_v56 }
 0x3cf   :  { %v3544_v51 = vsel %vm3542_vm4, %v17528_v33, %v15432_v13  ;;  %v3677_v32 = vadd.f32 0.041655596, %v3676_v63  ;;  %v18031_v62 = vand.u32 2147483647, %v17990_v4  ;;  %v15484_v9 = vshrl.u32 %v4175_v7, 5 }
 0x3d0   :  { %vm17537_vm12 = vweird.f32 %v18011_v11  ;;  %v3685_v2 = vmul.f32 %v3684_v10, %v15401_v45  ;;  %v3969_v60 = vsub.s32 4294967266, %v15452_v6  ;;  %v4171_v46 = vor.u32 8388608, %v4170_v15 }
 0x3d1   :  { %vm15480_vm11 = vcmp.le.f32.partialorder %v18031_v62, 0.7853982  ;;  %v4193_v57 = vshrl.u32 %v17632_v40, %v15446_v25  ;;  %v3823_v54 = vxor.u32 2147483648, %v3822_v23  ;;  %v4108_v58 = vadd.s32 536870912, %v15456_v29 }
 0x3d2   :  { %v4180_v43 = vshll.u32 %v17623_v39, %v4177_v59  ;;  %v4181_v20 = vshrl.u32 %v17620_v22, %v15446_v25  ;;  %v15495_v7 = vor.u32 %v4184_v55, %v4183_v17  ;;  %v4188_v27 = vor.u32 %v4187_v44, %v4186_v12 }
 0x3d3   :  { %v4191_v1 = vor.u32 %v4190_v5, %v4189_v34  ;;  %v4194_v63 = vor.u32 %v4193_v57, %v4192_v14  ;;  %v3949_v10 = vadd.s32 %v15259_v8, %v15257_v41  ;;  %v3965_v53 = vsub.s32 32, %v15452_v6  ;;  %v18034_v41 = vld [vmem:[#allocation23_spill] sm:$0xff] }
 0x3d4   :  { %vm4195_vm8 = vcmp.lt.s32.totalorder %v15484_v9, 1  ;;  %vm4198_vm2 = vcmp.lt.s32.totalorder %v15484_v9, 4  ;;  %v3545_v59 = vsel %vm3538_vm6, %v3541_v21, %v3544_v51  ;;  %v3678_v15 = vmul.f32 %v3677_v32, %v15401_v45 }
 0x3d5   :  { %v3970_v62 = vadd.s32 127, %v3969_v60  ;;  %v15505_v17 = vshll.u32 %v4171_v46, 8  ;;  %v15507_v12 = vshrl.u32 %v4108_v58, 30  ;;  %v4182_v34 = vor.u32 %v4181_v20, %v4180_v43 }
 0x3d6   :  { %vm4197_vm10 = vcmp.lt.s32.totalorder %v15484_v9, 3  ;;  %v4320_v8 = vand.u32 2139095040, %v18034_v41  ;;  %vm4196_vm9 = vcmp.lt.s32.totalorder %v15484_v9, 2  ;;  %v4204_v55 = vsel %vm4198_vm2, %v4191_v1, 920167782 }
 0x3d7   :  { %v4207_v36 = vsel %vm4195_vm8, %v15495_v7, %v4188_v27  ;;  %v4208_v44 = vsel %vm4198_vm2, %v4194_v63, 1326507024  ;;  %v3686_v5 = vadd.f32 -0.16666654, %v3685_v2  ;;  %v3824_v14 = vsel %vm3703_vm13, %v3823_v54, %v3822_v23 }
 0x3d8   :  { %v3966_v21 = vshll.u32 %v15380_v26, %v15452_v6  ;;  %v3967_v51 = vshrl.u32 %v3949_v10, %v3965_v53  ;;  %v3971_v32 = vshll.u32 %v3970_v62, 23  ;;  %v4209_v60 = vsel %vm4197_vm10, %v4191_v1, %v4208_v44 }
 0x3d9   :  { %v4212_v46 = vand.u32 65535, %v15505_v17  ;;  %v4213_v57 = vshrl.u32 %v15505_v17, 16  ;;  %v4110_v58 = vshll.u32 %v15507_v12, 30  ;;  %v4203_v2 = vsel %vm4195_vm8, %v4182_v34, %v15495_v7 }
 0x3da   :  { %v4205_v23 = vsel %vm4197_vm10, %v4188_v27, %v4204_v55  ;;  %v4210_v26 = vsel %vm4196_vm9, %v4207_v36, %v4209_v60  ;;  %v15538_v6 = vsel %vm15480_vm11, %v17990_v4, %v3824_v14  ;;  %v4321_v20 = vshrl.u32 %v4320_v8, 23 }
 0x3db   :  { %v4214_v54 = vand.u32 65535, %v4210_v26  ;;  %v4215_v43 = vshrl.u32 %v4210_v26, 16  ;;  %v15542_v1 = vsel %vm17537_vm12, nan, %v3545_v59  ;;  %v3679_v63 = vadd.f32 -0.4999988, %v3678_v15 }
 0x3dc   :  { %18035 = vst [vmem:[#allocation23_spill] sm:$0xff] %v15542_v1  ;;  %v3687_v10 = vmul.f32 %v3686_v5, %v15401_v45  ;;  %v15546_v53 = vand.u32 3, %v15444_v24  ;;  %v3968_v62 = vor.u32 %v3967_v51, %v3966_v21  ;;  %v3972_v55 = vor.u32 4788187, %v3971_v32 }
 0x3dd   :  { %v4206_v36 = vsel %vm4196_vm9, %v4203_v2, %v4205_v23  ;;  %v4217_v44 = vmul.u32 %v4215_v43, %v4212_v46  ;;  %v15553_v8 = vmul.f32 %v15538_v6, %v15538_v6  ;;  %v15556_v59 = vsub.s32 %v15456_v29, %v4110_v58 }
 0x3de   :  { %v4218_v15 = vmul.u32 %v4214_v54, %v4213_v57  ;;  %v4216_v5 = vmul.u32 %v4214_v54, %v4212_v46  ;;  %v4236_v26 = vand.u32 65535, %v4206_v36  ;;  %v10202_v33 = vadd.s32 4294967169, %v4321_v20 }
 0x3df   :  { %v4220_v60 = vshll.u32 %v4217_v44, 16  ;;  %v3680_v21 = vmul.f32 %v3679_v63, %v15401_v45  ;;  %v3688_v51 = vadd.f32 1.0, %v3687_v10  ;;  %v3830_v32 = vmul.f32 -0.001358992, %v15553_v8 }
 0x3e0   :  { %v4237_v2 = vshrl.u32 %v4206_v36, 16  ;;  %v3973_v23 = vand.u32 2147483647, %v3972_v55  ;;  %v3975_v56 = vcvt.s32.f32 %v3968_v62  ;;  %v4179_v42 = vshrl.u32 %v17623_v39, %v15446_v25 }
 0x3e1   :  { %v4219_v14 = vmul.u32 %v4215_v43, %v4213_v57  ;;  %v3837_v29 = vmul.f32 -0.00019511016, %v15553_v8  ;;  %vm4112_vm6 = vcmp.lt.s32.totalorder %v15556_v59, 0  ;;  %v4200_v58 = vsel %vm4198_vm2, %v4188_v27, 2102212464 }
 0x3e2   :  { %v4222_v54 = vshll.u32 %v4218_v15, 16  ;;  %v4113_v45 = vsub.s32 0, %v15556_v59  ;;  %vm4224_vm5 = vc.u32 %v4216_v5, %v4220_v60  ;;  %v4238_v20 = vmul.u32 %v4236_v26, %v4212_v46 }
 0x3e3   :  { %v4327_v63 = vadd.s32 1, %v10202_v33  ;;  %vm3857_vm4 = vcmp.lt.s32.totalorder %v18007_v3, 0  ;;  %v4225_v10 = vsel %vm4224_vm5, 1, %v17619_v16  ;;  %v4226_v62 = vadd.s32 %v4220_v60, %v4216_v5 }
 0x3e4   :  { %v4239_v25 = vmul.u32 %v4237_v2, %v4212_v46  ;;  %v4240_v43 = vmul.u32 %v4236_v26, %v4213_v57  ;;  %v3976_v55 = vmul.f32 %v3975_v56, %v3973_v23  ;;  %v4199_v36 = vsel %vm4195_vm8, %v4179_v42, %v4182_v34 }
 0x3e5   :  { %v4221_v11 = vshrl.u32 %v4217_v44, 16  ;;  %v4227_v61 = vadd.s32 %v4225_v10, %v4219_v14  ;;  %vm4228_vm2 = vc.u32 %v4226_v62, %v4222_v54  ;;  %v4241_v27 = vmul.u32 %v4237_v2, %v4213_v57 }
 0x3e6   :  { %v4242_v13 = vshll.u32 %v4239_v25, 16  ;;  %v4244_v24 = vshll.u32 %v4240_v43, 16  ;;  %v4114_v33 = vsel %vm4112_vm6, %v4113_v45, %v15556_v59  ;;  %v4201_v5 = vsel %vm4197_vm10, %v15495_v7, %v4200_v58 }
 0x3e7   :  { %v4223_v46 = vshrl.u32 %v4218_v15, 16  ;;  %v4229_v56 = vsel %vm4228_vm2, 1, %v17619_v16  ;;  %vm4328_vm8 = vcmp.gt.s32.totalorder %v4327_v63, 0  ;;  %v3977_v34 = vxor.u32 2147483648, %v3976_v55 }
 0x3e8   :  { %v4231_v60 = vadd.s32 %v4229_v56, %v4227_v61  ;;  %vm4246_vm5 = vc.u32 %v4238_v20, %v4242_v13  ;;  %v4248_v42 = vadd.s32 %v4242_v13, %v4238_v20  ;;  %v17539_v44 = vand.u32 2147483647, %v18034_v41 }
 0x3e9   :  { %v4247_v57 = vsel %vm4246_vm5, 1, %v17619_v16  ;;  %v4329_v14 = vsel %vm4328_vm8, %v4327_v63, 0  ;;  %v4243_v2 = vshrl.u32 %v4239_v25, 16  ;;  %v4115_v54 = vclz %v4114_v33 }
 0x3ea   :  { %v4232_v26 = vadd.s32 %v4231_v60, %v4221_v11  ;;  %v4249_v23 = vadd.s32 %v4247_v57, %v4241_v27  ;;  %vm4250_vm6 = vc.u32 %v4248_v42, %v4244_v24  ;;  %v4202_v7 = vsel %vm4196_vm9, %v4199_v36, %v4201_v5 }
 0x3eb   :  { %v4251_v15 = vsel %vm4250_vm6, 1, %v17619_v16  ;;  %v4331_v61 = vand.u32 31, %v4329_v14  ;;  %v4245_v13 = vshrl.u32 %v4240_v43, 16  ;;  %v15585_v45 = vadd.s32 %v4248_v42, %v4244_v24 }
 0x3ec   :  { %v15583_v58 = vadd.s32 %v4232_v26, %v4223_v46  ;;  %v4253_v20 = vadd.s32 %v4251_v15, %v4249_v23  ;;  %v15587_v10 = vadd.f32 1.0, %v3680_v21  ;;  %v18037_v11 = vsub.s32 4, %v15206_v38 }
 0x3ed   :  { %v18038_v9 = vand.u32 2147483647, %v18007_v3  ;;  %v15600_v25 = vsub.s32 32, %v4331_v61  ;;  %v15603_v24 = vmul.f32 %v3688_v51, %v15393_v49  ;;  %v3831_v43 = vadd.f32 0.041655596, %v3830_v32 }
 0x3ee   :  { %18036 = vst [vmem:[#allocation124_spill] sm:$0xff] %v15587_v10  ;;  %v3826_v63 = vsel %vm3703_vm13, %v18037_v11, %v15206_v38  ;;  %v3838_v21 = vadd.f32 0.008332121, %v3837_v29  ;;  %v4254_v36 = vadd.s32 %v4253_v20, %v4243_v2  ;;  %vm3696_vm9 = vcmp.eq.s32.totalorder %v15546_v53, 2 }
 0x3ef   :  { %vm15596_vm10 = vcmp.le.f32.partialorder %v18038_v9, 0.7853982  ;;  %18041 = vst [vmem:[#allocation125_spill] sm:$0xff] %v15603_v24  ;;  %v3978_v27 = vsel %vm3857_vm4, %v3977_v34, %v3976_v55  ;;  %v10197_v38 = vadd.s32 4294967294, %v4115_v54  ;;  %v4256_v33 = vmul.u32 %v15505_v17, %v4202_v7 }
 0x3f0   :  { %v4324_v5 = vand.u32 8388607, %v17539_v44  ;;  %v4255_v46 = vadd.s32 %v4254_v36, %v4245_v13  ;;  %vm4258_vm13 = vc.u32 %v15583_v58, %v15585_v45  ;;  %v4337_v49 = vshll.u32 %v17620_v22, %v4331_v61 }
 0x3f1   :  { %v4343_v51 = vshll.u32 %v17630_v19, %v4331_v61  ;;  %v4338_v32 = vshrl.u32 %v17895_v18, %v15600_v25  ;;  %v4340_v29 = vshll.u32 %v17895_v18, %v4331_v61  ;;  %v4341_v55 = vshrl.u32 %v17630_v19, %v15600_v25 }
 0x3f2   :  { %v4344_v17 = vshrl.u32 %v17631_v30, %v15600_v25  ;;  %v4259_v56 = vadd.s32 1, %v4255_v46  ;;  %v15622_v60 = vshrl.u32 %v4329_v14, 5  ;;  %v4346_v42 = vshll.u32 %v17631_v30, %v4331_v61 }
 0x3f3   :  { %v4347_v34 = vshrl.u32 %v17632_v40, %v15600_v25  ;;  %v15630_v57 = vsel %vm15596_vm10, %v18007_v3, %v3978_v27  ;;  %v4325_v26 = vor.u32 8388608, %v4324_v5  ;;  %v4334_v2 = vshll.u32 %v17623_v39, %v4331_v61 }
 0x3f4   :  { %v4335_v23 = vshrl.u32 %v17620_v22, %v15600_v25  ;;  %vm3693_vm2 = vcmp.eq.s32.totalorder %v15546_v53, 0  ;;  %vm10198_vm5 = vcmp.lt.s32.totalorder %v10197_v38, 0  ;;  %v4260_v14 = vsel %vm4258_vm13, %v4259_v56, %v4255_v46 }
 0x3f5   :  { %v4345_v54 = vor.u32 %v4344_v17, %v4343_v51  ;;  %v4348_v7 = vor.u32 %v4347_v34, %v4346_v42  ;;  %v3839_v15 = vmul.f32 %v3838_v21, %v15553_v8  ;;  %v4261_v13 = vadd.s32 %v4260_v14, %v4256_v33 }
 0x3f6   :  { %v15640_v20 = vor.u32 %v4338_v32, %v4337_v49  ;;  %v15642_v11 = vor.u32 %v4341_v55, %v4340_v29  ;;  %v17538_v61 = vxor.u32 2147483648, %v15587_v10  ;;  %v3832_v9 = vmul.f32 %v3831_v43, %v15553_v8 }
 0x3f7   :  { %vm4349_vm8 = vcmp.lt.s32.totalorder %v15622_v60, 1  ;;  %vm4352_vm6 = vcmp.lt.s32.totalorder %v15622_v60, 4  ;;  %v15650_v36 = vmul.f32 %v15630_v57, %v15630_v57  ;;  %v4118_v27 = vsel %vm10198_vm5, 0, %v10197_v38 }
 0x3f8   :  { %v15652_v5 = vor.u32 %v4335_v23, %v4334_v2  ;;  %vm4351_vm13 = vcmp.lt.s32.totalorder %v15622_v60, 3  ;;  %vm3692_vm12 = vcmp.lt.s32.totalorder %v15546_v53, 2  ;;  %v4262_v21 = vadd.s32 536870912, %v4261_v13 }
 0x3f9   :  { %v4358_v33 = vsel %vm4352_vm6, %v4345_v54, 920167782  ;;  %v4362_v43 = vsel %vm4352_vm6, %v4348_v7, 1326507024  ;;  %v15660_v46 = vshll.u32 %v4325_v26, 8  ;;  %v15664_v49 = vsel %vm15480_vm11, 0, %v3826_v63 }
 0x3fa   :  { %18042 = vst [vmem:[#allocation126_spill] sm:$0xff] %v15664_v49  ;;  %v3840_v38 = vadd.f32 -0.16666654, %v3839_v15  ;;  %vm4350_vm5 = vcmp.lt.s32.totalorder %v15622_v60, 2  ;;  %v4361_v51 = vsel %vm4349_vm8, %v15640_v20, %v15642_v11  ;;  %v17543_v32 = vxor.u32 2147483648, %v15603_v24 }
 0x3fb   :  { %v3698_v29 = vsel %vm3696_vm9, %v17538_v61, %v15603_v24  ;;  %v4123_v55 = vsub.s32 4294967266, %v4118_v27  ;;  %v4363_v28 = vsel %vm4351_vm13, %v4345_v54, %v4362_v43  ;;  %v3833_v63 = vadd.f32 -0.4999988, %v3832_v9 }
 0x3fc   :  { %v3991_v17 = vmul.f32 -0.00019511016, %v15650_v36  ;;  %v4357_v56 = vsel %vm4349_vm8, %v15652_v5, %v15640_v20  ;;  %v4359_v42 = vsel %vm4351_vm13, %v15642_v11, %v4358_v33  ;;  %v15687_v34 = vshrl.u32 %v4262_v21, 30 }
 0x3fd   :  { %v4364_v26 = vsel %vm4350_vm5, %v4361_v51, %v4363_v28  ;;  %v4366_v2 = vand.u32 65535, %v15660_v46  ;;  %v4367_v23 = vshrl.u32 %v15660_v46, 16  ;;  %v3841_v14 = vmul.f32 %v3840_v38, %v15553_v8 }
 0x3fe   :  { %v15695_v54 = vand.u32 3, %v15664_v49  ;;  %v4103_v7 = vadd.s32 %v15424_v31, %v15422_v0  ;;  %v4119_v15 = vsub.s32 32, %v4118_v27  ;;  %v4124_v9 = vadd.s32 127, %v4123_v55 }
 0x3ff   :  { %v4360_v21 = vsel %vm4350_vm5, %v4357_v56, %v4359_v42  ;;  %v4368_v33 = vand.u32 65535, %v4364_v26  ;;  %v4369_v43 = vshrl.u32 %v4364_v26, 16  ;;  %v3695_v51 = vsel %vm3693_vm2, %v15587_v10, %v17543_v32 }
 0x400   :  { %v3834_v38 = vmul.f32 %v3833_v63, %v15553_v8  ;;  %v3984_v28 = vmul.f32 -0.001358992, %v15650_v36  ;;  %v3992_v61 = vadd.f32 0.008332121, %v3991_v17  ;;  %v4264_v0 = vshll.u32 %v15687_v34, 30 }
 0x401   :  { %v4370_v31 = vmul.u32 %v4368_v33, %v4366_v2  ;;  %v4371_v55 = vmul.u32 %v4369_v43, %v4366_v2  ;;  %v15709_v44 = vmul.u32 %v4368_v33, %v4367_v23  ;;  %v3842_v56 = vadd.f32 1.0, %v3841_v14 }
 0x402   :  { %v4120_v42 = vshll.u32 %v15556_v59, %v4118_v27  ;;  %v4390_v26 = vand.u32 65535, %v4360_v21  ;;  %v4391_v24 = vshrl.u32 %v4360_v21, 16  ;;  %v4121_v49 = vshrl.u32 %v4103_v7, %v4119_v15 }
 0x403   :  { %v4125_v1 = vshll.u32 %v4124_v9, 23  ;;  %v4373_v50 = vmul.u32 %v4369_v43, %v4367_v23  ;;  %v4374_v32 = vshll.u32 %v4371_v55, 16  ;;  %v15714_v8 = vsel %vm3692_vm12, %v3695_v51, %v3698_v29 }
 0x404   :  { %v3985_v63 = vadd.f32 0.041655596, %v3984_v28  ;;  %v4376_v17 = vshll.u32 %v15709_v44, 16  ;;  %v4393_v10 = vmul.u32 %v4391_v24, %v4366_v2  ;;  %v3993_v33 = vmul.f32 %v3992_v61, %v15650_v36 }
 0x405   :  { %v15718_v35 = vsub.s32 %v4261_v13, %v4264_v0  ;;  %vm4378_vm11 = vc.u32 %v4370_v31, %v4374_v32  ;;  %v4380_v59 = vadd.s32 %v4374_v32, %v4370_v31  ;;  %v15720_v27 = vadd.f32 1.0, %v3834_v38  ;;  %v18045_v13 = vld [vmem:[#allocation24_spill] sm:$0xff] }
 0x406   :  { %v3979_v14 = vsub.s32 4, %v15323_v48  ;;  %v4379_v7 = vsel %vm4378_vm11, 1, %v17619_v16  ;;  %v4394_v15 = vmul.u32 %v4390_v26, %v4367_v23  ;;  %v15725_v53 = vmul.f32 %v3842_v56, %v15538_v6 }
 0x407   :  { %18043 = vst [vmem:[#allocation127_spill] sm:$0xff] %v15720_v27  ;;  %v4122_v29 = vor.u32 %v4121_v49, %v4120_v42  ;;  %v4126_v9 = vor.u32 4788187, %v4125_v1  ;;  %v4381_v21 = vadd.s32 %v4379_v7, %v4373_v50  ;;  %vm4382_vm12 = vc.u32 %v4380_v59, %v4376_v17 }
 0x408   :  { %18044 = vst [vmem:[#allocation128_spill] sm:$0xff] %v15725_v53  ;;  %v4392_v43 = vmul.u32 %v4390_v26, %v4366_v2  ;;  %v4396_v61 = vshll.u32 %v4393_v10, 16  ;;  %v4474_v51 = vand.u32 2139095040, %v18045_v13  ;;  %v3986_v32 = vmul.f32 %v3985_v63, %v15650_v36 }
 0x409   :  { %v3994_v38 = vadd.f32 -0.16666654, %v3993_v33  ;;  %v4267_v28 = vsub.s32 0, %v15718_v35  ;;  %v4375_v0 = vshrl.u32 %v4371_v55, 16  ;;  %vm4266_vm9 = vcmp.lt.s32.totalorder %v15718_v35, 0 }
 0x40a   :  { %v4383_v31 = vsel %vm4382_vm12, 1, %v17619_v16  ;;  %v4395_v6 = vmul.u32 %v4391_v24, %v4367_v23  ;;  %v4398_v56 = vshll.u32 %v4394_v15, 16  ;;  %vm3850_vm2 = vcmp.eq.s32.totalorder %v15695_v54, 2 }
 0x40b   :  { %v4127_v50 = vand.u32 2147483647, %v4126_v9  ;;  %v4129_v1 = vcvt.s32.f32 %v4122_v29  ;;  %v4333_v49 = vshrl.u32 %v17623_v39, %v15600_v25  ;;  %v4385_v2 = vadd.s32 %v4383_v31, %v4381_v21 }
 0x40c   :  { %vm3847_vm11 = vcmp.eq.s32.totalorder %v15695_v54, 0  ;;  %v4354_v55 = vsel %vm4352_vm6, %v15642_v11, 2102212464  ;;  %vm4400_vm3 = vc.u32 %v4392_v43, %v4396_v61  ;;  %v4402_v42 = vadd.s32 %v4396_v61, %v4392_v43 }
 0x40d   :  { %v4475_v26 = vshrl.u32 %v4474_v51, 23  ;;  %v4268_v24 = vsel %vm4266_vm9, %v4267_v28, %v15718_v35  ;;  %v4377_v23 = vshrl.u32 %v15709_v44, 16  ;;  %v4386_v63 = vadd.s32 %v4385_v2, %v4375_v0 }
 0x40e   :  { %v4401_v17 = vsel %vm4400_vm3, 1, %v17619_v16  ;;  %v4397_v33 = vshrl.u32 %v4393_v10, 16  ;;  %vm4404_vm12 = vc.u32 %v4402_v42, %v4398_v56  ;;  %v4130_v7 = vmul.f32 %v4129_v1, %v4127_v50 }
 0x40f   :  { %v4403_v59 = vadd.s32 %v4401_v17, %v4395_v6  ;;  %v10205_v25 = vadd.s32 4294967169, %v4475_v26  ;;  %v4353_v29 = vsel %vm4349_vm8, %v4333_v49, %v15652_v5  ;;  %v4355_v11 = vsel %vm4351_vm13, %v15640_v20, %v4354_v55 }
 0x410   :  { %v4405_v9 = vsel %vm4404_vm12, 1, %v17619_v16  ;;  %vm3846_vm6 = vcmp.lt.s32.totalorder %v15695_v54, 2  ;;  %v4269_v44 = vclz %v4268_v24  ;;  %v4399_v21 = vshrl.u32 %v4394_v15, 16 }
 0x411   :  { %v4407_v43 = vadd.s32 %v4405_v9, %v4403_v59  ;;  %v4481_v10 = vadd.s32 1, %v10205_v25  ;;  %v17547_v61 = vxor.u32 2147483648, %v15720_v27  ;;  %v3980_v51 = vsel %vm3857_vm4, %v3979_v14, %v15323_v48 }
 0x412   :  { %v15754_v28 = vadd.s32 %v4386_v63, %v4377_v23  ;;  %v15756_v5 = vadd.s32 %v4402_v42, %v4398_v56  ;;  %v17548_v20 = vxor.u32 2147483648, %v15725_v53  ;;  %v4356_v0 = vsel %vm4350_vm5, %v4353_v29, %v4355_v11 }
 0x413   :  { %v4408_v31 = vadd.s32 %v4407_v43, %v4397_v33  ;;  %vm4482_vm3 = vcmp.gt.s32.totalorder %v4481_v10, 0  ;;  %v3987_v15 = vadd.f32 -0.4999988, %v3986_v32  ;;  %v3995_v6 = vmul.f32 %v3994_v38, %v15650_v36 }
 0x414   :  { %v4131_v50 = vxor.u32 2147483648, %v4130_v7  ;;  %v4483_v1 = vsel %vm4482_vm3, %v4481_v10, 0  ;;  %v10200_v49 = vadd.s32 4294967294, %v4269_v44  ;;  %v17549_v48 = vand.u32 2147483647, %v18045_v13 }
 0x415   :  { %v4409_v2 = vadd.s32 %v4408_v31, %v4399_v21  ;;  %v4485_v14 = vand.u32 31, %v4483_v1  ;;  %v18046_v56 = vand.u32 2147483647, %v18015_v52  ;;  %vm4011_vm8 = vcmp.lt.s32.totalorder %v18015_v52, 0 }
 0x416   :  { %v4410_v60 = vmul.u32 %v15660_v46, %v4356_v0  ;;  %vm4412_vm13 = vc.u32 %v15754_v28, %v15756_v5  ;;  %v3852_v32 = vsel %vm3850_vm2, %v17547_v61, %v15725_v53  ;;  %v15780_v38 = vsel %vm15596_vm10, 0, %v3980_v51 }
 0x417   :  { %vm15765_vm4 = vcmp.le.f32.partialorder %v18046_v56, 0.7853982  ;;  %18049 = vst [vmem:[#allocation24_spill] sm:$0xff] %v15780_v38  ;;  %v4413_v42 = vadd.s32 1, %v4409_v2  ;;  %v15782_v26 = vsub.s32 32, %v4485_v14  ;;  %v3849_v46 = vsel %vm3847_vm11, %v15720_v27, %v17548_v20 }
 0x418   :  { %v3988_v24 = vmul.f32 %v3987_v15, %v15650_v36  ;;  %v3996_v23 = vadd.f32 1.0, %v3995_v6  ;;  %v15791_v63 = vand.u32 3, %v15780_v38  ;;  %v4132_v62 = vsel %vm4011_vm8, %v4131_v50, %v4130_v7 }
 0x419   :  { %vm10201_vm10 = vcmp.lt.s32.totalorder %v10200_v49, 0  ;;  %v4414_v17 = vsel %vm4412_vm13, %v4413_v42, %v4409_v2  ;;  %v4478_v33 = vand.u32 8388607, %v17549_v48  ;;  %v4491_v25 = vshll.u32 %v17620_v22, %v4485_v14 }
 0x41a   :  { %v4415_v59 = vadd.s32 %v4414_v17, %v4410_v60  ;;  %v4492_v29 = vshrl.u32 %v17895_v18, %v15782_v26  ;;  %v4494_v36 = vshll.u32 %v17895_v18, %v4485_v14  ;;  %v4495_v11 = vshrl.u32 %v17630_v19, %v15782_v26  ;;  %v18052_v17 = vld [vmem:[#allocation27_spill] sm:$0xff] }
 0x41b   :  { %v4497_v9 = vshll.u32 %v17630_v19, %v4485_v14  ;;  %v4498_v7 = vshrl.u32 %v17631_v30, %v15782_v26  ;;  %v4500_v44 = vshll.u32 %v17631_v30, %v4485_v14  ;;  %v15809_v21 = vsel %vm3846_vm6, %v3849_v46, %v3852_v32 }
 0x41c   :  { %v15811_v43 = vadd.f32 1.0, %v3988_v24  ;;  %v4416_v10 = vadd.s32 536870912, %v4415_v59  ;;  %v15813_v51 = vshrl.u32 %v4483_v1, 5  ;;  %v15816_v0 = vmul.f32 %v3996_v23, %v15630_v57 }
 0x41d   :  { %vm4001_vm5 = vcmp.eq.s32.totalorder %v15791_v63, 0  ;;  %vm4004_vm9 = vcmp.eq.s32.totalorder %v15791_v63, 2  ;;  %v15823_v31 = vsel %vm15765_vm4, %v18015_v52, %v4132_v62  ;;  %v4479_v54 = vor.u32 8388608, %v4478_v33 }
 0x41e   :  { %18050 = vst [vmem:[#allocation129_spill] sm:$0xff] %v15811_v43  ;;  %v4501_v15 = vshrl.u32 %v17632_v40, %v15782_v26  ;;  %v4272_v6 = vsel %vm10201_vm10, 0, %v10200_v49  ;;  %v4488_v50 = vshll.u32 %v17623_v39, %v4485_v14  ;;  %v4489_v57 = vshrl.u32 %v17620_v22, %v15782_v26 }
 0x41f   :  { %18051 = vst [vmem:[#allocation130_spill] sm:$0xff] %v15816_v0  ;;  %v15831_v1 = vor.u32 %v4492_v29, %v4491_v25  ;;  %v15833_v2 = vshrl.u32 %v4416_v10, 30  ;;  %v15835_v56 = vor.u32 %v4495_v11, %v4494_v36  ;;  %v4499_v60 = vor.u32 %v4498_v7, %v4497_v9 }
 0x420   :  { %v4502_v32 = vor.u32 %v4501_v15, %v4500_v44  ;;  %v4133_v42 = vsub.s32 4, %v15507_v12  ;;  %v15840_v46 = vmul.f32 %v15823_v31, %v15823_v31  ;;  %vm4503_vm2 = vcmp.lt.s32.totalorder %v15813_v51, 1 }
 0x421   :  { %vm4506_vm11 = vcmp.lt.s32.totalorder %v15813_v51, 4  ;;  %v17550_v49 = vxor.u32 2147483648, %v15816_v0  ;;  %v17558_v14 = vxor.u32 2147483648, %v15811_v43  ;;  %v4277_v24 = vsub.s32 4294967266, %v4272_v6 }
 0x422   :  { %v15846_v23 = vshll.u32 %v4479_v54, 8  ;;  %v15848_v62 = vor.u32 %v4489_v57, %v4488_v50  ;;  %vm4504_vm12 = vcmp.lt.s32.totalorder %v15813_v51, 2  ;;  %vm4505_vm6 = vcmp.lt.s32.totalorder %v15813_v51, 3 }
 0x423   :  { %v4628_v33 = vand.u32 2139095040, %v18052_v17  ;;  %v4418_v25 = vshll.u32 %v15833_v2, 30  ;;  %v4512_v29 = vsel %vm4506_vm11, %v4499_v60, 920167782  ;;  %v4515_v36 = vsel %vm4503_vm2, %v15831_v1, %v15835_v56 }
 0x424   :  { %v4516_v11 = vsel %vm4506_vm11, %v4502_v32, 1326507024  ;;  %v4138_v9 = vmul.f32 -0.001358992, %v15840_v46  ;;  %v4145_v7 = vmul.f32 -0.00019511016, %v15840_v46  ;;  %v4257_v44 = vadd.s32 %v15585_v45, %v15583_v58 }
 0x425   :  { %v4273_v10 = vsub.s32 32, %v4272_v6  ;;  %v4278_v54 = vadd.s32 127, %v4277_v24  ;;  %v4517_v15 = vsel %vm4505_vm6, %v4499_v60, %v4516_v11  ;;  %v4520_v50 = vand.u32 65535, %v15846_v23 }
 0x426   :  { %v4521_v57 = vshrl.u32 %v15846_v23, 16  ;;  %v4511_v32 = vsel %vm4503_vm2, %v15848_v62, %v15831_v1  ;;  %v4513_v61 = vsel %vm4505_vm6, %v15835_v56, %v4512_v29  ;;  %v4518_v58 = vsel %vm4504_vm12, %v4515_v36, %v4517_v15 }
 0x427   :  { %v4629_v45 = vshrl.u32 %v4628_v33, 23  ;;  %vm4000_vm3 = vcmp.lt.s32.totalorder %v15791_v63, 2  ;;  %v15880_v60 = vsub.s32 %v4415_v59, %v4418_v25  ;;  %v4522_v24 = vand.u32 65535, %v4518_v58 }
 0x428   :  { %v4523_v11 = vshrl.u32 %v4518_v58, 16  ;;  %v4003_v20 = vsel %vm4001_vm5, %v15811_v43, %v17550_v49  ;;  %v4006_v29 = vsel %vm4004_vm9, %v17558_v14, %v15816_v0  ;;  %v4134_v33 = vsel %vm4011_vm8, %v4133_v42, %v15507_v12 }
 0x429   :  { %v4139_v59 = vadd.f32 0.041655596, %v4138_v9  ;;  %v4274_v25 = vshll.u32 %v15718_v35, %v4272_v6  ;;  %v4275_v36 = vshrl.u32 %v4257_v44, %v4273_v10  ;;  %v4514_v15 = vsel %vm4504_vm12, %v4511_v32, %v4513_v61 }
 0x42a   :  { %v4525_v58 = vmul.u32 %v4523_v11, %v4520_v50  ;;  %v4146_v48 = vadd.f32 0.008332121, %v4145_v7  ;;  %v4279_v49 = vshll.u32 %v4278_v54, 23  ;;  %v4526_v27 = vmul.u32 %v4522_v24, %v4521_v57 }
 0x42b   :  { %v10208_v53 = vadd.s32 4294967169, %v4629_v45  ;;  %v4421_v43 = vsub.s32 0, %v15880_v60  ;;  %v4524_v38 = vmul.u32 %v4522_v24, %v4520_v50  ;;  %v4544_v0 = vand.u32 65535, %v4514_v15 }
 0x42c   :  { %v4528_v14 = vshll.u32 %v4525_v58, 16  ;;  %v4007_v12 = vsel %vm4000_vm3, %v4003_v20, %v4006_v29  ;;  %v15903_v35 = vsel %vm15765_vm4, 0, %v4134_v33  ;;  %vm4420_vm8 = vcmp.lt.s32.totalorder %v15880_v60, 0 }
 0x42d   :  { %18053 = vst [vmem:[#allocation27_spill] sm:$0xff] %v15903_v35  ;;  %v4545_v61 = vshrl.u32 %v4514_v15, 16  ;;  %v4140_v6 = vmul.f32 %v4139_v59, %v15840_v46  ;;  %v4276_v42 = vor.u32 %v4275_v36, %v4274_v25  ;;  %v4487_v9 = vshrl.u32 %v17623_v39, %v15782_v26 }
 0x42e   :  { %v4527_v7 = vmul.u32 %v4523_v11, %v4521_v57  ;;  %vm3690_vm13 = vweird.f32 %v17986_v37  ;;  %vm17562_vm10 = vweird.f32 %v17990_v4  ;;  %v4147_v20 = vmul.f32 %v4146_v48, %v15840_v46 }
 0x42f   :  { %v4280_v63 = vor.u32 4788187, %v4279_v49  ;;  %v4508_v55 = vsel %vm4506_vm11, %v15835_v56, 2102212464  ;;  %v4530_v44 = vshll.u32 %v4526_v27, 16  ;;  %vm17561_vm4 = vweird.f32 %v18007_v3  ;;  %v18062_v3 = vld [vmem:[#allocation29_spill] sm:$0xff] }
 0x430   :  { %v4422_v10 = vsel %vm4420_vm8, %v4421_v43, %v15880_v60  ;;  %vm4532_vm5 = vc.u32 %v4524_v38, %v4528_v14  ;;  %v4546_v54 = vmul.u32 %v4544_v0, %v4520_v50  ;;  %v4635_v26 = vadd.s32 1, %v10208_v53 }
 0x431   :  { %v4533_v32 = vsel %vm4532_vm5, 1, %v17619_v16  ;;  %v4534_v45 = vadd.s32 %v4528_v14, %v4524_v38  ;;  %v4547_v24 = vmul.u32 %v4545_v61, %v4520_v50  ;;  %v4548_v11 = vmul.u32 %v4544_v0, %v4521_v57 }
 0x432   :  { %v4283_v29 = vcvt.s32.f32 %v4276_v42  ;;  %v4507_v48 = vsel %vm4503_vm2, %v4487_v9, %v15848_v62  ;;  %v4529_v49 = vshrl.u32 %v4525_v58, 16  ;;  %v4535_v56 = vadd.s32 %v4533_v32, %v4527_v7 }
 0x433   :  { %vm4536_vm9 = vc.u32 %v4534_v45, %v4530_v44  ;;  %v4549_v33 = vmul.u32 %v4545_v61, %v4521_v57  ;;  %v4550_v59 = vshll.u32 %v4547_v24, 16  ;;  %v4552_v25 = vshll.u32 %v4548_v11, 16 }
 0x434   :  { %v4423_v43 = vclz %v4422_v10  ;;  %v4509_v53 = vsel %vm4505_vm6, %v15831_v1, %v4508_v55  ;;  %v4531_v36 = vshrl.u32 %v4526_v27, 16  ;;  %v4537_v38 = vsel %vm4536_vm9, 1, %v17619_v16 }
 0x435   :  { %v4539_v0 = vadd.s32 %v4537_v38, %v4535_v56  ;;  %vm4554_vm11 = vc.u32 %v4546_v54, %v4550_v59  ;;  %v4556_v14 = vadd.s32 %v4550_v59, %v4546_v54  ;;  %vm4636_vm3 = vcmp.gt.s32.totalorder %v4635_v26, 0 }
 0x436   :  { %v4281_v50 = vand.u32 2147483647, %v4280_v63  ;;  %v4555_v62 = vsel %vm4554_vm11, 1, %v17619_v16  ;;  %v17564_v15 = vand.u32 2147483647, %v18052_v17  ;;  %v4637_v57 = vsel %vm4636_vm3, %v4635_v26, 0 }
 0x437   :  { %v4540_v58 = vadd.s32 %v4539_v0, %v4529_v49  ;;  %v4551_v61 = vshrl.u32 %v4547_v24, 16  ;;  %v4557_v42 = vadd.s32 %v4555_v62, %v4549_v33  ;;  %vm4558_vm2 = vc.u32 %v4556_v14, %v4552_v25 }
 0x438   :  { %v10203_v9 = vadd.s32 4294967294, %v4423_v43  ;;  %v4510_v27 = vsel %vm4504_vm12, %v4507_v48, %v4509_v53  ;;  %v4559_v1 = vsel %vm4558_vm2, 1, %v17619_v16  ;;  %v4639_v7 = vand.u32 31, %v4637_v57 }
 0x439   :  { %v15930_v55 = vadd.s32 %v4540_v58, %v4531_v36  ;;  %v4553_v44 = vshrl.u32 %v4548_v11, 16  ;;  %v15932_v63 = vadd.s32 %v4556_v14, %v4552_v25  ;;  %v4561_v10 = vadd.s32 %v4559_v1, %v4557_v42 }
 0x43a   :  { %v15937_v54 = vsel %vm3690_vm13, nan, %v15714_v8  ;;  %v15942_v26 = vsel %vm17562_vm10, nan, %v15809_v21  ;;  %v15945_v51 = vand.u32 3, %v15903_v35  ;;  %v15947_v32 = vsub.s32 32, %v4639_v7 }
 0x43b   :  { %18054 = vst [vmem:[#allocation131_spill] sm:$0xff] %v15937_v54  ;;  %v15951_v45 = vsel %vm17561_vm4, nan, %v4007_v12  ;;  %v4141_v24 = vadd.f32 -0.4999988, %v4140_v6  ;;  %v4148_v11 = vadd.f32 -0.16666654, %v4147_v20  ;;  %v4562_v48 = vadd.s32 %v4561_v10, %v4551_v61 }
 0x43c   :  { %18055 = vst [vmem:[#allocation132_spill] sm:$0xff] %v15942_v26  ;;  %vm4165_vm12 = vcmp.lt.s32.totalorder %v18027_v47, 0  ;;  %v4284_v8 = vmul.f32 %v4283_v29, %v4281_v50  ;;  %vm10204_vm6 = vcmp.lt.s32.totalorder %v10203_v9, 0  ;;  %v4564_v49 = vmul.u32 %v15846_v23, %v4510_v27 }
 0x43d   :  { %18056 = vst [vmem:[#allocation133_spill] sm:$0xff] %v15951_v45  ;;  %v4632_v21 = vand.u32 8388607, %v17564_v15  ;;  %v4563_v56 = vadd.s32 %v4562_v48, %v4553_v44  ;;  %vm4566_vm8 = vc.u32 %v15930_v55, %v15932_v63  ;;  %v4645_v33 = vshll.u32 %v17620_v22, %v4639_v7 }
 0x43e   :  { %v4651_v12 = vshll.u32 %v17630_v19, %v4639_v7  ;;  %v4646_v6 = vshrl.u32 %v17895_v18, %v15947_v32  ;;  %v4648_v20 = vshll.u32 %v17895_v18, %v4639_v7  ;;  %v4649_v29 = vshrl.u32 %v17630_v19, %v15947_v32 }
 0x43f   :  { %v4652_v23 = vshrl.u32 %v17631_v30, %v15947_v32  ;;  %v18057_v59 = vand.u32 2147483647, %v18027_v47  ;;  %v4567_v43 = vadd.s32 1, %v4563_v56  ;;  %v15974_v53 = vshrl.u32 %v4637_v57, 5 }
 0x440   :  { %v4654_v36 = vshll.u32 %v17631_v30, %v4639_v7  ;;  %v4655_v38 = vshrl.u32 %v17632_v40, %v15947_v32  ;;  %v4149_v0 = vmul.f32 %v4148_v11, %v15840_v46  ;;  %v4426_v14 = vsel %vm10204_vm6, 0, %v10203_v9 }
 0x441   :  { %vm15970_vm5 = vcmp.le.f32.partialorder %v18057_v59, 0.7853982  ;;  %v4642_v50 = vshll.u32 %v17623_v39, %v4639_v7  ;;  %v4643_v62 = vshrl.u32 %v17620_v22, %v15947_v32  ;;  %v4568_v58 = vsel %vm4566_vm8, %v4567_v43, %v4563_v56 }
 0x442   :  { %v4633_v57 = vor.u32 8388608, %v4632_v21  ;;  %v4653_v61 = vor.u32 %v4652_v23, %v4651_v12  ;;  %v4656_v42 = vor.u32 %v4655_v38, %v4654_v36  ;;  %v4142_v27 = vmul.f32 %v4141_v24, %v15840_v46 }
 0x443   :  { %v4569_v1 = vadd.s32 %v4568_v58, %v4564_v49  ;;  %v15988_v44 = vor.u32 %v4646_v6, %v4645_v33  ;;  %v15990_v10 = vor.u32 %v4649_v29, %v4648_v20  ;;  %v4285_v9 = vxor.u32 2147483648, %v4284_v8 }
 0x444   :  { %v4431_v11 = vsub.s32 4294967266, %v4426_v14  ;;  %vm4657_vm9 = vcmp.lt.s32.totalorder %v15974_v53, 1  ;;  %vm4660_vm11 = vcmp.lt.s32.totalorder %v15974_v53, 4  ;;  %v4150_v7 = vadd.f32 1.0, %v4149_v0 }
 0x445   :  { %v4570_v48 = vadd.s32 536870912, %v4569_v1  ;;  %v15994_v59 = vor.u32 %v4643_v62, %v4642_v50  ;;  %vm4659_vm3 = vcmp.lt.s32.totalorder %v15974_v53, 3  ;;  %vm4158_vm2 = vcmp.eq.s32.totalorder %v15945_v51, 2 }
 0x446   :  { %v4411_v46 = vadd.s32 %v15756_v5, %v15754_v28  ;;  %v4666_v24 = vsel %vm4660_vm11, %v4653_v61, 920167782  ;;  %v4670_v49 = vsel %vm4660_vm11, %v4656_v42, 1326507024  ;;  %v16004_v21 = vshll.u32 %v4633_v57, 8 }
 0x447   :  { %v4427_v56 = vsub.s32 32, %v4426_v14  ;;  %v16006_v33 = vshrl.u32 %v4570_v48, 30  ;;  %vm4658_vm6 = vcmp.lt.s32.totalorder %v15974_v53, 2  ;;  %v4669_v12 = vsel %vm4657_vm9, %v15988_v44, %v15990_v10 }
 0x448   :  { %v16013_v6 = vadd.f32 1.0, %v4142_v27  ;;  %vm4155_vm8 = vcmp.eq.s32.totalorder %v15945_v51, 0  ;;  %v4286_v28 = vsel %vm4165_vm12, %v4285_v9, %v4284_v8  ;;  %v4432_v5 = vadd.s32 127, %v4431_v11 }
 0x449   :  { %v4671_v20 = vsel %vm4659_vm3, %v4653_v61, %v4670_v49  ;;  %v16021_v29 = vmul.f32 %v4150_v7, %v15823_v31  ;;  %v4572_v23 = vshll.u32 %v16006_v33, 30  ;;  %v4665_v43 = vsel %vm4657_vm9, %v15994_v59, %v15988_v44 }
 0x44a   :  { %18060 = vst [vmem:[#allocation134_spill] sm:$0xff] %v16013_v6  ;;  %v4667_v36 = vsel %vm4659_vm3, %v15990_v10, %v4666_v24  ;;  %v4287_v8 = vsub.s32 4, %v15687_v34  ;;  %v4672_v38 = vsel %vm4658_vm6, %v4669_v12, %v4671_v20  ;;  %v4674_v0 = vand.u32 65535, %v16004_v21 }
 0x44b   :  { %18061 = vst [vmem:[#allocation135_spill] sm:$0xff] %v16021_v29  ;;  %v4675_v31 = vshrl.u32 %v16004_v21, 16  ;;  %v16039_v50 = vsel %vm15970_vm5, %v18027_v47, %v4286_v28  ;;  %v4428_v62 = vshll.u32 %v15880_v60, %v4426_v14  ;;  %v4429_v58 = vshrl.u32 %v4411_v46, %v4427_v56 }
 0x44c   :  { %v16042_v57 = vsub.s32 %v4569_v1, %v4572_v23  ;;  %v4433_v61 = vshll.u32 %v4432_v5, 23  ;;  %v4668_v42 = vsel %vm4658_vm6, %v4665_v43, %v4667_v36  ;;  %v4676_v27 = vand.u32 65535, %v4672_v38 }
 0x44d   :  { %v4677_v9 = vshrl.u32 %v4672_v38, 16  ;;  %v17568_v11 = vxor.u32 2147483648, %v16021_v29  ;;  %v17563_v7 = vxor.u32 2147483648, %v16013_v6  ;;  %v16052_v60 = vmul.f32 %v16039_v50, %v16039_v50 }
 0x44e   :  { %vm4574_vm4 = vcmp.lt.s32.totalorder %v16042_v57, 0  ;;  %v4575_v48 = vsub.s32 0, %v16042_v57  ;;  %v4678_v14 = vmul.u32 %v4676_v27, %v4674_v0  ;;  %v16054_v46 = vmul.u32 %v4676_v27, %v4675_v31 }
 0x44f   :  { %v4679_v1 = vmul.u32 %v4677_v9, %v4674_v0  ;;  %v4430_v24 = vor.u32 %v4429_v58, %v4428_v62  ;;  %v4698_v56 = vand.u32 65535, %v4668_v42  ;;  %v4699_v12 = vshrl.u32 %v4668_v42, 16 }
 0x450   :  { %v4576_v49 = vsel %vm4574_vm4, %v4575_v48, %v16042_v57  ;;  %v4434_v28 = vor.u32 4788187, %v4433_v61  ;;  %v4681_v20 = vmul.u32 %v4677_v9, %v4675_v31  ;;  %vm4154_vm10 = vcmp.lt.s32.totalorder %v15945_v51, 2 }
 0x451   :  { %v4577_v5 = vclz %v4576_v49  ;;  %v4682_v23 = vshll.u32 %v4679_v1, 16  ;;  %v4160_v43 = vsel %vm4158_vm2, %v17563_v7, %v16021_v29  ;;  %v4684_v36 = vshll.u32 %v16054_v46, 16 }
 0x452   :  { %v4701_v38 = vmul.u32 %v4699_v12, %v4674_v0  ;;  %v4292_v62 = vmul.f32 -0.001358992, %v16052_v60  ;;  %v4157_v61 = vsel %vm4155_vm8, %v16013_v6, %v17568_v11  ;;  %v4299_v27 = vmul.f32 -0.00019511016, %v16052_v60 }
 0x453   :  { %v10206_v58 = vadd.s32 4294967294, %v4577_v5  ;;  %vm4686_vm4 = vc.u32 %v4678_v14, %v4682_v23  ;;  %v4688_v42 = vadd.s32 %v4682_v23, %v4678_v14  ;;  %v4702_v48 = vmul.u32 %v4698_v56, %v4675_v31 }
 0x454   :  { %v4687_v9 = vsel %vm4686_vm4, 1, %v17619_v16  ;;  %v4288_v49 = vsel %vm4165_vm12, %v4287_v8, %v15687_v34  ;;  %v4435_v7 = vand.u32 2147483647, %v4434_v28  ;;  %v4437_v15 = vcvt.s32.f32 %v4430_v24 }
 0x455   :  { %v4689_v5 = vadd.s32 %v4687_v9, %v4681_v20  ;;  %vm4690_vm2 = vc.u32 %v4688_v42, %v4684_v36  ;;  %v4700_v14 = vmul.u32 %v4698_v56, %v4674_v0  ;;  %v4704_v23 = vshll.u32 %v4701_v38, 16 }
 0x456   :  { %v4782_v29 = vand.u32 2139095040, %v18062_v3  ;;  %v4161_v11 = vsel %vm4154_vm10, %v4157_v61, %v4160_v43  ;;  %v4293_v6 = vadd.f32 0.041655596, %v4292_v62  ;;  %vm10207_vm8 = vcmp.lt.s32.totalorder %v10206_v58, 0 }
 0x457   :  { %v4683_v4 = vshrl.u32 %v4679_v1, 16  ;;  %v4300_v37 = vadd.f32 0.008332121, %v4299_v27  ;;  %v4691_v35 = vsel %vm4690_vm2, 1, %v17619_v16  ;;  %v4703_v45 = vmul.u32 %v4699_v12, %v4675_v31 }
 0x458   :  { %v4706_v26 = vshll.u32 %v4702_v48, 16  ;;  %vm17576_vm12 = vweird.f32 %v18015_v52  ;;  %v4438_v34 = vmul.f32 %v4437_v15, %v4435_v7  ;;  %v4641_v8 = vshrl.u32 %v17623_v39, %v15947_v32 }
 0x459   :  { %v4662_v0 = vsel %vm4660_vm11, %v15990_v10, 2102212464  ;;  %v4693_v51 = vadd.s32 %v4691_v35, %v4689_v5  ;;  %v4580_v24 = vsel %vm10207_vm8, 0, %v10206_v58  ;;  %vm4708_vm10 = vc.u32 %v4700_v14, %v4704_v23 }
 0x45a   :  { %v4710_v56 = vadd.s32 %v4704_v23, %v4700_v14  ;;  %v4783_v1 = vshrl.u32 %v4782_v29, 23  ;;  %vm4319_vm4 = vcmp.lt.s32.totalorder %v18034_v41, 0  ;;  %v4565_v31 = vadd.s32 %v15932_v63, %v15930_v55 }
 0x45b   :  { %v4685_v12 = vshrl.u32 %v16054_v46, 16  ;;  %v4694_v15 = vadd.s32 %v4693_v51, %v4683_v4  ;;  %v4709_v7 = vsel %vm4708_vm10, 1, %v17619_v16  ;;  %v4705_v32 = vshrl.u32 %v4701_v38, 16 }
 0x45c   :  { %v4711_v28 = vadd.s32 %v4709_v7, %v4703_v45  ;;  %vm4712_vm2 = vc.u32 %v4710_v56, %v4706_v26  ;;  %v10211_v20 = vadd.s32 4294967169, %v4783_v1  ;;  %v4585_v10 = vsub.s32 4294967266, %v4580_v24 }
 0x45d   :  { %v4661_v35 = vsel %vm4657_vm9, %v4641_v8, %v15994_v59  ;;  %v4663_v29 = vsel %vm4659_vm3, %v15988_v44, %v4662_v0  ;;  %v4713_v55 = vsel %vm4712_vm2, 1, %v17619_v16  ;;  %v4581_v63 = vsub.s32 32, %v4580_v24 }
 0x45e   :  { %v4707_v46 = vshrl.u32 %v4702_v48, 16  ;;  %v4715_v4 = vadd.s32 %v4713_v55, %v4711_v28  ;;  %v4789_v43 = vadd.s32 1, %v10211_v20  ;;  %v4294_v36 = vmul.f32 %v4293_v6, %v16052_v60 }
 0x45f   :  { %v4301_v45 = vmul.f32 %v4300_v37, %v16052_v60  ;;  %v16099_v38 = vadd.s32 %v4694_v15, %v4685_v12  ;;  %v16101_v62 = vadd.s32 %v4710_v56, %v4706_v26  ;;  %v4441_v59 = vsub.s32 4, %v15833_v2 }
 0x460   :  { %v4664_v58 = vsel %vm4658_vm6, %v4661_v35, %v4663_v29  ;;  %v4716_v44 = vadd.s32 %v4715_v4, %v4705_v32  ;;  %vm4790_vm9 = vcmp.gt.s32.totalorder %v4789_v43, 0  ;;  %v4439_v42 = vxor.u32 2147483648, %v4438_v34 }
 0x461   :  { %v4586_v61 = vadd.s32 127, %v4585_v10  ;;  %v17574_v27 = vand.u32 2147483647, %v18062_v3  ;;  %v4791_v9 = vsel %vm4790_vm9, %v4789_v43, 0  ;;  %v4582_v6 = vshll.u32 %v16042_v57, %v4580_v24 }
 0x462   :  { %v4583_v48 = vshrl.u32 %v4565_v31, %v4581_v63  ;;  %v4717_v37 = vadd.s32 %v4716_v44, %v4707_v46  ;;  %v4793_v5 = vand.u32 31, %v4791_v9  ;;  %v16110_v26 = vsel %vm15970_vm5, 0, %v4288_v49 }
 0x463   :  { %18063 = vst [vmem:[#allocation29_spill] sm:$0xff] %v16110_v26  ;;  %v18064_v14 = vand.u32 2147483647, %v18034_v41  ;;  %v4718_v23 = vmul.u32 %v16004_v21, %v4664_v58  ;;  %vm4720_vm3 = vc.u32 %v16099_v38, %v16101_v62  ;;  %v16123_v57 = vsel %vm17576_vm12, nan, %v4161_v11 }
 0x464   :  { %18067 = vst [vmem:[#allocation136_spill] sm:$0xff] %v16123_v57  ;;  %v16126_v8 = vand.u32 3, %v16110_v26  ;;  %v4721_v25 = vadd.s32 1, %v4717_v37  ;;  %v16128_v49 = vsub.s32 32, %v4793_v5  ;;  %v4295_v0 = vadd.f32 -0.4999988, %v4294_v36 }
 0x465   :  { %vm16114_vm11 = vcmp.le.f32.partialorder %v18064_v14, 0.7853982  ;;  %v4302_v51 = vadd.f32 -0.16666654, %v4301_v45  ;;  %v4442_v24 = vsel %vm4319_vm4, %v4441_v59, %v15833_v2  ;;  %v4587_v21 = vshll.u32 %v4586_v61, 23  ;;  %v18069_v14 = vld [vmem:[#allocation32_spill] sm:$0xff] }
 0x466   :  { %v4440_v56 = vsel %vm4319_vm4, %v4439_v42, %v4438_v34  ;;  %v4584_v1 = vor.u32 %v4583_v48, %v4582_v6  ;;  %v4722_v31 = vsel %vm4720_vm3, %v4721_v25, %v4717_v37  ;;  %v4786_v11 = vand.u32 8388607, %v17574_v27 }
 0x467   :  { %v4723_v12 = vadd.s32 %v4722_v31, %v4718_v23  ;;  %v4799_v15 = vshll.u32 %v17620_v22, %v4793_v5  ;;  %v4802_v7 = vshll.u32 %v17895_v18, %v4793_v5  ;;  %v4805_v32 = vshll.u32 %v17630_v19, %v4793_v5 }
 0x468   :  { %v4800_v28 = vshrl.u32 %v17895_v18, %v16128_v49  ;;  %v4803_v2 = vshrl.u32 %v17630_v19, %v16128_v49  ;;  %v4806_v34 = vshrl.u32 %v17631_v30, %v16128_v49  ;;  %v4808_v20 = vshll.u32 %v17631_v30, %v4793_v5 }
 0x469   :  { %v4296_v10 = vmul.f32 %v4295_v0, %v16052_v60  ;;  %v4588_v35 = vor.u32 4788187, %v4587_v21  ;;  %v4724_v29 = vadd.s32 536870912, %v4723_v12  ;;  %v16148_v55 = vshrl.u32 %v4791_v9, 5 }
 0x46a   :  { %v4303_v63 = vmul.f32 %v4302_v51, %v16052_v60  ;;  %v16154_v46 = vsel %vm16114_vm11, %v18034_v41, %v4440_v56  ;;  %v4787_v4 = vor.u32 8388608, %v4786_v11  ;;  %v4809_v43 = vshrl.u32 %v17632_v40, %v16128_v49 }
 0x46b   :  { %v4591_v36 = vcvt.s32.f32 %v4584_v1  ;;  %v16158_v45 = vshrl.u32 %v4724_v29, 30  ;;  %v4796_v59 = vshll.u32 %v17623_v39, %v4793_v5  ;;  %v4797_v58 = vshrl.u32 %v17620_v22, %v16128_v49 }
 0x46c   :  { %v16163_v44 = vor.u32 %v4800_v28, %v4799_v15  ;;  %v4804_v60 = vor.u32 %v4803_v2, %v4802_v7  ;;  %v4807_v42 = vor.u32 %v4806_v34, %v4805_v32  ;;  %v4810_v61 = vor.u32 %v4809_v43, %v4808_v20 }
 0x46d   :  { %v4589_v9 = vand.u32 2147483647, %v4588_v35  ;;  %v4726_v6 = vshll.u32 %v16158_v45, 30  ;;  %vm4811_vm5 = vcmp.lt.s32.totalorder %v16148_v55, 1  ;;  %vm4814_vm6 = vcmp.lt.s32.totalorder %v16148_v55, 4 }
 0x46e   :  { %v16168_v48 = vadd.f32 1.0, %v4296_v10  ;;  %v4304_v37 = vadd.f32 1.0, %v4303_v63  ;;  %vm4473_vm8 = vcmp.lt.s32.totalorder %v18045_v13, 0  ;;  %v16171_v5 = vshll.u32 %v4787_v4, 8 }
 0x46f   :  { %v4936_v23 = vand.u32 2139095040, %v18069_v14  ;;  %v16176_v25 = vmul.f32 %v16154_v46, %v16154_v46  ;;  %v16178_v0 = vsub.s32 %v4723_v12, %v4726_v6  ;;  %v4798_v51 = vor.u32 %v4797_v58, %v4796_v59 }
 0x470   :  { %18068 = vst [vmem:[#allocation137_spill] sm:$0xff] %v16168_v48  ;;  %vm4813_vm10 = vcmp.lt.s32.totalorder %v16148_v55, 3  ;;  %vm4812_vm4 = vcmp.lt.s32.totalorder %v16148_v55, 2  ;;  %v4820_v21 = vsel %vm4814_vm6, %v4807_v42, 920167782  ;;  %v4823_v56 = vsel %vm4811_vm5, %v16163_v44, %v4804_v60 }
 0x471   :  { %v4824_v1 = vsel %vm4814_vm6, %v4810_v61, 1326507024  ;;  %v4446_v31 = vmul.f32 -0.001358992, %v16176_v25  ;;  %v4592_v11 = vmul.f32 %v4591_v36, %v4589_v9  ;;  %vm4728_vm2 = vcmp.lt.s32.totalorder %v16178_v0, 0 }
 0x472   :  { %v4729_v12 = vsub.s32 0, %v16178_v0  ;;  %v4825_v15 = vsel %vm4813_vm10, %v4807_v42, %v4824_v1  ;;  %v4828_v7 = vand.u32 65535, %v16171_v5  ;;  %v4829_v32 = vshrl.u32 %v16171_v5, 16 }
 0x473   :  { %v4937_v28 = vshrl.u32 %v4936_v23, 23  ;;  %v4819_v34 = vsel %vm4811_vm5, %v4798_v51, %v16163_v44  ;;  %v4821_v20 = vsel %vm4813_vm10, %v4804_v60, %v4820_v21  ;;  %v4826_v10 = vsel %vm4812_vm4, %v4823_v56, %v4825_v15 }
 0x474   :  { %v4730_v2 = vsel %vm4728_vm2, %v4729_v12, %v16178_v0  ;;  %v16206_v35 = vsel %vm16114_vm11, 0, %v4442_v24  ;;  %v4830_v63 = vand.u32 65535, %v4826_v10  ;;  %v4831_v4 = vshrl.u32 %v4826_v10, 16 }
 0x475   :  { %18070 = vst [vmem:[#allocation32_spill] sm:$0xff] %v16206_v35  ;;  %v4731_v29 = vclz %v4730_v2  ;;  %v16209_v43 = vmul.f32 %v4304_v37, %v16039_v50  ;;  %v16213_v59 = vmul.f32 -0.00019511016, %v16176_v25  ;;  %v4593_v58 = vxor.u32 2147483648, %v4592_v11 }
 0x476   :  { %v4795_v61 = vshrl.u32 %v17623_v39, %v16128_v49  ;;  %v4822_v53 = vsel %vm4812_vm4, %v4819_v34, %v4821_v20  ;;  %v4833_v24 = vmul.u32 %v4831_v4, %v4828_v7  ;;  %v16219_v9 = vadd.f32 0.041655596, %v4446_v31 }
 0x477   :  { %18071 = vst [vmem:[#allocation138_spill] sm:$0xff] %v16209_v43  ;;  %v10209_v42 = vadd.s32 4294967294, %v4731_v29  ;;  %v18072_v6 = vand.u32 2147483647, %v18045_v13  ;;  %v4834_v37 = vmul.u32 %v4830_v63, %v4829_v32  ;;  %v4852_v23 = vand.u32 65535, %v4822_v53 }
 0x478   :  { %v10214_v21 = vadd.s32 4294967169, %v4937_v28  ;;  %v4719_v56 = vadd.s32 %v16101_v62, %v16099_v38  ;;  %v4832_v49 = vmul.u32 %v4830_v63, %v4828_v7  ;;  %v4836_v1 = vshll.u32 %v4833_v24, 16 }
 0x479   :  { %vm16223_vm9 = vcmp.le.f32.partialorder %v18072_v6, 0.7853982  ;;  %vm10210_vm11 = vcmp.lt.s32.totalorder %v10209_v42, 0  ;;  %v4594_v12 = vsel %vm4473_vm8, %v4593_v58, %v4592_v11  ;;  %v4853_v15 = vshrl.u32 %v4822_v53, 16 }
 0x47a   :  { %v4734_v31 = vsel %vm10210_vm11, 0, %v10209_v42  ;;  %v4815_v10 = vsel %vm4811_vm5, %v4795_v61, %v4798_v51  ;;  %v4835_v29 = vmul.u32 %v4831_v4, %v4829_v32  ;;  %vm4312_vm3 = vcmp.eq.s32.totalorder %v16126_v8, 2 }
 0x47b   :  { %v4735_v34 = vsub.s32 32, %v4734_v31  ;;  %v4739_v20 = vsub.s32 4294967266, %v4734_v31  ;;  %v4816_v38 = vsel %vm4814_vm6, %v4804_v60, 2102212464  ;;  %v4838_v62 = vshll.u32 %v4834_v37, 16 }
 0x47c   :  { %v4854_v28 = vmul.u32 %v4852_v23, %v4828_v7  ;;  %v4943_v63 = vadd.s32 1, %v10214_v21  ;;  %v4736_v11 = vshll.u32 %v16178_v0, %v4734_v31  ;;  %vm4840_vm2 = vc.u32 %v4832_v49, %v4836_v1 }
 0x47d   :  { %v4737_v58 = vshrl.u32 %v4719_v56, %v4735_v34  ;;  %v4740_v42 = vadd.s32 127, %v4739_v20  ;;  %v4841_v53 = vsel %vm4840_vm2, 1, %v17619_v16  ;;  %v4842_v6 = vadd.s32 %v4836_v1, %v4832_v49 }
 0x47e   :  { %v4855_v27 = vmul.u32 %v4853_v15, %v4828_v7  ;;  %v4856_v2 = vmul.u32 %v4852_v23, %v4829_v32  ;;  %v4817_v4 = vsel %vm4813_vm10, %v16163_v44, %v4816_v38  ;;  %v4837_v61 = vshrl.u32 %v4833_v24, 16 }
 0x47f   :  { %v4741_v51 = vshll.u32 %v4740_v42, 23  ;;  %v4843_v60 = vadd.s32 %v4841_v53, %v4835_v29  ;;  %vm4844_vm5 = vc.u32 %v4842_v6, %v4838_v62  ;;  %v4857_v36 = vmul.u32 %v4853_v15, %v4829_v32 }
 0x480   :  { %v4858_v21 = vshll.u32 %v4855_v27, 16  ;;  %v4860_v52 = vshll.u32 %v4856_v2, 16  ;;  %v4738_v0 = vor.u32 %v4737_v58, %v4736_v11  ;;  %v4839_v31 = vshrl.u32 %v4834_v37, 16 }
 0x481   :  { %v4742_v56 = vor.u32 4788187, %v4741_v51  ;;  %v4845_v34 = vsel %vm4844_vm5, 1, %v17619_v16  ;;  %vm4944_vm11 = vcmp.gt.s32.totalorder %v4943_v63, 0  ;;  %v16246_v23 = vsel %vm16223_vm9, %v18045_v13, %v4594_v12 }
 0x482   :  { %v4847_v20 = vadd.s32 %v4845_v34, %v4843_v60  ;;  %vm4862_vm6 = vc.u32 %v4854_v28, %v4858_v21  ;;  %v4864_v7 = vadd.s32 %v4858_v21, %v4854_v28  ;;  %v4818_v44 = vsel %vm4812_vm4, %v4815_v10, %v4817_v4 }
 0x483   :  { %v4863_v32 = vsel %vm4862_vm6, 1, %v17619_v16  ;;  %v4945_v24 = vsel %vm4944_vm11, %v4943_v63, 0  ;;  %v4859_v1 = vshrl.u32 %v4855_v27, 16  ;;  %v4743_v15 = vand.u32 2147483647, %v4742_v56 }
 0x484   :  { %v4848_v49 = vadd.s32 %v4847_v20, %v4837_v61  ;;  %v4865_v37 = vadd.s32 %v4863_v32, %v4857_v36  ;;  %vm4866_vm10 = vc.u32 %v4864_v7, %v4860_v52  ;;  %v4745_v29 = vcvt.s32.f32 %v4738_v0 }
 0x485   :  { %v4867_v38 = vsel %vm4866_vm10, 1, %v17619_v16  ;;  %v4947_v62 = vand.u32 31, %v4945_v24  ;;  %v4861_v11 = vshrl.u32 %v4856_v2, 16  ;;  %v16254_v12 = vadd.s32 %v4864_v7, %v4860_v52 }
 0x486   :  { %v16252_v28 = vadd.s32 %v4848_v49, %v4839_v31  ;;  %v4869_v58 = vadd.s32 %v4867_v38, %v4865_v37  ;;  %v17577_v55 = vxor.u32 2147483648, %v16209_v43  ;;  %v18075_v10 = vxor.u32 2147483648, %v16168_v48 }
 0x487   :  { %v16265_v36 = vand.u32 3, %v16206_v35  ;;  %v16267_v63 = vsub.s32 32, %v4947_v62  ;;  %v4448_v2 = vmul.f32 %v16219_v9, %v16176_v25  ;;  %v4454_v52 = vadd.f32 0.008332121, %v16213_v59 }
 0x488   :  { %v16262_v27 = vsel %vm4312_vm3, %v18075_v10, %v16209_v43  ;;  %vm4627_vm4 = vcmp.lt.s32.totalorder %v18052_v17, 0  ;;  %v4870_v42 = vadd.s32 %v4869_v58, %v4859_v1  ;;  %vm4309_vm2 = vcmp.eq.s32.totalorder %v16126_v8, 0 }
 0x489   :  { %v16276_v53 = vmul.f32 %v16246_v23, %v16246_v23  ;;  %v4746_v6 = vmul.f32 %v4745_v29, %v4743_v15  ;;  %v4872_v51 = vmul.u32 %v16171_v5, %v4818_v44  ;;  %v18076_v4 = vand.u32 2147483647, %v18069_v14 }
 0x48a   :  { %v18077_v60 = vand.u32 2147483647, %v18052_v17  ;;  %v4871_v59 = vadd.s32 %v4870_v42, %v4861_v11  ;;  %vm4874_vm5 = vc.u32 %v16252_v28, %v16254_v12  ;;  %v4953_v21 = vshll.u32 %v17620_v22, %v4947_v62 }
 0x48b   :  { %v4940_v61 = vand.u32 8388607, %v18076_v4  ;;  %v4959_v0 = vshll.u32 %v17630_v19, %v4947_v62  ;;  %v4954_v5 = vshrl.u32 %v17895_v18, %v16267_v63  ;;  %v4956_v56 = vshll.u32 %v17895_v18, %v4947_v62 }
 0x48c   :  { %vm16283_vm3 = vcmp.le.f32.partialorder %v18077_v60, 0.7853982  ;;  %v4957_v31 = vshrl.u32 %v17630_v19, %v16267_v63  ;;  %v4960_v34 = vshrl.u32 %v17631_v30, %v16267_v63  ;;  %vm4308_vm6 = vcmp.lt.s32.totalorder %v16126_v8, 2 }
 0x48d   :  { %v4875_v20 = vadd.s32 1, %v4871_v59  ;;  %v16299_v7 = vshrl.u32 %v4945_v24, 5  ;;  %v4962_v44 = vshll.u32 %v17631_v30, %v4947_v62  ;;  %v4963_v32 = vshrl.u32 %v17632_v40, %v16267_v63 }
 0x48e   :  { %v4607_v49 = vmul.f32 -0.00019511016, %v16276_v53  ;;  %v4941_v1 = vor.u32 8388608, %v4940_v61  ;;  %v4950_v18 = vshll.u32 %v17623_v39, %v4947_v62  ;;  %v4951_v19 = vshrl.u32 %v17620_v22, %v16267_v63 }
 0x48f   :  { %v4747_v37 = vxor.u32 2147483648, %v4746_v6  ;;  %v4876_v15 = vsel %vm4874_vm5, %v4875_v20, %v4871_v59  ;;  %v4961_v24 = vor.u32 %v4960_v34, %v4959_v0  ;;  %v4964_v29 = vor.u32 %v4963_v32, %v4962_v44 }
 0x490   :  { %v4455_v30 = vmul.f32 %v4454_v52, %v16176_v25  ;;  %v4877_v38 = vadd.s32 %v4876_v15, %v4872_v51  ;;  %v16312_v11 = vor.u32 %v4954_v5, %v4953_v21  ;;  %v16314_v40 = vor.u32 %v4957_v31, %v4956_v56 }
 0x491   :  { %v4449_v58 = vadd.f32 -0.4999988, %v4448_v2  ;;  %v4600_v62 = vmul.f32 -0.001358992, %v16276_v53  ;;  %vm4965_vm11 = vcmp.lt.s32.totalorder %v16299_v7, 1  ;;  %vm4968_vm10 = vcmp.lt.s32.totalorder %v16299_v7, 4 }
 0x492   :  { %v4608_v22 = vadd.f32 0.008332121, %v4607_v49  ;;  %v4878_v10 = vadd.s32 536870912, %v4877_v38  ;;  %v16319_v42 = vor.u32 %v4951_v19, %v4950_v18  ;;  %vm4967_vm5 = vcmp.lt.s32.totalorder %v16299_v7, 3 }
 0x493   :  { %v4748_v52 = vsel %vm4627_vm4, %v4747_v37, %v4746_v6  ;;  %v4974_v51 = vsel %vm4968_vm10, %v4961_v24, 920167782  ;;  %v4978_v2 = vsel %vm4968_vm10, %v4964_v29, 1326507024  ;;  %v16328_v4 = vshll.u32 %v4941_v1, 8 }
 0x494   :  { %v4456_v61 = vadd.f32 -0.16666654, %v4455_v30  ;;  %v16330_v60 = vshrl.u32 %v4878_v10, 30  ;;  %vm4966_vm12 = vcmp.lt.s32.totalorder %v16299_v7, 2  ;;  %v4977_v59 = vsel %vm4965_vm11, %v16312_v11, %v16314_v40 }
 0x495   :  { %v4311_v6 = vsel %vm4309_vm2, %v16168_v48, %v17577_v55  ;;  %v4450_v21 = vmul.f32 %v4449_v58, %v16176_v25  ;;  %v4601_v0 = vadd.f32 0.041655596, %v4600_v62  ;;  %v4979_v5 = vsel %vm4967_vm5, %v4961_v24, %v4978_v2 }
 0x496   :  { %v16348_v56 = vsel %vm16283_vm3, %v18052_v17, %v4748_v52  ;;  %v4880_v31 = vshll.u32 %v16330_v60, 30  ;;  %v4973_v34 = vsel %vm4965_vm11, %v16319_v42, %v16312_v11  ;;  %v4975_v20 = vsel %vm4967_vm5, %v16314_v40, %v4974_v51 }
 0x497   :  { %v4609_v44 = vmul.f32 %v4608_v22, %v16276_v53  ;;  %v4980_v32 = vsel %vm4966_vm12, %v4977_v59, %v4979_v5  ;;  %v4982_v49 = vand.u32 65535, %v16328_v4  ;;  %v4983_v1 = vshrl.u32 %v16328_v4, 16 }
 0x498   :  { %v16366_v18 = vsel %vm4308_vm6, %v4311_v6, %v16262_v27  ;;  %v4457_v19 = vmul.f32 %v4456_v61, %v16176_v25  ;;  %v4595_v37 = vsub.s32 4, %v16006_v33  ;;  %v4881_v15 = vsub.s32 %v4877_v38, %v4880_v31 }
 0x499   :  { %v16372_v24 = vmul.f32 %v16348_v56, %v16348_v56  ;;  %v4976_v29 = vsel %vm4966_vm12, %v4973_v34, %v4975_v20  ;;  %v4984_v30 = vand.u32 65535, %v4980_v32  ;;  %v4985_v58 = vshrl.u32 %v4980_v32, 16 }
 0x49a   :  { %v16376_v62 = vadd.f32 1.0, %v4450_v21  ;;  %v4602_v8 = vmul.f32 %v4601_v0, %v16276_v53  ;;  %vm4882_vm2 = vcmp.lt.s32.totalorder %v4881_v15, 0  ;;  %v4883_v27 = vsub.s32 0, %v4881_v15 }
 0x49b   :  { %v4610_v22 = vadd.f32 -0.16666654, %v4609_v44  ;;  %v4986_v25 = vmul.u32 %v4984_v30, %v4982_v49  ;;  %v4987_v10 = vmul.u32 %v4985_v58, %v4982_v49  ;;  %v16379_v52 = vmul.u32 %v4984_v30, %v4983_v1 }
 0x49c   :  { %v16381_v38 = vadd.f32 1.0, %v4457_v19  ;;  %v4884_v51 = vsel %vm4882_vm2, %v4883_v27, %v4881_v15  ;;  %v5006_v2 = vand.u32 65535, %v4976_v29  ;;  %v5007_v61 = vshrl.u32 %v4976_v29, 16 }
 0x49d   :  { %v4761_v59 = vmul.f32 -0.00019511016, %v16372_v24  ;;  %v4885_v6 = vclz %v4884_v51  ;;  %v4989_v5 = vmul.u32 %v4985_v58, %v4983_v1  ;;  %v4990_v21 = vshll.u32 %v4987_v10, 16 }
 0x49e   :  { %v4596_v0 = vsel %vm4473_vm8, %v4595_v37, %v16006_v33  ;;  %v4603_v31 = vadd.f32 -0.4999988, %v4602_v8  ;;  %v4992_v34 = vshll.u32 %v16379_v52, 16  ;;  %v5009_v20 = vmul.u32 %v5007_v61, %v4982_v49 }
 0x49f   :  { %v4611_v44 = vmul.f32 %v4610_v22, %v16276_v53  ;;  %v10212_v32 = vadd.s32 4294967294, %v4885_v6  ;;  %vm4994_vm6 = vc.u32 %v4986_v25, %v4990_v21  ;;  %v4996_v19 = vadd.s32 %v4990_v21, %v4986_v25 }
 0x4a0   :  { %v4754_v29 = vmul.f32 -0.001358992, %v16372_v24  ;;  %v4873_v30 = vadd.s32 %v16254_v12, %v16252_v28  ;;  %v4995_v58 = vsel %vm4994_vm6, 1, %v17619_v16  ;;  %v5010_v27 = vmul.u32 %v5006_v2, %v4983_v1 }
 0x4a1   :  { %v4762_v51 = vadd.f32 0.008332121, %v4761_v59  ;;  %vm10213_vm2 = vcmp.lt.s32.totalorder %v10212_v32, 0  ;;  %v4949_v33 = vshrl.u32 %v17623_v39, %v16267_v63  ;;  %v4997_v37 = vadd.s32 %v4995_v58, %v4989_v5 }
 0x4a2   :  { %v4888_v8 = vsel %vm10213_vm2, 0, %v10212_v32  ;;  %vm4998_vm8 = vc.u32 %v4996_v19, %v4992_v34  ;;  %v5008_v22 = vmul.u32 %v5006_v2, %v4982_v49  ;;  %v5012_v6 = vshll.u32 %v5009_v20, 16 }
 0x4a3   :  { %v4889_v55 = vsub.s32 32, %v4888_v8  ;;  %v4890_v25 = vshll.u32 %v4881_v15, %v4888_v8  ;;  %v4893_v21 = vsub.s32 4294967266, %v4888_v8  ;;  %v4991_v48 = vshrl.u32 %v4987_v10, 16 }
 0x4a4   :  { %v4755_v43 = vadd.f32 0.041655596, %v4754_v29  ;;  %v4999_v28 = vsel %vm4998_vm8, 1, %v17619_v16  ;;  %v5011_v12 = vmul.u32 %v5007_v61, %v4983_v1  ;;  %v5014_v35 = vshll.u32 %v5010_v27, 16 }
 0x4a5   :  { %v4763_v59 = vmul.f32 %v4762_v51, %v16372_v24  ;;  %v4891_v26 = vshrl.u32 %v4873_v30, %v4889_v55  ;;  %v4894_v57 = vadd.s32 127, %v4893_v21  ;;  %v5001_v54 = vadd.s32 %v4999_v28, %v4997_v37 }
 0x4a6   :  { %v4970_v39 = vsel %vm4968_vm10, %v16314_v40, 2102212464  ;;  %v4993_v63 = vshrl.u32 %v16379_v52, 16  ;;  %vm5016_vm6 = vc.u32 %v5008_v22, %v5012_v6  ;;  %v5018_v49 = vadd.s32 %v5012_v6, %v5008_v22 }
 0x4a7   :  { %v4892_v15 = vor.u32 %v4891_v26, %v4890_v25  ;;  %v4895_v10 = vshll.u32 %v4894_v57, 23  ;;  %v5002_v2 = vadd.s32 %v5001_v54, %v4991_v48  ;;  %v5017_v5 = vsel %vm5016_vm6, 1, %v17619_v16 }
 0x4a8   :  { %vm4466_vm2 = vcmp.eq.s32.totalorder %v16265_v36, 2  ;;  %v4969_v55 = vsel %vm4965_vm11, %v4949_v33, %v16319_v42  ;;  %v5013_v1 = vshrl.u32 %v5009_v20, 16  ;;  %v5019_v61 = vadd.s32 %v5017_v5, %v5011_v12 }
 0x4a9   :  { %vm5020_vm8 = vc.u32 %v5018_v49, %v5014_v35  ;;  %v4896_v34 = vor.u32 4788187, %v4895_v10  ;;  %v4899_v40 = vcvt.s32.f32 %v4892_v15  ;;  %v4971_v52 = vsel %vm4967_vm5, %v16312_v11, %v4970_v39 }
 0x4aa   :  { %v5021_v26 = vsel %vm5020_vm8, 1, %v17619_v16  ;;  %v16412_v54 = vsel %vm16223_vm9, 0, %v4596_v0  ;;  %v4756_v57 = vmul.f32 %v4755_v43, %v16372_v24  ;;  %v5015_v48 = vshrl.u32 %v5010_v27, 16 }
 0x4ab   :  { %v5023_v32 = vadd.s32 %v5021_v26, %v5019_v61  ;;  %v4764_v42 = vadd.f32 -0.16666654, %v4763_v59  ;;  %v4897_v20 = vand.u32 2147483647, %v4896_v34  ;;  %v16415_v19 = vadd.s32 %v5002_v2, %v4993_v63 }
 0x4ac   :  { %v16417_v29 = vadd.s32 %v5018_v49, %v5014_v35  ;;  %v16421_v30 = vmul.f32 %v16381_v38, %v16154_v46  ;;  %v4604_v16 = vmul.f32 %v4603_v31, %v16276_v53  ;;  %v4972_v50 = vsel %vm4966_vm12, %v4969_v55, %v4971_v52 }
 0x4ad   :  { %v5024_v11 = vadd.s32 %v5023_v32, %v5013_v1  ;;  %vm17588_vm9 = vweird.f32 %v18027_v47  ;;  %vm4462_vm11 = vcmp.lt.s32.totalorder %v16265_v36, 2  ;;  %v4467_v43 = vxor.u32 2147483648, %v16376_v62 }
 0x4ae   :  { %v4612_v0 = vadd.f32 1.0, %v4611_v44  ;;  %v4749_v35 = vsub.s32 4, %v16158_v45  ;;  %v4900_v58 = vmul.f32 %v4899_v40, %v4897_v20  ;;  %v4757_v27 = vadd.f32 -0.4999988, %v4756_v57 }
 0x4af   :  { %v18080_v46 = vand.u32 2147483647, %v18062_v3  ;;  %vm4781_vm12 = vcmp.lt.s32.totalorder %v18062_v3, 0  ;;  %v5025_v53 = vadd.s32 %v5024_v11, %v5015_v48  ;;  %v4765_v7 = vmul.f32 %v4764_v42, %v16372_v24 }
 0x4b0   :  { %v4901_v31 = vxor.u32 2147483648, %v4900_v58  ;;  %v5026_v51 = vmul.u32 %v16328_v4, %v4972_v50  ;;  %vm5028_vm5 = vc.u32 %v16415_v19, %v16417_v29  ;;  %v4464_v44 = vxor.u32 2147483648, %v16421_v30 }
 0x4b1   :  { %vm16432_vm10 = vcmp.le.f32.partialorder %v18080_v46, 0.7853982  ;;  %v16442_v33 = vadd.f32 1.0, %v4604_v16  ;;  %v4615_v37 = vand.u32 3, %v16412_v54  ;;  %v5029_v8 = vadd.s32 1, %v5025_v53 }
 0x4b2   :  { %vm4463_vm6 = vcmp.eq.s32.totalorder %v16265_v36, 0  ;;  %v16447_v22 = vmul.f32 %v4612_v0, %v16246_v23  ;;  %v4750_v6 = vsel %vm4627_vm4, %v4749_v35, %v16158_v45  ;;  %v4902_v4 = vsel %vm4781_vm12, %v4901_v31, %v4900_v58 }
 0x4b3   :  { %v4758_v25 = vmul.f32 %v4757_v27, %v16372_v24  ;;  %v4903_v21 = vsub.s32 4, %v16330_v60  ;;  %v4905_v28 = vsel %vm16432_vm10, %v18062_v3, %v4902_v4  ;;  %v5030_v12 = vsel %vm5028_vm5, %v5029_v8, %v5025_v53 }
 0x4b4   :  { %vm17585_vm8 = vweird.f32 %v18034_v41  ;;  %v4468_v45 = vsel %vm4466_vm2, %v4467_v43, %v16421_v30  ;;  %v4766_v23 = vadd.f32 1.0, %v4765_v7  ;;  %v4907_v59 = vmul.f32 %v4905_v28, %v4905_v28 }
 0x4b5   :  { %v5031_v39 = vadd.s32 %v5030_v12, %v5026_v51  ;;  %v4465_v24 = vsel %vm4463_vm6, %v16376_v62, %v4464_v44  ;;  %vm4620_vm4 = vcmp.eq.s32.totalorder %v4615_v37, 2  ;;  %v4621_v63 = vxor.u32 2147483648, %v16442_v33 }
 0x4b6   :  { %v16471_v49 = vsel %vm16283_vm3, 0, %v4750_v6  ;;  %v4618_v15 = vxor.u32 2147483648, %v16447_v22  ;;  %v4908_v10 = vmul.f32 -0.001358992, %v4907_v59  ;;  %v4915_v2 = vmul.f32 -0.00019511016, %v4907_v59 }
 0x4b7   :  { %v5032_v5 = vadd.s32 536870912, %v5031_v39  ;;  %vm4617_vm2 = vcmp.eq.s32.totalorder %v4615_v37, 0  ;;  %v16474_v55 = vadd.f32 1.0, %v4758_v25  ;;  %v4769_v1 = vand.u32 3, %v16471_v49 }
 0x4b8   :  { %v4904_v61 = vsel %vm4781_vm12, %v4903_v21, %v16330_v60  ;;  %v16481_v34 = vmul.f32 %v4766_v23, %v16348_v56  ;;  %v4909_v9 = vadd.f32 0.041655596, %v4908_v10  ;;  %v4916_v40 = vadd.f32 0.008332121, %v4915_v2  ;;  %v18086_v10 = vld [vmem:[#allocation26_spill] sm:$0xff] }
 0x4b9   :  { %v5033_v52 = vshrl.u32 %v5032_v5, 30  ;;  %v16486_v26 = vsel %vm17588_vm9, nan, %v16366_v18  ;;  %v4469_v57 = vsel %vm4462_vm11, %v4465_v24, %v4468_v45  ;;  %vm4616_vm3 = vcmp.lt.s32.totalorder %v4615_v37, 2  ;;  %v18087_v5 = vld [vmem:[#allocation42_spill] sm:$0xff] }
 0x4ba   :  { %v4622_v60 = vsel %vm4620_vm4, %v4621_v63, %v16447_v22  ;;  %v4619_v56 = vsel %vm4617_vm2, %v16442_v33, %v4618_v15  ;;  %v4910_v48 = vmul.f32 %v4909_v9, %v4907_v59  ;;  %v4917_v32 = vmul.f32 %v4916_v40, %v4907_v59  ;;  %v18145_v45 = vld [vmem:[#allocation66_spill] sm:$0xff] }
 0x4bb   :  { %v5034_v42 = vshll.u32 %v5033_v52, 30  ;;  %vm17584_vm12 = vweird.f32 %v18045_v13  ;;  %vm4774_vm5 = vcmp.eq.s32.totalorder %v4769_v1, 2  ;;  %v4775_v18 = vxor.u32 2147483648, %v16474_v55 }
 0x4bc   :  { %v16501_v36 = vsel %vm16432_vm10, 0, %v4904_v61  ;;  %v4772_v20 = vxor.u32 2147483648, %v16481_v34  ;;  %v4911_v16 = vadd.f32 -0.4999988, %v4910_v48  ;;  %v4918_v50 = vadd.f32 -0.16666654, %v4917_v32 }
 0x4bd   :  { %v5035_v11 = vsub.s32 %v5031_v39, %v5034_v42  ;;  %v4623_v0 = vsel %vm4616_vm3, %v4619_v56, %v4622_v60  ;;  %vm4771_vm11 = vcmp.eq.s32.totalorder %v4769_v1, 0  ;;  %v4923_v35 = vand.u32 3, %v16501_v36 }
 0x4be   :  { %v5057_v58 = vsub.s32 4, %v5033_v52  ;;  %v4912_v27 = vmul.f32 %v4911_v16, %v4907_v59  ;;  %v4919_v46 = vmul.f32 %v4918_v50, %v4907_v59  ;;  %v16507_v7 = vsel %vm17585_vm8, nan, %v4469_v57  ;;  %v18088_v50 = vld [vmem:[#allocation47_spill] sm:$0xff] }
 0x4bf   :  { %vm5036_vm6 = vcmp.lt.s32.totalorder %v5035_v11, 0  ;;  %v5037_v53 = vsub.s32 0, %v5035_v11  ;;  %vm17587_vm10 = vweird.f32 %v18052_v17  ;;  %vm4770_vm4 = vcmp.lt.s32.totalorder %v4769_v1, 2 }
 0x4c0   :  { %v4776_v38 = vsel %vm4774_vm5, %v4775_v18, %v16481_v34  ;;  %v4773_v31 = vsel %vm4771_vm11, %v16474_v55, %v4772_v20  ;;  %v16517_v51 = vadd.f32 1.0, %v4912_v27  ;;  %v4920_v37 = vadd.f32 1.0, %v4919_v46  ;;  %v18089_v27 = vld [vmem:[#allocation41_spill] sm:$0xff]  ;;  %v18091_v46 = vld [vmem:[#allocation28_spill] sm:$0xff] }
 0x4c1   :  { %v5038_v8 = vsel %vm5036_vm6, %v5037_v53, %v5035_v11  ;;  %v16521_v6 = vsel %vm17584_vm12, nan, %v4623_v0  ;;  %vm4928_vm2 = vcmp.eq.s32.totalorder %v4923_v35, 2  ;;  %vm4935_vm3 = vcmp.lt.s32.totalorder %v18069_v14, 0 }
 0x4c2   :  { %v5039_v4 = vclz %v5038_v8  ;;  %v16524_v25 = vmul.f32 %v4920_v37, %v4905_v28  ;;  %v4929_v21 = vxor.u32 2147483648, %v16517_v51  ;;  %v18083_v12 = vand.u32 2147483647, %v18069_v14 }
 0x4c3   :  { %v5058_v23 = vsel %vm4935_vm3, %v5057_v58, %v5033_v52  ;;  %v4777_v59 = vsel %vm4770_vm4, %v4773_v31, %v4776_v38  ;;  %vm4924_vm11 = vcmp.lt.s32.totalorder %v4923_v35, 2  ;;  %vm4925_vm6 = vcmp.eq.s32.totalorder %v4923_v35, 0 }
 0x4c4   :  { %vm16529_vm5 = vcmp.le.f32.partialorder %v18083_v12, 0.7853982  ;;  %v10215_v39 = vadd.s32 4294967294, %v5039_v4  ;;  %v4926_v24 = vxor.u32 2147483648, %v16524_v25  ;;  %v4930_v28 = vsel %vm4928_vm2, %v4929_v21, %v16524_v25  ;;  %v18093_v4 = vld [vmem:[#allocation44_spill] sm:$0xff] }
 0x4c5   :  { %v5264_v2 = vadd.s32 3, %v18086_v10  ;;  %v5419_v1 = vadd.s32 3, %v18087_v5  ;;  %vm17586_vm12 = vweird.f32 %v18062_v3  ;;  %v5027_v61 = vadd.s32 %v16417_v29, %v16415_v19 }
 0x4c6   :  { %vm10216_vm8 = vcmp.lt.s32.totalorder %v10215_v39, 0  ;;  %v16546_v9 = vsel %vm16529_vm5, 0, %v5058_v23  ;;  %v4927_v40 = vsel %vm4925_vm6, %v16517_v51, %v4926_v24  ;;  %v16553_v16 = vsel %vm17587_vm10, nan, %v4777_v59  ;;  %v18094_v23 = vld [vmem:[#allocation45_spill] sm:$0xff] }
 0x4c7   :  { %v5042_v52 = vsel %vm10216_vm8, 0, %v10215_v39  ;;  %v5265_v57 = vand.u32 3, %v5264_v2  ;;  %v5420_v60 = vand.u32 3, %v5419_v1  ;;  %v4931_v56 = vsel %vm4924_vm11, %v4927_v40, %v4930_v28  ;;  %v18096_v39 = vld [vmem:[#allocation43_spill] sm:$0xff]  ;;  %v18097_v1 = vld [vmem:[#allocation49_spill] sm:$0xff] }
 0x4c8   :  { %v5043_v48 = vsub.s32 32, %v5042_v52  ;;  %v5044_v32 = vshll.u32 %v5035_v11, %v5042_v52  ;;  %v5047_v42 = vsub.s32 4294967266, %v5042_v52  ;;  %v16557_v19 = vsel %vm17586_vm12, nan, %v4931_v56  ;;  %v18101_v56 = vld [vmem:[#allocation46_spill] sm:$0xff] }
 0x4c9   :  { %v16560_v29 = vand.u32 3, %v16546_v9  ;;  %v5574_v0 = vadd.s32 3, %v18088_v50  ;;  %vm5266_vm8 = vcmp.lt.s32.totalorder %v5265_v57, 2  ;;  %vm5267_vm4 = vcmp.eq.s32.totalorder %v5265_v57, 0  ;;  %v18103_v50 = vld [vmem:[#allocation6_spill] sm:$0xff] }
 0x4ca   :  { %v5045_v35 = vshrl.u32 %v5027_v61, %v5043_v48  ;;  %v5048_v58 = vadd.s32 127, %v5047_v42  ;;  %v18090_v11 = vxor.u32 2147483648, %v18089_v27  ;;  %vm5270_vm2 = vcmp.eq.s32.totalorder %v5265_v57, 2  ;;  %v18098_v61 = vld [vmem:[#allocation5_spill] sm:$0xff] }
 0x4cb   :  { %vm5421_vm11 = vcmp.lt.s32.totalorder %v5420_v60, 2  ;;  %vm5422_vm6 = vcmp.eq.s32.totalorder %v5420_v60, 0  ;;  %vm5087_vm12 = vcmask 523264   ;;  %v18092_v37 = vxor.u32 2147483648, %v18091_v46  ;;  %v18102_v42 = vld [vmem:[#allocation53_spill] sm:$0xff] }
 0x4cc   :  { %v5269_v53 = vsel %vm5267_vm4, %v18091_v46, %v18090_v11  ;;  %v5046_v38 = vor.u32 %v5045_v35, %v5044_v32  ;;  %v5049_v31 = vshll.u32 %v5048_v58, 23  ;;  %5088 = vst.msk [vmem:[%s17216_s1] sm:$0xff] %vm5087_vm12, %v18093_v4  ;;  %v18095_v59 = vxor.u32 2147483648, %v18094_v23  ;;  %v18105_v35 = vld [vmem:[#allocation40_spill] sm:$0xff] }
 0x4cd   :  { %v5272_v8 = vsel %vm5270_vm2, %v18092_v37, %v18089_v27  ;;  %vm5425_vm4 = vcmp.eq.s32.totalorder %v5420_v60, 2  ;;  %v5575_v10 = vand.u32 3, %v5574_v0  ;;  %5089 = vst.msk [vmem:[%s17216_s1 + $0x8] sm:$0xff] %vm5087_vm12, %v18097_v1  ;;  %vm18099_vm2 = vweird.f32 %v18098_v61  ;;  %v18107_v27 = vld [vmem:[#allocation48_spill] sm:$0xff]  ;;  %v18117_v61 = vld [vmem:[#allocation59_spill] sm:$0xff] }
 0x4ce   :  { %v5273_v12 = vsel %vm5266_vm8, %v5269_v53, %v5272_v8  ;;  %v5424_v28 = vsel %vm5422_vm6, %v18096_v39, %v18095_v59  ;;  %v5050_v2 = vor.u32 4788187, %v5049_v31  ;;  %v5053_v5 = vcvt.s32.f32 %v5046_v38  ;;  %5090 = vst.msk [vmem:[%s17216_s1 + $0x10] sm:$0xff] %vm5087_vm12, %v18101_v56  ;;  %v18109_v53 = vld [vmem:[#allocation8_spill] sm:$0xff]  ;;  %v18110_v31 = vld [vmem:[#allocation50_spill] sm:$0xff]  ;;  %v18111_v8 = vld [vmem:[#allocation55_spill] sm:$0xff] }
 0x4cf   :  { %v16584_v40 = vsel %vm18099_vm2, nan, %v5273_v12  ;;  %v18100_v52 = vxor.u32 2147483648, %v18096_v39  ;;  %vm5576_vm8 = vcmp.lt.s32.totalorder %v5575_v10, 2  ;;  %vm5577_vm6 = vcmp.eq.s32.totalorder %v5575_v10, 0  ;;  %5091 = vst.msk [vmem:[%s17216_s1 + $0x18] sm:$0xff] %vm5087_vm12, %v18102_v42  ;;  %v18112_v12 = vld [vmem:[#allocation60_spill] sm:$0xff] }
 0x4d0   :  { %vm5580_vm10 = vcmp.eq.s32.totalorder %v5575_v10, 2  ;;  %v5051_v32 = vand.u32 2147483647, %v5050_v2  ;;  %v18106_v58 = vxor.u32 2147483648, %v18105_v35  ;;  %v18108_v60 = vxor.u32 2147483648, %v18107_v27  ;;  %5092 = vst.msk [vmem:[%s17216_s1 + $0x20] sm:$0xff] %vm5087_vm12, %v18109_v53 }
 0x4d1   :  { %v5427_v57 = vsel %vm5425_vm4, %v18100_v52, %v18094_v23  ;;  %vm18104_vm4 = vweird.f32 %v18103_v50  ;;  %v5729_v37 = vadd.s32 3, %v18110_v31  ;;  %v5884_v4 = vadd.s32 3, %v18111_v8  ;;  %v18113_v39 = vld [vmem:[#allocation56_spill] sm:$0xff]  ;;  %v18116_v2 = vld [vmem:[#allocation54_spill] sm:$0xff]  ;;  %v18126_v8 = vld [vmem:[#allocation51_spill] sm:$0xff]  ;;  %5114 = vst.msk [vmem:[%s17216_s1 + $0xd0] sm:$0xff] %vm5087_vm12, %v16486_v26 }
 0x4d2   :  { %v5428_v48 = vsel %vm5421_vm11, %v5424_v28, %v5427_v57  ;;  %v5579_v11 = vsel %vm5577_vm6, %v18107_v27, %v18106_v58  ;;  %v5582_v46 = vsel %vm5580_vm10, %v18108_v60, %v18105_v35  ;;  %v6039_v23 = vadd.s32 3, %v18112_v12  ;;  %5093 = vst.msk [vmem:[%s17216_s1 + $0x28] sm:$0xff] %vm5087_vm12, %v18113_v39  ;;  %v18114_v28 = vld [vmem:[#allocation7_spill] sm:$0xff]  ;;  %v18120_v35 = vld [vmem:[#allocation70_spill] sm:$0xff]  ;;  %v18124_v31 = vld [vmem:[#allocation52_spill] sm:$0xff] }
 0x4d3   :  { %v16602_v0 = vsel %vm18104_vm4, nan, %v5428_v48  ;;  %v5583_v38 = vsel %vm5576_vm8, %v5579_v11, %v5582_v46  ;;  %v5054_v59 = vmul.f32 %v5053_v5, %v5051_v32  ;;  %vm18115_vm10 = vweird.f32 %v18114_v28  ;;  %v18118_v57 = vld [vmem:[#allocation67_spill] sm:$0xff]  ;;  %5095 = vst.msk [vmem:[%s17216_s1 + $0x38] sm:$0xff] %vm5087_vm12, %v18120_v35  ;;  %v18121_v11 = vld [vmem:[#allocation76_spill] sm:$0xff]  ;;  %v18122_v46 = vld [vmem:[#allocation77_spill] sm:$0xff] }
 0x4d4   :  { %v16625_v10 = vsel %vm18115_vm10, nan, %v5583_v38  ;;  %v6194_v1 = vadd.s32 3, %v18116_v2  ;;  %v6349_v52 = vadd.s32 3, %v18117_v61  ;;  %5094 = vst.msk [vmem:[%s17216_s1 + $0x30] sm:$0xff] %vm5087_vm12, %v18118_v57  ;;  %v5730_v5 = vand.u32 3, %v5729_v37  ;;  %v18119_v32 = vld [vmem:[#allocation71_spill] sm:$0xff] }
 0x4d5   :  { %v5885_v56 = vand.u32 3, %v5884_v4  ;;  %v6040_v48 = vand.u32 3, %v6039_v23  ;;  %v6504_v42 = vadd.s32 3, %v18119_v32  ;;  %v5055_v50 = vxor.u32 2147483648, %v5054_v59  ;;  %5096 = vst.msk [vmem:[%s17216_s1 + $0x40] sm:$0xff] %vm5087_vm12, %v18122_v46  ;;  %v18123_v38 = vld [vmem:[#allocation78_spill] sm:$0xff] }
 0x4d6   :  { %v6195_v58 = vand.u32 3, %v6194_v1  ;;  %v16640_v27 = vand.u32 3, %v6349_v52  ;;  %v6659_v60 = vadd.s32 3, %v18121_v11  ;;  %vm5731_vm11 = vcmp.lt.s32.totalorder %v5730_v5, 2  ;;  %5097 = vst.msk [vmem:[%s17216_s1 + $0x48] sm:$0xff] %vm5087_vm12, %v18123_v38  ;;  %v18129_v2 = vld [vmem:[#allocation58_spill] sm:$0xff] }
 0x4d7   :  { %vm5732_vm2 = vcmp.eq.s32.totalorder %v5730_v5, 0  ;;  %vm5735_vm8 = vcmp.eq.s32.totalorder %v5730_v5, 2  ;;  %vm5886_vm6 = vcmp.lt.s32.totalorder %v5885_v56, 2  ;;  %v5056_v53 = vsel %vm4935_vm3, %v5055_v50, %v5054_v59  ;;  %v18128_v59 = vld [vmem:[#allocation73_spill] sm:$0xff]  ;;  %v18135_v11 = vld [vmem:[#allocation90_spill] sm:$0xff]  ;;  %5115 = vst.msk [vmem:[%s17216_s1 + $0xd8] sm:$0xff] %vm5087_vm12, %v16507_v7 }
 0x4d8   :  { %v18125_v37 = vxor.u32 2147483648, %v18124_v31  ;;  %v18127_v12 = vxor.u32 2147483648, %v18126_v8  ;;  %vm5887_vm4 = vcmp.eq.s32.totalorder %v5885_v56, 0  ;;  %v16664_v39 = vsel %vm16529_vm5, %v18069_v14, %v5056_v53  ;;  %5098 = vst.msk [vmem:[%s17216_s1 + $0x50] sm:$0xff] %vm5087_vm12, %v18128_v59  ;;  %v18131_v61 = vld [vmem:[#allocation57_spill] sm:$0xff]  ;;  %v18185_v26 = vld [vmem:[#allocation80_spill] sm:$0xff] }
 0x4d9   :  { %v18130_v1 = vxor.u32 2147483648, %v18129_v2  ;;  %vm5890_vm3 = vcmp.eq.s32.totalorder %v5885_v56, 2  ;;  %v5061_v57 = vmul.f32 %v16664_v39, %v16664_v39  ;;  %v18132_v5 = vld [vmem:[#allocation85_spill] sm:$0xff]  ;;  %v18134_v50 = vxor.u32 2147483648, %v18131_v61  ;;  %5100 = vst.msk [vmem:[%s17216_s1 + $0x60] sm:$0xff] %vm5087_vm12, %v18135_v11 }
 0x4da   :  { %v5734_v4 = vsel %vm5732_vm2, %v18126_v8, %v18125_v37  ;;  %v5737_v23 = vsel %vm5735_vm8, %v18127_v12, %v18124_v31  ;;  %5099 = vst.msk [vmem:[%s17216_s1 + $0x58] sm:$0xff] %vm5087_vm12, %v18132_v5  ;;  %vm6041_vm5 = vcmp.lt.s32.totalorder %v6040_v48, 2  ;;  %vm6042_vm10 = vcmp.eq.s32.totalorder %v6040_v48, 0  ;;  %v18136_v31 = vld [vmem:[#allocation95_spill] sm:$0xff]  ;;  %v18137_v37 = vld [vmem:[#allocation34_spill] sm:$0xff]  ;;  %v18142_v59 = vld [vmem:[#allocation97_spill] sm:$0xff] }
 0x4db   :  { %v5738_v28 = vsel %vm5731_vm11, %v5734_v4, %v5737_v23  ;;  %v5889_v52 = vsel %vm5887_vm4, %v18131_v61, %v18130_v1  ;;  %v5892_v35 = vsel %vm5890_vm3, %v18134_v50, %v18129_v2  ;;  %vm6045_vm11 = vcmp.eq.s32.totalorder %v6040_v48, 2  ;;  %5101 = vst.msk [vmem:[%s17216_s1 + $0x68] sm:$0xff] %vm5087_vm12, %v18136_v31  ;;  %v18139_v4 = vld [vmem:[#allocation63_spill] sm:$0xff]  ;;  %v18141_v23 = vld [vmem:[#allocation62_spill] sm:$0xff] }
 0x4dc   :  { %v16683_v32 = vsel %vm764_vm15, nan, %v5738_v28  ;;  %v5893_v46 = vsel %vm5886_vm6, %v5889_v52, %v5892_v35  ;;  %vm6196_vm2 = vcmp.lt.s32.totalorder %v6195_v58, 2  ;;  %v5062_v53 = vmul.f32 -0.001358992, %v5061_v57  ;;  %5102 = vst.msk [vmem:[%s17216_s1 + $0x70] sm:$0xff] %vm5087_vm12, %v18142_v59  ;;  %v18144_v52 = vld [vmem:[#allocation103_spill] sm:$0xff] }
 0x4dd   :  { %v5069_v38 = vmul.f32 -0.00019511016, %v5061_v57  ;;  %vm18138_vm15 = vweird.f32 %v18137_v37  ;;  %v18140_v12 = vxor.u32 2147483648, %v18139_v4  ;;  %v18143_v28 = vxor.u32 2147483648, %v18141_v23  ;;  %5103 = vst.msk [vmem:[%s17216_s1 + $0x78] sm:$0xff] %vm5087_vm12, %v18144_v52  ;;  %v18147_v35 = vld [vmem:[#allocation65_spill] sm:$0xff] }
 0x4de   :  { %v16701_v8 = vsel %vm18138_vm15, nan, %v5893_v46  ;;  %vm6197_vm8 = vcmp.eq.s32.totalorder %v6195_v58, 0  ;;  %vm6200_vm6 = vcmp.eq.s32.totalorder %v6195_v58, 2  ;;  %vm6351_vm4 = vcmp.lt.s32.totalorder %v16640_v27, 2  ;;  %v18148_v46 = vld [vmem:[#allocation108_spill] sm:$0xff]  ;;  %v18156_v52 = vld [vmem:[#allocation113_spill] sm:$0xff] }
 0x4df   :  { %v6044_v56 = vsel %vm6042_vm10, %v18141_v23, %v18140_v12  ;;  %v6047_v2 = vsel %vm6045_vm11, %v18143_v28, %v18139_v4  ;;  %v5063_v1 = vadd.f32 0.041655596, %v5062_v53  ;;  %v5070_v61 = vadd.f32 0.008332121, %v5069_v38  ;;  %5104 = vst.msk [vmem:[%s17216_s1 + $0x80] sm:$0xff] %vm5087_vm12, %v18148_v46  ;;  %v18149_v53 = vld [vmem:[#allocation25_spill] sm:$0xff] }
 0x4e0   :  { %v6048_v5 = vsel %vm6041_vm5, %v6044_v56, %v6047_v2  ;;  %v18146_v50 = vxor.u32 2147483648, %v18145_v45  ;;  %vm5082_vm3 = vcmp.eq.s32.totalorder %v16560_v29, 2  ;;  %vm18150_vm10 = vweird.f32 %v18149_v53  ;;  %v18152_v12 = vld [vmem:[#allocation110_spill] sm:$0xff]  ;;  %v18153_v56 = vld [vmem:[#allocation69_spill] sm:$0xff]  ;;  %v18155_v28 = vld [vmem:[#allocation68_spill] sm:$0xff]  ;;  %5106 = vst.msk [vmem:[%s17216_s1 + $0x90] sm:$0xff] %vm5087_vm12, %v18156_v52 }
 0x4e1   :  { %v16732_v38 = vsel %vm18150_vm10, nan, %v6048_v5  ;;  %v18151_v48 = vxor.u32 2147483648, %v18147_v35  ;;  %vm6352_vm5 = vcmp.eq.s32.totalorder %v16640_v27, 0  ;;  %vm6355_vm11 = vcmp.eq.s32.totalorder %v16640_v27, 2  ;;  %5105 = vst.msk [vmem:[%s17216_s1 + $0x88] sm:$0xff] %vm5087_vm12, %v18152_v12  ;;  %v18160_v46 = vld [vmem:[#allocation119_spill] sm:$0xff] }
 0x4e2   :  { %v6199_v11 = vsel %vm6197_vm8, %v18147_v35, %v18146_v50  ;;  %v5064_v37 = vmul.f32 %v5063_v1, %v5061_v57  ;;  %v5071_v4 = vmul.f32 %v5070_v61, %v5061_v57  ;;  %v18154_v59 = vxor.u32 2147483648, %v18153_v56  ;;  %v18157_v1 = vld [vmem:[#allocation9_spill] sm:$0xff]  ;;  %5107 = vst.msk [vmem:[%s17216_s1 + $0x98] sm:$0xff] %vm5087_vm12, %v18160_v46  ;;  %v18174_v46 = vld [vmem:[#allocation75_spill] sm:$0xff] }
 0x4e3   :  { %v6202_v31 = vsel %vm6200_vm6, %v18151_v48, %v18145_v45  ;;  %vm5079_vm15 = vcmp.eq.s32.totalorder %v16560_v29, 0  ;;  %vm18158_vm8 = vweird.f32 %v18157_v1  ;;  %v18159_v58 = vxor.u32 2147483648, %v18155_v28  ;;  %v18161_v48 = vld [vmem:[#allocation79_spill] sm:$0xff]  ;;  %v18162_v12 = vld [vmem:[#allocation121_spill] sm:$0xff]  ;;  %5116 = vst.msk [vmem:[%s17216_s1 + $0xe0] sm:$0xff] %vm5087_vm12, %v16521_v6  ;;  %v18191_v6 = vld [vmem:[#allocation92_spill] sm:$0xff] }
 0x4e4   :  { %v6203_v23 = vsel %vm6196_vm2, %v6199_v11, %v6202_v31  ;;  %v6354_v2 = vsel %vm6352_vm5, %v18155_v28, %v18154_v59  ;;  %v6505_v45 = vand.u32 3, %v6504_v42  ;;  %v6660_v50 = vand.u32 3, %v6659_v60  ;;  %5108 = vst.msk [vmem:[%s17216_s1 + $0xa0] sm:$0xff] %vm5087_vm12, %v18162_v12  ;;  %v18163_v42 = vld [vmem:[#allocation10_spill] sm:$0xff]  ;;  %v18168_v59 = vld [vmem:[#allocation72_spill] sm:$0xff]  ;;  %v18170_v1 = vld [vmem:[#allocation131_spill] sm:$0xff] }
 0x4e5   :  { %v16756_v61 = vsel %vm18158_vm8, nan, %v6203_v23  ;;  %v6357_v5 = vsel %vm6355_vm11, %v18159_v58, %v18153_v56  ;;  %v5065_v35 = vadd.f32 -0.4999988, %v5064_v37  ;;  %v5072_v11 = vadd.f32 -0.16666654, %v5071_v4  ;;  %v18165_v4 = vld [vmem:[#allocation23_spill] sm:$0xff] }
 0x4e6   :  { %vm5078_vm2 = vcmp.lt.s32.totalorder %v16560_v29, 2  ;;  %v6358_v53 = vsel %vm6351_vm4, %v6354_v2, %v6357_v5  ;;  %v6814_v31 = vadd.s32 3, %v18161_v48  ;;  %vm5076_vm6 = vweird.f32 %v18069_v14  ;;  %5109 = vst.msk [vmem:[%s17216_s1 + $0xa8] sm:$0xff] %vm5087_vm12, %v18165_v4  ;;  %v18166_v23 = vld [vmem:[#allocation64_spill] sm:$0xff]  ;;  %v18176_v48 = vld [vmem:[#allocation74_spill] sm:$0xff] }
 0x4e7   :  { %vm18164_vm10 = vweird.f32 %v18163_v42  ;;  %vm6506_vm5 = vcmp.lt.s32.totalorder %v6505_v45, 2  ;;  %vm6507_vm11 = vcmp.eq.s32.totalorder %v6505_v45, 0  ;;  %vm6510_vm8 = vcmp.eq.s32.totalorder %v6505_v45, 2  ;;  %5110 = vst.msk [vmem:[%s17216_s1 + $0xb0] sm:$0xff] %vm5087_vm12, %v18170_v1  ;;  %v18171_v45 = vld [vmem:[#allocation132_spill] sm:$0xff]  ;;  %v18177_v42 = vld [vmem:[#allocation133_spill] sm:$0xff] }
 0x4e8   :  { %v16778_v60 = vsel %vm18164_vm10, nan, %v6358_v53  ;;  %v5066_v37 = vmul.f32 %v5065_v35, %v5061_v57  ;;  %v5073_v27 = vmul.f32 %v5072_v11, %v5061_v57  ;;  %v18167_v56 = vxor.u32 2147483648, %v18166_v23  ;;  %5111 = vst.msk [vmem:[%s17216_s1 + $0xb8] sm:$0xff] %vm5087_vm12, %v18171_v45  ;;  %v18172_v35 = vld [vmem:[#allocation35_spill] sm:$0xff]  ;;  %v18181_v1 = vld [vmem:[#allocation136_spill] sm:$0xff] }
 0x4e9   :  { %v18169_v2 = vxor.u32 2147483648, %v18168_v59  ;;  %vm6661_vm4 = vcmp.lt.s32.totalorder %v6660_v50, 2  ;;  %vm6662_vm10 = vcmp.eq.s32.totalorder %v6660_v50, 0  ;;  %vm6665_vm9 = vcmp.eq.s32.totalorder %v6660_v50, 2  ;;  %5112 = vst.msk [vmem:[%s17216_s1 + $0xc0] sm:$0xff] %vm5087_vm12, %v18177_v42  ;;  %v18182_v45 = vld [vmem:[#allocation88_spill] sm:$0xff] }
 0x4ea   :  { %v6509_v28 = vsel %vm6507_vm11, %v18168_v59, %v18167_v56  ;;  %v16796_v58 = vadd.f32 1.0, %v5066_v37  ;;  %v5074_v5 = vadd.f32 1.0, %v5073_v27  ;;  %vm18173_vm11 = vweird.f32 %v18172_v35  ;;  %v18180_v59 = vld [vmem:[#allocation84_spill] sm:$0xff]  ;;  %5113 = vst.msk [vmem:[%s17216_s1 + $0xc8] sm:$0xff] %vm5087_vm12, %v18181_v1 }
 0x4eb   :  { %v6512_v52 = vsel %vm6510_vm8, %v18169_v2, %v18166_v23  ;;  %v18175_v53 = vxor.u32 2147483648, %v18174_v46  ;;  %v18178_v37 = vxor.u32 2147483648, %v18176_v48  ;;  %v6815_v4 = vand.u32 3, %v6814_v31  ;;  %v18179_v23 = vld [vmem:[#allocation81_spill] sm:$0xff]  ;;  %5117 = vst.msk [vmem:[%s17216_s1 + $0xe8] sm:$0xff] %vm5087_vm12, %v16553_v16 }
 0x4ec   :  { %v6513_v57 = vsel %vm6506_vm5, %v6509_v28, %v6512_v52  ;;  %v6969_v56 = vadd.s32 3, %v18179_v23  ;;  %v7124_v28 = vadd.s32 3, %v18180_v59  ;;  %v16821_v2 = vmul.f32 %v5074_v5, %v16664_v39  ;;  %v18183_v39 = vld [vmem:[#allocation36_spill] sm:$0xff]  ;;  %v18189_v59 = vld [vmem:[#allocation37_spill] sm:$0xff]  ;;  %5118 = vst.msk [vmem:[%s17216_s1 + $0xf0] sm:$0xff] %vm5087_vm12, %v16557_v19 }
 0x4ed   :  { %v16805_v11 = vsel %vm18173_vm11, nan, %v6513_v57  ;;  %v6664_v12 = vsel %vm6662_vm10, %v18176_v48, %v18175_v53  ;;  %v6667_v27 = vsel %vm6665_vm9, %v18178_v37, %v18174_v46  ;;  %v5083_v52 = vxor.u32 2147483648, %v16796_v58  ;;  %v18187_v53 = vld [vmem:[#allocation61_spill] sm:$0xff]  ;;  %10080 = vst.msk [vmem:[%s17217_s2] sm:$0xff] %vm5087_vm12, %v16584_v40 }
 0x4ee   :  { %v6668_v57 = vsel %vm6661_vm4, %v6664_v12, %v6667_v27  ;;  %v7279_v35 = vadd.s32 3, %v18182_v45  ;;  %vm18184_vm9 = vweird.f32 %v18183_v39  ;;  %vm6816_vm5 = vcmp.lt.s32.totalorder %v6815_v4, 2  ;;  %10081 = vst.msk [vmem:[%s17217_s2 + $0x8] sm:$0xff] %vm5087_vm12, %v16602_v0 }
 0x4ef   :  { %v16838_v31 = vsel %vm18184_vm9, nan, %v6668_v57  ;;  %vm6817_vm8 = vcmp.eq.s32.totalorder %v6815_v4, 0  ;;  %vm6820_vm10 = vcmp.eq.s32.totalorder %v6815_v4, 2  ;;  %v5080_v5 = vxor.u32 2147483648, %v16821_v2  ;;  %10082 = vst.msk [vmem:[%s17217_s2 + $0x10] sm:$0xff] %vm5087_vm12, %v16625_v10  ;;  %v18210_v10 = vld [vmem:[#allocation33_spill] sm:$0xff] }
 0x4f0   :  { %v5084_v50 = vsel %vm5082_vm3, %v5083_v52, %v16821_v2  ;;  %v18186_v46 = vxor.u32 2147483648, %v18185_v26  ;;  %v18188_v12 = vxor.u32 2147483648, %v18187_v53  ;;  %v6970_v27 = vand.u32 3, %v6969_v56  ;;  %10083 = vst.msk [vmem:[%s17217_s2 + $0x18] sm:$0xff] %vm5087_vm12, %v16683_v32 }
 0x4f1   :  { %v7125_v4 = vand.u32 3, %v7124_v28  ;;  %v7280_v23 = vand.u32 3, %v7279_v35  ;;  %v5081_v7 = vsel %vm5079_vm15, %v16796_v58, %v5080_v5  ;;  %vm18190_vm3 = vweird.f32 %v18189_v59  ;;  %v18192_v28 = vld [vmem:[#allocation96_spill] sm:$0xff]  ;;  %v18193_v35 = vld [vmem:[#allocation83_spill] sm:$0xff]  ;;  %10084 = vst.msk [vmem:[%s17217_s2 + $0x20] sm:$0xff] %vm5087_vm12, %v16701_v8 }
 0x4f2   :  { %v6819_v48 = vsel %vm6817_vm8, %v18187_v53, %v18186_v46  ;;  %v6822_v42 = vsel %vm6820_vm10, %v18188_v12, %v18185_v26  ;;  %v7434_v56 = vadd.s32 3, %v18191_v6  ;;  %v7589_v57 = vadd.s32 3, %v18192_v28  ;;  %v18195_v26 = vld [vmem:[#allocation82_spill] sm:$0xff]  ;;  %v18199_v12 = vld [vmem:[#allocation87_spill] sm:$0xff]  ;;  %v18205_v28 = vld [vmem:[#allocation89_spill] sm:$0xff]  ;;  %10085 = vst.msk [vmem:[%s17217_s2 + $0x28] sm:$0xff] %vm5087_vm12, %v16732_v38 }
 0x4f3   :  { %v6823_v37 = vsel %vm6816_vm5, %v6819_v48, %v6822_v42  ;;  %v5085_v45 = vsel %vm5078_vm2, %v5081_v7, %v5084_v50  ;;  %vm6971_vm15 = vcmp.lt.s32.totalorder %v6970_v27, 2  ;;  %vm6972_vm4 = vcmp.eq.s32.totalorder %v6970_v27, 0  ;;  %v18197_v53 = vld [vmem:[#allocation38_spill] sm:$0xff]  ;;  %v18203_v59 = vld [vmem:[#allocation91_spill] sm:$0xff]  ;;  %10086 = vst.msk [vmem:[%s17217_s2 + $0x30] sm:$0xff] %vm5087_vm12, %v16756_v61 }
 0x4f4   :  { %v16874_v1 = vsel %vm18190_vm3, nan, %v6823_v37  ;;  %vm6975_vm11 = vcmp.eq.s32.totalorder %v6970_v27, 2  ;;  %v5086_v16 = vsel %vm5076_vm6, nan, %v5085_v45  ;;  %v18194_v39 = vxor.u32 2147483648, %v18193_v35  ;;  %v18201_v37 = vld [vmem:[#allocation86_spill] sm:$0xff]  ;;  %10087 = vst.msk [vmem:[%s17217_s2 + $0x38] sm:$0xff] %vm5087_vm12, %v16778_v60 }
 0x4f5   :  { %v18196_v29 = vxor.u32 2147483648, %v18195_v26  ;;  %vm7126_vm2 = vcmp.lt.s32.totalorder %v7125_v4, 2  ;;  %5119 = vst.msk [vmem:[%s17216_s1 + $0xf8] sm:$0xff] %vm5087_vm12, %v5086_v16  ;;  %vm7127_vm9 = vcmp.eq.s32.totalorder %v7125_v4, 0  ;;  %vm7130_vm5 = vcmp.eq.s32.totalorder %v7125_v4, 2 }
 0x4f6   :  { %v6974_v46 = vsel %vm6972_vm4, %v18195_v26, %v18194_v39  ;;  %vm7281_vm8 = vcmp.lt.s32.totalorder %v7280_v23, 2  ;;  %vm18198_vm10 = vweird.f32 %v18197_v53  ;;  %v18200_v42 = vxor.u32 2147483648, %v18199_v12  ;;  %10088 = vst.msk [vmem:[%s17217_s2 + $0x40] sm:$0xff] %vm5087_vm12, %v16805_v11  ;;  %v18228_v11 = vld [vmem:[#allocation109_spill] sm:$0xff] }
 0x4f7   :  { %v6977_v50 = vsel %vm6975_vm11, %v18196_v29, %v18193_v35  ;;  %v18202_v7 = vxor.u32 2147483648, %v18201_v37  ;;  %vm7282_vm3 = vcmp.eq.s32.totalorder %v7280_v23, 0  ;;  %v18204_v6 = vxor.u32 2147483648, %v18203_v59  ;;  %v18206_v35 = vld [vmem:[#allocation39_spill] sm:$0xff]  ;;  %v18209_v29 = vld [vmem:[#allocation100_spill] sm:$0xff]  ;;  %10089 = vst.msk [vmem:[%s17217_s2 + $0x48] sm:$0xff] %vm5087_vm12, %v16838_v31 }
 0x4f8   :  { %v6978_v19 = vsel %vm6971_vm15, %v6974_v46, %v6977_v50  ;;  %v7129_v27 = vsel %vm7127_vm9, %v18201_v37, %v18200_v42  ;;  %vm7285_vm15 = vcmp.eq.s32.totalorder %v7280_v23, 2  ;;  %v7435_v16 = vand.u32 3, %v7434_v56  ;;  %10090 = vst.msk [vmem:[%s17217_s2 + $0x50] sm:$0xff] %vm5087_vm12, %v16874_v1  ;;  %v18232_v31 = vld [vmem:[#allocation107_spill] sm:$0xff] }
 0x4f9   :  { %v6979_v48 = vsel %vm18198_vm10, nan, %v6978_v19  ;;  %v7132_v40 = vsel %vm7130_vm5, %v18202_v7, %v18199_v12  ;;  %v7284_v45 = vsel %vm7282_vm3, %v18205_v28, %v18204_v6  ;;  %vm18207_vm4 = vweird.f32 %v18206_v35  ;;  %v18212_v19 = vld [vmem:[#allocation94_spill] sm:$0xff]  ;;  %v18214_v12 = vld [vmem:[#allocation93_spill] sm:$0xff] }
 0x4fa   :  { %v7133_v4 = vsel %vm7126_vm2, %v7129_v27, %v7132_v40  ;;  %v18208_v26 = vxor.u32 2147483648, %v18205_v28  ;;  %v7590_v46 = vand.u32 3, %v7589_v57  ;;  %v7744_v50 = vadd.s32 3, %v18209_v29  ;;  %v18216_v27 = vld [vmem:[#allocation11_spill] sm:$0xff]  ;;  %v18226_v29 = vld [vmem:[#allocation102_spill] sm:$0xff]  ;;  %10091 = vst.msk [vmem:[%s17217_s2 + $0x58] sm:$0xff] %vm5087_vm12, %v6979_v48 }
 0x4fb   :  { %v7134_v39 = vsel %vm18207_vm4, nan, %v7133_v4  ;;  %vm7436_vm11 = vcmp.lt.s32.totalorder %v7435_v16, 2  ;;  %vm7437_vm2 = vcmp.eq.s32.totalorder %v7435_v16, 0  ;;  %vm7440_vm9 = vcmp.eq.s32.totalorder %v7435_v16, 2  ;;  %v18218_v40 = vld [vmem:[#allocation99_spill] sm:$0xff] }
 0x4fc   :  { %v7287_v0 = vsel %vm7285_vm15, %v18208_v26, %v18203_v59  ;;  %vm18211_vm5 = vweird.f32 %v18210_v10  ;;  %v18213_v53 = vxor.u32 2147483648, %v18212_v19  ;;  %v18215_v32 = vxor.u32 2147483648, %v18214_v12  ;;  %v18220_v59 = vld [vmem:[#allocation98_spill] sm:$0xff]  ;;  %10092 = vst.msk [vmem:[%s17217_s2 + $0x60] sm:$0xff] %vm5087_vm12, %v7134_v39  ;;  %v18237_v48 = vld [vmem:[#allocation123_spill] sm:$0xff]  ;;  %v18240_v39 = vld [vmem:[#allocation112_spill] sm:$0xff] }
 0x4fd   :  { %v7288_v56 = vsel %vm7281_vm8, %v7284_v45, %v7287_v0  ;;  %vm7591_vm8 = vcmp.lt.s32.totalorder %v7590_v46, 2  ;;  %vm7592_vm10 = vcmp.eq.s32.totalorder %v7590_v46, 0  ;;  %vm7595_vm3 = vcmp.eq.s32.totalorder %v7590_v46, 2  ;;  %v18222_v45 = vld [vmem:[#allocation105_spill] sm:$0xff]  ;;  %v18224_v0 = vld [vmem:[#allocation104_spill] sm:$0xff] }
 0x4fe   :  { %v7289_v57 = vsel %vm18211_vm5, nan, %v7288_v56  ;;  %v7439_v42 = vsel %vm7437_vm2, %v18214_v12, %v18213_v53  ;;  %v7442_v23 = vsel %vm7440_vm9, %v18215_v32, %v18212_v19  ;;  %v7745_v8 = vand.u32 3, %v7744_v50  ;;  %v18229_v12 = vld [vmem:[#allocation101_spill] sm:$0xff]  ;;  %v18230_v32 = vld [vmem:[#allocation116_spill] sm:$0xff] }
 0x4ff   :  { %v7443_v37 = vsel %vm7436_vm11, %v7439_v42, %v7442_v23  ;;  %vm18217_vm15 = vweird.f32 %v18216_v27  ;;  %v18219_v4 = vxor.u32 2147483648, %v18218_v40  ;;  %v18221_v38 = vxor.u32 2147483648, %v18220_v59  ;;  %10093 = vst.msk [vmem:[%s17217_s2 + $0x68] sm:$0xff] %vm5087_vm12, %v7289_v57 }
 0x500   :  { %v7444_v7 = vsel %vm18217_vm15, nan, %v7443_v37  ;;  %v7899_v16 = vadd.s32 3, %v18222_v45  ;;  %vm7746_vm4 = vcmp.lt.s32.totalorder %v7745_v8, 2  ;;  %vm7747_vm11 = vcmp.eq.s32.totalorder %v7745_v8, 0  ;;  %v18249_v37 = vld [vmem:[#allocation118_spill] sm:$0xff] }
 0x501   :  { %v7594_v6 = vsel %vm7592_vm10, %v18220_v59, %v18219_v4  ;;  %v7597_v28 = vsel %vm7595_vm3, %v18221_v38, %v18218_v40  ;;  %vm7750_vm2 = vcmp.eq.s32.totalorder %v7745_v8, 2  ;;  %v18225_v46 = vxor.u32 2147483648, %v18224_v0  ;;  %v18234_v40 = vld [vmem:[#allocation106_spill] sm:$0xff]  ;;  %10094 = vst.msk [vmem:[%s17217_s2 + $0x70] sm:$0xff] %vm5087_vm12, %v7444_v7 }
 0x502   :  { %v7598_v61 = vsel %vm7591_vm8, %v7594_v6, %v7597_v28  ;;  %v18227_v60 = vxor.u32 2147483648, %v18226_v29  ;;  %v7900_v10 = vand.u32 3, %v7899_v16  ;;  %v8054_v53 = vadd.s32 3, %v18228_v11  ;;  %v18236_v16 = vld [vmem:[#allocation120_spill] sm:$0xff] }
 0x503   :  { %v7599_v26 = vsel %vm2612_vm14, nan, %v7598_v61  ;;  %v7749_v50 = vsel %vm7747_vm11, %v18226_v29, %v18225_v46  ;;  %v8209_v42 = vadd.s32 3, %v18229_v12  ;;  %v8364_v23 = vadd.s32 3, %v18230_v32 }
 0x504   :  { %v7752_v56 = vsel %vm7750_vm2, %v18227_v60, %v18224_v0  ;;  %vm7901_vm14 = vcmp.lt.s32.totalorder %v7900_v10, 2  ;;  %vm7902_vm9 = vcmp.eq.s32.totalorder %v7900_v10, 0  ;;  %vm7905_vm5 = vcmp.eq.s32.totalorder %v7900_v10, 2  ;;  %v18238_v0 = vld [vmem:[#allocation14_spill] sm:$0xff]  ;;  %10095 = vst.msk [vmem:[%s17217_s2 + $0x78] sm:$0xff] %vm5087_vm12, %v7599_v26 }
 0x505   :  { %v7753_v19 = vsel %vm7746_vm4, %v7749_v50, %v7752_v56  ;;  %v18233_v27 = vxor.u32 2147483648, %v18232_v31  ;;  %v18235_v59 = vxor.u32 2147483648, %v18234_v40  ;;  %v8055_v1 = vand.u32 3, %v8054_v53  ;;  %v18242_v50 = vld [vmem:[#allocation111_spill] sm:$0xff]  ;;  %v18246_v53 = vld [vmem:[#allocation114_spill] sm:$0xff] }
 0x506   :  { %v7754_v8 = vsel %vm2766_vm0, nan, %v7753_v19  ;;  %v8210_v38 = vand.u32 3, %v8209_v42  ;;  %v8365_v45 = vand.u32 3, %v8364_v23  ;;  %v8519_v61 = vadd.s32 3, %v18236_v16  ;;  %v18244_v19 = vld [vmem:[#allocation115_spill] sm:$0xff] }
 0x507   :  { %v7904_v4 = vsel %vm7902_vm9, %v18234_v40, %v18233_v27  ;;  %v7907_v6 = vsel %vm7905_vm5, %v18235_v59, %v18232_v31  ;;  %v8674_v35 = vadd.s32 3, %v18237_v48  ;;  %vm18239_vm0 = vweird.f32 %v18238_v0  ;;  %10096 = vst.msk [vmem:[%s17217_s2 + $0x80] sm:$0xff] %vm5087_vm12, %v7754_v8  ;;  %v18251_v27 = vld [vmem:[#allocation117_spill] sm:$0xff] }
 0x508   :  { %v7908_v28 = vsel %vm7901_vm14, %v7904_v4, %v7907_v6  ;;  %vm8056_vm8 = vcmp.lt.s32.totalorder %v8055_v1, 2  ;;  %vm8057_vm10 = vcmp.eq.s32.totalorder %v8055_v1, 0  ;;  %vm8060_vm3 = vcmp.eq.s32.totalorder %v8055_v1, 2  ;;  %v18255_v48 = vld [vmem:[#allocation17_spill] sm:$0xff] }
 0x509   :  { %v7909_v46 = vsel %vm18239_vm0, nan, %v7908_v28  ;;  %v18241_v29 = vxor.u32 2147483648, %v18240_v39  ;;  %v18243_v56 = vxor.u32 2147483648, %v18242_v50  ;;  %vm8211_vm15 = vcmp.lt.s32.totalorder %v8210_v38, 2 }
 0x50a   :  { %vm8212_vm4 = vcmp.eq.s32.totalorder %v8210_v38, 0  ;;  %v18245_v11 = vxor.u32 2147483648, %v18244_v19  ;;  %vm8215_vm11 = vcmp.eq.s32.totalorder %v8210_v38, 2  ;;  %vm8366_vm2 = vcmp.lt.s32.totalorder %v8365_v45, 2  ;;  %10097 = vst.msk [vmem:[%s17217_s2 + $0x88] sm:$0xff] %vm5087_vm12, %v7909_v46 }
 0x50b   :  { %v8059_v60 = vsel %vm8057_vm10, %v18242_v50, %v18241_v29  ;;  %v8062_v10 = vsel %vm8060_vm3, %v18243_v56, %v18240_v39  ;;  %v18248_v32 = vxor.u32 2147483648, %v18246_v53  ;;  %vm8367_vm14 = vcmp.eq.s32.totalorder %v8365_v45, 0  ;;  %v18259_v39 = vld [vmem:[#allocation31_spill] sm:$0xff]  ;;  %v18261_v56 = vld [vmem:[#allocation125_spill] sm:$0xff] }
 0x50c   :  { %v8063_v57 = vsel %vm8056_vm8, %v8059_v60, %v8062_v10  ;;  %v8214_v7 = vsel %vm8212_vm4, %v18246_v53, %v18245_v11  ;;  %vm8370_vm9 = vcmp.eq.s32.totalorder %v8365_v45, 2  ;;  %v18250_v31 = vxor.u32 2147483648, %v18249_v37  ;;  %v18254_v45 = vld [vmem:[#allocation126_spill] sm:$0xff] }
 0x50d   :  { %v8064_v42 = vsel %vm3074_vm1, nan, %v8063_v57  ;;  %v8217_v23 = vsel %vm8215_vm11, %v18248_v32, %v18244_v19  ;;  %v18252_v8 = vxor.u32 2147483648, %v18251_v27  ;;  %v8520_v59 = vand.u32 3, %v8519_v61  ;;  %v18257_v61 = vld [vmem:[#allocation122_spill] sm:$0xff]  ;;  %v18263_v57 = vld [vmem:[#allocation124_spill] sm:$0xff] }
 0x50e   :  { %v8218_v26 = vsel %vm8211_vm15, %v8214_v7, %v8217_v23  ;;  %v8369_v40 = vsel %vm8367_vm14, %v18251_v27, %v18250_v31  ;;  %10098 = vst.msk [vmem:[%s17217_s2 + $0x90] sm:$0xff] %vm5087_vm12, %v8064_v42  ;;  %v8675_v28 = vand.u32 3, %v8674_v35  ;;  %v8829_v16 = vadd.s32 3, %v18254_v45  ;;  %v18264_v53 = vld [vmem:[#allocation18_spill] sm:$0xff]  ;;  %v18267_v32 = vld [vmem:[#allocation24_spill] sm:$0xff] }
 0x50f   :  { %v8372_v4 = vsel %vm8370_vm9, %v18252_v8, %v18249_v37  ;;  %v8219_v1 = vsel %vm3228_vm7, nan, %v8218_v26  ;;  %vm18256_vm1 = vweird.f32 %v18255_v48  ;;  %vm8521_vm5 = vcmp.lt.s32.totalorder %v8520_v59, 2  ;;  %v18268_v26 = vld [vmem:[#allocation27_spill] sm:$0xff]  ;;  %v18270_v8 = vld [vmem:[#allocation128_spill] sm:$0xff]  ;;  %v18274_v48 = vld [vmem:[#allocation29_spill] sm:$0xff] }
 0x510   :  { %v8373_v38 = vsel %vm8366_vm2, %v8369_v40, %v8372_v4  ;;  %vm8522_vm0 = vcmp.eq.s32.totalorder %v8520_v59, 0  ;;  %vm8525_vm8 = vcmp.eq.s32.totalorder %v8520_v59, 2  ;;  %10099 = vst.msk [vmem:[%s17217_s2 + $0x98] sm:$0xff] %vm5087_vm12, %v8219_v1  ;;  %v18258_v46 = vxor.u32 2147483648, %v18257_v61  ;;  %v18272_v59 = vld [vmem:[#allocation127_spill] sm:$0xff] }
 0x511   :  { %v8374_v0 = vsel %vm18256_vm1, nan, %v8373_v38  ;;  %v18260_v35 = vxor.u32 2147483648, %v18259_v39  ;;  %vm8676_vm7 = vcmp.lt.s32.totalorder %v8675_v28, 2  ;;  %vm8677_vm10 = vcmp.eq.s32.totalorder %v8675_v28, 0 }
 0x512   :  { %v8524_v29 = vsel %vm8522_vm0, %v18259_v39, %v18258_v46  ;;  %10100 = vst.msk [vmem:[%s17217_s2 + $0xa0] sm:$0xff] %vm5087_vm12, %v8374_v0  ;;  %v18262_v10 = vxor.u32 2147483648, %v18261_v56  ;;  %vm8680_vm3 = vcmp.eq.s32.totalorder %v8675_v28, 2  ;;  %v8830_v11 = vand.u32 3, %v8829_v16  ;;  %v18276_v39 = vld [vmem:[#allocation21_spill] sm:$0xff] }
 0x513   :  { %v8527_v50 = vsel %vm8525_vm8, %v18260_v35, %v18257_v61  ;;  %vm18265_vm15 = vweird.f32 %v18264_v53  ;;  %v18266_v12 = vxor.u32 2147483648, %v18263_v57  ;;  %v8984_v23 = vadd.s32 3, %v18267_v32  ;;  %v18275_v61 = vld [vmem:[#allocation32_spill] sm:$0xff]  ;;  %v18278_v35 = vld [vmem:[#allocation130_spill] sm:$0xff] }
 0x514   :  { %v8528_v60 = vsel %vm8521_vm5, %v8524_v29, %v8527_v50  ;;  %v8679_v19 = vsel %vm8677_vm10, %v18263_v57, %v18262_v10  ;;  %v9139_v37 = vadd.s32 3, %v18268_v26  ;;  %vm8831_vm4 = vcmp.lt.s32.totalorder %v8830_v11, 2  ;;  %v18285_v32 = vld [vmem:[#allocation22_spill] sm:$0xff] }
 0x515   :  { %v8529_v7 = vsel %vm18265_vm15, nan, %v8528_v60  ;;  %v8682_v42 = vsel %vm8680_vm3, %v18266_v12, %v18261_v56  ;;  %vm8832_vm11 = vcmp.eq.s32.totalorder %v8830_v11, 0  ;;  %vm8835_vm2 = vcmp.eq.s32.totalorder %v8830_v11, 2  ;;  %v18280_v60 = vld [vmem:[#allocation129_spill] sm:$0xff]  ;;  %v18282_v11 = vld [vmem:[#allocation135_spill] sm:$0xff] }
 0x516   :  { %v8683_v31 = vsel %vm8676_vm7, %v8679_v19, %v8682_v42  ;;  %10101 = vst.msk [vmem:[%s17217_s2 + $0xa8] sm:$0xff] %vm5087_vm12, %v8529_v7  ;;  %v18271_v4 = vxor.u32 2147483648, %v18270_v8  ;;  %v18273_v1 = vxor.u32 2147483648, %v18272_v59  ;;  %v8985_v28 = vand.u32 3, %v8984_v23  ;;  %v18284_v7 = vld [vmem:[#allocation134_spill] sm:$0xff] }
 0x517   :  { %v8684_v40 = vsel %vm3690_vm13, nan, %v8683_v31  ;;  %v9140_v16 = vand.u32 3, %v9139_v37  ;;  %v9294_v0 = vadd.s32 3, %v18274_v48  ;;  %v9449_v46 = vadd.s32 3, %v18275_v61 }
 0x518   :  { %v8834_v6 = vsel %vm8832_vm11, %v18272_v59, %v18271_v4  ;;  %v8837_v38 = vsel %vm8835_vm2, %v18273_v1, %v18270_v8  ;;  %10102 = vst.msk [vmem:[%s17217_s2 + $0xb0] sm:$0xff] %vm5087_vm12, %v8684_v40  ;;  %vm18277_vm13 = vweird.f32 %v18276_v39  ;;  %vm8986_vm14 = vcmp.lt.s32.totalorder %v8985_v28, 2  ;;  %v18288_v8 = vld [vmem:[#allocation19_spill] sm:$0xff]  ;;  %v18290_v59 = vld [vmem:[#allocation138_spill] sm:$0xff]  ;;  %v18292_v1 = vld [vmem:[#allocation137_spill] sm:$0xff] }
 0x519   :  { %v8838_v45 = vsel %vm8831_vm4, %v8834_v6, %v8837_v38  ;;  %vm8987_vm9 = vcmp.eq.s32.totalorder %v8985_v28, 0  ;;  %vm8990_vm1 = vcmp.eq.s32.totalorder %v8985_v28, 2  ;;  %v18279_v50 = vxor.u32 2147483648, %v18278_v35 }
 0x51a   :  { %v8839_v29 = vsel %vm18277_vm13, nan, %v8838_v45  ;;  %v18281_v10 = vxor.u32 2147483648, %v18280_v60  ;;  %vm9141_vm5 = vcmp.lt.s32.totalorder %v9140_v16, 2  ;;  %vm9142_vm0 = vcmp.eq.s32.totalorder %v9140_v16, 0 }
 0x51b   :  { %v8989_v56 = vsel %vm8987_vm9, %v18280_v60, %v18279_v50  ;;  %10103 = vst.msk [vmem:[%s17217_s2 + $0xb8] sm:$0xff] %vm5087_vm12, %v8839_v29  ;;  %v18283_v53 = vxor.u32 2147483648, %v18282_v11  ;;  %vm9145_vm8 = vcmp.eq.s32.totalorder %v9140_v16, 2  ;;  %v9295_v42 = vand.u32 3, %v9294_v0 }
 0x51c   :  { %v8992_v57 = vsel %vm8990_vm1, %v18281_v10, %v18278_v35  ;;  %vm18286_vm7 = vweird.f32 %v18285_v32  ;;  %v18287_v26 = vxor.u32 2147483648, %v18284_v7  ;;  %v9450_v31 = vand.u32 3, %v9449_v46 }
 0x51d   :  { %v8993_v19 = vsel %vm8986_vm14, %v8989_v56, %v8992_v57  ;;  %v9144_v12 = vsel %vm9142_vm0, %v18284_v7, %v18283_v53  ;;  %v9604_v27 = vadd.s32 3, %v16412_v54  ;;  %vm9296_vm10 = vcmp.lt.s32.totalorder %v9295_v42, 2 }
 0x51e   :  { %v8994_v23 = vsel %vm18286_vm7, nan, %v8993_v19  ;;  %v9147_v37 = vsel %vm9145_vm8, %v18287_v26, %v18282_v11  ;;  %vm9297_vm3 = vcmp.eq.s32.totalorder %v9295_v42, 0  ;;  %vm9300_vm15 = vcmp.eq.s32.totalorder %v9295_v42, 2 }
 0x51f   :  { %v9148_v40 = vsel %vm9141_vm5, %v9144_v12, %v9147_v37  ;;  %10104 = vst.msk [vmem:[%s17217_s2 + $0xc0] sm:$0xff] %vm5087_vm12, %v8994_v23  ;;  %vm18289_vm4 = vweird.f32 %v18288_v8  ;;  %v18291_v6 = vxor.u32 2147483648, %v18290_v59  ;;  %v18293_v28 = vxor.u32 2147483648, %v18292_v1 }
 0x520   :  { %v9149_v4 = vsel %vm18289_vm4, nan, %v9148_v40  ;;  %vm9451_vm11 = vcmp.lt.s32.totalorder %v9450_v31, 2  ;;  %vm9452_vm2 = vcmp.eq.s32.totalorder %v9450_v31, 0  ;;  %vm9455_vm13 = vcmp.eq.s32.totalorder %v9450_v31, 2 }
 0x521   :  { %v9299_v38 = vsel %vm9297_vm3, %v18292_v1, %v18291_v6  ;;  %v9302_v54 = vsel %vm9300_vm15, %v18293_v28, %v18290_v59  ;;  %v9605_v16 = vand.u32 3, %v9604_v27  ;;  %10105 = vst.msk [vmem:[%s17217_s2 + $0xc8] sm:$0xff] %vm5087_vm12, %v9149_v4  ;;  %vm18294_vm14 = vweird.f32 %v18027_v47 }
 0x522   :  { %v9303_v45 = vsel %vm9296_vm10, %v9299_v38, %v9302_v54  ;;  %v9454_v0 = vsel %vm9452_vm2, %v16376_v62, %v4464_v44  ;;  %v9457_v61 = vsel %vm9455_vm13, %v4467_v43, %v16421_v30  ;;  %v9759_v46 = vadd.s32 3, %v16471_v49 }
 0x523   :  { %v9304_v48 = vsel %vm18294_vm14, nan, %v9303_v45  ;;  %v9458_v39 = vsel %vm9451_vm11, %v9454_v0, %v9457_v61  ;;  %vm9606_vm9 = vcmp.lt.s32.totalorder %v9605_v16, 2  ;;  %vm9607_vm1 = vcmp.eq.s32.totalorder %v9605_v16, 0 }
 0x524   :  { %vm9610_vm5 = vcmp.eq.s32.totalorder %v9605_v16, 2  ;;  %10106 = vst.msk [vmem:[%s17217_s2 + $0xd0] sm:$0xff] %vm5087_vm12, %v9304_v48  ;;  %vm18295_vm0 = vweird.f32 %v18034_v41  ;;  %v9609_v44 = vsel %vm9607_vm1, %v16442_v33, %v4618_v15  ;;  %v9760_v30 = vand.u32 3, %v9759_v46 }
 0x525   :  { %v9459_v47 = vsel %vm18295_vm0, nan, %v9458_v39  ;;  %v9612_v62 = vsel %vm9610_vm5, %v4621_v63, %v16447_v22  ;;  %v9914_v49 = vadd.s32 3, %v16501_v36  ;;  %v10069_v29 = vadd.s32 3, %v16546_v9 }
 0x526   :  { %v9613_v43 = vsel %vm9606_vm9, %v9609_v44, %v9612_v62  ;;  %10107 = vst.msk [vmem:[%s17217_s2 + $0xd8] sm:$0xff] %vm5087_vm12, %v9459_v47  ;;  %vm18296_vm8 = vweird.f32 %v18045_v13  ;;  %vm9761_vm7 = vcmp.lt.s32.totalorder %v9760_v30, 2  ;;  %vm9762_vm10 = vcmp.eq.s32.totalorder %v9760_v30, 0 }
 0x527   :  { %v9614_v41 = vsel %vm18296_vm8, nan, %v9613_v43  ;;  %vm9765_vm3 = vcmp.eq.s32.totalorder %v9760_v30, 2  ;;  %v9764_v33 = vsel %vm9762_vm10, %v16474_v55, %v4772_v20  ;;  %v9915_v63 = vand.u32 3, %v9914_v49 }
 0x528   :  { %v9767_v22 = vsel %vm9765_vm3, %v4775_v18, %v16481_v34  ;;  %v10070_v15 = vand.u32 3, %v10069_v29  ;;  %10108 = vst.msk [vmem:[%s17217_s2 + $0xe0] sm:$0xff] %vm5087_vm12, %v9614_v41  ;;  %vm18297_vm15 = vweird.f32 %v18052_v17  ;;  %vm18298_vm1 = vweird.f32 %v18062_v3 }
 0x529   :  { %v9768_v13 = vsel %vm9761_vm7, %v9764_v33, %v9767_v22  ;;  %vm9916_vm4 = vcmp.lt.s32.totalorder %v9915_v63, 2  ;;  %vm9917_vm11 = vcmp.eq.s32.totalorder %v9915_v63, 0  ;;  %vm9920_vm2 = vcmp.eq.s32.totalorder %v9915_v63, 2 }
 0x52a   :  { %v9769_v36 = vsel %vm18297_vm15, nan, %v9768_v13  ;;  %v9919_v20 = vsel %vm9917_vm11, %v16517_v51, %v4926_v24  ;;  %v9922_v55 = vsel %vm9920_vm2, %v4929_v21, %v16524_v25  ;;  %vm10071_vm13 = vcmp.lt.s32.totalorder %v10070_v15, 2 }
 0x52b   :  { %vm10072_vm14 = vcmp.eq.s32.totalorder %v10070_v15, 0  ;;  %10109 = vst.msk [vmem:[%s17217_s2 + $0xe8] sm:$0xff] %vm5087_vm12, %v9769_v36  ;;  %v9923_v17 = vsel %vm9916_vm4, %v9919_v20, %v9922_v55  ;;  %vm10075_vm9 = vcmp.eq.s32.totalorder %v10070_v15, 2 }
 0x52c   :  { %v10074_v34 = vsel %vm10072_vm14, %v16796_v58, %v5080_v5  ;;  %v9924_v18 = vsel %vm18298_vm1, nan, %v9923_v17  ;;  %v10077_v51 = vsel %vm10075_vm9, %v5083_v52, %v16821_v2 }
 0x52d   :  { %v10078_v25 = vsel %vm10071_vm13, %v10074_v34, %v10077_v51  ;;  %10110 = vst.msk [vmem:[%s17217_s2 + $0xf0] sm:$0xff] %vm5087_vm12, %v9924_v18 }
 0x52e   :  { %v10079_v21 = vsel %vm5076_vm6, nan, %v10078_v25 }
 0x52f   :  { %10111 = vst.msk [vmem:[%s17217_s2 + $0xf8] sm:$0xff] %vm5087_vm12, %v10079_v21 }
 0x530   :  { %10120 = vsyncpa [#allocation3], 1 }

</bundles_post_ra>
